<compile_context>
chip_gen: v7x
topology: tpu7x:2x2x1
jax: 0.10.0
libtpu: 0.0.40
codegen_flags: <defaults>
</compile_context>

<pallas_src>
import functools

import jax
import jax.numpy as jnp
from jax import lax
from jax.experimental import pallas as pl
from jax.experimental.pallas import tpu as pltpu

_EPS = 1e-5


# ----------------------------------------------------------------------------
# Small helpers
# ----------------------------------------------------------------------------
def _round_up(x, m):
    return ((x + m - 1) // m) * m


def _pick_tile(n, target):
    """Largest multiple-of-8 divisor of n that is <= target (n itself if small)."""
    if n <= target:
        return n
    t = (target // 8) * 8
    while t >= 8:
        if n % t == 0:
            return t
        t -= 8
    return n


def _pick_row_tile(m, target=256):
    # Aim for >= 2 row tiles when possible (DMA pipelining / megacore split),
    # capped at `target`; callers pad the row count up to a tile multiple.
    return min(target, max(8, _round_up((m + 1) // 2, 8)))


def _vmem_limit_bytes():
    # Generation-aware scoped-VMEM limit: ~3/4 of physical (≈96 MiB on
    # v5e/v6e's 128 MiB, ≈48 MiB on v7x's 64 MiB), capped at 100 MiB.
    cap = 128 * 1024 * 1024
    try:
        cap = int(getattr(pltpu.get_tpu_info(), "vmem_capacity_bytes", cap))
    except Exception:
        pass
    return int(min(100 * 1024 * 1024, cap * 3 // 4))


def _gelu_erf(x):
    # Exact (erf-based) GELU as in torch.nn.functional.gelu(default).
    # TODO(synk): Mosaic has no guaranteed erf lowering; this uses the
    # Abramowitz-Stegun 7.1.26 rational approximation (|abs err| <= 1.5e-7)
    # with an exact divide so no extra approximation stacks on top.
    z = x * 0.7071067811865476
    a = jnp.abs(z)
    t = 1.0 / (1.0 + 0.3275911 * a)
    poly = t * (0.254829592 + t * (-0.284496736 + t * (1.421413741
                + t * (-1.453152027 + t * 1.061405429))))
    erf_abs = 1.0 - poly * jnp.exp(-a * a)
    erf = jnp.where(z >= 0.0, erf_abs, -erf_abs)
    return 0.5 * x * (1.0 + erf)


def _rotate_every_two_matrix(d, dtype):
    # (x @ R)[2k] = -x[2k+1] ; (x @ R)[2k+1] = x[2k]
    idx = jnp.arange(d // 2)
    r = jnp.zeros((d, d), dtype)
    r = r.at[2 * idx + 1, 2 * idx].set(-1.0)
    r = r.at[2 * idx, 2 * idx + 1].set(1.0)
    return r


# ----------------------------------------------------------------------------
# Fused attention-branch kernel: LayerNorm + packed full-width QKV (+ CAPE)
# + flash-style online-softmax over a KV grid axis + fused output projection.
# Grid = (batch, q_tiles, kv_tiles); one q-tile's stats live in VMEM scratch.
# ----------------------------------------------------------------------------
def _attn_kernel(*refs, heads, head_dim, scale, eps, self_kv, use_cape):
    it = iter(refs)
    xq_ref = next(it)                       # (tq, c)    query-side hidden (pre-norm)
    g_ref = next(it)                        # (1, c)
    b_ref = next(it)                        # (1, c)
    kv_ref = next(it)                       # (tk, c_kv) kv-side source
    wq_ref = next(it)                       # (c, [1|2]*inner)
    wkv_ref = next(it)                      # (c_kv, [2|3]*inner)
    if use_cape:
        phq_ref = next(it)                  # (tq, inner) CAPE phases (query rows)
        phk_ref = next(it)                  # (tk, inner) CAPE phases (key rows)
    wo_ref = next(it)                       # (inner, dim)
    bo_ref = next(it)                       # (1, dim)
    o_ref = next(it)                        # (tq, dim)
    q_scr = next(it)                        # (tq, inner) scaled (CAPE'd) queries
    mx_scr = next(it)                       # (tq, heads) running row max
    l_scr = next(it)                        # (tq, heads) running denominator
    acc_scr = next(it)                      # (tq, inner) unnormalized P@V

    j = pl.program_id(2)
    inner = heads * head_dim

    gamma = g_ref[...].astype(jnp.float32)
    beta = b_ref[...].astype(jnp.float32)

    def layer_norm(v):
        v = v.astype(jnp.float32)
        mu = jnp.mean(v, axis=-1, keepdims=True)
        vc = v - mu
        var = jnp.mean(vc * vc, axis=-1, keepdims=True)
        return vc * lax.rsqrt(var + eps) * gamma + beta

    # ---- once per (batch, q-tile): fused LayerNorm + Q projection (+ CAPE) --
    @pl.when(j == 0)
    def _init():
        xn = layer_norm(xq_ref[...])
        qp = jnp.dot(xn, wq_ref[...], preferred_element_type=jnp.float32)
        if use_cape:
            ph = phq_ref[...].astype(jnp.float32)
            q = qp[:, :inner] * jnp.cos(ph) + qp[:, inner:] * jnp.sin(ph)
        else:
            q = qp
        q_scr[...] = q * scale
        mx_scr[...] = jnp.full(mx_scr.shape, -jnp.inf, jnp.float32)
        l_scr[...] = jnp.zeros(l_scr.shape, jnp.float32)
        acc_scr[...] = jnp.zeros(acc_scr.shape, jnp.float32)

    # ---- per KV tile: fused K|V(|K_rot) projection + online softmax update --
    # TODO(synk): at production sizes cast the matmul operands to bf16 (keep
    # preferred_element_type=f32) to use the native bf16 MXU and halve VMEM/DMA.
    kv_in = kv_ref[...]
    kv_src = layer_norm(kv_in) if self_kv else kv_in.astype(jnp.float32)
    kvp = jnp.dot(kv_src, wkv_ref[...], preferred_element_type=jnp.float32)
    if use_cape:
        ph_k = phk_ref[...].astype(jnp.float32)
        k = kvp[:, :inner] * jnp.cos(ph_k) + kvp[:, inner:2 * inner] * jnp.sin(ph_k)
        v = kvp[:, 2 * inner:]
    else:
        k = kvp[:, :inner]
        v = kvp[:, inner:]

    q = q_scr[...]
    m_prev = mx_scr[...]
    l_prev = l_scr[...]
    acc_prev = acc_scr[...]
    m_cols, l_cols, acc_cols = [], [], []
    for h in range(heads):                                      # static head loop
        sl = slice(h * head_dim, (h + 1) * head_dim)
        s = lax.dot_general(q[:, sl], k[:, sl], (((1,), (1,)), ((), ())),
                            preferred_element_type=jnp.float32)   # (tq, tk)
        m_old = m_prev[:, h:h + 1]
        m_new = jnp.maximum(m_old, jnp.max(s, axis=-1, keepdims=True))
        alpha = jnp.exp(m_old - m_new)
        p = jnp.exp(s - m_new)
        m_cols.append(m_new)
        l_cols.append(alpha * l_prev[:, h:h + 1] + jnp.sum(p, axis=-1, keepdims=True))
        acc_cols.append(alpha * acc_prev[:, sl]
                        + jnp.dot(p, v[:, sl], preferred_element_type=jnp.float32))
    acc_new = jnp.concatenate(acc_cols, axis=-1)
    l_new = jnp.concatenate(l_cols, axis=-1)
    mx_scr[...] = jnp.concatenate(m_cols, axis=-1)
    l_scr[...] = l_new
    acc_scr[...] = acc_new

    # ---- last KV tile: deferred normalization + fused output projection -----
    @pl.when(j == pl.num_programs(2) - 1)
    def _finalize():
        parts = [acc_new[:, h * head_dim:(h + 1) * head_dim]
                 * pl.reciprocal(l_new[:, h:h + 1], approx=True)
                 for h in range(heads)]
        o = jnp.concatenate(parts, axis=-1)
        out = jnp.dot(o, wo_ref[...], preferred_element_type=jnp.float32) + bo_ref[...]
        o_ref[...] = out.astype(o_ref.dtype)


def fused_attention_branch(x3d, gamma2d, beta2d, attn_p, heads, head_dim,
                           ctx3d=None, phase3d=None, q_tile=256, kv_tile=512):
    """norm + multi-head attention (+ optional CAPE) + out-proj in ONE pallas_call."""
    bq, lq, c = x3d.shape
    inner = heads * head_dim
    dim = attn_p["wo"].shape[1]
    scale = 1.0 / float(head_dim) ** 0.5
    cross = ctx3d is not None
    use_cape = phase3d is not None
    assert not (cross and use_cape)
    assert lq % 8 == 0, "query length per (rearranged) batch must be sublane aligned"

    if cross:
        bk, lk, ck = ctx3d.shape
        assert bk == bq
        kv2d = ctx3d.reshape(bk * lk, ck)
    else:
        lk, ck = lq, c
        kv2d = x3d.reshape(bq * lq, c)
    assert lk % 8 == 0, "kv length must be sublane aligned"

    tq = _pick_tile(lq, q_tile)
    tk = _pick_tile(lk, kv_tile)
    n_q = lq // tq
    n_kv = lk // tk

    x2d = x3d.reshape(bq * lq, c)
    const = lambda i, qi, j: (0, 0)

    inputs = [x2d, gamma2d, beta2d, kv2d, attn_p["wq_pack"], attn_p["wkv_pack"]]
    in_specs = [
        pl.BlockSpec((tq, c), lambda i, qi, j: (i * n_q + qi, 0)),
        pl.BlockSpec((1, c), const),
        pl.BlockSpec((1, c), const),
        pl.BlockSpec((tk, ck), lambda i, qi, j: (i * n_kv + j, 0)),
        pl.BlockSpec(attn_p["wq_pack"].shape, const),
        pl.BlockSpec(attn_p["wkv_pack"].shape, const),
    ]
    if use_cape:
        phase2d = phase3d.reshape(bq * lq, inner)
        inputs += [phase2d, phase2d]          # query-tiled view and kv-tiled view
        in_specs += [pl.BlockSpec((tq, inner), lambda i, qi, j: (i * n_q + qi, 0)),
                     pl.BlockSpec((tk, inner), lambda i, qi, j: (i * n_kv + j, 0))]
    inputs += [attn_p["wo"], attn_p["bo"]]
    in_specs += [pl.BlockSpec(attn_p["wo"].shape, const),
                 pl.BlockSpec((1, dim), const)]

    out = pl.pallas_call(
        functools.partial(_attn_kernel, heads=heads, head_dim=head_dim,
                          scale=scale, eps=_EPS, self_kv=not cross,
                          use_cape=use_cape),
        out_shape=jax.ShapeDtypeStruct((bq * lq, dim), x3d.dtype),
        grid=(bq, n_q, n_kv),
        in_specs=in_specs,
        out_specs=pl.BlockSpec((tq, dim), lambda i, qi, j: (i * n_q + qi, 0)),
        scratch_shapes=[
            pltpu.VMEM((tq, inner), jnp.float32),   # scaled (CAPE'd) queries
            pltpu.VMEM((tq, heads), jnp.float32),   # online-softmax running max
            pltpu.VMEM((tq, heads), jnp.float32),   # online-softmax denominator
            pltpu.VMEM((tq, inner), jnp.float32),   # unnormalized attention output
        ],
        compiler_params=pltpu.CompilerParams(
            dimension_semantics=("parallel", "parallel", "arbitrary"),
            vmem_limit_bytes=_vmem_limit_bytes()),
    )(*inputs)
    return out.reshape(bq, lq, dim)


# ----------------------------------------------------------------------------
# Fused feed-forward kernel: 4-way residual sum + norm3 + GEGLU + ff.net[2]
# + final residual, tiled over rows.
# ----------------------------------------------------------------------------
def _ff_kernel(x_ref, cd_ref, cv_ref, cr_ref, g_ref, b_ref,
               w1h_ref, b1h_ref, w1g_ref, b1g_ref, w2_ref, b2_ref, o_ref, *, eps):
    # fused 4-way residual sum (saves a standalone XLA op: one HBM write+read)
    x = (x_ref[...].astype(jnp.float32) + cd_ref[...].astype(jnp.float32)
         + cv_ref[...].astype(jnp.float32) + cr_ref[...].astype(jnp.float32))
    mu = jnp.mean(x, axis=-1, keepdims=True)
    xc = x - mu
    var = jnp.mean(xc * xc, axis=-1, keepdims=True)
    xn = xc * lax.rsqrt(var + eps) * g_ref[...] + b_ref[...]
    hidden = jnp.dot(xn, w1h_ref[...], preferred_element_type=jnp.float32) + b1h_ref[...]
    gate = jnp.dot(xn, w1g_ref[...], preferred_element_type=jnp.float32) + b1g_ref[...]
    act = hidden * _gelu_erf(gate)
    out = jnp.dot(act, w2_ref[...], preferred_element_type=jnp.float32) + b2_ref[...] + x
    o_ref[...] = out.astype(o_ref.dtype)


def fused_residual_feed_forward(x2d, cd2d, cv2d, cr2d, prep, row_tile=256):
    m, c = x2d.shape
    ff_inner = prep["ff_w2"].shape[0]
    rows = _pick_row_tile(m, row_tile)
    m_pad = _round_up(m, rows)

    def pad(a):
        return a if m_pad == m else jnp.pad(a, ((0, m_pad - m), (0, 0)))

    xs = [pad(a) for a in (x2d, cd2d, cv2d, cr2d)]
    n_tiles = m_pad // rows
    row_spec = pl.BlockSpec((rows, c), lambda i: (i, 0))
    const = lambda i: (0, 0)
    # TODO(synk): at production dim/ff_inner ship the weights in bf16 and (on
    # v7x) single-buffer / inner-tile them to stay under the 64 MiB VMEM.
    out = pl.pallas_call(
        functools.partial(_ff_kernel, eps=_EPS),
        out_shape=jax.ShapeDtypeStruct((m_pad, c), x2d.dtype),
        grid=(n_tiles,),
        in_specs=[row_spec, row_spec, row_spec, row_spec,
                  pl.BlockSpec((1, c), const), pl.BlockSpec((1, c), const),
                  pl.BlockSpec((c, ff_inner), const), pl.BlockSpec((1, ff_inner), const),
                  pl.BlockSpec((c, ff_inner), const), pl.BlockSpec((1, ff_inner), const),
                  pl.BlockSpec((ff_inner, c), const), pl.BlockSpec((1, c), const)],
        out_specs=pl.BlockSpec((rows, c), lambda i: (i, 0)),
        compiler_params=pltpu.CompilerParams(
            dimension_semantics=("parallel",),
            vmem_limit_bytes=_vmem_limit_bytes()),
    )(*xs, prep["norm3_g"], prep["norm3_b"],
      prep["ff_w1h"], prep["ff_b1h"], prep["ff_w1g"], prep["ff_b1g"],
      prep["ff_w2"], prep["ff_b2"])
    return out[:m] if m_pad != m else out


# ----------------------------------------------------------------------------
# One-time weight re-layout (hoisted out of the per-call forward).
# ----------------------------------------------------------------------------
def prepare_params(params, heads, head_dim):
    inner = heads * head_dim
    dim = params["attn1"]["wo"].shape[1]
    rot = _rotate_every_two_matrix(inner, params["attn_mv"]["wq"].dtype)

    def pack_attn(p, with_rot):
        if with_rot:  # fold rotate_every_two into the weights: rot(x@W) == x@(W@R)
            wq_pack = jnp.concatenate([p["wq"], p["wq"] @ rot], axis=1)
            wkv_pack = jnp.concatenate([p["wk"], p["wk"] @ rot, p["wv"]], axis=1)
        else:
            wq_pack = p["wq"]
            wkv_pack = jnp.concatenate([p["wk"], p["wv"]], axis=1)
        return {"wq_pack": wq_pack, "wkv_pack": wkv_pack,
                "wo": p["wo"], "bo": p["bo"].reshape(1, dim)}

    ff_inner = params["ff_w2"].shape[0]
    w1, b1 = params["ff_w1"], params["ff_b1"]
    c = dim
    return {
        "attn1": pack_attn(params["attn1"], False),
        "attn_mv": pack_attn(params["attn_mv"], True),
        "attn2": pack_attn(params["attn2"], False),
        "norm1_g": params["norm1_g"].reshape(1, c), "norm1_b": params["norm1_b"].reshape(1, c),
        "norm_mv_g": params["norm_mv_g"].reshape(1, c), "norm_mv_b": params["norm_mv_b"].reshape(1, c),
        "norm2_g": params["norm2_g"].reshape(1, c), "norm2_b": params["norm2_b"].reshape(1, c),
        "norm3_g": params["norm3_g"].reshape(1, c), "norm3_b": params["norm3_b"].reshape(1, c),
        "ff_w1h": w1[:, :ff_inner], "ff_w1g": w1[:, ff_inner:],
        "ff_b1h": b1[:ff_inner].reshape(1, ff_inner), "ff_b1g": b1[ff_inner:].reshape(1, ff_inner),
        "ff_w2": params["ff_w2"], "ff_b2": params["ff_b2"].reshape(1, dim),
    }


# ----------------------------------------------------------------------------
# Block forward (4 pallas_calls + thin JAX glue for the einops rearranges)
# ----------------------------------------------------------------------------
def basic_dr_transformer_block(prep, hidden_states, encoder_hidden_states, posemb,
                               num_domains, num_views, heads, head_dim):
    b0, l0, c = hidden_states.shape
    inner = heads * head_dim

    # attn1 (cross-domain joint attention): '(b t) l c -> b (t l) c'
    x_cd = hidden_states.reshape(b0 // num_domains, num_domains * l0, c)
    cd_out = fused_attention_branch(x_cd, prep["norm1_g"], prep["norm1_b"],
                                    prep["attn1"], heads, head_dim)
    cd_out = cd_out.reshape(b0, l0, c)

    # attn_mv (cross-view joint attention + CAPE): '(b m t) l c -> (b t) (m l) c'
    # TODO(synk): the view<->domain transposes stay as XLA copies; the strided
    # multi-batch gather they imply is not expressible by a rectangular BlockSpec.
    b = b0 // (num_views * num_domains)
    x_cv = hidden_states.reshape(b, num_views, num_domains, l0, c)
    x_cv = x_cv.transpose(0, 2, 1, 3, 4).reshape(b * num_domains, num_views * l0, c)
    pb, pt, pn = posemb.shape
    assert inner % (2 * pn) == 0
    phase = jnp.broadcast_to(posemb[:, None, :, None, :],
                             (pb, num_domains, pt, l0, pn))
    phase = phase.reshape(pb * num_domains, pt * l0, pn)
    phase = jnp.repeat(phase, inner // pn, axis=-1)        # (b*num_d, num_v*l0, inner)
    cv_out = fused_attention_branch(x_cv, prep["norm_mv_g"], prep["norm_mv_b"],
                                    prep["attn_mv"], heads, head_dim, phase3d=phase)
    cv_out = cv_out.reshape(b, num_domains, num_views, l0, c)
    cv_out = cv_out.transpose(0, 2, 1, 3, 4).reshape(b0, l0, c)

    # attn2 (cross attention with encoder_hidden_states)
    cross_out = fused_attention_branch(hidden_states, prep["norm2_g"], prep["norm2_b"],
                                       prep["attn2"], heads, head_dim,
                                       ctx3d=encoder_hidden_states)

    # 4-way residual + norm3 + GEGLU feed-forward + final residual (one kernel)
    out = fused_residual_feed_forward(
        hidden_states.reshape(b0 * l0, c), cd_out.reshape(b0 * l0, c),
        cv_out.reshape(b0 * l0, c), cross_out.reshape(b0 * l0, c), prep)
    return out.reshape(b0, l0, c)


# ----------------------------------------------------------------------------
# Deterministic parameter init (shapes per BasicDRTransformerBlock.__init__)
# ----------------------------------------------------------------------------
def init_params(key, dim, heads, head_dim, cross_dim, zero_mv_out=True):
    inner = heads * head_dim
    ff_inner = dim * 4
    keys = iter(jax.random.split(key, 24))

    def w(shape, s=0.05):
        return s * jax.random.normal(next(keys), shape, jnp.float32)

    def attn(kv_dim, zero_out):
        p = {"wq": w((dim, inner)), "wk": w((kv_dim, inner)), "wv": w((kv_dim, inner))}
        if zero_out:   # nn.init.zeros_(attn_mv.to_out[0].{weight,bias}) in __init__
            p["wo"] = jnp.zeros((inner, dim), jnp.float32)
            p["bo"] = jnp.zeros((dim,), jnp.float32)
        else:
            p["wo"] = w((inner, dim))
            p["bo"] = w((dim,), 0.02)
        return p

    ones = jnp.ones((dim,), jnp.float32)
    zeros = jnp.zeros((dim,), jnp.float32)
    return {
        "norm1_g": ones, "norm1_b": zeros,
        "norm_mv_g": ones, "norm_mv_b": zeros,
        "norm2_g": ones, "norm2_b": zeros,
        "norm3_g": ones, "norm3_b": zeros,
        "attn1": attn(dim, False),
        "attn_mv": attn(dim, zero_mv_out),
        "attn2": attn(cross_dim, False),
        "ff_w1": w((dim, ff_inner * 2)), "ff_b1": w((ff_inner * 2,), 0.02),
        "ff_w2": w((ff_inner, dim)), "ff_b2": w((dim,), 0.02),
    }


# ----------------------------------------------------------------------------
# Pure-JAX reference (straight translation of the PyTorch forward, for checking)
# ----------------------------------------------------------------------------
def _ref_layer_norm(x, g, b, eps=1e-5):
    mu = jnp.mean(x, axis=-1, keepdims=True)
    var = jnp.mean((x - mu) ** 2, axis=-1, keepdims=True)
    return (x - mu) / jnp.sqrt(var + eps) * g + b


def _ref_rotate_every_two(x):
    x1 = x[..., 0::2]
    x2 = x[..., 1::2]
    return jnp.stack((-x2, x1), axis=-1).reshape(x.shape)


def _ref_attention(p, hidden, heads, head_dim, encoder_hidden=None,
                   mode=None, num_d=1, num_v=1, posemb=None):
    b0, l0, c = hidden.shape
    if mode == "cd":
        b = b0 // num_d
        hs = hidden.reshape(b, num_d * l0, c)
    elif mode == "cv":
        b = b0 // (num_v * num_d)
        hs = hidden.reshape(b, num_v, num_d, l0, c).transpose(0, 2, 1, 3, 4)
        hs = hs.reshape(b * num_d, num_v * l0, c)
    else:
        hs = hidden
    ctx = hs if encoder_hidden is None else encoder_hidden
    q = hs @ p["wq"]
    k = ctx @ p["wk"]
    v = ctx @ p["wv"]
    if posemb is not None:
        bq, lq, inner = q.shape
        pb, pt, pn = posemb.shape
        l = lq // num_v
        pm = jnp.broadcast_to(posemb[:, None, :, None, :], (pb, num_d, pt, l, pn))
        pm = pm.reshape(pb * num_d, pt * l, pn)
        m = jnp.repeat(pm, inner // pn, axis=-1)
        q = q * jnp.cos(m) + _ref_rotate_every_two(q) * jnp.sin(m)
        k = k * jnp.cos(m) + _ref_rotate_every_two(k) * jnp.sin(m)
    bq, lq, inner = q.shape
    bk, lk, _ = k.shape
    qh = q.reshape(bq, lq, heads, head_dim).transpose(0, 2, 1, 3)
    kh = k.reshape(bk, lk, heads, head_dim).transpose(0, 2, 1, 3)
    vh = v.reshape(bk, lk, heads, head_dim).transpose(0, 2, 1, 3)
    s = jnp.einsum("bhqd,bhkd->bhqk", qh, kh) / (head_dim ** 0.5)
    a = jax.nn.softmax(s, axis=-1)
    oh = jnp.einsum("bhqk,bhkd->bhqd", a, vh)
    o = oh.transpose(0, 2, 1, 3).reshape(bq, lq, inner)
    o = o @ p["wo"] + p["bo"]
    if mode == "cd":
        o = o.reshape(b0, l0, -1)
    elif mode == "cv":
        o = o.reshape(b, num_d, num_v, l0, -1).transpose(0, 2, 1, 3, 4).reshape(b0, l0, -1)
    return o


def reference_forward(params, hidden_states, encoder_hidden_states, posemb,
                      num_domains, num_views, heads, head_dim):
    x = hidden_states
    nh = _ref_layer_norm(x, params["norm1_g"], params["norm1_b"])
    cd = _ref_attention(params["attn1"], nh, heads, head_dim,
                        mode="cd", num_d=num_domains, num_v=num_views)
    nh = _ref_layer_norm(x, params["norm_mv_g"], params["norm_mv_b"])
    cv = _ref_attention(params["attn_mv"], nh, heads, head_dim,
                        mode="cv", num_d=num_domains, num_v=num_views, posemb=posemb)
    nh = _ref_layer_norm(x, params["norm2_g"], params["norm2_b"])
    cross = _ref_attention(params["attn2"], nh, heads, head_dim,
                           encoder_hidden=encoder_hidden_states)
    x = x + cd + cv + cross
    nh = _ref_layer_norm(x, params["norm3_g"], params["norm3_b"])
    h = nh @ params["ff_w1"] + params["ff_b1"]
    inner = params["ff_w2"].shape[0]
    h = h[..., :inner] * jax.nn.gelu(h[..., inner:], approximate=False)
    ff = h @ params["ff_w2"] + params["ff_b2"]
    return ff + x


# ----------------------------------------------------------------------------
if __name__ == "__main__":
    B_LOGICAL, NUM_VIEWS, NUM_DOMAINS = 1, 2, 3
    BATCH = B_LOGICAL * NUM_VIEWS * NUM_DOMAINS   # 6
    SEQ = 16
    DIM = 32
    HEADS = 2
    HEAD_DIM = 16
    CROSS_DIM = 24
    ENC_SEQ = 8
    POSE_DIM = 4                                   # (HEADS*HEAD_DIM) % (2*POSE_DIM) == 0

    root = jax.random.PRNGKey(0)
    k_hidden, k_enc, k_pose, k_params = jax.random.split(root, 4)
    hidden_states = jax.random.normal(k_hidden, (BATCH, SEQ, DIM), jnp.float32)
    encoder_hidden_states = jax.random.normal(k_enc, (BATCH, ENC_SEQ, CROSS_DIM), jnp.float32)
    posemb = jax.random.normal(k_pose, (B_LOGICAL, NUM_VIEWS, POSE_DIM), jnp.float32)

    # zero_mv_out=False so the CAPE / cross-view branch actually contributes to
    # the output and is verified (the real module zero-inits attn_mv.to_out).
    params = init_params(k_params, DIM, HEADS, HEAD_DIM, CROSS_DIM, zero_mv_out=False)
    prep = prepare_params(params, HEADS, HEAD_DIM)   # hoisted weight re-layout (once)

    fwd = jax.jit(functools.partial(basic_dr_transformer_block,
                                    num_domains=NUM_DOMAINS, num_views=NUM_VIEWS,
                                    heads=HEADS, head_dim=HEAD_DIM))
    out = jax.block_until_ready(fwd(prep, hidden_states, encoder_hidden_states, posemb))

    ref = reference_forward(params, hidden_states, encoder_hidden_states, posemb,
                            num_domains=NUM_DOMAINS, num_views=NUM_VIEWS,
                            heads=HEADS, head_dim=HEAD_DIM)

    assert out.shape == hidden_states.shape and out.dtype == hidden_states.dtype
    if not bool(jnp.all(jnp.isfinite(out))):
        raise RuntimeError("non-finite values in kernel output")
    max_err = float(jnp.max(jnp.abs(out - ref)))
    if max_err > 1e-2:
        raise RuntimeError(f"kernel/reference mismatch: max abs err = {max_err}")
    print("KERNEL_OK")
</pallas_src>

<mosaic_0001>
module attributes {stable_mosaic.version = 11 : i64} {
  func.func @_attn_kernel(%arg0: i32, %arg1: i32, %arg2: i32, %arg3: memref<48x32xf32, #tpu.memory_space<vmem>>, %arg4: memref<1x32xf32, #tpu.memory_space<vmem>>, %arg5: memref<1x32xf32, #tpu.memory_space<vmem>>, %arg6: memref<48x32xf32, #tpu.memory_space<vmem>>, %arg7: memref<32x32xf32, #tpu.memory_space<vmem>>, %arg8: memref<32x64xf32, #tpu.memory_space<vmem>>, %arg9: memref<32x32xf32, #tpu.memory_space<vmem>>, %arg10: memref<1x32xf32, #tpu.memory_space<vmem>>, %arg11: memref<48x32xf32, #tpu.memory_space<vmem>>, %arg12: memref<48x32xf32, #tpu.memory_space<vmem>>, %arg13: memref<48x2xf32, #tpu.memory_space<vmem>>, %arg14: memref<48x2xf32, #tpu.memory_space<vmem>>, %arg15: memref<48x32xf32, #tpu.memory_space<vmem>>) attributes {dimension_semantics = [#tpu.dimension_semantics<parallel>, #tpu.dimension_semantics<parallel>, #tpu.dimension_semantics<arbitrary>], iteration_bounds = array<i64: 2, 1, 1>, scalar_prefetch = 0 : i64, scratch_operands = 4 : i64, tpu.core_type = #tpu.core_type<tc>, window_params = [{transform_indices = @transform_0, window_bounds = array<i64: 48, 32>}, {pipeline_mode = #tpu.pipeline_mode<synchronous>, transform_indices = @transform_1, window_bounds = array<i64: 1, 32>}, {pipeline_mode = #tpu.pipeline_mode<synchronous>, transform_indices = @transform_2, window_bounds = array<i64: 1, 32>}, {transform_indices = @transform_3, window_bounds = array<i64: 48, 32>}, {pipeline_mode = #tpu.pipeline_mode<synchronous>, transform_indices = @transform_4, window_bounds = array<i64: 32, 32>}, {pipeline_mode = #tpu.pipeline_mode<synchronous>, transform_indices = @transform_5, window_bounds = array<i64: 32, 64>}, {pipeline_mode = #tpu.pipeline_mode<synchronous>, transform_indices = @transform_6, window_bounds = array<i64: 32, 32>}, {pipeline_mode = #tpu.pipeline_mode<synchronous>, transform_indices = @transform_7, window_bounds = array<i64: 1, 32>}, {transform_indices = @transform_8, window_bounds = array<i64: 48, 32>}]} {
    %c0 = arith.constant 0 : index
    %c0_0 = arith.constant 0 : index
    %0 = vector.load %arg4[%c0, %c0_0] : memref<1x32xf32, #tpu.memory_space<vmem>>, vector<1x32xf32>
    %c0_1 = arith.constant 0 : index
    %c0_2 = arith.constant 0 : index
    %1 = vector.load %arg5[%c0_1, %c0_2] : memref<1x32xf32, #tpu.memory_space<vmem>>, vector<1x32xf32>
    %c0_i32 = arith.constant 0 : i32
    %2 = arith.cmpi eq, %arg2, %c0_i32 : i32
    %3 = arith.extui %2 : i1 to i32
    %c0_i32_3 = arith.constant 0 : i32
    %4 = arith.cmpi ne, %3, %c0_i32_3 : i32
    scf.if %4 {
      %c0_37 = arith.constant 0 : index
      %c0_38 = arith.constant 0 : index
      %89 = vector.load %arg3[%c0_37, %c0_38] : memref<48x32xf32, #tpu.memory_space<vmem>>, vector<48x32xf32>
      %cst_39 = arith.constant dense<0.000000e+00> : vector<48xf32>
      %90 = vector.multi_reduction <add>, %89, %cst_39 [1] : vector<48x32xf32> to vector<48xf32>
      %91 = vector.shape_cast %90 : vector<48xf32> to vector<48x1xf32>
      %cst_40 = arith.constant 3.200000e+01 : f32
      %92 = vector.broadcast %cst_40 : f32 to vector<48x1xf32>
      %93 = arith.divf %91, %92 : vector<48x1xf32>
      %94 = vector.broadcast %93 : vector<48x1xf32> to vector<48x32xf32>
      %95 = arith.subf %89, %94 : vector<48x32xf32>
      %96 = arith.mulf %95, %95 : vector<48x32xf32>
      %cst_41 = arith.constant dense<0.000000e+00> : vector<48xf32>
      %97 = vector.multi_reduction <add>, %96, %cst_41 [1] : vector<48x32xf32> to vector<48xf32>
      %98 = vector.shape_cast %97 : vector<48xf32> to vector<48x1xf32>
      %cst_42 = arith.constant 3.200000e+01 : f32
      %99 = vector.broadcast %cst_42 : f32 to vector<48x1xf32>
      %100 = arith.divf %98, %99 : vector<48x1xf32>
      %cst_43 = arith.constant 9.99999974E-6 : f32
      %101 = vector.broadcast %cst_43 : f32 to vector<48x1xf32>
      %102 = arith.addf %100, %101 : vector<48x1xf32>
      %103 = math.rsqrt %102 : vector<48x1xf32>
      %104 = vector.broadcast %103 : vector<48x1xf32> to vector<48x32xf32>
      %105 = arith.mulf %95, %104 : vector<48x32xf32>
      %106 = vector.broadcast %0 : vector<1x32xf32> to vector<48x32xf32>
      %107 = arith.mulf %105, %106 : vector<48x32xf32>
      %108 = vector.broadcast %1 : vector<1x32xf32> to vector<48x32xf32>
      %109 = arith.addf %107, %108 : vector<48x32xf32>
      %c0_44 = arith.constant 0 : index
      %c0_45 = arith.constant 0 : index
      %110 = vector.load %arg7[%c0_44, %c0_45] : memref<32x32xf32, #tpu.memory_space<vmem>>, vector<32x32xf32>
      %cst_46 = arith.constant dense<0.000000e+00> : vector<48x32xf32>
      %111 = tpu.matmul %109, %110, %cst_46 {dimension_numbers = #tpu.dot_dimension_numbers<[1], [0], [0], [1], [0, 0, 1, 1], [], []>} : vector<48x32xf32>, vector<32x32xf32>, vector<48x32xf32> -> vector<48x32xf32>
      %cst_47 = arith.constant 2.500000e-01 : f32
      %112 = vector.broadcast %cst_47 : f32 to vector<48x32xf32>
      %113 = arith.mulf %111, %112 : vector<48x32xf32>
      %c0_48 = arith.constant 0 : index
      %c0_49 = arith.constant 0 : index
      %114 = vector.load %arg12[%c0_48, %c0_49] : memref<48x32xf32, #tpu.memory_space<vmem>>, vector<48x32xf32>
      tpu.vector_store %arg12[%c0_48, %c0_49], %113 {strides = array<i32>} : memref<48x32xf32, #tpu.memory_space<vmem>>, vector<48x32xf32>,
      %cst_50 = arith.constant 0xFF800000 : f32
      %115 = vector.broadcast %cst_50 : f32 to vector<48x2xf32>
      %c0_51 = arith.constant 0 : index
      %c0_52 = arith.constant 0 : index
      %116 = vector.load %arg13[%c0_51, %c0_52] : memref<48x2xf32, #tpu.memory_space<vmem>>, vector<48x2xf32>
      tpu.vector_store %arg13[%c0_51, %c0_52], %115 {strides = array<i32>} : memref<48x2xf32, #tpu.memory_space<vmem>>, vector<48x2xf32>,
      %cst_53 = arith.constant 0.000000e+00 : f32
      %117 = vector.broadcast %cst_53 : f32 to vector<48x2xf32>
      %c0_54 = arith.constant 0 : index
      %c0_55 = arith.constant 0 : index
      %118 = vector.load %arg14[%c0_54, %c0_55] : memref<48x2xf32, #tpu.memory_space<vmem>>, vector<48x2xf32>
      tpu.vector_store %arg14[%c0_54, %c0_55], %117 {strides = array<i32>} : memref<48x2xf32, #tpu.memory_space<vmem>>, vector<48x2xf32>,
      %cst_56 = arith.constant 0.000000e+00 : f32
      %119 = vector.broadcast %cst_56 : f32 to vector<48x32xf32>
      %c0_57 = arith.constant 0 : index
      %c0_58 = arith.constant 0 : index
      %120 = vector.load %arg15[%c0_57, %c0_58] : memref<48x32xf32, #tpu.memory_space<vmem>>, vector<48x32xf32>
      tpu.vector_store %arg15[%c0_57, %c0_58], %119 {strides = array<i32>} : memref<48x32xf32, #tpu.memory_space<vmem>>, vector<48x32xf32>,
    } else {
    }
    %c0_4 = arith.constant 0 : index
    %c0_5 = arith.constant 0 : index
    %5 = vector.load %arg6[%c0_4, %c0_5] : memref<48x32xf32, #tpu.memory_space<vmem>>, vector<48x32xf32>
    %cst = arith.constant dense<0.000000e+00> : vector<48xf32>
    %6 = vector.multi_reduction <add>, %5, %cst [1] : vector<48x32xf32> to vector<48xf32>
    %7 = vector.shape_cast %6 : vector<48xf32> to vector<48x1xf32>
    %cst_6 = arith.constant 3.200000e+01 : f32
    %8 = vector.broadcast %cst_6 : f32 to vector<48x1xf32>
    %9 = arith.divf %7, %8 : vector<48x1xf32>
    %10 = vector.broadcast %9 : vector<48x1xf32> to vector<48x32xf32>
    %11 = arith.subf %5, %10 : vector<48x32xf32>
    %12 = arith.mulf %11, %11 : vector<48x32xf32>
    %cst_7 = arith.constant dense<0.000000e+00> : vector<48xf32>
    %13 = vector.multi_reduction <add>, %12, %cst_7 [1] : vector<48x32xf32> to vector<48xf32>
    %14 = vector.shape_cast %13 : vector<48xf32> to vector<48x1xf32>
    %cst_8 = arith.constant 3.200000e+01 : f32
    %15 = vector.broadcast %cst_8 : f32 to vector<48x1xf32>
    %16 = arith.divf %14, %15 : vector<48x1xf32>
    %cst_9 = arith.constant 9.99999974E-6 : f32
    %17 = vector.broadcast %cst_9 : f32 to vector<48x1xf32>
    %18 = arith.addf %16, %17 : vector<48x1xf32>
    %19 = math.rsqrt %18 : vector<48x1xf32>
    %20 = vector.broadcast %19 : vector<48x1xf32> to vector<48x32xf32>
    %21 = arith.mulf %11, %20 : vector<48x32xf32>
    %22 = vector.broadcast %0 : vector<1x32xf32> to vector<48x32xf32>
    %23 = arith.mulf %21, %22 : vector<48x32xf32>
    %24 = vector.broadcast %1 : vector<1x32xf32> to vector<48x32xf32>
    %25 = arith.addf %23, %24 : vector<48x32xf32>
    %c0_10 = arith.constant 0 : index
    %c0_11 = arith.constant 0 : index
    %26 = vector.load %arg8[%c0_10, %c0_11] : memref<32x64xf32, #tpu.memory_space<vmem>>, vector<32x64xf32>
    %cst_12 = arith.constant dense<0.000000e+00> : vector<48x64xf32>
    %27 = tpu.matmul %25, %26, %cst_12 {dimension_numbers = #tpu.dot_dimension_numbers<[1], [0], [0], [1], [0, 0, 1, 1], [], []>} : vector<48x32xf32>, vector<32x64xf32>, vector<48x64xf32> -> vector<48x64xf32>
    %28 = vector.extract_strided_slice %27 {offsets = [0, 0], sizes = [48, 32], strides = [1, 1]} : vector<48x64xf32> to vector<48x32xf32>
    %29 = vector.extract_strided_slice %27 {offsets = [0, 32], sizes = [48, 32], strides = [1, 1]} : vector<48x64xf32> to vector<48x32xf32>
    %c0_13 = arith.constant 0 : index
    %c0_14 = arith.constant 0 : index
    %30 = vector.load %arg12[%c0_13, %c0_14] : memref<48x32xf32, #tpu.memory_space<vmem>>, vector<48x32xf32>
    %c0_15 = arith.constant 0 : index
    %c0_16 = arith.constant 0 : index
    %31 = vector.load %arg13[%c0_15, %c0_16] : memref<48x2xf32, #tpu.memory_space<vmem>>, vector<48x2xf32>
    %c0_17 = arith.constant 0 : index
    %c0_18 = arith.constant 0 : index
    %32 = vector.load %arg14[%c0_17, %c0_18] : memref<48x2xf32, #tpu.memory_space<vmem>>, vector<48x2xf32>
    %c0_19 = arith.constant 0 : index
    %c0_20 = arith.constant 0 : index
    %33 = vector.load %arg15[%c0_19, %c0_20] : memref<48x32xf32, #tpu.memory_space<vmem>>, vector<48x32xf32>
    %34 = vector.extract_strided_slice %30 {offsets = [0, 0], sizes = [48, 16], strides = [1, 1]} : vector<48x32xf32> to vector<48x16xf32>
    %35 = vector.extract_strided_slice %28 {offsets = [0, 0], sizes = [48, 16], strides = [1, 1]} : vector<48x32xf32> to vector<48x16xf32>
    %cst_21 = arith.constant dense<0.000000e+00> : vector<48x48xf32>
    %36 = tpu.matmul %34, %35, %cst_21 {dimension_numbers = #tpu.dot_dimension_numbers<[1], [1], [0], [0], [0, 0, 1, 0], [], []>} : vector<48x16xf32>, vector<48x16xf32>, vector<48x48xf32> -> vector<48x48xf32>
    %37 = vector.extract_strided_slice %31 {offsets = [0, 0], sizes = [48, 1], strides = [1, 1]} : vector<48x2xf32> to vector<48x1xf32>
    %cst_22 = arith.constant dense<0xFF800000> : vector<48xf32>
    %38 = vector.multi_reduction <maximumf>, %36, %cst_22 [1] : vector<48x48xf32> to vector<48xf32>
    %39 = vector.shape_cast %38 : vector<48xf32> to vector<48x1xf32>
    %40 = arith.maximumf %37, %39 : vector<48x1xf32>
    %41 = arith.subf %37, %40 : vector<48x1xf32>
    %42 = math.exp %41 : vector<48x1xf32>
    %43 = vector.broadcast %40 : vector<48x1xf32> to vector<48x48xf32>
    %44 = arith.subf %36, %43 : vector<48x48xf32>
    %45 = math.exp %44 : vector<48x48xf32>
    %46 = vector.extract_strided_slice %32 {offsets = [0, 0], sizes = [48, 1], strides = [1, 1]} : vector<48x2xf32> to vector<48x1xf32>
    %47 = arith.mulf %42, %46 : vector<48x1xf32>
    %cst_23 = arith.constant dense<0.000000e+00> : vector<48xf32>
    %48 = vector.multi_reduction <add>, %45, %cst_23 [1] : vector<48x48xf32> to vector<48xf32>
    %49 = vector.shape_cast %48 : vector<48xf32> to vector<48x1xf32>
    %50 = arith.addf %47, %49 : vector<48x1xf32>
    %51 = vector.extract_strided_slice %33 {offsets = [0, 0], sizes = [48, 16], strides = [1, 1]} : vector<48x32xf32> to vector<48x16xf32>
    %52 = vector.broadcast %42 : vector<48x1xf32> to vector<48x16xf32>
    %53 = arith.mulf %52, %51 : vector<48x16xf32>
    %54 = vector.extract_strided_slice %29 {offsets = [0, 0], sizes = [48, 16], strides = [1, 1]} : vector<48x32xf32> to vector<48x16xf32>
    %cst_24 = arith.constant dense<0.000000e+00> : vector<48x16xf32>
    %55 = tpu.matmul %45, %54, %cst_24 {dimension_numbers = #tpu.dot_dimension_numbers<[1], [0], [0], [1], [0, 0, 1, 1], [], []>} : vector<48x48xf32>, vector<48x16xf32>, vector<48x16xf32> -> vector<48x16xf32>
    %56 = arith.addf %53, %55 : vector<48x16xf32>
    %57 = vector.extract_strided_slice %30 {offsets = [0, 16], sizes = [48, 16], strides = [1, 1]} : vector<48x32xf32> to vector<48x16xf32>
    %58 = vector.extract_strided_slice %28 {offsets = [0, 16], sizes = [48, 16], strides = [1, 1]} : vector<48x32xf32> to vector<48x16xf32>
    %cst_25 = arith.constant dense<0.000000e+00> : vector<48x48xf32>
    %59 = tpu.matmul %57, %58, %cst_25 {dimension_numbers = #tpu.dot_dimension_numbers<[1], [1], [0], [0], [0, 0, 1, 0], [], []>} : vector<48x16xf32>, vector<48x16xf32>, vector<48x48xf32> -> vector<48x48xf32>
    %60 = vector.extract_strided_slice %31 {offsets = [0, 1], sizes = [48, 1], strides = [1, 1]} : vector<48x2xf32> to vector<48x1xf32>
    %cst_26 = arith.constant dense<0xFF800000> : vector<48xf32>
    %61 = vector.multi_reduction <maximumf>, %59, %cst_26 [1] : vector<48x48xf32> to vector<48xf32>
    %62 = vector.shape_cast %61 : vector<48xf32> to vector<48x1xf32>
    %63 = arith.maximumf %60, %62 : vector<48x1xf32>
    %64 = arith.subf %60, %63 : vector<48x1xf32>
    %65 = math.exp %64 : vector<48x1xf32>
    %66 = vector.broadcast %63 : vector<48x1xf32> to vector<48x48xf32>
    %67 = arith.subf %59, %66 : vector<48x48xf32>
    %68 = math.exp %67 : vector<48x48xf32>
    %69 = vector.extract_strided_slice %32 {offsets = [0, 1], sizes = [48, 1], strides = [1, 1]} : vector<48x2xf32> to vector<48x1xf32>
    %70 = arith.mulf %65, %69 : vector<48x1xf32>
    %cst_27 = arith.constant dense<0.000000e+00> : vector<48xf32>
    %71 = vector.multi_reduction <add>, %68, %cst_27 [1] : vector<48x48xf32> to vector<48xf32>
    %72 = vector.shape_cast %71 : vector<48xf32> to vector<48x1xf32>
    %73 = arith.addf %70, %72 : vector<48x1xf32>
    %74 = vector.extract_strided_slice %33 {offsets = [0, 16], sizes = [48, 16], strides = [1, 1]} : vector<48x32xf32> to vector<48x16xf32>
    %75 = vector.broadcast %65 : vector<48x1xf32> to vector<48x16xf32>
    %76 = arith.mulf %75, %74 : vector<48x16xf32>
    %77 = vector.extract_strided_slice %29 {offsets = [0, 16], sizes = [48, 16], strides = [1, 1]} : vector<48x32xf32> to vector<48x16xf32>
    %cst_28 = arith.constant dense<0.000000e+00> : vector<48x16xf32>
    %78 = tpu.matmul %68, %77, %cst_28 {dimension_numbers = #tpu.dot_dimension_numbers<[1], [0], [0], [1], [0, 0, 1, 1], [], []>} : vector<48x48xf32>, vector<48x16xf32>, vector<48x16xf32> -> vector<48x16xf32>
    %79 = arith.addf %76, %78 : vector<48x16xf32>
    %80 = tpu.concatenate %56, %79 in 1 : vector<48x16xf32>, vector<48x16xf32> -> vector<48x32xf32>
    %81 = tpu.concatenate %50, %73 in 1 : vector<48x1xf32>, vector<48x1xf32> -> vector<48x2xf32>
    %82 = tpu.concatenate %40, %63 in 1 : vector<48x1xf32>, vector<48x1xf32> -> vector<48x2xf32>
    %c0_29 = arith.constant 0 : index
    %c0_30 = arith.constant 0 : index
    %83 = vector.load %arg13[%c0_29, %c0_30] : memref<48x2xf32, #tpu.memory_space<vmem>>, vector<48x2xf32>
    tpu.vector_store %arg13[%c0_29, %c0_30], %82 {strides = array<i32>} : memref<48x2xf32, #tpu.memory_space<vmem>>, vector<48x2xf32>,
    %c0_31 = arith.constant 0 : index
    %c0_32 = arith.constant 0 : index
    %84 = vector.load %arg14[%c0_31, %c0_32] : memref<48x2xf32, #tpu.memory_space<vmem>>, vector<48x2xf32>
    tpu.vector_store %arg14[%c0_31, %c0_32], %81 {strides = array<i32>} : memref<48x2xf32, #tpu.memory_space<vmem>>, vector<48x2xf32>,
    %c0_33 = arith.constant 0 : index
    %c0_34 = arith.constant 0 : index
    %85 = vector.load %arg15[%c0_33, %c0_34] : memref<48x32xf32, #tpu.memory_space<vmem>>, vector<48x32xf32>
    tpu.vector_store %arg15[%c0_33, %c0_34], %80 {strides = array<i32>} : memref<48x32xf32, #tpu.memory_space<vmem>>, vector<48x32xf32>,
    %c0_i32_35 = arith.constant 0 : i32
    %86 = arith.cmpi eq, %arg2, %c0_i32_35 : i32
    %87 = arith.extui %86 : i1 to i32
    %c0_i32_36 = arith.constant 0 : i32
    %88 = arith.cmpi ne, %87, %c0_i32_36 : i32
    scf.if %88 {
      %89 = vector.extract_strided_slice %80 {offsets = [0, 0], sizes = [48, 16], strides = [1, 1]} : vector<48x32xf32> to vector<48x16xf32>
      %90 = vector.extract_strided_slice %81 {offsets = [0, 0], sizes = [48, 1], strides = [1, 1]} : vector<48x2xf32> to vector<48x1xf32>
      %91 = tpu.reciprocal %90 {approx = true} : vector<48x1xf32> -> vector<48x1xf32>
      %92 = vector.broadcast %91 : vector<48x1xf32> to vector<48x16xf32>
      %93 = arith.mulf %89, %92 : vector<48x16xf32>
      %94 = vector.extract_strided_slice %80 {offsets = [0, 16], sizes = [48, 16], strides = [1, 1]} : vector<48x32xf32> to vector<48x16xf32>
      %95 = vector.extract_strided_slice %81 {offsets = [0, 1], sizes = [48, 1], strides = [1, 1]} : vector<48x2xf32> to vector<48x1xf32>
      %96 = tpu.reciprocal %95 {approx = true} : vector<48x1xf32> -> vector<48x1xf32>
      %97 = vector.broadcast %96 : vector<48x1xf32> to vector<48x16xf32>
      %98 = arith.mulf %94, %97 : vector<48x16xf32>
      %99 = tpu.concatenate %93, %98 in 1 : vector<48x16xf32>, vector<48x16xf32> -> vector<48x32xf32>
      %c0_37 = arith.constant 0 : index
      %c0_38 = arith.constant 0 : index
      %100 = vector.load %arg9[%c0_37, %c0_38] : memref<32x32xf32, #tpu.memory_space<vmem>>, vector<32x32xf32>
      %cst_39 = arith.constant dense<0.000000e+00> : vector<48x32xf32>
      %101 = tpu.matmul %99, %100, %cst_39 {dimension_numbers = #tpu.dot_dimension_numbers<[1], [0], [0], [1], [0, 0, 1, 1], [], []>} : vector<48x32xf32>, vector<32x32xf32>, vector<48x32xf32> -> vector<48x32xf32>
      %c0_40 = arith.constant 0 : index
      %c0_41 = arith.constant 0 : index
      %102 = vector.load %arg10[%c0_40, %c0_41] : memref<1x32xf32, #tpu.memory_space<vmem>>, vector<1x32xf32>
      %103 = vector.broadcast %102 : vector<1x32xf32> to vector<48x32xf32>
      %104 = arith.addf %101, %103 : vector<48x32xf32>
      %c0_42 = arith.constant 0 : index
      %c0_43 = arith.constant 0 : index
      %105 = vector.load %arg11[%c0_42, %c0_43] : memref<48x32xf32, #tpu.memory_space<vmem>>, vector<48x32xf32>
      tpu.vector_store %arg11[%c0_42, %c0_43], %104 {strides = array<i32>} : memref<48x32xf32, #tpu.memory_space<vmem>>, vector<48x32xf32>,
    } else {
    }
    return
  }
  func.func @transform_0(%arg0: i32, %arg1: i32, %arg2: i32) -> (i32, i32) {
    %c1_i32 = arith.constant 1 : i32
    %0 = arith.muli %arg0, %c1_i32 : i32
    %1 = arith.addi %0, %arg1 : i32
    %c0_i32 = arith.constant 0 : i32
    %c0_i32_0 = arith.constant 0 : i32
    return %1, %c0_i32 : i32, i32
  }
  func.func @transform_1(%arg0: i32, %arg1: i32, %arg2: i32) -> (i32, i32) {
    %c0_i32 = arith.constant 0 : i32
    %c0_i32_0 = arith.constant 0 : i32
    %c0_i32_1 = arith.constant 0 : i32
    return %c0_i32, %c0_i32_0 : i32, i32
  }
  func.func @transform_2(%arg0: i32, %arg1: i32, %arg2: i32) -> (i32, i32) {
    %c0_i32 = arith.constant 0 : i32
    %c0_i32_0 = arith.constant 0 : i32
    %c0_i32_1 = arith.constant 0 : i32
    return %c0_i32, %c0_i32_0 : i32, i32
  }
  func.func @transform_3(%arg0: i32, %arg1: i32, %arg2: i32) -> (i32, i32) {
    %c1_i32 = arith.constant 1 : i32
    %0 = arith.muli %arg0, %c1_i32 : i32
    %1 = arith.addi %0, %arg2 : i32
    %c0_i32 = arith.constant 0 : i32
    %c0_i32_0 = arith.constant 0 : i32
    return %1, %c0_i32 : i32, i32
  }
  func.func @transform_4(%arg0: i32, %arg1: i32, %arg2: i32) -> (i32, i32) {
    %c0_i32 = arith.constant 0 : i32
    %c0_i32_0 = arith.constant 0 : i32
    %c0_i32_1 = arith.constant 0 : i32
    return %c0_i32, %c0_i32_0 : i32, i32
  }
  func.func @transform_5(%arg0: i32, %arg1: i32, %arg2: i32) -> (i32, i32) {
    %c0_i32 = arith.constant 0 : i32
    %c0_i32_0 = arith.constant 0 : i32
    %c0_i32_1 = arith.constant 0 : i32
    return %c0_i32, %c0_i32_0 : i32, i32
  }
  func.func @transform_6(%arg0: i32, %arg1: i32, %arg2: i32) -> (i32, i32) {
    %c0_i32 = arith.constant 0 : i32
    %c0_i32_0 = arith.constant 0 : i32
    %c0_i32_1 = arith.constant 0 : i32
    return %c0_i32, %c0_i32_0 : i32, i32
  }
  func.func @transform_7(%arg0: i32, %arg1: i32, %arg2: i32) -> (i32, i32) {
    %c0_i32 = arith.constant 0 : i32
    %c0_i32_0 = arith.constant 0 : i32
    %c0_i32_1 = arith.constant 0 : i32
    return %c0_i32, %c0_i32_0 : i32, i32
  }
  func.func @transform_8(%arg0: i32, %arg1: i32, %arg2: i32) -> (i32, i32) {
    %c1_i32 = arith.constant 1 : i32
    %0 = arith.muli %arg0, %c1_i32 : i32
    %1 = arith.addi %0, %arg1 : i32
    %c0_i32 = arith.constant 0 : i32
    %c0_i32_0 = arith.constant 0 : i32
    return %1, %c0_i32 : i32, i32
  }
}

module attributes {stable_mosaic.version = 11 : i64} {
  func.func @_attn_kernel(%arg0: i32, %arg1: i32, %arg2: i32, %arg3: memref<16x32xf32, #tpu.memory_space<vmem>>, %arg4: memref<1x32xf32, #tpu.memory_space<vmem>>, %arg5: memref<1x32xf32, #tpu.memory_space<vmem>>, %arg6: memref<8x24xf32, #tpu.memory_space<vmem>>, %arg7: memref<32x32xf32, #tpu.memory_space<vmem>>, %arg8: memref<24x64xf32, #tpu.memory_space<vmem>>, %arg9: memref<32x32xf32, #tpu.memory_space<vmem>>, %arg10: memref<1x32xf32, #tpu.memory_space<vmem>>, %arg11: memref<16x32xf32, #tpu.memory_space<vmem>>, %arg12: memref<16x32xf32, #tpu.memory_space<vmem>>, %arg13: memref<16x2xf32, #tpu.memory_space<vmem>>, %arg14: memref<16x2xf32, #tpu.memory_space<vmem>>, %arg15: memref<16x32xf32, #tpu.memory_space<vmem>>) attributes {dimension_semantics = [#tpu.dimension_semantics<parallel>, #tpu.dimension_semantics<parallel>, #tpu.dimension_semantics<arbitrary>], iteration_bounds = array<i64: 6, 1, 1>, scalar_prefetch = 0 : i64, scratch_operands = 4 : i64, tpu.core_type = #tpu.core_type<tc>, window_params = [{transform_indices = @transform_0, window_bounds = array<i64: 16, 32>}, {pipeline_mode = #tpu.pipeline_mode<synchronous>, transform_indices = @transform_1, window_bounds = array<i64: 1, 32>}, {pipeline_mode = #tpu.pipeline_mode<synchronous>, transform_indices = @transform_2, window_bounds = array<i64: 1, 32>}, {transform_indices = @transform_3, window_bounds = array<i64: 8, 24>}, {pipeline_mode = #tpu.pipeline_mode<synchronous>, transform_indices = @transform_4, window_bounds = array<i64: 32, 32>}, {pipeline_mode = #tpu.pipeline_mode<synchronous>, transform_indices = @transform_5, window_bounds = array<i64: 24, 64>}, {pipeline_mode = #tpu.pipeline_mode<synchronous>, transform_indices = @transform_6, window_bounds = array<i64: 32, 32>}, {pipeline_mode = #tpu.pipeline_mode<synchronous>, transform_indices = @transform_7, window_bounds = array<i64: 1, 32>}, {transform_indices = @transform_8, window_bounds = array<i64: 16, 32>}]} {
    %c0 = arith.constant 0 : index
    %c0_0 = arith.constant 0 : index
    %0 = vector.load %arg4[%c0, %c0_0] : memref<1x32xf32, #tpu.memory_space<vmem>>, vector<1x32xf32>
    %c0_1 = arith.constant 0 : index
    %c0_2 = arith.constant 0 : index
    %1 = vector.load %arg5[%c0_1, %c0_2] : memref<1x32xf32, #tpu.memory_space<vmem>>, vector<1x32xf32>
    %c0_i32 = arith.constant 0 : i32
    %2 = arith.cmpi eq, %arg2, %c0_i32 : i32
    %3 = arith.extui %2 : i1 to i32
    %c0_i32_3 = arith.constant 0 : i32
    %4 = arith.cmpi ne, %3, %c0_i32_3 : i32
    scf.if %4 {
      %c0_32 = arith.constant 0 : index
      %c0_33 = arith.constant 0 : index
      %69 = vector.load %arg3[%c0_32, %c0_33] : memref<16x32xf32, #tpu.memory_space<vmem>>, vector<16x32xf32>
      %cst_34 = arith.constant dense<0.000000e+00> : vector<16xf32>
      %70 = vector.multi_reduction <add>, %69, %cst_34 [1] : vector<16x32xf32> to vector<16xf32>
      %71 = vector.shape_cast %70 : vector<16xf32> to vector<16x1xf32>
      %cst_35 = arith.constant 3.200000e+01 : f32
      %72 = vector.broadcast %cst_35 : f32 to vector<16x1xf32>
      %73 = arith.divf %71, %72 : vector<16x1xf32>
      %74 = vector.broadcast %73 : vector<16x1xf32> to vector<16x32xf32>
      %75 = arith.subf %69, %74 : vector<16x32xf32>
      %76 = arith.mulf %75, %75 : vector<16x32xf32>
      %cst_36 = arith.constant dense<0.000000e+00> : vector<16xf32>
      %77 = vector.multi_reduction <add>, %76, %cst_36 [1] : vector<16x32xf32> to vector<16xf32>
      %78 = vector.shape_cast %77 : vector<16xf32> to vector<16x1xf32>
      %cst_37 = arith.constant 3.200000e+01 : f32
      %79 = vector.broadcast %cst_37 : f32 to vector<16x1xf32>
      %80 = arith.divf %78, %79 : vector<16x1xf32>
      %cst_38 = arith.constant 9.99999974E-6 : f32
      %81 = vector.broadcast %cst_38 : f32 to vector<16x1xf32>
      %82 = arith.addf %80, %81 : vector<16x1xf32>
      %83 = math.rsqrt %82 : vector<16x1xf32>
      %84 = vector.broadcast %83 : vector<16x1xf32> to vector<16x32xf32>
      %85 = arith.mulf %75, %84 : vector<16x32xf32>
      %86 = vector.broadcast %0 : vector<1x32xf32> to vector<16x32xf32>
      %87 = arith.mulf %85, %86 : vector<16x32xf32>
      %88 = vector.broadcast %1 : vector<1x32xf32> to vector<16x32xf32>
      %89 = arith.addf %87, %88 : vector<16x32xf32>
      %c0_39 = arith.constant 0 : index
      %c0_40 = arith.constant 0 : index
      %90 = vector.load %arg7[%c0_39, %c0_40] : memref<32x32xf32, #tpu.memory_space<vmem>>, vector<32x32xf32>
      %cst_41 = arith.constant dense<0.000000e+00> : vector<16x32xf32>
      %91 = tpu.matmul %89, %90, %cst_41 {dimension_numbers = #tpu.dot_dimension_numbers<[1], [0], [0], [1], [0, 0, 1, 1], [], []>} : vector<16x32xf32>, vector<32x32xf32>, vector<16x32xf32> -> vector<16x32xf32>
      %cst_42 = arith.constant 2.500000e-01 : f32
      %92 = vector.broadcast %cst_42 : f32 to vector<16x32xf32>
      %93 = arith.mulf %91, %92 : vector<16x32xf32>
      %c0_43 = arith.constant 0 : index
      %c0_44 = arith.constant 0 : index
      %94 = vector.load %arg12[%c0_43, %c0_44] : memref<16x32xf32, #tpu.memory_space<vmem>>, vector<16x32xf32>
      tpu.vector_store %arg12[%c0_43, %c0_44], %93 {strides = array<i32>} : memref<16x32xf32, #tpu.memory_space<vmem>>, vector<16x32xf32>,
      %cst_45 = arith.constant 0xFF800000 : f32
      %95 = vector.broadcast %cst_45 : f32 to vector<16x2xf32>
      %c0_46 = arith.constant 0 : index
      %c0_47 = arith.constant 0 : index
      %96 = vector.load %arg13[%c0_46, %c0_47] : memref<16x2xf32, #tpu.memory_space<vmem>>, vector<16x2xf32>
      tpu.vector_store %arg13[%c0_46, %c0_47], %95 {strides = array<i32>} : memref<16x2xf32, #tpu.memory_space<vmem>>, vector<16x2xf32>,
      %cst_48 = arith.constant 0.000000e+00 : f32
      %97 = vector.broadcast %cst_48 : f32 to vector<16x2xf32>
      %c0_49 = arith.constant 0 : index
      %c0_50 = arith.constant 0 : index
      %98 = vector.load %arg14[%c0_49, %c0_50] : memref<16x2xf32, #tpu.memory_space<vmem>>, vector<16x2xf32>
      tpu.vector_store %arg14[%c0_49, %c0_50], %97 {strides = array<i32>} : memref<16x2xf32, #tpu.memory_space<vmem>>, vector<16x2xf32>,
      %cst_51 = arith.constant 0.000000e+00 : f32
      %99 = vector.broadcast %cst_51 : f32 to vector<16x32xf32>
      %c0_52 = arith.constant 0 : index
      %c0_53 = arith.constant 0 : index
      %100 = vector.load %arg15[%c0_52, %c0_53] : memref<16x32xf32, #tpu.memory_space<vmem>>, vector<16x32xf32>
      tpu.vector_store %arg15[%c0_52, %c0_53], %99 {strides = array<i32>} : memref<16x32xf32, #tpu.memory_space<vmem>>, vector<16x32xf32>,
    } else {
    }
    %c0_4 = arith.constant 0 : index
    %c0_5 = arith.constant 0 : index
    %5 = vector.load %arg6[%c0_4, %c0_5] : memref<8x24xf32, #tpu.memory_space<vmem>>, vector<8x24xf32>
    %c0_6 = arith.constant 0 : index
    %c0_7 = arith.constant 0 : index
    %6 = vector.load %arg8[%c0_6, %c0_7] : memref<24x64xf32, #tpu.memory_space<vmem>>, vector<24x64xf32>
    %cst = arith.constant dense<0.000000e+00> : vector<8x64xf32>
    %7 = tpu.matmul %5, %6, %cst {dimension_numbers = #tpu.dot_dimension_numbers<[1], [0], [0], [1], [0, 0, 1, 1], [], []>} : vector<8x24xf32>, vector<24x64xf32>, vector<8x64xf32> -> vector<8x64xf32>
    %8 = vector.extract_strided_slice %7 {offsets = [0, 0], sizes = [8, 32], strides = [1, 1]} : vector<8x64xf32> to vector<8x32xf32>
    %9 = vector.extract_strided_slice %7 {offsets = [0, 32], sizes = [8, 32], strides = [1, 1]} : vector<8x64xf32> to vector<8x32xf32>
    %c0_8 = arith.constant 0 : index
    %c0_9 = arith.constant 0 : index
    %10 = vector.load %arg12[%c0_8, %c0_9] : memref<16x32xf32, #tpu.memory_space<vmem>>, vector<16x32xf32>
    %c0_10 = arith.constant 0 : index
    %c0_11 = arith.constant 0 : index
    %11 = vector.load %arg13[%c0_10, %c0_11] : memref<16x2xf32, #tpu.memory_space<vmem>>, vector<16x2xf32>
    %c0_12 = arith.constant 0 : index
    %c0_13 = arith.constant 0 : index
    %12 = vector.load %arg14[%c0_12, %c0_13] : memref<16x2xf32, #tpu.memory_space<vmem>>, vector<16x2xf32>
    %c0_14 = arith.constant 0 : index
    %c0_15 = arith.constant 0 : index
    %13 = vector.load %arg15[%c0_14, %c0_15] : memref<16x32xf32, #tpu.memory_space<vmem>>, vector<16x32xf32>
    %14 = vector.extract_strided_slice %10 {offsets = [0, 0], sizes = [16, 16], strides = [1, 1]} : vector<16x32xf32> to vector<16x16xf32>
    %15 = vector.extract_strided_slice %8 {offsets = [0, 0], sizes = [8, 16], strides = [1, 1]} : vector<8x32xf32> to vector<8x16xf32>
    %cst_16 = arith.constant dense<0.000000e+00> : vector<16x8xf32>
    %16 = tpu.matmul %14, %15, %cst_16 {dimension_numbers = #tpu.dot_dimension_numbers<[1], [1], [0], [0], [0, 0, 1, 0], [], []>} : vector<16x16xf32>, vector<8x16xf32>, vector<16x8xf32> -> vector<16x8xf32>
    %17 = vector.extract_strided_slice %11 {offsets = [0, 0], sizes = [16, 1], strides = [1, 1]} : vector<16x2xf32> to vector<16x1xf32>
    %cst_17 = arith.constant dense<0xFF800000> : vector<16xf32>
    %18 = vector.multi_reduction <maximumf>, %16, %cst_17 [1] : vector<16x8xf32> to vector<16xf32>
    %19 = vector.shape_cast %18 : vector<16xf32> to vector<16x1xf32>
    %20 = arith.maximumf %17, %19 : vector<16x1xf32>
    %21 = arith.subf %17, %20 : vector<16x1xf32>
    %22 = math.exp %21 : vector<16x1xf32>
    %23 = vector.broadcast %20 : vector<16x1xf32> to vector<16x8xf32>
    %24 = arith.subf %16, %23 : vector<16x8xf32>
    %25 = math.exp %24 : vector<16x8xf32>
    %26 = vector.extract_strided_slice %12 {offsets = [0, 0], sizes = [16, 1], strides = [1, 1]} : vector<16x2xf32> to vector<16x1xf32>
    %27 = arith.mulf %22, %26 : vector<16x1xf32>
    %cst_18 = arith.constant dense<0.000000e+00> : vector<16xf32>
    %28 = vector.multi_reduction <add>, %25, %cst_18 [1] : vector<16x8xf32> to vector<16xf32>
    %29 = vector.shape_cast %28 : vector<16xf32> to vector<16x1xf32>
    %30 = arith.addf %27, %29 : vector<16x1xf32>
    %31 = vector.extract_strided_slice %13 {offsets = [0, 0], sizes = [16, 16], strides = [1, 1]} : vector<16x32xf32> to vector<16x16xf32>
    %32 = vector.broadcast %22 : vector<16x1xf32> to vector<16x16xf32>
    %33 = arith.mulf %32, %31 : vector<16x16xf32>
    %34 = vector.extract_strided_slice %9 {offsets = [0, 0], sizes = [8, 16], strides = [1, 1]} : vector<8x32xf32> to vector<8x16xf32>
    %cst_19 = arith.constant dense<0.000000e+00> : vector<16x16xf32>
    %35 = tpu.matmul %25, %34, %cst_19 {dimension_numbers = #tpu.dot_dimension_numbers<[1], [0], [0], [1], [0, 0, 1, 1], [], []>} : vector<16x8xf32>, vector<8x16xf32>, vector<16x16xf32> -> vector<16x16xf32>
    %36 = arith.addf %33, %35 : vector<16x16xf32>
    %37 = vector.extract_strided_slice %10 {offsets = [0, 16], sizes = [16, 16], strides = [1, 1]} : vector<16x32xf32> to vector<16x16xf32>
    %38 = vector.extract_strided_slice %8 {offsets = [0, 16], sizes = [8, 16], strides = [1, 1]} : vector<8x32xf32> to vector<8x16xf32>
    %cst_20 = arith.constant dense<0.000000e+00> : vector<16x8xf32>
    %39 = tpu.matmul %37, %38, %cst_20 {dimension_numbers = #tpu.dot_dimension_numbers<[1], [1], [0], [0], [0, 0, 1, 0], [], []>} : vector<16x16xf32>, vector<8x16xf32>, vector<16x8xf32> -> vector<16x8xf32>
    %40 = vector.extract_strided_slice %11 {offsets = [0, 1], sizes = [16, 1], strides = [1, 1]} : vector<16x2xf32> to vector<16x1xf32>
    %cst_21 = arith.constant dense<0xFF800000> : vector<16xf32>
    %41 = vector.multi_reduction <maximumf>, %39, %cst_21 [1] : vector<16x8xf32> to vector<16xf32>
    %42 = vector.shape_cast %41 : vector<16xf32> to vector<16x1xf32>
    %43 = arith.maximumf %40, %42 : vector<16x1xf32>
    %44 = arith.subf %40, %43 : vector<16x1xf32>
    %45 = math.exp %44 : vector<16x1xf32>
    %46 = vector.broadcast %43 : vector<16x1xf32> to vector<16x8xf32>
    %47 = arith.subf %39, %46 : vector<16x8xf32>
    %48 = math.exp %47 : vector<16x8xf32>
    %49 = vector.extract_strided_slice %12 {offsets = [0, 1], sizes = [16, 1], strides = [1, 1]} : vector<16x2xf32> to vector<16x1xf32>
    %50 = arith.mulf %45, %49 : vector<16x1xf32>
    %cst_22 = arith.constant dense<0.000000e+00> : vector<16xf32>
    %51 = vector.multi_reduction <add>, %48, %cst_22 [1] : vector<16x8xf32> to vector<16xf32>
    %52 = vector.shape_cast %51 : vector<16xf32> to vector<16x1xf32>
    %53 = arith.addf %50, %52 : vector<16x1xf32>
    %54 = vector.extract_strided_slice %13 {offsets = [0, 16], sizes = [16, 16], strides = [1, 1]} : vector<16x32xf32> to vector<16x16xf32>
    %55 = vector.broadcast %45 : vector<16x1xf32> to vector<16x16xf32>
    %56 = arith.mulf %55, %54 : vector<16x16xf32>
    %57 = vector.extract_strided_slice %9 {offsets = [0, 16], sizes = [8, 16], strides = [1, 1]} : vector<8x32xf32> to vector<8x16xf32>
    %cst_23 = arith.constant dense<0.000000e+00> : vector<16x16xf32>
    %58 = tpu.matmul %48, %57, %cst_23 {dimension_numbers = #tpu.dot_dimension_numbers<[1], [0], [0], [1], [0, 0, 1, 1], [], []>} : vector<16x8xf32>, vector<8x16xf32>, vector<16x16xf32> -> vector<16x16xf32>
    %59 = arith.addf %56, %58 : vector<16x16xf32>
    %60 = tpu.concatenate %36, %59 in 1 : vector<16x16xf32>, vector<16x16xf32> -> vector<16x32xf32>
    %61 = tpu.concatenate %30, %53 in 1 : vector<16x1xf32>, vector<16x1xf32> -> vector<16x2xf32>
    %62 = tpu.concatenate %20, %43 in 1 : vector<16x1xf32>, vector<16x1xf32> -> vector<16x2xf32>
    %c0_24 = arith.constant 0 : index
    %c0_25 = arith.constant 0 : index
    %63 = vector.load %arg13[%c0_24, %c0_25] : memref<16x2xf32, #tpu.memory_space<vmem>>, vector<16x2xf32>
    tpu.vector_store %arg13[%c0_24, %c0_25], %62 {strides = array<i32>} : memref<16x2xf32, #tpu.memory_space<vmem>>, vector<16x2xf32>,
    %c0_26 = arith.constant 0 : index
    %c0_27 = arith.constant 0 : index
    %64 = vector.load %arg14[%c0_26, %c0_27] : memref<16x2xf32, #tpu.memory_space<vmem>>, vector<16x2xf32>
    tpu.vector_store %arg14[%c0_26, %c0_27], %61 {strides = array<i32>} : memref<16x2xf32, #tpu.memory_space<vmem>>, vector<16x2xf32>,
    %c0_28 = arith.constant 0 : index
    %c0_29 = arith.constant 0 : index
    %65 = vector.load %arg15[%c0_28, %c0_29] : memref<16x32xf32, #tpu.memory_space<vmem>>, vector<16x32xf32>
    tpu.vector_store %arg15[%c0_28, %c0_29], %60 {strides = array<i32>} : memref<16x32xf32, #tpu.memory_space<vmem>>, vector<16x32xf32>,
    %c0_i32_30 = arith.constant 0 : i32
    %66 = arith.cmpi eq, %arg2, %c0_i32_30 : i32
    %67 = arith.extui %66 : i1 to i32
    %c0_i32_31 = arith.constant 0 : i32
    %68 = arith.cmpi ne, %67, %c0_i32_31 : i32
    scf.if %68 {
      %69 = vector.extract_strided_slice %60 {offsets = [0, 0], sizes = [16, 16], strides = [1, 1]} : vector<16x32xf32> to vector<16x16xf32>
      %70 = vector.extract_strided_slice %61 {offsets = [0, 0], sizes = [16, 1], strides = [1, 1]} : vector<16x2xf32> to vector<16x1xf32>
      %71 = tpu.reciprocal %70 {approx = true} : vector<16x1xf32> -> vector<16x1xf32>
      %72 = vector.broadcast %71 : vector<16x1xf32> to vector<16x16xf32>
      %73 = arith.mulf %69, %72 : vector<16x16xf32>
      %74 = vector.extract_strided_slice %60 {offsets = [0, 16], sizes = [16, 16], strides = [1, 1]} : vector<16x32xf32> to vector<16x16xf32>
      %75 = vector.extract_strided_slice %61 {offsets = [0, 1], sizes = [16, 1], strides = [1, 1]} : vector<16x2xf32> to vector<16x1xf32>
      %76 = tpu.reciprocal %75 {approx = true} : vector<16x1xf32> -> vector<16x1xf32>
      %77 = vector.broadcast %76 : vector<16x1xf32> to vector<16x16xf32>
      %78 = arith.mulf %74, %77 : vector<16x16xf32>
      %79 = tpu.concatenate %73, %78 in 1 : vector<16x16xf32>, vector<16x16xf32> -> vector<16x32xf32>
      %c0_32 = arith.constant 0 : index
      %c0_33 = arith.constant 0 : index
      %80 = vector.load %arg9[%c0_32, %c0_33] : memref<32x32xf32, #tpu.memory_space<vmem>>, vector<32x32xf32>
      %cst_34 = arith.constant dense<0.000000e+00> : vector<16x32xf32>
      %81 = tpu.matmul %79, %80, %cst_34 {dimension_numbers = #tpu.dot_dimension_numbers<[1], [0], [0], [1], [0, 0, 1, 1], [], []>} : vector<16x32xf32>, vector<32x32xf32>, vector<16x32xf32> -> vector<16x32xf32>
      %c0_35 = arith.constant 0 : index
      %c0_36 = arith.constant 0 : index
      %82 = vector.load %arg10[%c0_35, %c0_36] : memref<1x32xf32, #tpu.memory_space<vmem>>, vector<1x32xf32>
      %83 = vector.broadcast %82 : vector<1x32xf32> to vector<16x32xf32>
      %84 = arith.addf %81, %83 : vector<16x32xf32>
      %c0_37 = arith.constant 0 : index
      %c0_38 = arith.constant 0 : index
      %85 = vector.load %arg11[%c0_37, %c0_38] : memref<16x32xf32, #tpu.memory_space<vmem>>, vector<16x32xf32>
      tpu.vector_store %arg11[%c0_37, %c0_38], %84 {strides = array<i32>} : memref<16x32xf32, #tpu.memory_space<vmem>>, vector<16x32xf32>,
    } else {
    }
    return
  }
  func.func @transform_0(%arg0: i32, %arg1: i32, %arg2: i32) -> (i32, i32) {
    %c1_i32 = arith.constant 1 : i32
    %0 = arith.muli %arg0, %c1_i32 : i32
    %1 = arith.addi %0, %arg1 : i32
    %c0_i32 = arith.constant 0 : i32
    %c0_i32_0 = arith.constant 0 : i32
    return %1, %c0_i32 : i32, i32
  }
  func.func @transform_1(%arg0: i32, %arg1: i32, %arg2: i32) -> (i32, i32) {
    %c0_i32 = arith.constant 0 : i32
    %c0_i32_0 = arith.constant 0 : i32
    %c0_i32_1 = arith.constant 0 : i32
    return %c0_i32, %c0_i32_0 : i32, i32
  }
  func.func @transform_2(%arg0: i32, %arg1: i32, %arg2: i32) -> (i32, i32) {
    %c0_i32 = arith.constant 0 : i32
    %c0_i32_0 = arith.constant 0 : i32
    %c0_i32_1 = arith.constant 0 : i32
    return %c0_i32, %c0_i32_0 : i32, i32
  }
  func.func @transform_3(%arg0: i32, %arg1: i32, %arg2: i32) -> (i32, i32) {
    %c1_i32 = arith.constant 1 : i32
    %0 = arith.muli %arg0, %c1_i32 : i32
    %1 = arith.addi %0, %arg2 : i32
    %c0_i32 = arith.constant 0 : i32
    %c0_i32_0 = arith.constant 0 : i32
    return %1, %c0_i32 : i32, i32
  }
  func.func @transform_4(%arg0: i32, %arg1: i32, %arg2: i32) -> (i32, i32) {
    %c0_i32 = arith.constant 0 : i32
    %c0_i32_0 = arith.constant 0 : i32
    %c0_i32_1 = arith.constant 0 : i32
    return %c0_i32, %c0_i32_0 : i32, i32
  }
  func.func @transform_5(%arg0: i32, %arg1: i32, %arg2: i32) -> (i32, i32) {
    %c0_i32 = arith.constant 0 : i32
    %c0_i32_0 = arith.constant 0 : i32
    %c0_i32_1 = arith.constant 0 : i32
    return %c0_i32, %c0_i32_0 : i32, i32
  }
  func.func @transform_6(%arg0: i32, %arg1: i32, %arg2: i32) -> (i32, i32) {
    %c0_i32 = arith.constant 0 : i32
    %c0_i32_0 = arith.constant 0 : i32
    %c0_i32_1 = arith.constant 0 : i32
    return %c0_i32, %c0_i32_0 : i32, i32
  }
  func.func @transform_7(%arg0: i32, %arg1: i32, %arg2: i32) -> (i32, i32) {
    %c0_i32 = arith.constant 0 : i32
    %c0_i32_0 = arith.constant 0 : i32
    %c0_i32_1 = arith.constant 0 : i32
    return %c0_i32, %c0_i32_0 : i32, i32
  }
  func.func @transform_8(%arg0: i32, %arg1: i32, %arg2: i32) -> (i32, i32) {
    %c1_i32 = arith.constant 1 : i32
    %0 = arith.muli %arg0, %c1_i32 : i32
    %1 = arith.addi %0, %arg1 : i32
    %c0_i32 = arith.constant 0 : i32
    %c0_i32_0 = arith.constant 0 : i32
    return %1, %c0_i32 : i32, i32
  }
}

module attributes {stable_mosaic.version = 11 : i64} {
  func.func @_attn_kernel(%arg0: i32, %arg1: i32, %arg2: i32, %arg3: memref<32x32xf32, #tpu.memory_space<vmem>>, %arg4: memref<1x32xf32, #tpu.memory_space<vmem>>, %arg5: memref<1x32xf32, #tpu.memory_space<vmem>>, %arg6: memref<32x32xf32, #tpu.memory_space<vmem>>, %arg7: memref<32x64xf32, #tpu.memory_space<vmem>>, %arg8: memref<32x96xf32, #tpu.memory_space<vmem>>, %arg9: memref<32x32xf32, #tpu.memory_space<vmem>>, %arg10: memref<32x32xf32, #tpu.memory_space<vmem>>, %arg11: memref<32x32xf32, #tpu.memory_space<vmem>>, %arg12: memref<1x32xf32, #tpu.memory_space<vmem>>, %arg13: memref<32x32xf32, #tpu.memory_space<vmem>>, %arg14: memref<32x32xf32, #tpu.memory_space<vmem>>, %arg15: memref<32x2xf32, #tpu.memory_space<vmem>>, %arg16: memref<32x2xf32, #tpu.memory_space<vmem>>, %arg17: memref<32x32xf32, #tpu.memory_space<vmem>>) attributes {dimension_semantics = [#tpu.dimension_semantics<parallel>, #tpu.dimension_semantics<parallel>, #tpu.dimension_semantics<arbitrary>], iteration_bounds = array<i64: 3, 1, 1>, scalar_prefetch = 0 : i64, scratch_operands = 4 : i64, tpu.core_type = #tpu.core_type<tc>, window_params = [{transform_indices = @transform_0, window_bounds = array<i64: 32, 32>}, {pipeline_mode = #tpu.pipeline_mode<synchronous>, transform_indices = @transform_1, window_bounds = array<i64: 1, 32>}, {pipeline_mode = #tpu.pipeline_mode<synchronous>, transform_indices = @transform_2, window_bounds = array<i64: 1, 32>}, {transform_indices = @transform_3, window_bounds = array<i64: 32, 32>}, {pipeline_mode = #tpu.pipeline_mode<synchronous>, transform_indices = @transform_4, window_bounds = array<i64: 32, 64>}, {pipeline_mode = #tpu.pipeline_mode<synchronous>, transform_indices = @transform_5, window_bounds = array<i64: 32, 96>}, {transform_indices = @transform_6, window_bounds = array<i64: 32, 32>}, {transform_indices = @transform_7, window_bounds = array<i64: 32, 32>}, {pipeline_mode = #tpu.pipeline_mode<synchronous>, transform_indices = @transform_8, window_bounds = array<i64: 32, 32>}, {pipeline_mode = #tpu.pipeline_mode<synchronous>, transform_indices = @transform_9, window_bounds = array<i64: 1, 32>}, {transform_indices = @transform_10, window_bounds = array<i64: 32, 32>}]} {
    %c0 = arith.constant 0 : index
    %c0_0 = arith.constant 0 : index
    %0 = vector.load %arg4[%c0, %c0_0] : memref<1x32xf32, #tpu.memory_space<vmem>>, vector<1x32xf32>
    %c0_1 = arith.constant 0 : index
    %c0_2 = arith.constant 0 : index
    %1 = vector.load %arg5[%c0_1, %c0_2] : memref<1x32xf32, #tpu.memory_space<vmem>>, vector<1x32xf32>
    %c0_i32 = arith.constant 0 : i32
    %2 = arith.cmpi eq, %arg2, %c0_i32 : i32
    %3 = arith.extui %2 : i1 to i32
    %c0_i32_3 = arith.constant 0 : i32
    %4 = arith.cmpi ne, %3, %c0_i32_3 : i32
    scf.if %4 {
      %c0_39 = arith.constant 0 : index
      %c0_40 = arith.constant 0 : index
      %96 = vector.load %arg3[%c0_39, %c0_40] : memref<32x32xf32, #tpu.memory_space<vmem>>, vector<32x32xf32>
      %cst_41 = arith.constant dense<0.000000e+00> : vector<32xf32>
      %97 = vector.multi_reduction <add>, %96, %cst_41 [1] : vector<32x32xf32> to vector<32xf32>
      %98 = vector.shape_cast %97 : vector<32xf32> to vector<32x1xf32>
      %cst_42 = arith.constant 3.200000e+01 : f32
      %99 = vector.broadcast %cst_42 : f32 to vector<32x1xf32>
      %100 = arith.divf %98, %99 : vector<32x1xf32>
      %101 = vector.broadcast %100 : vector<32x1xf32> to vector<32x32xf32>
      %102 = arith.subf %96, %101 : vector<32x32xf32>
      %103 = arith.mulf %102, %102 : vector<32x32xf32>
      %cst_43 = arith.constant dense<0.000000e+00> : vector<32xf32>
      %104 = vector.multi_reduction <add>, %103, %cst_43 [1] : vector<32x32xf32> to vector<32xf32>
      %105 = vector.shape_cast %104 : vector<32xf32> to vector<32x1xf32>
      %cst_44 = arith.constant 3.200000e+01 : f32
      %106 = vector.broadcast %cst_44 : f32 to vector<32x1xf32>
      %107 = arith.divf %105, %106 : vector<32x1xf32>
      %cst_45 = arith.constant 9.99999974E-6 : f32
      %108 = vector.broadcast %cst_45 : f32 to vector<32x1xf32>
      %109 = arith.addf %107, %108 : vector<32x1xf32>
      %110 = math.rsqrt %109 : vector<32x1xf32>
      %111 = vector.broadcast %110 : vector<32x1xf32> to vector<32x32xf32>
      %112 = arith.mulf %102, %111 : vector<32x32xf32>
      %113 = vector.broadcast %0 : vector<1x32xf32> to vector<32x32xf32>
      %114 = arith.mulf %112, %113 : vector<32x32xf32>
      %115 = vector.broadcast %1 : vector<1x32xf32> to vector<32x32xf32>
      %116 = arith.addf %114, %115 : vector<32x32xf32>
      %c0_46 = arith.constant 0 : index
      %c0_47 = arith.constant 0 : index
      %117 = vector.load %arg7[%c0_46, %c0_47] : memref<32x64xf32, #tpu.memory_space<vmem>>, vector<32x64xf32>
      %cst_48 = arith.constant dense<0.000000e+00> : vector<32x64xf32>
      %118 = tpu.matmul %116, %117, %cst_48 {dimension_numbers = #tpu.dot_dimension_numbers<[1], [0], [0], [1], [0, 0, 1, 1], [], []>} : vector<32x32xf32>, vector<32x64xf32>, vector<32x64xf32> -> vector<32x64xf32>
      %c0_49 = arith.constant 0 : index
      %c0_50 = arith.constant 0 : index
      %119 = vector.load %arg9[%c0_49, %c0_50] : memref<32x32xf32, #tpu.memory_space<vmem>>, vector<32x32xf32>
      %120 = vector.extract_strided_slice %118 {offsets = [0, 0], sizes = [32, 32], strides = [1, 1]} : vector<32x64xf32> to vector<32x32xf32>
      %121 = math.cos %119 : vector<32x32xf32>
      %122 = arith.mulf %120, %121 : vector<32x32xf32>
      %123 = vector.extract_strided_slice %118 {offsets = [0, 32], sizes = [32, 32], strides = [1, 1]} : vector<32x64xf32> to vector<32x32xf32>
      %124 = math.sin %119 : vector<32x32xf32>
      %125 = arith.mulf %123, %124 : vector<32x32xf32>
      %126 = arith.addf %122, %125 : vector<32x32xf32>
      %cst_51 = arith.constant 2.500000e-01 : f32
      %127 = vector.broadcast %cst_51 : f32 to vector<32x32xf32>
      %128 = arith.mulf %126, %127 : vector<32x32xf32>
      %c0_52 = arith.constant 0 : index
      %c0_53 = arith.constant 0 : index
      %129 = vector.load %arg14[%c0_52, %c0_53] : memref<32x32xf32, #tpu.memory_space<vmem>>, vector<32x32xf32>
      tpu.vector_store %arg14[%c0_52, %c0_53], %128 {strides = array<i32>} : memref<32x32xf32, #tpu.memory_space<vmem>>, vector<32x32xf32>,
      %cst_54 = arith.constant 0xFF800000 : f32
      %130 = vector.broadcast %cst_54 : f32 to vector<32x2xf32>
      %c0_55 = arith.constant 0 : index
      %c0_56 = arith.constant 0 : index
      %131 = vector.load %arg15[%c0_55, %c0_56] : memref<32x2xf32, #tpu.memory_space<vmem>>, vector<32x2xf32>
      tpu.vector_store %arg15[%c0_55, %c0_56], %130 {strides = array<i32>} : memref<32x2xf32, #tpu.memory_space<vmem>>, vector<32x2xf32>,
      %cst_57 = arith.constant 0.000000e+00 : f32
      %132 = vector.broadcast %cst_57 : f32 to vector<32x2xf32>
      %c0_58 = arith.constant 0 : index
      %c0_59 = arith.constant 0 : index
      %133 = vector.load %arg16[%c0_58, %c0_59] : memref<32x2xf32, #tpu.memory_space<vmem>>, vector<32x2xf32>
      tpu.vector_store %arg16[%c0_58, %c0_59], %132 {strides = array<i32>} : memref<32x2xf32, #tpu.memory_space<vmem>>, vector<32x2xf32>,
      %cst_60 = arith.constant 0.000000e+00 : f32
      %134 = vector.broadcast %cst_60 : f32 to vector<32x32xf32>
      %c0_61 = arith.constant 0 : index
      %c0_62 = arith.constant 0 : index
      %135 = vector.load %arg17[%c0_61, %c0_62] : memref<32x32xf32, #tpu.memory_space<vmem>>, vector<32x32xf32>
      tpu.vector_store %arg17[%c0_61, %c0_62], %134 {strides = array<i32>} : memref<32x32xf32, #tpu.memory_space<vmem>>, vector<32x32xf32>,
    } else {
    }
    %c0_4 = arith.constant 0 : index
    %c0_5 = arith.constant 0 : index
    %5 = vector.load %arg6[%c0_4, %c0_5] : memref<32x32xf32, #tpu.memory_space<vmem>>, vector<32x32xf32>
    %cst = arith.constant dense<0.000000e+00> : vector<32xf32>
    %6 = vector.multi_reduction <add>, %5, %cst [1] : vector<32x32xf32> to vector<32xf32>
    %7 = vector.shape_cast %6 : vector<32xf32> to vector<32x1xf32>
    %cst_6 = arith.constant 3.200000e+01 : f32
    %8 = vector.broadcast %cst_6 : f32 to vector<32x1xf32>
    %9 = arith.divf %7, %8 : vector<32x1xf32>
    %10 = vector.broadcast %9 : vector<32x1xf32> to vector<32x32xf32>
    %11 = arith.subf %5, %10 : vector<32x32xf32>
    %12 = arith.mulf %11, %11 : vector<32x32xf32>
    %cst_7 = arith.constant dense<0.000000e+00> : vector<32xf32>
    %13 = vector.multi_reduction <add>, %12, %cst_7 [1] : vector<32x32xf32> to vector<32xf32>
    %14 = vector.shape_cast %13 : vector<32xf32> to vector<32x1xf32>
    %cst_8 = arith.constant 3.200000e+01 : f32
    %15 = vector.broadcast %cst_8 : f32 to vector<32x1xf32>
    %16 = arith.divf %14, %15 : vector<32x1xf32>
    %cst_9 = arith.constant 9.99999974E-6 : f32
    %17 = vector.broadcast %cst_9 : f32 to vector<32x1xf32>
    %18 = arith.addf %16, %17 : vector<32x1xf32>
    %19 = math.rsqrt %18 : vector<32x1xf32>
    %20 = vector.broadcast %19 : vector<32x1xf32> to vector<32x32xf32>
    %21 = arith.mulf %11, %20 : vector<32x32xf32>
    %22 = vector.broadcast %0 : vector<1x32xf32> to vector<32x32xf32>
    %23 = arith.mulf %21, %22 : vector<32x32xf32>
    %24 = vector.broadcast %1 : vector<1x32xf32> to vector<32x32xf32>
    %25 = arith.addf %23, %24 : vector<32x32xf32>
    %c0_10 = arith.constant 0 : index
    %c0_11 = arith.constant 0 : index
    %26 = vector.load %arg8[%c0_10, %c0_11] : memref<32x96xf32, #tpu.memory_space<vmem>>, vector<32x96xf32>
    %cst_12 = arith.constant dense<0.000000e+00> : vector<32x96xf32>
    %27 = tpu.matmul %25, %26, %cst_12 {dimension_numbers = #tpu.dot_dimension_numbers<[1], [0], [0], [1], [0, 0, 1, 1], [], []>} : vector<32x32xf32>, vector<32x96xf32>, vector<32x96xf32> -> vector<32x96xf32>
    %c0_13 = arith.constant 0 : index
    %c0_14 = arith.constant 0 : index
    %28 = vector.load %arg10[%c0_13, %c0_14] : memref<32x32xf32, #tpu.memory_space<vmem>>, vector<32x32xf32>
    %29 = vector.extract_strided_slice %27 {offsets = [0, 0], sizes = [32, 32], strides = [1, 1]} : vector<32x96xf32> to vector<32x32xf32>
    %30 = math.cos %28 : vector<32x32xf32>
    %31 = arith.mulf %29, %30 : vector<32x32xf32>
    %32 = vector.extract_strided_slice %27 {offsets = [0, 32], sizes = [32, 32], strides = [1, 1]} : vector<32x96xf32> to vector<32x32xf32>
    %33 = math.sin %28 : vector<32x32xf32>
    %34 = arith.mulf %32, %33 : vector<32x32xf32>
    %35 = arith.addf %31, %34 : vector<32x32xf32>
    %36 = vector.extract_strided_slice %27 {offsets = [0, 64], sizes = [32, 32], strides = [1, 1]} : vector<32x96xf32> to vector<32x32xf32>
    %c0_15 = arith.constant 0 : index
    %c0_16 = arith.constant 0 : index
    %37 = vector.load %arg14[%c0_15, %c0_16] : memref<32x32xf32, #tpu.memory_space<vmem>>, vector<32x32xf32>
    %c0_17 = arith.constant 0 : index
    %c0_18 = arith.constant 0 : index
    %38 = vector.load %arg15[%c0_17, %c0_18] : memref<32x2xf32, #tpu.memory_space<vmem>>, vector<32x2xf32>
    %c0_19 = arith.constant 0 : index
    %c0_20 = arith.constant 0 : index
    %39 = vector.load %arg16[%c0_19, %c0_20] : memref<32x2xf32, #tpu.memory_space<vmem>>, vector<32x2xf32>
    %c0_21 = arith.constant 0 : index
    %c0_22 = arith.constant 0 : index
    %40 = vector.load %arg17[%c0_21, %c0_22] : memref<32x32xf32, #tpu.memory_space<vmem>>, vector<32x32xf32>
    %41 = vector.extract_strided_slice %37 {offsets = [0, 0], sizes = [32, 16], strides = [1, 1]} : vector<32x32xf32> to vector<32x16xf32>
    %42 = vector.extract_strided_slice %35 {offsets = [0, 0], sizes = [32, 16], strides = [1, 1]} : vector<32x32xf32> to vector<32x16xf32>
    %cst_23 = arith.constant dense<0.000000e+00> : vector<32x32xf32>
    %43 = tpu.matmul %41, %42, %cst_23 {dimension_numbers = #tpu.dot_dimension_numbers<[1], [1], [0], [0], [0, 0, 1, 0], [], []>} : vector<32x16xf32>, vector<32x16xf32>, vector<32x32xf32> -> vector<32x32xf32>
    %44 = vector.extract_strided_slice %38 {offsets = [0, 0], sizes = [32, 1], strides = [1, 1]} : vector<32x2xf32> to vector<32x1xf32>
    %cst_24 = arith.constant dense<0xFF800000> : vector<32xf32>
    %45 = vector.multi_reduction <maximumf>, %43, %cst_24 [1] : vector<32x32xf32> to vector<32xf32>
    %46 = vector.shape_cast %45 : vector<32xf32> to vector<32x1xf32>
    %47 = arith.maximumf %44, %46 : vector<32x1xf32>
    %48 = arith.subf %44, %47 : vector<32x1xf32>
    %49 = math.exp %48 : vector<32x1xf32>
    %50 = vector.broadcast %47 : vector<32x1xf32> to vector<32x32xf32>
    %51 = arith.subf %43, %50 : vector<32x32xf32>
    %52 = math.exp %51 : vector<32x32xf32>
    %53 = vector.extract_strided_slice %39 {offsets = [0, 0], sizes = [32, 1], strides = [1, 1]} : vector<32x2xf32> to vector<32x1xf32>
    %54 = arith.mulf %49, %53 : vector<32x1xf32>
    %cst_25 = arith.constant dense<0.000000e+00> : vector<32xf32>
    %55 = vector.multi_reduction <add>, %52, %cst_25 [1] : vector<32x32xf32> to vector<32xf32>
    %56 = vector.shape_cast %55 : vector<32xf32> to vector<32x1xf32>
    %57 = arith.addf %54, %56 : vector<32x1xf32>
    %58 = vector.extract_strided_slice %40 {offsets = [0, 0], sizes = [32, 16], strides = [1, 1]} : vector<32x32xf32> to vector<32x16xf32>
    %59 = vector.broadcast %49 : vector<32x1xf32> to vector<32x16xf32>
    %60 = arith.mulf %59, %58 : vector<32x16xf32>
    %61 = vector.extract_strided_slice %36 {offsets = [0, 0], sizes = [32, 16], strides = [1, 1]} : vector<32x32xf32> to vector<32x16xf32>
    %cst_26 = arith.constant dense<0.000000e+00> : vector<32x16xf32>
    %62 = tpu.matmul %52, %61, %cst_26 {dimension_numbers = #tpu.dot_dimension_numbers<[1], [0], [0], [1], [0, 0, 1, 1], [], []>} : vector<32x32xf32>, vector<32x16xf32>, vector<32x16xf32> -> vector<32x16xf32>
    %63 = arith.addf %60, %62 : vector<32x16xf32>
    %64 = vector.extract_strided_slice %37 {offsets = [0, 16], sizes = [32, 16], strides = [1, 1]} : vector<32x32xf32> to vector<32x16xf32>
    %65 = vector.extract_strided_slice %35 {offsets = [0, 16], sizes = [32, 16], strides = [1, 1]} : vector<32x32xf32> to vector<32x16xf32>
    %cst_27 = arith.constant dense<0.000000e+00> : vector<32x32xf32>
    %66 = tpu.matmul %64, %65, %cst_27 {dimension_numbers = #tpu.dot_dimension_numbers<[1], [1], [0], [0], [0, 0, 1, 0], [], []>} : vector<32x16xf32>, vector<32x16xf32>, vector<32x32xf32> -> vector<32x32xf32>
    %67 = vector.extract_strided_slice %38 {offsets = [0, 1], sizes = [32, 1], strides = [1, 1]} : vector<32x2xf32> to vector<32x1xf32>
    %cst_28 = arith.constant dense<0xFF800000> : vector<32xf32>
    %68 = vector.multi_reduction <maximumf>, %66, %cst_28 [1] : vector<32x32xf32> to vector<32xf32>
    %69 = vector.shape_cast %68 : vector<32xf32> to vector<32x1xf32>
    %70 = arith.maximumf %67, %69 : vector<32x1xf32>
    %71 = arith.subf %67, %70 : vector<32x1xf32>
    %72 = math.exp %71 : vector<32x1xf32>
    %73 = vector.broadcast %70 : vector<32x1xf32> to vector<32x32xf32>
    %74 = arith.subf %66, %73 : vector<32x32xf32>
    %75 = math.exp %74 : vector<32x32xf32>
    %76 = vector.extract_strided_slice %39 {offsets = [0, 1], sizes = [32, 1], strides = [1, 1]} : vector<32x2xf32> to vector<32x1xf32>
    %77 = arith.mulf %72, %76 : vector<32x1xf32>
    %cst_29 = arith.constant dense<0.000000e+00> : vector<32xf32>
    %78 = vector.multi_reduction <add>, %75, %cst_29 [1] : vector<32x32xf32> to vector<32xf32>
    %79 = vector.shape_cast %78 : vector<32xf32> to vector<32x1xf32>
    %80 = arith.addf %77, %79 : vector<32x1xf32>
    %81 = vector.extract_strided_slice %40 {offsets = [0, 16], sizes = [32, 16], strides = [1, 1]} : vector<32x32xf32> to vector<32x16xf32>
    %82 = vector.broadcast %72 : vector<32x1xf32> to vector<32x16xf32>
    %83 = arith.mulf %82, %81 : vector<32x16xf32>
    %84 = vector.extract_strided_slice %36 {offsets = [0, 16], sizes = [32, 16], strides = [1, 1]} : vector<32x32xf32> to vector<32x16xf32>
    %cst_30 = arith.constant dense<0.000000e+00> : vector<32x16xf32>
    %85 = tpu.matmul %75, %84, %cst_30 {dimension_numbers = #tpu.dot_dimension_numbers<[1], [0], [0], [1], [0, 0, 1, 1], [], []>} : vector<32x32xf32>, vector<32x16xf32>, vector<32x16xf32> -> vector<32x16xf32>
    %86 = arith.addf %83, %85 : vector<32x16xf32>
    %87 = tpu.concatenate %63, %86 in 1 : vector<32x16xf32>, vector<32x16xf32> -> vector<32x32xf32>
    %88 = tpu.concatenate %57, %80 in 1 : vector<32x1xf32>, vector<32x1xf32> -> vector<32x2xf32>
    %89 = tpu.concatenate %47, %70 in 1 : vector<32x1xf32>, vector<32x1xf32> -> vector<32x2xf32>
    %c0_31 = arith.constant 0 : index
    %c0_32 = arith.constant 0 : index
    %90 = vector.load %arg15[%c0_31, %c0_32] : memref<32x2xf32, #tpu.memory_space<vmem>>, vector<32x2xf32>
    tpu.vector_store %arg15[%c0_31, %c0_32], %89 {strides = array<i32>} : memref<32x2xf32, #tpu.memory_space<vmem>>, vector<32x2xf32>,
    %c0_33 = arith.constant 0 : index
    %c0_34 = arith.constant 0 : index
    %91 = vector.load %arg16[%c0_33, %c0_34] : memref<32x2xf32, #tpu.memory_space<vmem>>, vector<32x2xf32>
    tpu.vector_store %arg16[%c0_33, %c0_34], %88 {strides = array<i32>} : memref<32x2xf32, #tpu.memory_space<vmem>>, vector<32x2xf32>,
    %c0_35 = arith.constant 0 : index
    %c0_36 = arith.constant 0 : index
    %92 = vector.load %arg17[%c0_35, %c0_36] : memref<32x32xf32, #tpu.memory_space<vmem>>, vector<32x32xf32>
    tpu.vector_store %arg17[%c0_35, %c0_36], %87 {strides = array<i32>} : memref<32x32xf32, #tpu.memory_space<vmem>>, vector<32x32xf32>,
    %c0_i32_37 = arith.constant 0 : i32
    %93 = arith.cmpi eq, %arg2, %c0_i32_37 : i32
    %94 = arith.extui %93 : i1 to i32
    %c0_i32_38 = arith.constant 0 : i32
    %95 = arith.cmpi ne, %94, %c0_i32_38 : i32
    scf.if %95 {
      %96 = vector.extract_strided_slice %87 {offsets = [0, 0], sizes = [32, 16], strides = [1, 1]} : vector<32x32xf32> to vector<32x16xf32>
      %97 = vector.extract_strided_slice %88 {offsets = [0, 0], sizes = [32, 1], strides = [1, 1]} : vector<32x2xf32> to vector<32x1xf32>
      %98 = tpu.reciprocal %97 {approx = true} : vector<32x1xf32> -> vector<32x1xf32>
      %99 = vector.broadcast %98 : vector<32x1xf32> to vector<32x16xf32>
      %100 = arith.mulf %96, %99 : vector<32x16xf32>
      %101 = vector.extract_strided_slice %87 {offsets = [0, 16], sizes = [32, 16], strides = [1, 1]} : vector<32x32xf32> to vector<32x16xf32>
      %102 = vector.extract_strided_slice %88 {offsets = [0, 1], sizes = [32, 1], strides = [1, 1]} : vector<32x2xf32> to vector<32x1xf32>
      %103 = tpu.reciprocal %102 {approx = true} : vector<32x1xf32> -> vector<32x1xf32>
      %104 = vector.broadcast %103 : vector<32x1xf32> to vector<32x16xf32>
      %105 = arith.mulf %101, %104 : vector<32x16xf32>
      %106 = tpu.concatenate %100, %105 in 1 : vector<32x16xf32>, vector<32x16xf32> -> vector<32x32xf32>
      %c0_39 = arith.constant 0 : index
      %c0_40 = arith.constant 0 : index
      %107 = vector.load %arg11[%c0_39, %c0_40] : memref<32x32xf32, #tpu.memory_space<vmem>>, vector<32x32xf32>
      %cst_41 = arith.constant dense<0.000000e+00> : vector<32x32xf32>
      %108 = tpu.matmul %106, %107, %cst_41 {dimension_numbers = #tpu.dot_dimension_numbers<[1], [0], [0], [1], [0, 0, 1, 1], [], []>} : vector<32x32xf32>, vector<32x32xf32>, vector<32x32xf32> -> vector<32x32xf32>
      %c0_42 = arith.constant 0 : index
      %c0_43 = arith.constant 0 : index
      %109 = vector.load %arg12[%c0_42, %c0_43] : memref<1x32xf32, #tpu.memory_space<vmem>>, vector<1x32xf32>
      %110 = vector.broadcast %109 : vector<1x32xf32> to vector<32x32xf32>
      %111 = arith.addf %108, %110 : vector<32x32xf32>
      %c0_44 = arith.constant 0 : index
      %c0_45 = arith.constant 0 : index
      %112 = vector.load %arg13[%c0_44, %c0_45] : memref<32x32xf32, #tpu.memory_space<vmem>>, vector<32x32xf32>
      tpu.vector_store %arg13[%c0_44, %c0_45], %111 {strides = array<i32>} : memref<32x32xf32, #tpu.memory_space<vmem>>, vector<32x32xf32>,
    } else {
    }
    return
  }
  func.func @transform_0(%arg0: i32, %arg1: i32, %arg2: i32) -> (i32, i32) {
    %c1_i32 = arith.constant 1 : i32
    %0 = arith.muli %arg0, %c1_i32 : i32
    %1 = arith.addi %0, %arg1 : i32
    %c0_i32 = arith.constant 0 : i32
    %c0_i32_0 = arith.constant 0 : i32
    return %1, %c0_i32 : i32, i32
  }
  func.func @transform_1(%arg0: i32, %arg1: i32, %arg2: i32) -> (i32, i32) {
    %c0_i32 = arith.constant 0 : i32
    %c0_i32_0 = arith.constant 0 : i32
    %c0_i32_1 = arith.constant 0 : i32
    return %c0_i32, %c0_i32_0 : i32, i32
  }
  func.func @transform_2(%arg0: i32, %arg1: i32, %arg2: i32) -> (i32, i32) {
    %c0_i32 = arith.constant 0 : i32
    %c0_i32_0 = arith.constant 0 : i32
    %c0_i32_1 = arith.constant 0 : i32
    return %c0_i32, %c0_i32_0 : i32, i32
  }
  func.func @transform_3(%arg0: i32, %arg1: i32, %arg2: i32) -> (i32, i32) {
    %c1_i32 = arith.constant 1 : i32
    %0 = arith.muli %arg0, %c1_i32 : i32
    %1 = arith.addi %0, %arg2 : i32
    %c0_i32 = arith.constant 0 : i32
    %c0_i32_0 = arith.constant 0 : i32
    return %1, %c0_i32 : i32, i32
  }
  func.func @transform_4(%arg0: i32, %arg1: i32, %arg2: i32) -> (i32, i32) {
    %c0_i32 = arith.constant 0 : i32
    %c0_i32_0 = arith.constant 0 : i32
    %c0_i32_1 = arith.constant 0 : i32
    return %c0_i32, %c0_i32_0 : i32, i32
  }
  func.func @transform_5(%arg0: i32, %arg1: i32, %arg2: i32) -> (i32, i32) {
    %c0_i32 = arith.constant 0 : i32
    %c0_i32_0 = arith.constant 0 : i32
    %c0_i32_1 = arith.constant 0 : i32
    return %c0_i32, %c0_i32_0 : i32, i32
  }
  func.func @transform_6(%arg0: i32, %arg1: i32, %arg2: i32) -> (i32, i32) {
    %c1_i32 = arith.constant 1 : i32
    %0 = arith.muli %arg0, %c1_i32 : i32
    %1 = arith.addi %0, %arg1 : i32
    %c0_i32 = arith.constant 0 : i32
    %c0_i32_0 = arith.constant 0 : i32
    return %1, %c0_i32 : i32, i32
  }
  func.func @transform_7(%arg0: i32, %arg1: i32, %arg2: i32) -> (i32, i32) {
    %c1_i32 = arith.constant 1 : i32
    %0 = arith.muli %arg0, %c1_i32 : i32
    %1 = arith.addi %0, %arg2 : i32
    %c0_i32 = arith.constant 0 : i32
    %c0_i32_0 = arith.constant 0 : i32
    return %1, %c0_i32 : i32, i32
  }
  func.func @transform_8(%arg0: i32, %arg1: i32, %arg2: i32) -> (i32, i32) {
    %c0_i32 = arith.constant 0 : i32
    %c0_i32_0 = arith.constant 0 : i32
    %c0_i32_1 = arith.constant 0 : i32
    return %c0_i32, %c0_i32_0 : i32, i32
  }
  func.func @transform_9(%arg0: i32, %arg1: i32, %arg2: i32) -> (i32, i32) {
    %c0_i32 = arith.constant 0 : i32
    %c0_i32_0 = arith.constant 0 : i32
    %c0_i32_1 = arith.constant 0 : i32
    return %c0_i32, %c0_i32_0 : i32, i32
  }
  func.func @transform_10(%arg0: i32, %arg1: i32, %arg2: i32) -> (i32, i32) {
    %c1_i32 = arith.constant 1 : i32
    %0 = arith.muli %arg0, %c1_i32 : i32
    %1 = arith.addi %0, %arg1 : i32
    %c0_i32 = arith.constant 0 : i32
    %c0_i32_0 = arith.constant 0 : i32
    return %1, %c0_i32 : i32, i32
  }
}

module attributes {stable_mosaic.version = 11 : i64} {
  func.func @_ff_kernel(%arg0: i32, %arg1: memref<48x32xf32, #tpu.memory_space<vmem>>, %arg2: memref<48x32xf32, #tpu.memory_space<vmem>>, %arg3: memref<48x32xf32, #tpu.memory_space<vmem>>, %arg4: memref<48x32xf32, #tpu.memory_space<vmem>>, %arg5: memref<1x32xf32, #tpu.memory_space<vmem>>, %arg6: memref<1x32xf32, #tpu.memory_space<vmem>>, %arg7: memref<32x128xf32, #tpu.memory_space<vmem>>, %arg8: memref<1x128xf32, #tpu.memory_space<vmem>>, %arg9: memref<32x128xf32, #tpu.memory_space<vmem>>, %arg10: memref<1x128xf32, #tpu.memory_space<vmem>>, %arg11: memref<128x32xf32, #tpu.memory_space<vmem>>, %arg12: memref<1x32xf32, #tpu.memory_space<vmem>>, %arg13: memref<48x32xf32, #tpu.memory_space<vmem>>) attributes {dimension_semantics = [#tpu.dimension_semantics<parallel>], iteration_bounds = array<i64: 2>, scalar_prefetch = 0 : i64, scratch_operands = 0 : i64, tpu.core_type = #tpu.core_type<tc>, window_params = [{transform_indices = @transform_0, window_bounds = array<i64: 48, 32>}, {transform_indices = @transform_1, window_bounds = array<i64: 48, 32>}, {transform_indices = @transform_2, window_bounds = array<i64: 48, 32>}, {transform_indices = @transform_3, window_bounds = array<i64: 48, 32>}, {pipeline_mode = #tpu.pipeline_mode<synchronous>, transform_indices = @transform_4, window_bounds = array<i64: 1, 32>}, {pipeline_mode = #tpu.pipeline_mode<synchronous>, transform_indices = @transform_5, window_bounds = array<i64: 1, 32>}, {pipeline_mode = #tpu.pipeline_mode<synchronous>, transform_indices = @transform_6, window_bounds = array<i64: 32, 128>}, {pipeline_mode = #tpu.pipeline_mode<synchronous>, transform_indices = @transform_7, window_bounds = array<i64: 1, 128>}, {pipeline_mode = #tpu.pipeline_mode<synchronous>, transform_indices = @transform_8, window_bounds = array<i64: 32, 128>}, {pipeline_mode = #tpu.pipeline_mode<synchronous>, transform_indices = @transform_9, window_bounds = array<i64: 1, 128>}, {pipeline_mode = #tpu.pipeline_mode<synchronous>, transform_indices = @transform_10, window_bounds = array<i64: 128, 32>}, {pipeline_mode = #tpu.pipeline_mode<synchronous>, transform_indices = @transform_11, window_bounds = array<i64: 1, 32>}, {transform_indices = @transform_12, window_bounds = array<i64: 48, 32>}]} {
    %c0 = arith.constant 0 : index
    %c0_0 = arith.constant 0 : index
    %0 = vector.load %arg1[%c0, %c0_0] : memref<48x32xf32, #tpu.memory_space<vmem>>, vector<48x32xf32>
    %c0_1 = arith.constant 0 : index
    %c0_2 = arith.constant 0 : index
    %1 = vector.load %arg2[%c0_1, %c0_2] : memref<48x32xf32, #tpu.memory_space<vmem>>, vector<48x32xf32>
    %2 = arith.addf %0, %1 : vector<48x32xf32>
    %c0_3 = arith.constant 0 : index
    %c0_4 = arith.constant 0 : index
    %3 = vector.load %arg3[%c0_3, %c0_4] : memref<48x32xf32, #tpu.memory_space<vmem>>, vector<48x32xf32>
    %4 = arith.addf %2, %3 : vector<48x32xf32>
    %c0_5 = arith.constant 0 : index
    %c0_6 = arith.constant 0 : index
    %5 = vector.load %arg4[%c0_5, %c0_6] : memref<48x32xf32, #tpu.memory_space<vmem>>, vector<48x32xf32>
    %6 = arith.addf %4, %5 : vector<48x32xf32>
    %cst = arith.constant dense<0.000000e+00> : vector<48xf32>
    %7 = vector.multi_reduction <add>, %6, %cst [1] : vector<48x32xf32> to vector<48xf32>
    %8 = vector.shape_cast %7 : vector<48xf32> to vector<48x1xf32>
    %cst_7 = arith.constant 3.200000e+01 : f32
    %9 = vector.broadcast %cst_7 : f32 to vector<48x1xf32>
    %10 = arith.divf %8, %9 : vector<48x1xf32>
    %11 = vector.broadcast %10 : vector<48x1xf32> to vector<48x32xf32>
    %12 = arith.subf %6, %11 : vector<48x32xf32>
    %13 = arith.mulf %12, %12 : vector<48x32xf32>
    %cst_8 = arith.constant dense<0.000000e+00> : vector<48xf32>
    %14 = vector.multi_reduction <add>, %13, %cst_8 [1] : vector<48x32xf32> to vector<48xf32>
    %15 = vector.shape_cast %14 : vector<48xf32> to vector<48x1xf32>
    %cst_9 = arith.constant 3.200000e+01 : f32
    %16 = vector.broadcast %cst_9 : f32 to vector<48x1xf32>
    %17 = arith.divf %15, %16 : vector<48x1xf32>
    %cst_10 = arith.constant 9.99999974E-6 : f32
    %18 = vector.broadcast %cst_10 : f32 to vector<48x1xf32>
    %19 = arith.addf %17, %18 : vector<48x1xf32>
    %20 = math.rsqrt %19 : vector<48x1xf32>
    %21 = vector.broadcast %20 : vector<48x1xf32> to vector<48x32xf32>
    %22 = arith.mulf %12, %21 : vector<48x32xf32>
    %c0_11 = arith.constant 0 : index
    %c0_12 = arith.constant 0 : index
    %23 = vector.load %arg5[%c0_11, %c0_12] : memref<1x32xf32, #tpu.memory_space<vmem>>, vector<1x32xf32>
    %24 = vector.broadcast %23 : vector<1x32xf32> to vector<48x32xf32>
    %25 = arith.mulf %22, %24 : vector<48x32xf32>
    %c0_13 = arith.constant 0 : index
    %c0_14 = arith.constant 0 : index
    %26 = vector.load %arg6[%c0_13, %c0_14] : memref<1x32xf32, #tpu.memory_space<vmem>>, vector<1x32xf32>
    %27 = vector.broadcast %26 : vector<1x32xf32> to vector<48x32xf32>
    %28 = arith.addf %25, %27 : vector<48x32xf32>
    %c0_15 = arith.constant 0 : index
    %c0_16 = arith.constant 0 : index
    %29 = vector.load %arg7[%c0_15, %c0_16] : memref<32x128xf32, #tpu.memory_space<vmem>>, vector<32x128xf32>
    %cst_17 = arith.constant dense<0.000000e+00> : vector<48x128xf32>
    %30 = tpu.matmul %28, %29, %cst_17 {dimension_numbers = #tpu.dot_dimension_numbers<[1], [0], [0], [1], [0, 0, 1, 1], [], []>} : vector<48x32xf32>, vector<32x128xf32>, vector<48x128xf32> -> vector<48x128xf32>
    %c0_18 = arith.constant 0 : index
    %c0_19 = arith.constant 0 : index
    %31 = vector.load %arg8[%c0_18, %c0_19] : memref<1x128xf32, #tpu.memory_space<vmem>>, vector<1x128xf32>
    %32 = vector.broadcast %31 : vector<1x128xf32> to vector<48x128xf32>
    %33 = arith.addf %30, %32 : vector<48x128xf32>
    %c0_20 = arith.constant 0 : index
    %c0_21 = arith.constant 0 : index
    %34 = vector.load %arg9[%c0_20, %c0_21] : memref<32x128xf32, #tpu.memory_space<vmem>>, vector<32x128xf32>
    %cst_22 = arith.constant dense<0.000000e+00> : vector<48x128xf32>
    %35 = tpu.matmul %28, %34, %cst_22 {dimension_numbers = #tpu.dot_dimension_numbers<[1], [0], [0], [1], [0, 0, 1, 1], [], []>} : vector<48x32xf32>, vector<32x128xf32>, vector<48x128xf32> -> vector<48x128xf32>
    %c0_23 = arith.constant 0 : index
    %c0_24 = arith.constant 0 : index
    %36 = vector.load %arg10[%c0_23, %c0_24] : memref<1x128xf32, #tpu.memory_space<vmem>>, vector<1x128xf32>
    %37 = vector.broadcast %36 : vector<1x128xf32> to vector<48x128xf32>
    %38 = arith.addf %35, %37 : vector<48x128xf32>
    %cst_25 = arith.constant 0.707106769 : f32
    %39 = vector.broadcast %cst_25 : f32 to vector<48x128xf32>
    %40 = arith.mulf %38, %39 : vector<48x128xf32>
    %41 = math.absf %40 : vector<48x128xf32>
    %cst_26 = arith.constant 0.327591091 : f32
    %42 = vector.broadcast %cst_26 : f32 to vector<48x128xf32>
    %43 = arith.mulf %42, %41 : vector<48x128xf32>
    %cst_27 = arith.constant 1.000000e+00 : f32
    %44 = vector.broadcast %cst_27 : f32 to vector<48x128xf32>
    %45 = arith.addf %44, %43 : vector<48x128xf32>
    %cst_28 = arith.constant 1.000000e+00 : f32
    %46 = vector.broadcast %cst_28 : f32 to vector<48x128xf32>
    %47 = arith.divf %46, %45 : vector<48x128xf32>
    %cst_29 = arith.constant 1.06140542 : f32
    %48 = vector.broadcast %cst_29 : f32 to vector<48x128xf32>
    %49 = arith.mulf %47, %48 : vector<48x128xf32>
    %cst_30 = arith.constant -1.45315206 : f32
    %50 = vector.broadcast %cst_30 : f32 to vector<48x128xf32>
    %51 = arith.addf %50, %49 : vector<48x128xf32>
    %52 = arith.mulf %47, %51 : vector<48x128xf32>
    %cst_31 = arith.constant 1.42141378 : f32
    %53 = vector.broadcast %cst_31 : f32 to vector<48x128xf32>
    %54 = arith.addf %53, %52 : vector<48x128xf32>
    %55 = arith.mulf %47, %54 : vector<48x128xf32>
    %cst_32 = arith.constant -0.284496725 : f32
    %56 = vector.broadcast %cst_32 : f32 to vector<48x128xf32>
    %57 = arith.addf %56, %55 : vector<48x128xf32>
    %58 = arith.mulf %47, %57 : vector<48x128xf32>
    %cst_33 = arith.constant 0.254829586 : f32
    %59 = vector.broadcast %cst_33 : f32 to vector<48x128xf32>
    %60 = arith.addf %59, %58 : vector<48x128xf32>
    %61 = arith.mulf %47, %60 : vector<48x128xf32>
    %cst_34 = arith.constant 0.000000e+00 : f32
    %62 = vector.broadcast %cst_34 : f32 to vector<48x128xf32>
    %63 = arith.subf %62, %41 : vector<48x128xf32>
    %64 = arith.mulf %63, %41 : vector<48x128xf32>
    %65 = math.exp %64 : vector<48x128xf32>
    %66 = arith.mulf %61, %65 : vector<48x128xf32>
    %cst_35 = arith.constant 1.000000e+00 : f32
    %67 = vector.broadcast %cst_35 : f32 to vector<48x128xf32>
    %68 = arith.subf %67, %66 : vector<48x128xf32>
    %cst_36 = arith.constant 0.000000e+00 : f32
    %69 = vector.broadcast %cst_36 : f32 to vector<48x128xf32>
    %70 = arith.cmpf oge, %40, %69 : vector<48x128xf32>
    %cst_37 = arith.constant 0.000000e+00 : f32
    %71 = vector.broadcast %cst_37 : f32 to vector<48x128xf32>
    %72 = arith.subf %71, %68 : vector<48x128xf32>
    %73 = arith.select %70, %68, %72 : vector<48x128xi1>, vector<48x128xf32>
    %cst_38 = arith.constant 5.000000e-01 : f32
    %74 = vector.broadcast %cst_38 : f32 to vector<48x128xf32>
    %75 = arith.mulf %74, %38 : vector<48x128xf32>
    %cst_39 = arith.constant 1.000000e+00 : f32
    %76 = vector.broadcast %cst_39 : f32 to vector<48x128xf32>
    %77 = arith.addf %76, %73 : vector<48x128xf32>
    %78 = arith.mulf %75, %77 : vector<48x128xf32>
    %79 = arith.mulf %33, %78 : vector<48x128xf32>
    %c0_40 = arith.constant 0 : index
    %c0_41 = arith.constant 0 : index
    %80 = vector.load %arg11[%c0_40, %c0_41] : memref<128x32xf32, #tpu.memory_space<vmem>>, vector<128x32xf32>
    %cst_42 = arith.constant dense<0.000000e+00> : vector<48x32xf32>
    %81 = tpu.matmul %79, %80, %cst_42 {dimension_numbers = #tpu.dot_dimension_numbers<[1], [0], [0], [1], [0, 0, 1, 1], [], []>} : vector<48x128xf32>, vector<128x32xf32>, vector<48x32xf32> -> vector<48x32xf32>
    %c0_43 = arith.constant 0 : index
    %c0_44 = arith.constant 0 : index
    %82 = vector.load %arg12[%c0_43, %c0_44] : memref<1x32xf32, #tpu.memory_space<vmem>>, vector<1x32xf32>
    %83 = vector.broadcast %82 : vector<1x32xf32> to vector<48x32xf32>
    %84 = arith.addf %81, %83 : vector<48x32xf32>
    %85 = arith.addf %84, %6 : vector<48x32xf32>
    %c0_45 = arith.constant 0 : index
    %c0_46 = arith.constant 0 : index
    %86 = vector.load %arg13[%c0_45, %c0_46] : memref<48x32xf32, #tpu.memory_space<vmem>>, vector<48x32xf32>
    tpu.vector_store %arg13[%c0_45, %c0_46], %85 {strides = array<i32>} : memref<48x32xf32, #tpu.memory_space<vmem>>, vector<48x32xf32>,
    return
  }
  func.func @transform_0(%arg0: i32) -> (i32, i32) {
    %c0_i32 = arith.constant 0 : i32
    %c0_i32_0 = arith.constant 0 : i32
    return %arg0, %c0_i32 : i32, i32
  }
  func.func @transform_1(%arg0: i32) -> (i32, i32) {
    %c0_i32 = arith.constant 0 : i32
    %c0_i32_0 = arith.constant 0 : i32
    return %arg0, %c0_i32 : i32, i32
  }
  func.func @transform_2(%arg0: i32) -> (i32, i32) {
    %c0_i32 = arith.constant 0 : i32
    %c0_i32_0 = arith.constant 0 : i32
    return %arg0, %c0_i32 : i32, i32
  }
  func.func @transform_3(%arg0: i32) -> (i32, i32) {
    %c0_i32 = arith.constant 0 : i32
    %c0_i32_0 = arith.constant 0 : i32
    return %arg0, %c0_i32 : i32, i32
  }
  func.func @transform_4(%arg0: i32) -> (i32, i32) {
    %c0_i32 = arith.constant 0 : i32
    %c0_i32_0 = arith.constant 0 : i32
    %c0_i32_1 = arith.constant 0 : i32
    return %c0_i32, %c0_i32_0 : i32, i32
  }
  func.func @transform_5(%arg0: i32) -> (i32, i32) {
    %c0_i32 = arith.constant 0 : i32
    %c0_i32_0 = arith.constant 0 : i32
    %c0_i32_1 = arith.constant 0 : i32
    return %c0_i32, %c0_i32_0 : i32, i32
  }
  func.func @transform_6(%arg0: i32) -> (i32, i32) {
    %c0_i32 = arith.constant 0 : i32
    %c0_i32_0 = arith.constant 0 : i32
    %c0_i32_1 = arith.constant 0 : i32
    return %c0_i32, %c0_i32_0 : i32, i32
  }
  func.func @transform_7(%arg0: i32) -> (i32, i32) {
    %c0_i32 = arith.constant 0 : i32
    %c0_i32_0 = arith.constant 0 : i32
    %c0_i32_1 = arith.constant 0 : i32
    return %c0_i32, %c0_i32_0 : i32, i32
  }
  func.func @transform_8(%arg0: i32) -> (i32, i32) {
    %c0_i32 = arith.constant 0 : i32
    %c0_i32_0 = arith.constant 0 : i32
    %c0_i32_1 = arith.constant 0 : i32
    return %c0_i32, %c0_i32_0 : i32, i32
  }
  func.func @transform_9(%arg0: i32) -> (i32, i32) {
    %c0_i32 = arith.constant 0 : i32
    %c0_i32_0 = arith.constant 0 : i32
    %c0_i32_1 = arith.constant 0 : i32
    return %c0_i32, %c0_i32_0 : i32, i32
  }
  func.func @transform_10(%arg0: i32) -> (i32, i32) {
    %c0_i32 = arith.constant 0 : i32
    %c0_i32_0 = arith.constant 0 : i32
    %c0_i32_1 = arith.constant 0 : i32
    return %c0_i32, %c0_i32_0 : i32, i32
  }
  func.func @transform_11(%arg0: i32) -> (i32, i32) {
    %c0_i32 = arith.constant 0 : i32
    %c0_i32_0 = arith.constant 0 : i32
    %c0_i32_1 = arith.constant 0 : i32
    return %c0_i32, %c0_i32_0 : i32, i32
  }
  func.func @transform_12(%arg0: i32) -> (i32, i32) {
    %c0_i32 = arith.constant 0 : i32
    %c0_i32_0 = arith.constant 0 : i32
    return %arg0, %c0_i32 : i32, i32
  }
}

</mosaic_0001>

<bundles_post_ra>
// kernel: basic_dr_transformer_block.6
= control target key start
LH: loop header
LB: loop body
LE: loop exit
PB: predicated region body
PF: predicated region fallthrough
CT: control target
= control target key end

     0   :  { %s2688_s0 = inlined_call_operand.hbm [shape: f32[96,32], index: 0, kind: input, shape index: {}]   ;;  %s2689_s1 = inlined_call_operand.hbm [shape: f32[1,32], index: 1, kind: input, shape index: {}]   ;;  %s2690_s2 = inlined_call_operand.hbm [shape: f32[1,32], index: 2, kind: input, shape index: {}]   ;;  %s2691_s3 = inlined_call_operand.hbm [shape: f32[48,24], index: 3, kind: input, shape index: {}]   ;;  %s2692_s4 = inlined_call_operand.hbm [shape: f32[32,32], index: 4, kind: input, shape index: {}]   ;;  %s2693_s5 = inlined_call_operand.hbm [shape: f32[24,64], index: 5, kind: input, shape index: {}]   ;;  %s2694_s6 = inlined_call_operand.hbm [shape: f32[32,32], index: 6, kind: input, shape index: {}]   ;;  %s2695_s7 = inlined_call_operand.hbm [shape: f32[1,32], index: 7, kind: input, shape index: {}]   ;;  %s2696_s8 = inlined_call_operand.hbm [shape: f32[96,32], index: 8, kind: output, shape index: {}]  }
   0x1   :  { %2704 = sst [smem:[#allocation28_spill]] %s2688_s0 }
   0x2   :  { %2705 = sst [smem:[#allocation29_spill]] %s2689_s1 }
   0x3   :  { %2706 = sst [smem:[#allocation30_spill]] %s2690_s2 }
   0x4   :  { %2707 = sst [smem:[#allocation31_spill]] %s2692_s4 }
   0x5   :  { %2708 = sst [smem:[#allocation32_spill]] %s2693_s5 }
   0x6   :  { %2709 = sst [smem:[#allocation33_spill]] %s2694_s6 }
   0x7   :  { %2710 = sst [smem:[#allocation34_spill]] %s2695_s7 }
   0x8   :  { %2711 = sst [smem:[#allocation35_spill]] %s2696_s8 }
   0x9   :  { %13 = vsyncpa [#allocation7], 0 }
   0xa   :  { %15 = vsyncpa [#allocation7 + $0x1], 0 }
   0xb   :  { %16 = vsyncpa [#allocation10], 0 }
   0xc   :  { %17 = vsyncpa [#allocation13], 0 }
   0xd   :  { %19 = vsyncpa [#allocation13 + $0x1], 0 }
   0xe   :  { %20 = vsyncpa [#allocation16], 0 }
   0xf   :  { %21 = vsyncpa [#allocation19], 0 }
  0x10   :  { %22 = vsyncpa [#allocation8], 0 }
  0x11   :  { %24 = vsyncpa [#allocation8 + $0x1], 0  ;;  %s2209_s27 = smov 0   ;;  %s2211_s28 = smov 0  }
  0x12   :  { %s2213_s29 = smov 0   ;;  %s2215_s30 = smov 0  }
  0x13   :  { %s2217_s9 = smov 0   ;;  %s2219_s10 = smov 0  }
  0x14 LB: > { %s2240_s11 = sadd.s32 4294967295, %s2139_s10   ;;  %p1487_p0 = scmp.ge.s32.totalorder %s2139_s10, 1  ;;  %s2139_s10 = sphi %s2219_s10, %s30_s10   ;;  %s2135_s9 = sphi %s2217_s9, %s2748_s9   ;;  %s2131_s30 = sphi %s2215_s30, %s2747_s30   ;;  %s2127_s29 = sphi %s2213_s29, %s2746_s29   ;;  %s2123_s28 = sphi %s2211_s28, %s2745_s28   ;;  %s2119_s27 = sphi %s2209_s27, %s2744_s27  }
  0x15   : > { %p2697_p1 = scmp.eq.s32.totalorder %s2240_s11, 0  ;;  %p264_p2 = scmp.lt.s32.totalorder %s2139_s10, 7 }
  0x16   : > { %s2141_s13 = smov [#allocation9]   ;;  %s2142_s15 = smov [#allocation14]  }
  0x17   : > { %p2245_p3 = pnand %p1487_p0, %p264_p2  ;;  %s277_s14 = sshll.u32 %s2141_s13, 4  ;;  %s278_s14 = int_to_ptr.vmem [resolvable:$true] %s277_s14 }
  0x18   : > { %s298_s16 = sshll.u32 %s2142_s15, 4  ;;  %s2143_s18 = smov [#allocation15]   ;;  %s2257_s16 = int_to_ptr.vmem [resolvable:$true] %s298_s16 }
  0x19   : > { %s2712_s12 = scalar_select %p2245_p3, 1, 0 }
  0x1a   : > { %p1663_p4 = pneg %p2245_p3  ;;  %s2259_s19 = sshll.u32 %s2143_s18, 4  ;;  %s312_s19 = int_to_ptr.vmem [resolvable:$true] %s2259_s19 }
  0x1b   : > { %s2714_s1 = sld [smem:[#allocation29_spill]] }
  0x1c   : > { %p2253_p5 = pnand %p1663_p4, %p2697_p1 }
  0x1e   : > { %p2269_p7 = pneg %p2253_p5 }
  0x21   : > { %s1809_s22 = scalar_lea.hbm %s2714_s1, 16 }
  0x22   : > { %p1810_p6 = scmp.ne.s32.totalorder %s2714_s1, %s1809_s22  ;;  %p1816_p10 = scmp.lt.u32.totalorder %s1809_s22, %s2714_s1 }
  0x24   : > { %p1812_p8 = pnand %p2269_p7, %p1810_p6 }
  0x26   : > { %p1813_p9 = pneg %p1812_p8 }
  0x28   : > { %p1818_p11 = pnand %p1816_p10, %p1813_p9 }
  0x2a   : > { %1821 = shalt.err (!%p1818_p11)
}
  0x2b   : > { %s1822_s15 = scalar_lea.vmem %s278_s14, 16  ;;  %s1829_s18 = scalar_lea.vmem %s278_s14, 32 }
  0x2c   : > { %p1823_p12 = scmp.ne.s32.totalorder %s278_s14, %s1822_s15  ;;  %p1830_p2 = scmp.lt.s32.totalorder %s278_s14, %s278_s14 }
  0x2d   : > { %p1831_p4 = scmp.lt.s32.totalorder %s1829_s18, %s1822_s15 }
  0x2e   : > { %p1825_p13 = pnand %p1823_p12, %p2269_p7 }
  0x2f   : > { %p1832_p1 = por %p1831_p4, %p1830_p2 }
  0x30   : > { %p1826_p0 = pneg %p1825_p13 }
  0x32   : > { %p1833_p3 = pnand %p1832_p1, %p1826_p0 }
  0x34   : > { %1836 = shalt.err (!%p1833_p3)
}
  0x35   : > { %1666 = dma.hbm_to_vmem [thread:$0]  (!%p2253_p5), %s2714_s1, 16, %s278_s14, [#allocation10]  }
  0x36   : > { %s2716_s4 = sld [smem:[#allocation31_spill]] }
  0x3c   : > { %s1837_s24 = scalar_lea.hbm %s2716_s4, 512 }
  0x3d   : > { %p1838_p6 = scmp.ne.s32.totalorder %s2716_s4, %s1837_s24  ;;  %p1844_p1 = scmp.lt.u32.totalorder %s1837_s24, %s2716_s4 }
  0x3f   : > { %p1840_p8 = pnand %p1838_p6, %p2269_p7 }
  0x41   : > { %p1841_p9 = pneg %p1840_p8 }
  0x43   : > { %p1846_p3 = pnand %p1844_p1, %p1841_p9 }
  0x45   : > { %1849 = shalt.err (!%p1846_p3)
}
  0x46   : > { %s1850_s14 = scalar_lea.vmem %s2257_s16, 512  ;;  %p1858_p13 = scmp.lt.s32.totalorder %s2257_s16, %s2257_s16 }
  0x47   : > { %p1851_p10 = scmp.ne.s32.totalorder %s2257_s16, %s1850_s14  ;;  %p1859_p0 = scmp.lt.s32.totalorder %s1850_s14, %s1850_s14 }
  0x49   : > { %p1853_p11 = pnand %p1851_p10, %p2269_p7  ;;  %p1860_p2 = por %p1859_p0, %p1858_p13 }
  0x4b   : > { %p1854_p12 = pneg %p1853_p11 }
  0x4d   : > { %p1861_p4 = pnand %p1860_p2, %p1854_p12 }
  0x4f   : > { %1864 = shalt.err (!%p1861_p4)
}
  0x50   : > { %s2700_s20 = smov 128   ;;  %s2701_s21 = smov 8  }
  0x51   : > { %1672 = dma.hbm_to_vmem [thread:$0]  (!%p2253_p5), %s2716_s4, 512, %s2257_s16, [#allocation13], %s2700_s20, %s2700_s20, %s2701_s21  }
  0x52   : > { %s2717_s5 = sld [smem:[#allocation32_spill]] }
  0x58   : > { %s1865_s13 = scalar_lea.hbm %s2717_s5, 384 }
  0x59   : > { %p1866_p6 = scmp.ne.s32.totalorder %s2717_s5, %s1865_s13  ;;  %p1872_p1 = scmp.lt.u32.totalorder %s1865_s13, %s2717_s5 }
  0x5b   : > { %p1868_p8 = pnand %p1866_p6, %p2269_p7 }
  0x5d   : > { %p1869_p9 = pneg %p1868_p8 }
  0x5f   : > { %p1874_p3 = pnand %p1872_p1, %p1869_p9 }
  0x61   : > { %1877 = shalt.err (!%p1874_p3)
}
  0x62   : > { %s1878_s22 = scalar_lea.vmem %s312_s19, 384  ;;  %p1886_p13 = scmp.lt.s32.totalorder %s312_s19, %s312_s19 }
  0x63   : > { %p1879_p10 = scmp.ne.s32.totalorder %s312_s19, %s1878_s22  ;;  %p1887_p0 = scmp.lt.s32.totalorder %s1878_s22, %s1878_s22 }
  0x65   : > { %p1881_p11 = pnand %p1879_p10, %p2269_p7  ;;  %p1888_p2 = por %p1887_p0, %p1886_p13 }
  0x67   : > { %p1882_p12 = pneg %p1881_p11 }
  0x69   : > { %p1889_p4 = pnand %p1888_p2, %p1882_p12 }
  0x6b   : > { %1892 = shalt.err (!%p1889_p4)
}
  0x6c   : > { %1675 = dma.hbm_to_vmem [thread:$0]  (!%p2253_p5), %s2717_s5, 384, %s312_s19, [#allocation16], %s2700_s20, %s2700_s20, %s2701_s21  }
  0x6d   : > { %s2146_s23 = smov [#allocation11]   ;;  %s2147_s26 = smov [#allocation17]  }
  0x6e   : > { %s288_s24 = sshll.u32 %s2146_s23, 4  ;;  %s324_s13 = sshll.u32 %s2147_s26, 4  ;;  %s289_s24 = int_to_ptr.vmem [resolvable:$true] %s288_s24  ;;  %s325_s13 = int_to_ptr.vmem [resolvable:$true] %s324_s13 }
  0x6f   : > { %s2718_s2 = sld [smem:[#allocation30_spill]] }
  0x75   : > { %s1893_s14 = scalar_lea.hbm %s2718_s2, 16 }
  0x76   : > { %p1894_p6 = scmp.ne.s32.totalorder %s2718_s2, %s1893_s14  ;;  %p1900_p1 = scmp.lt.u32.totalorder %s1893_s14, %s2718_s2 }
  0x78   : > { %p1896_p8 = pnand %p1894_p6, %p2269_p7 }
  0x7a   : > { %p1897_p9 = pneg %p1896_p8 }
  0x7c   : > { %p1902_p3 = pnand %p1900_p1, %p1897_p9 }
  0x7e   : > { %1905 = shalt.err (!%p1902_p3)
}
  0x7f   : > { %s1906_s19 = scalar_lea.vmem %s289_s24, 16  ;;  %s1913_s16 = scalar_lea.vmem %s289_s24, 32 }
  0x80   : > { %p1907_p10 = scmp.ne.s32.totalorder %s289_s24, %s1906_s19  ;;  %p1914_p13 = scmp.lt.s32.totalorder %s289_s24, %s289_s24 }
  0x81   : > { %p1915_p0 = scmp.lt.s32.totalorder %s1913_s16, %s1906_s19 }
  0x82   : > { %p1909_p11 = pnand %p1907_p10, %p2269_p7 }
  0x83   : > { %p1916_p2 = por %p1915_p0, %p1914_p13 }
  0x84   : > { %p1910_p12 = pneg %p1909_p11 }
  0x86   : > { %p1917_p4 = pnand %p1916_p2, %p1910_p12 }
  0x88   : > { %1920 = shalt.err (!%p1917_p4)
}
  0x89   : > { %1669 = dma.hbm_to_vmem [thread:$0]  (!%p2253_p5), %s2718_s2, 16, %s289_s24, [#allocation10]  }
  0x8a   : > { %s2719_s6 = sld [smem:[#allocation33_spill]] }
  0x90   : > { %s1921_s15 = scalar_lea.hbm %s2719_s6, 512 }
  0x91   : > { %p1922_p6 = scmp.ne.s32.totalorder %s2719_s6, %s1921_s15  ;;  %p1928_p1 = scmp.lt.u32.totalorder %s1921_s15, %s2719_s6 }
  0x93   : > { %p1924_p8 = pnand %p1922_p6, %p2269_p7 }
  0x95   : > { %p1925_p9 = pneg %p1924_p8 }
  0x97   : > { %p1930_p3 = pnand %p1928_p1, %p1925_p9 }
  0x99   : > { %1933 = shalt.err (!%p1930_p3)
}
  0x9a   : > { %s1934_s19 = scalar_lea.vmem %s325_s13, 512  ;;  %p1942_p13 = scmp.lt.s32.totalorder %s325_s13, %s325_s13 }
  0x9b   : > { %p1935_p10 = scmp.ne.s32.totalorder %s325_s13, %s1934_s19  ;;  %p1943_p0 = scmp.lt.s32.totalorder %s1934_s19, %s1934_s19 }
  0x9d   : > { %p1937_p11 = pnand %p1935_p10, %p2269_p7  ;;  %p1944_p2 = por %p1943_p0, %p1942_p13 }
  0x9f   : > { %p1938_p12 = pneg %p1937_p11 }
  0xa1   : > { %p1945_p4 = pnand %p1944_p2, %p1938_p12 }
  0xa3   : > { %1948 = shalt.err (!%p1945_p4)
}
  0xa4   : > { %1678 = dma.hbm_to_vmem [thread:$0]  (!%p2253_p5), %s2719_s6, 512, %s325_s13, [#allocation16], %s2700_s20, %s2700_s20, %s2701_s21  }
  0xa5   : > { %s2148_s4 = smov [#allocation18]   ;;  %s2720_s7 = sld [smem:[#allocation34_spill]] }
  0xa6   : > { %s338_s23 = sshll.u32 %s2148_s4, 4  ;;  %s339_s23 = int_to_ptr.vmem [resolvable:$true] %s338_s23 }
  0xab   : > { %s1949_s15 = scalar_lea.hbm %s2720_s7, 16 }
  0xac   : > { %p1950_p6 = scmp.ne.s32.totalorder %s2720_s7, %s1949_s15  ;;  %p1956_p1 = scmp.lt.u32.totalorder %s1949_s15, %s2720_s7 }
  0xae   : > { %p1952_p8 = pnand %p1950_p6, %p2269_p7 }
  0xb0   : > { %p1953_p9 = pneg %p1952_p8 }
  0xb2   : > { %p1958_p3 = pnand %p1956_p1, %p1953_p9 }
  0xb4   : > { %1961 = shalt.err (!%p1958_p3)
}
  0xb5   : > { %s1962_s13 = scalar_lea.vmem %s339_s23, 16  ;;  %s1969_s19 = scalar_lea.vmem %s339_s23, 32 }
  0xb6   : > { %p1963_p10 = scmp.ne.s32.totalorder %s339_s23, %s1962_s13  ;;  %p1970_p13 = scmp.lt.s32.totalorder %s339_s23, %s339_s23 }
  0xb7   : > { %p1971_p0 = scmp.lt.s32.totalorder %s1969_s19, %s1962_s13 }
  0xb8   : > { %p1965_p11 = pnand %p1963_p10, %p2269_p7 }
  0xb9   : > { %p1972_p2 = por %p1971_p0, %p1970_p13 }
  0xba   : > { %p1966_p12 = pneg %p1965_p11 }
  0xbc   : > { %p1973_p4 = pnand %p1972_p2, %p1966_p12 }
  0xbe   : > { %1976 = shalt.err (!%p1973_p4)
}
  0xbf   : > { %1681 = dma.hbm_to_vmem [thread:$0]  (!%p2253_p5), %s2720_s7, 16, %s339_s23, [#allocation19]  }
  0xc0   : > { %s1486_s25 = sadd.s32 4294967294, %s2139_s10   ;;  %s49_s4 = sadd.s32 1, %s2135_s9 }
  0xc1   : > { %p51_p7 = scmp.ge.s32.totalorder %s49_s4, 6  ;;  %s58_s17 = sadd.s32 1, %s2127_s29 }
  0xc2   : > { %p65_p6 = scmp.ne.s32.totalorder %s2127_s29, %s2123_s28  ;;  %p66_p8 = scmp.eq.s32.totalorder %s2139_s10, 0 }
  0xc3   : > { %s2750_s4 = smov (%p51_p7, %s49_s4), 0  ;;  %p71_p1 = scmp.ne.s32.totalorder %s2123_s28, %s2119_s27 }
  0xc4   : > { %p2398_p9 = por %p66_p8, %p65_p6  ;;  %s55_s23 = ssub.s32 %s2135_s9, %s2750_s4 }
  0xc5   : > { %p251_p5 = scmp.eq.s32.totalorder %s2240_s11, 5  ;;  %p56_p3 = scmp.eq.s32.totalorder %s55_s23, 0 }
  0xc6   : > { %p2722_p10 = scmp.eq.s32.totalorder %s2240_s11, 0  ;;  %p257_p13 = scmp.eq.s32.totalorder %s1486_s25, 5 }
  0xc7   : > { %p2413_p12 = por %p251_p5, %p65_p6  ;;  %p1699_p2 = scmp.lt.s32.totalorder %s2139_s10, 6 }
  0xc8   : > { %p2409_p11 = por %p2722_p10, %p71_p1  ;;  %p2420_p0 = por %p257_p13, %p71_p1 }
  0xc9   : > { %s2724_s15 = scalar_select %p2413_p12, 1, 0 }
  0xca   : > { %s2723_s26 = scalar_select %p2409_p11, 1, 0 }
  0xcb   : > { %s2418_s18 = scalar_select %p56_p3, %s2127_s29, %s58_s17  }
  0xcc   : > { %s2725_s14 = scalar_select %p2420_p0, 1, 0 }
  0xcd   : > { %s2426_s22 = sand.u32 1, %s2127_s29   ;;  %s1533_s1 = sshll.u32 %s2135_s9, 8 }
  0xce   : > { %s1495_s13 = sshll.u32 %s2426_s22, 4  ;;  %s2726_s0 = sld [smem:[#allocation28_spill]] }
  0xcf   : > { %s353_s25 = scalar_lea.vmem [#allocation6], %s1495_s13  ;;  %p2437_p4 = pnand %p1699_p2, %p2398_p9 }
  0xd0   : > { %s361_s17 = sshll.u32 %s353_s25, 4  ;;  %s350_s21 = scalar_lea.sflag [#allocation7], %s2426_s22  ;;  %s2441_s17 = int_to_ptr.vmem [resolvable:$true] %s361_s17 }
  0xd1   : > { %p1979_p6 = pneg %p2437_p4 }
  0xd4   : > { %s2433_s16 = scalar_lea.hbm %s2726_s0, %s1533_s1  ;;  %s1982_s13 = scalar_lea.hbm %s2726_s0, 1536 }
  0xd5   : > { %s1977_s19 = scalar_lea.hbm %s2433_s16, 256  ;;  %p1983_p9 = scmp.lt.u32.totalorder %s2433_s16, %s2726_s0 }
  0xd6   : > { %p1978_p7 = scmp.ne.s32.totalorder %s2433_s16, %s1977_s19  ;;  %p1984_p5 = scmp.lt.u32.totalorder %s1982_s13, %s1977_s19 }
  0xd7   : > { %p1986_p10 = scmp.lt.u32.totalorder %s1977_s19, %s2433_s16 }
  0xd8   : > { %p1980_p8 = pnand %p1979_p6, %p1978_p7  ;;  %p1985_p3 = por %p1984_p5, %p1983_p9 }
  0xda   : > { %p1981_p1 = pneg %p1980_p8  ;;  %p1987_p13 = por %p1986_p10, %p1985_p3 }
  0xdc   : > { %p1988_p2 = pnand %p1987_p13, %p1981_p1 }
  0xde   : > { %1991 = shalt.err (!%p1988_p2)
}
  0xdf   : > { %s1992_s20 = scalar_lea.vmem %s2441_s17, 256  ;;  %s2149_s1 = smov [#allocation6]  }
  0xe0   : > { %p1993_p7 = scmp.ne.s32.totalorder %s2441_s17, %s1992_s20  ;;  %s1997_s8 = sshll.u32 %s2149_s1, 4  ;;  %s1998_s8 = int_to_ptr.vmem [resolvable:$false] %s1997_s8 }
  0xe1   : > { %s1999_s24 = scalar_lea.vmem %s1998_s8, 512  ;;  %p2000_p12 = scmp.lt.s32.totalorder %s2441_s17, %s1998_s8 }
  0xe2   : > { %p1995_p8 = pnand %p1993_p7, %p1979_p6  ;;  %p2001_p9 = scmp.lt.s32.totalorder %s1999_s24, %s1992_s20 }
  0xe4   : > { %p1996_p0 = pneg %p1995_p8  ;;  %p2002_p5 = por %p2001_p9, %p2000_p12 }
  0xe6   : > { %p2003_p3 = pnand %p2002_p5, %p1996_p0 }
  0xe8   : > { %2006 = shalt.err (!%p2003_p3)
}
  0xe9   : > { %s2728_s19 = smov 8   ;;  %s2729_s13 = smov 128  }
  0xea   : > { %1685 = dma.hbm_to_vmem [thread:$0]  (!%p2437_p4), %s2433_s16, 256, %s2441_s17, %s350_s21, %s2729_s13, %s2729_s13, %s2728_s19  }
  0xeb   : > { %s1498_s25 = sshll.u32 %s2426_s22, 3  ;;  %s1499_s1 = sshll.u32 %s2135_s9, 7 }
  0xec   : > { %s2480_s24 = scalar_lea.hbm %s2691_s3, %s1499_s1  ;;  %s375_s0 = scalar_lea.vmem [#allocation12], %s1498_s25 }
  0xed   : > { %s383_s2 = sshll.u32 %s375_s0, 4  ;;  %s2730_s5 = sand.u32 1, %s2139_s10   ;;  %s384_s2 = int_to_ptr.vmem [resolvable:$true] %s383_s2 }
  0xee   : > { %s372_s6 = scalar_lea.sflag [#allocation13], %s2730_s5  ;;  %s2007_s7 = scalar_lea.hbm %s2480_s24, 128 }
  0xef   : > { %p2008_p12 = scmp.ne.s32.totalorder %s2480_s24, %s2007_s7  ;;  %s2012_s16 = scalar_lea.hbm %s2691_s3, 768 }
  0xf0   : > { %p2013_p10 = scmp.lt.u32.totalorder %s2480_s24, %s2691_s3  ;;  %p2014_p13 = scmp.lt.u32.totalorder %s2012_s16, %s2007_s7 }
  0xf1   : > { %p2010_p0 = pnand %p2008_p12, %p1979_p6  ;;  %p2016_p7 = scmp.lt.u32.totalorder %s2007_s7, %s2480_s24 }
  0xf2   : > { %p2015_p2 = por %p2014_p13, %p2013_p10 }
  0xf3   : > { %p2011_p1 = pneg %p2010_p0 }
  0xf4   : > { %p2017_p8 = por %p2016_p7, %p2015_p2 }
  0xf6   : > { %p2018_p9 = pnand %p2017_p8, %p2011_p1 }
  0xf8   : > { %2021 = shalt.err (!%p2018_p9)
}
  0xf9   : > { %s2022_s0 = scalar_lea.vmem %s384_s2, 128  ;;  %s2150_s5 = smov [#allocation12]  }
  0xfa   : > { %p2023_p5 = scmp.ne.s32.totalorder %s384_s2, %s2022_s0  ;;  %s2027_s13 = sshll.u32 %s2150_s5, 4  ;;  %s2028_s13 = int_to_ptr.vmem [resolvable:$false] %s2027_s13 }
  0xfb   : > { %s2029_s25 = scalar_lea.vmem %s2028_s13, 256  ;;  %p2030_p0 = scmp.lt.s32.totalorder %s384_s2, %s2028_s13 }
  0xfc   : > { %p2025_p3 = pnand %p2023_p5, %p1979_p6  ;;  %p2031_p11 = scmp.lt.s32.totalorder %s2029_s25, %s2022_s0 }
  0xfe   : > { %p2026_p12 = pneg %p2025_p3  ;;  %p2032_p10 = por %p2031_p11, %p2030_p0 }
 0x100   : > { %p2033_p13 = pnand %p2032_p10, %p2026_p12 }
 0x102   : > { %2036 = shalt.err (!%p2033_p13)
}
 0x103   : > { %1688 = dma.hbm_to_vmem [thread:$0]  (!%p2437_p4), %s2480_s24, 128, %s384_s2, %s372_s6  }
 0x104   : > { %p2731_p1 = scmp.ne.s32.totalorder %s2712_s12, 0 }
 0x105   : > { %s2506_s7 = sand.u32 (!%p2731_p1), 1, %s2123_s28   ;;  %p2732_p11 = scmp.ne.s32.totalorder (!%p2731_p1), %s2723_s26, 0 }
 0x106   : > { %392 = sbr.rel (%p2731_p1) target bundleno = 2018 (0x7e2), region = 52  ;;  %s1501_s1 = sshll.u32 (!%p2731_p1), %s2506_s7, 4 }
 0x107   : > { %s395_s20 = scalar_lea.sflag (!%p2731_p1), [#allocation7], %s2506_s7  ;;  %s398_s8 = scalar_lea.vmem (!%p2731_p1), [#allocation6], %s1501_s1 }
 0x10d   : > { %2090 = dma.done.wait (%p2732_p11), %s395_s20, 256  }
 0x10e   : > { %2092 = vsyncadd (%p2732_p11), %s395_s20, 4294967040  ;;  %p2733_p4 = scmp.eq.s32.totalorder %s2240_s11, 0 }
 0x110   : > { %2094 = dma.done.wait (%p2733_p4), [#allocation10], 32   ;;  %p2734_p6 = pmov %p2733_p4 }
 0x111   : > { %s411_s2 = sand.u32 1, %s2240_s11   ;;  %s1504_s6 = sshll.u32 %s2506_s7, 3 }
 0x112   : > { %2096 = vsyncadd (%p2734_p6), [#allocation10], 4294967264  ;;  %s412_s12 = scalar_lea.sflag [#allocation13], %s411_s2  ;;  %s2522_s23 = scalar_lea.vmem [#allocation12], %s1504_s6 }
 0x113   : > { %2098 = dma.done.wait (%p2732_p11), %s412_s12, 128  }
 0x114   : > { %2100 = vsyncadd (%p2732_p11), %s412_s12, 4294967168  ;;  %p2735_p2 = pmov %p2733_p4 }
 0x116   : > { %2102 = dma.done.wait (%p2735_p2), [#allocation13], 512   ;;  %p2736_p7 = pmov %p2735_p2 }
 0x117   : > { %p2737_p8 = pmov %p2735_p2 }
 0x118   : > { %2104 = vsyncadd (%p2736_p7), [#allocation13], 4294966784 }
 0x119   : > { %2106 = dma.done.wait (%p2737_p8), [#allocation16], 896   ;;  %p2738_p9 = pmov %p2735_p2 }
 0x11a   : > { %p2739_p5 = pmov %p2735_p2 }
 0x11b   : > { %2108 = vsyncadd (%p2738_p9), [#allocation16], 4294966400 }
 0x11c   : > { %2110 = dma.done.wait (%p2739_p5), [#allocation19], 16   ;;  %p2740_p3 = pmov %p2735_p2 }
 0x11d   : > { %vm482_vm0 = vcmask 261120   ;;  %v480_v0 = vld [vmem:[%s398_s8] sm:$0xff]  ;;  %v481_v1 = vld [vmem:[%s398_s8 + $0x8] sm:$0xff]  ;;  %vm615_vm1 = vcmask 15360   ;;  %v2151_v22 = vmov 0.0|0.0   ;;  %v2152_v24 = vmov 0.0  }
 0x11e   : > { %2112 = vsyncadd (%p2740_p3), [#allocation19], 4294967280  ;;  %v483_v2 = vsel %vm482_vm0, %v480_v0, 0.0  ;;  %v486_v3 = vsel %vm482_vm0, %v481_v1, 0.0  ;;  %v526_v14 = vld [vmem:[#allocation14] sm:$0xff]  ;;  %v527_v15 = vld [vmem:[#allocation14 + $0x8] sm:$0xff]  ;;  %1622 = vmatprep.subr.bf16.mxu1 %v2151_v22 }
 0x11f   : > { %484 = vadd.xlane.f32.xlu0 %v483_v2  ;;  %v528_v16 = vld [vmem:[#allocation14 + $0x10] sm:$0xff]  ;;  %v1614_v17 = vpack.c.bf16 %v527_v15, %v526_v14  ;;  %v529_v18 = vld [vmem:[#allocation14 + $0x18] sm:$0xff]  ;;  %v623_v20 = vld [vmem:[#allocation15] sm:$0xff]  ;;  %618 = vst.msk [vmem:[#allocation4] sm:$0xff] %vm615_vm1, %v2152_v24  ;;  %vm2153_vm2 = vmmov 0   ;;  %vm626_vm3 = vcmask 195584  }
 0x120   : > { %v1618_v19 = vpack.c.bf16 %v529_v18, %v528_v16  ;;  %v624_v21 = vld [vmem:[#allocation15 + $0x8] sm:$0xff]  ;;  %619 = vst.msk [vmem:[#allocation4 + $0x8] sm:$0xff] %vm615_vm1, %v2152_v24  ;;  %1580 = vmatprep.mubr.msk.f32.mxu1 %vm2153_vm2, %v2152_v24  ;;  %v625_v25 = vld [vmem:[#allocation15 + $0x10] sm:$0xff]  ;;  %vm708_vm4 = vcmask 130048   ;;  %s2154_s11 = smov 112   ;;  %vm793_vm5 = vcmask 64512  }
 0x121   : > { %1615 = vmatprep.subr.bf16.mxu0 %v1614_v17  ;;  %v1623_v23 = vpack.c.bf16 %v624_v21, %v623_v20  ;;  %620 = vst.msk [vmem:[#allocation5] sm:$0xff] %vm482_vm0, %v2152_v24  ;;  %621 = vst.msk [vmem:[#allocation5 + $0x8] sm:$0xff] %vm482_vm0, %v2152_v24  ;;  %v622_v26 = vld [vmem:[%s2522_s23] sm:$0xff]  ;;  %v1510_v34 = vld [vmem:[#allocation9] ss:$0 sm:$0xff]  ;;  %v2155_v54 = vmov -inf  }
 0x122   : > { %1617 = vmatpush3.bf16.msra.mxu0 %v1614_v17  ;;  %v1511_v36 = vld [vmem:[#allocation11] ss:$0 sm:$0xff]  ;;  %617 = vst.msk [vmem:[#allocation3 + $0x8] sm:$0xff] %vm615_vm1, %v2155_v54  ;;  %616 = vst.msk [vmem:[#allocation3] sm:$0xff] %vm615_vm1, %v2155_v54  ;;  %v2156_v59 = vmov 0   ;;  %vm1167_vm6 = vcmask 7168  }
 0x123   : > { %487 = vadd.xlane.f32.xlu0 %v486_v3  ;;  %1619 = vmatprep.subr.bf16.mxu0 %v1618_v19  ;;  %s2158_s26 = smov 96   ;;  %s2159_s24 = smov 80  }
 0x124   : > { %1624 = vmatpush3.bf16.msra.mxu1 %v1623_v23  ;;  %1776 = vset.pattern.permute.xlu1 %v2156_v59  ;;  %s2160_s21 = smov 16   ;;  %s468_s22 = scalar_lea.vmem [#allocation20], %s1501_s1 }
 0x125   : > { %1578 = vmatprep.subr.mxu1 %v2152_v24  ;;  %1775 = vset.pattern.permute.xlu0 %v2156_v59  ;;  %s1318_s16 = sshll.u32 %s468_s22, 4  ;;  %s1534_s17 = sshll.u32 %s2131_s30, 8  ;;  %s2633_s16 = int_to_ptr.vmem [resolvable:$true] %s1318_s16 }
 0x126   : > { %1621 = vmatpush3.bf16.msra.mxu0 %v1618_v19  ;;  %s2741_s5 = sld [smem:[#allocation35_spill]]  ;;  %s1304_s25 = scalar_lea.sflag [#allocation8], %s2506_s7 }
 0x127   : > { %s2037_s30 = scalar_lea.vmem %s2633_s16, 256  ;;  %p2742_p0 = scmp.ne.s32.totalorder %s2724_s15, 0 }
 0x128   : > { %1579 = vmatpush3.msra.mxu1 %v625_v25  ;;  %p2038_p12 = scmp.ne.s32.totalorder %s2633_s16, %s2037_s30  ;;  %s2161_s1 = smov [#allocation20]  }
 0x129   : > { %1581 = vmatmul.mubr.msk.f32.vlgmr.msra.gmra.mrb[0].mxu1 %vm626_vm3, %v622_v26  ;;  %s2041_s20 = sshll.u32 %s2161_s1, 4  ;;  %s2042_s20 = int_to_ptr.vmem [resolvable:$false] %s2041_s20 }
 0x12a   : > { %p2039_p10 = pnand %p2038_p12, %p2742_p0  ;;  %s2043_s8 = scalar_lea.vmem %s2042_s20, 512 }
 0x12b   : > { %p2044_p1 = scmp.lt.s32.totalorder %s2633_s16, %s2042_s20  ;;  %p2045_p11 = scmp.lt.s32.totalorder %s2043_s8, %s2037_s30 }
 0x12c   : > { %s2638_s13 = scalar_lea.hbm %s2741_s5, %s1534_s17  ;;  %p2040_p13 = pneg %p2039_p10 }
 0x12d   : > { %p2046_p4 = por %p2045_p11, %p2044_p1 }
 0x12f   : > { %p2047_p6 = pnand %p2046_p4, %p2040_p13 }
 0x1ac   : > { %v485_v4 = vpop.xlane.xlu0 %484 }
 0x1ad   : > { %v490_v5 = vmul.f32 0.03125, %v485_v4 }
 0x1af   : > { %v492_v6 = vsub.f32 %v480_v0, %v490_v5  ;;  %v2574_v0 = vld [vmem:[#allocation3 + $0x8] sm:$0xff] }
 0x1b0   : > { %v488_v7 = vpop.xlane.xlu0 %487 }
 0x1b1   : > { %v491_v8 = vmul.f32 0.03125, %v488_v7  ;;  %v494_v9 = vmul.f32 %v492_v6, %v492_v6 }
 0x1b3   : > { %v493_v10 = vsub.f32 %v481_v1, %v491_v8  ;;  %v496_v11 = vsel %vm482_vm0, %v494_v9, 0.0  ;;  %v2576_v1 = vld [vmem:[#allocation3] sm:$0xff] }
 0x1b4   : > { %497 = vadd.xlane.f32.xlu1 %v496_v11 }
 0x1b5   : > { %v495_v12 = vmul.f32 %v493_v10, %v493_v10 }
 0x1b7   : > { %v499_v13 = vsel %vm482_vm0, %v495_v12, 0.0 }
 0x1b8   : > { %500 = vadd.xlane.f32.xlu1 %v499_v13 }
 0x1fc   : > { %v2551_v43 = vpop.f32.mrb[0].mxu1 }
 0x1fd   : > { %1583 = vmatprep.subr.msk.mxu0 %vm708_vm4, %v2551_v43  ;;  %v1582_v44 = vpop.f32.mrb[1].mxu1  ;;  %936 = vrot.lane.b32.xlu0 %v2551_v43, %s2154_s11 }
 0x241   : > { %v498_v27 = vpop.xlane.xlu1 %497 }
 0x242   : > { %v502_v28 = vmul.f32 0.03125, %v498_v27 }
 0x244   : > { %v504_v29 = vadd.f32 1e-05, %v502_v28 }
 0x245   : > { %v501_v30 = vpop.xlane.xlu1 %500 }
 0x246   : > { %1785 = vrsqrt.f32 %v504_v29  ;;  %v503_v31 = vmul.f32 0.03125, %v501_v30 }
 0x248   : > { %v505_v32 = vadd.f32 1e-05, %v503_v31 }
 0x24a   : > { %1787 = vrsqrt.f32 %v505_v32 }
 0x250   : > { %v1786_v33 = vpop.eup %1785 }
 0x251   : > { %v508_v35 = vmul.f32 %v1786_v33, %v492_v6  ;;  %v2157_v6 = vmov 1  }
 0x253   : > { %v516_v37 = vmul.f32 %v1510_v34, %v508_v35 }
 0x254   : > { %v1788_v38 = vpop.eup %1787 }
 0x255   : > { %v509_v39 = vmul.f32 %v1788_v38, %v493_v10  ;;  %v524_v40 = vadd.f32 %v1511_v36, %v516_v37 }
 0x257   : > { %v517_v41 = vmul.f32 %v1510_v34, %v509_v39  ;;  %1571 = vmatprep.mubr.msk.f32.mxu0 %vm482_vm0, %v524_v40 }
 0x259   : > { %v525_v42 = vadd.f32 %v1511_v36, %v517_v41 }
 0x25b   : > { %1572 = vmatmul.mubr.msk.f32.vlgmr.msra.gmra.mrb[0].mxu0 %vm482_vm0, %v525_v42 }
 0x25c   : > { %1584 = vmatpush3.xpose.msk.msra.mxu0 %vm708_vm4, %v2551_v43 }
 0x26f   : > { %v937_v45 = vpop.permute.xlu0 %936 }
 0x270   : > { %1593 = vmatprep.subr.msk.mxu1 %vm708_vm4, %v937_v45 }
 0x271   : > { %1594 = vmatpush3.xpose.msk.msra.mxu1 %vm708_vm4, %v937_v45 }
 0x32e   : > { %v1573_v46 = vpop.f32.mrb[0].mxu0 }
 0x32f   : > { %v612_v47 = vmul.f32 0.25, %v1573_v46  ;;  %v602_v48 = vpop.f32.mrb[1].mxu0 }
 0x330   : > { %v611_v49 = vmul.f32 0.25, %v602_v48  ;;  %v704_v48 = vld [vmem:[#allocation4] sm:$0xff] }
 0x331   : > { %614 = vst.msk [vmem:[#allocation2 + $0x8] sm:$0xff] %vm482_vm0, %v612_v47 }
 0x332   : > { %613 = vst.msk [vmem:[#allocation2] sm:$0xff] %vm482_vm0, %v611_v49 }
 0x338   : > { %v701_v51 = vld [vmem:[#allocation2 + $0x8] sm:$0xff] }
 0x339   : > { %v700_v50 = vld [vmem:[#allocation2] sm:$0xff] }
 0x33a   : > { %932 = vrot.lane.b32.xlu1 %v700_v50, %s2154_s11  ;;  %1585 = vmatprep.mubr.msk.f32.mxu0 %vm708_vm4, %v700_v50 }
 0x33b   : > { %1586 = vmatmul.mubr.msk.f32.vlgmr.msra.gmra.mrb[2].mxu0 %vm708_vm4, %v701_v51 }
 0x33e   : > { %934 = vrot.lane.b32.xlu1 %v701_v51, %s2154_s11  ;;  %v705_v51 = vld [vmem:[#allocation4 + $0x8] sm:$0xff] }
 0x3ac   : > { %v933_v52 = vpop.permute.xlu1 %932 }
 0x3ad   : > { %1595 = vmatprep.mubr.msk.f32.mxu1 %vm708_vm4, %v933_v52 }
 0x3b0   : > { %v935_v53 = vpop.permute.xlu1 %934 }
 0x3b1   : > { %1596 = vmatmul.mubr.msk.f32.vlgmr.msra.gmra.mrb[2].mxu1 %vm708_vm4, %v935_v53 }
 0x40e   : > { %v1587_v55 = vpop.f32.mrb[2].mxu0 }
 0x40f   : > { %v784_v56 = vpop.f32.mrb[3].mxu0  ;;  %v797_v57 = vsel %vm793_vm5, %v1587_v55, -inf }
 0x410   : > { %798 = vmax.xlane.f32.xlu0 %v797_v57  ;;  %v794_v58 = vsel %vm793_vm5, %v784_v56, -inf }
 0x411   : > { %795 = vmax.xlane.f32.xlu1 %v794_v58 }
 0x484   : > { %v1597_v60 = vpop.f32.mrb[2].mxu1 }
 0x485   : > { %v1010_v61 = vpop.f32.mrb[3].mxu1  ;;  %v1022_v63 = vsel %vm793_vm5, %v1597_v60, -inf }
 0x486   : > { %v1019_v62 = vsel %vm793_vm5, %v1010_v61, -inf }
 0x487   : > { %1020 = vmax.xlane.f32.xlu0 %v1019_v62 }
 0x48b   : > { %1023 = vmax.xlane.f32.xlu0 %v1022_v63 }
 0x49d   : > { %v799_v2 = vpop.xlane.xlu0 %798 }
 0x49e   : > { %v2579_v3 = vmax.f32 %v2574_v0, %v799_v2  ;;  %v796_v4 = vpop.xlane.xlu1 %795  ;;  %v1209_v2 = vld [vmem:[#allocation17] sm:$0xff] }
 0x49f   : > { %v2582_v5 = vmax.f32 %v2576_v1, %v796_v4 }
 0x4a0   : > { %v803_v37 = vsub.f32 %v2574_v0, %v2579_v3 }
 0x4a1   : > { %815 = vperm.xlu0 %1775, %v2579_v3   ;;  %810 = vperm.xlu1 %1776, %v2582_v5   ;;  %v802_v34 = vsub.f32 %v2576_v1, %v2582_v5 }
 0x4a2   : > { %v806_v40 = vmul.f32 1.442695, %v803_v37 }
 0x4a3   : > { %v804_v38 = vmul.f32 1.442695, %v802_v34 }
 0x4a5   : > { %1777 = vset.pattern.permute.xlu1 %v2157_v6  ;;  %1779 = vset.pattern.permute.xlu0 %v2157_v6 }
 0x514   : > { %v1021_v7 = vpop.xlane.xlu0 %1020 }
 0x515   : > { %v1025_v8 = vmax.f32 %v2576_v1, %v1021_v7 }
 0x517   : > { %v1170_v9 = vsel %vm1167_vm6, %v2582_v5, %v1025_v8  ;;  %1035 = vperm.xlu1 %1777, %v1025_v8   ;;  %v1027_v35 = vsub.f32 %v2576_v1, %v1025_v8  ;;  %v1211_v8 = vld [vmem:[#allocation17 + $0x10] sm:$0xff] }
 0x518   : > { %1173 = vst.msk [vmem:[#allocation3] sm:$0xff] %vm615_vm1, %v1170_v9  ;;  %v1024_v10 = vpop.xlane.xlu0 %1023  ;;  %v1212_v9 = vld [vmem:[#allocation17 + $0x18] sm:$0xff] }
 0x519   : > { %v1026_v11 = vmax.f32 %v2574_v0, %v1024_v10  ;;  %v1029_v39 = vmul.f32 1.442695, %v1027_v35  ;;  %v1629_v10 = vpack.c.bf16 %v1212_v9, %v1211_v8 }
 0x51b   : > { %v1171_v12 = vsel %vm1167_vm6, %v2579_v3, %v1026_v11  ;;  %1040 = vperm.xlu1 %1777, %v1026_v11   ;;  %v1028_v41 = vsub.f32 %v2574_v0, %v1026_v11  ;;  %v1210_v3 = vld [vmem:[#allocation17 + $0x8] sm:$0xff] }
 0x51c   : > { %1174 = vst.msk [vmem:[#allocation3 + $0x8] sm:$0xff] %vm615_vm1, %v1171_v12  ;;  %v1625_v4 = vpack.c.bf16 %v1210_v3, %v1209_v2 }
 0x51d   : > { %v1031_v42 = vmul.f32 1.442695, %v1028_v41 }
 0x51e   : > { %1626 = vmatprep.subr.bf16.mxu1 %v1625_v4 }
 0x51f   : > { %846 = vrot.lane.b32.xlu1 %v2551_v43, %s2158_s26  ;;  %1628 = vmatpush3.bf16.msra.mxu1 %v1625_v4 }
 0x520   : > { %v811_v13 = vpop.permute.xlu1 %810  ;;  %1778 = vset.pattern.permute.xlu1 %v2156_v59  ;;  %v816_v17 = vpop.permute.xlu0 %815  ;;  %1630 = vmatprep.subr.bf16.mxu1 %v1629_v10 }
 0x521   : > { %v818_v14 = vsub.f32 %v784_v56, %v811_v13  ;;  %v819_v18 = vsub.f32 %v1587_v55, %v816_v17  ;;  %v706_v17 = vld [vmem:[#allocation5] sm:$0xff] }
 0x523   : > { %v820_v15 = vmul.f32 1.442695, %v818_v14  ;;  %1071 = vrot.lane.b32.xlu1 %v2551_v43, %s2159_s24  ;;  %v822_v19 = vmul.f32 1.442695, %v819_v18  ;;  %1632 = vmatpush3.bf16.msra.mxu1 %v1629_v10 }
 0x525   : > { %1789 = vpow2.f32 %v820_v15 }
 0x526   : > { %1791 = vpow2.f32 %v822_v19 }
 0x52f   : > { %v1790_v16 = vpop.eup %1789 }
 0x530   : > { %1590 = vmatprep.mubr.msk.f32.mxu0 %vm793_vm5, %v1790_v16  ;;  %v826_v20 = vsel %vm793_vm5, %v1790_v16, 0.0  ;;  %v1792_v21 = vpop.eup %1791 }
 0x531   : > { %v829_v22 = vsel %vm793_vm5, %v1792_v21, 0.0 }
 0x547   : > { %827 = vadd.xlane.f32.xlu1 %v826_v20 }
 0x54b   : > { %830 = vadd.xlane.f32.xlu1 %v829_v22  ;;  %v707_v22 = vld [vmem:[#allocation5 + $0x8] sm:$0xff] }
 0x596   : > { %v1036_v23 = vpop.permute.xlu1 %1035 }
 0x597   : > { %v1043_v24 = vsub.f32 %v1010_v61, %v1036_v23 }
 0x599   : > { %v1045_v25 = vmul.f32 1.442695, %v1043_v24 }
 0x59a   : > { %v1041_v26 = vpop.permute.xlu1 %1040 }
 0x59b   : > { %1793 = vpow2.f32 %v1045_v25  ;;  %v1044_v27 = vsub.f32 %v1597_v60, %v1041_v26 }
 0x59d   : > { %v1047_v28 = vmul.f32 1.442695, %v1044_v27 }
 0x59e   : > { %v847_v29 = vpop.permute.xlu1 %846 }
 0x59f   : > { %1795 = vpow2.f32 %v1047_v28  ;;  %1588 = vmatprep.subr.mxu0 %v847_v29 }
 0x5a0   : > { %1589 = vmatpush3.msra.mxu0 %v847_v29  ;;  %1797 = vpow2.f32 %v804_v38 }
 0x5a1   : > { %1591 = vmatmul.mubr.msk.f32.vlgmr.msra.gmra.mrb[4].mxu0 %vm793_vm5, %v1792_v21  ;;  %1799 = vpow2.f32 %v1029_v39  ;;  %v1525_v39 = vld [vmem:[#allocation18] ss:$0 sm:$0xff] }
 0x5a2   : > { %v1072_v30 = vpop.permute.xlu1 %1071  ;;  %1801 = vpow2.f32 %v806_v40 }
 0x5a3   : > { %1598 = vmatprep.subr.mxu0 %v1072_v30  ;;  %1803 = vpow2.f32 %v1031_v42 }
 0x5a4   : > { %1599 = vmatpush3.msra.mxu0 %v1072_v30 }
 0x5a5   : > { %v1794_v31 = vpop.eup %1793 }
 0x5a6   : > { %1600 = vmatprep.mubr.msk.f32.mxu0 %vm793_vm5, %v1794_v31  ;;  %v1051_v32 = vsel %vm793_vm5, %v1794_v31, 0.0 }
 0x5a7   : > { %1052 = vadd.xlane.f32.xlu0 %v1051_v32 }
 0x5a9   : > { %v1796_v33 = vpop.eup %1795 }
 0x5aa   : > { %1601 = vmatmul.mubr.msk.f32.vlgmr.msra.gmra.mrb[6].mxu0 %vm793_vm5, %v1796_v33  ;;  %v1054_v36 = vsel %vm793_vm5, %v1796_v33, 0.0  ;;  %v1798_v43 = vpop.eup %1797 }
 0x5ab   : > { %1055 = vadd.xlane.f32.xlu1 %v1054_v36  ;;  %v1800_v44 = vpop.eup %1799  ;;  %v824_v49 = vmul.f32 %v1798_v43, %v704_v48 }
 0x5ac   : > { %v1802_v45 = vpop.eup %1801  ;;  %v1049_v50 = vmul.f32 %v1800_v44, %v704_v48 }
 0x5ad   : > { %v1804_v46 = vpop.eup %1803  ;;  %v825_v56 = vmul.f32 %v1802_v45, %v705_v51 }
 0x5ae   : > { %v1050_v58 = vmul.f32 %v1804_v46, %v705_v51 }
 0x5bc   : > { %836 = vperm.xlu1 %1778, %v1798_v43  }
 0x5bd   : > { %1061 = vperm.xlu0 %1779, %v1800_v44  }
 0x5c0   : > { %841 = vperm.xlu1 %1778, %v1802_v45  }
 0x5c4   : > { %1780 = vset.pattern.permute.xlu1 %v2157_v6 }
 0x5c5   : > { %1066 = vperm.xlu1 %1780, %v1804_v46  }
 0x5c9   : > { %1781 = vset.pattern.permute.xlu1 %v2156_v59 }
 0x5d4   : > { %v828_v47 = vpop.xlane.xlu1 %827 }
 0x5d5   : > { %v832_v54 = vadd.f32 %v828_v47, %v824_v49 }
 0x5d8   : > { %v831_v52 = vpop.xlane.xlu1 %830 }
 0x5d9   : > { %v833_v61 = vadd.f32 %v831_v52, %v825_v56 }
 0x634   : > { %v1053_v53 = vpop.xlane.xlu0 %1052 }
 0x635   : > { %v1057_v55 = vadd.f32 %v1053_v53, %v1049_v50 }
 0x637   : > { %v1168_v57 = vsel %vm1167_vm6, %v832_v54, %v1057_v55 }
 0x638   : > { %1175 = vst.msk [vmem:[#allocation4] sm:$0xff] %vm615_vm1, %v1168_v57  ;;  %v1056_v60 = vpop.xlane.xlu1 %1055 }
 0x639   : > { %v1058_v62 = vadd.f32 %v1056_v60, %v1050_v58 }
 0x63b   : > { %v1169_v63 = vsel %vm1167_vm6, %v833_v61, %v1058_v62 }
 0x63c   : > { %1176 = vst.msk [vmem:[#allocation4 + $0x8] sm:$0xff] %vm615_vm1, %v1169_v63  ;;  %1805 = vrcp.f32 %v1169_v63  ;;  %v1062_v18 = vpop.permute.xlu0 %1061 }
 0x63d   : > { %1807 = vrcp.f32 %v1168_v57  ;;  %v1069_v20 = vmul.f32 %v1062_v18, %v706_v17 }
 0x646   : > { %v1806_v0 = vpop.eup %1805 }
 0x647   : > { %1192 = vperm.xlu1 %1781, %v1806_v0   ;;  %v1808_v1 = vpop.eup %1807 }
 0x64b   : > { %1782 = vset.pattern.permute.xlu1 %v2157_v6 }
 0x64c   : > { %1202 = vperm.xlu1 %1782, %v1806_v0  }
 0x650   : > { %1783 = vset.pattern.permute.xlu1 %v2156_v59  ;;  %v837_v59 = vpop.permute.xlu1 %836 }
 0x651   : > { %1187 = vperm.xlu1 %1783, %v1808_v1   ;;  %v844_v21 = vmul.f32 %v837_v59, %v706_v17 }
 0x655   : > { %1784 = vset.pattern.permute.xlu1 %v2157_v6  ;;  %v842_v6 = vpop.permute.xlu1 %841 }
 0x656   : > { %1198 = vperm.xlu1 %1784, %v1808_v1   ;;  %v845_v26 = vmul.f32 %v842_v6, %v707_v22 }
 0x659   : > { %v1067_v13 = vpop.permute.xlu1 %1066 }
 0x65a   : > { %v1070_v27 = vmul.f32 %v1067_v13, %v707_v22 }
 0x674   : > { %v1592_v5 = vpop.f32.mrb[4].mxu0 }
 0x675   : > { %v921_v7 = vpop.f32.mrb[5].mxu0  ;;  %v931_v32 = vadd.f32 %v1592_v5, %v845_v26 }
 0x676   : > { %v930_v24 = vadd.f32 %v921_v7, %v844_v21 }
 0x67d   : > { %v1602_v11 = vpop.f32.mrb[6].mxu0 }
 0x67e   : > { %v1146_v12 = vpop.f32.mrb[7].mxu0 }
 0x67f   : > { %1157 = vrot.lane.b32.xlu1 %v1146_v12, %s2160_s21 }
 0x683   : > { %1159 = vrot.lane.b32.xlu1 %v1602_v11, %s2160_s21 }
 0x6c6   : > { %v1193_v14 = vpop.permute.xlu1 %1192 }
 0x6cb   : > { %v1203_v15 = vpop.permute.xlu1 %1202 }
 0x6d0   : > { %v1188_v16 = vpop.permute.xlu1 %1187 }
 0x6d5   : > { %v1199_v19 = vpop.permute.xlu1 %1198 }
 0x6f1   : > { %v1158_v23 = vpop.permute.xlu1 %1157 }
 0x6f2   : > { %v1163_v25 = vadd.f32 %v1158_v23, %v1069_v20 }
 0x6f4   : > { %v1165_v28 = vsel %vm708_vm4, %v930_v24, %v1163_v25 }
 0x6f5   : > { %1178 = vst.msk [vmem:[#allocation5] sm:$0xff] %vm482_vm0, %v1165_v28  ;;  %v1195_v29 = vmul.f32 %v1188_v16, %v1165_v28  ;;  %v1205_v30 = vmul.f32 %v1199_v19, %v1165_v28  ;;  %v1160_v31 = vpop.permute.xlu1 %1159 }
 0x6f6   : > { %v1164_v33 = vadd.f32 %v1160_v31, %v1070_v27 }
 0x6f7   : > { %v1207_v34 = vsel %vm708_vm4, %v1195_v29, %v1205_v30 }
 0x6f8   : > { %v1166_v35 = vsel %vm708_vm4, %v931_v32, %v1164_v33  ;;  %1611 = vmatprep.mubr.msk.f32.mxu1 %vm482_vm0, %v1207_v34 }
 0x6f9   : > { %1179 = vst.msk [vmem:[#allocation5 + $0x8] sm:$0xff] %vm482_vm0, %v1166_v35  ;;  %v1196_v36 = vmul.f32 %v1193_v14, %v1166_v35  ;;  %v1206_v37 = vmul.f32 %v1203_v15, %v1166_v35 }
 0x6fb   : > { %v1208_v38 = vsel %vm708_vm4, %v1196_v36, %v1206_v37 }
 0x6fc   : > { %1612 = vmatmul.mubr.msk.f32.vlgmr.msra.gmra.mrb[4].mxu1 %vm482_vm0, %v1208_v38 }
 0x7cf   : > { %v1613_v40 = vpop.f32.mrb[4].mxu1 }
 0x7d0   : > { %v1298_v41 = vadd.f32 %v1613_v40, %v1525_v39  ;;  %v1292_v42 = vpop.f32.mrb[5].mxu1 }
 0x7d1   : > { %v1293_v43 = vadd.f32 %v1525_v39, %v1292_v42 }
 0x7d2   : > { %1302 = vst.msk [vmem:[%s468_s22 + $0x8] sm:$0xff] %vm482_vm0, %v1298_v41 }
 0x7d3   : > { %1301 = vst.msk [vmem:[%s468_s22] sm:$0xff] %vm482_vm0, %v1293_v43 }
 0x7d4   : > { %2050 = shalt.err (!%p2047_p6)
}
 0x7d5   : > { %s2051_s2 = scalar_lea.hbm %s2638_s13, 256  ;;  %s2055_s23 = scalar_lea.hbm %s2741_s5, 1536 }
 0x7d6   : > { %p2052_p2 = scmp.ne.s32.totalorder %s2638_s13, %s2051_s2  ;;  %p2056_p9 = scmp.lt.u32.totalorder %s2638_s13, %s2741_s5 }
 0x7d7   : > { %p2057_p5 = scmp.lt.u32.totalorder %s2055_s23, %s2051_s2  ;;  %p2059_p12 = scmp.lt.u32.totalorder %s2051_s2, %s2638_s13 }
 0x7d8   : > { %p2053_p7 = pnand %p2052_p2, %p2742_p0 }
 0x7d9   : > { %p2058_p3 = por %p2057_p5, %p2056_p9 }
 0x7da   : > { %p2054_p8 = pneg %p2053_p7 }
 0x7db   : > { %p2060_p10 = por %p2059_p12, %p2058_p3 }
 0x7dd   : > { %p2061_p13 = pnand %p2060_p10, %p2054_p8 }
 0x7df   : > { %2064 = shalt.err (!%p2061_p13)
}
 0x7e0   : > { %s2162_s24 = smov 128   ;;  %s2163_s21 = smov 8  }
 0x7e1   : > { %1661 = dma.vmem_to_hbm [thread:$0]  (%p2742_p0), %s2633_s16, 256, %s2638_s13, %s1304_s25, %s2162_s24, %s2162_s24, %s2163_s21  }
 0x7e2 PF: > { %p1706_p1 = scmp.ge.s32.totalorder %s2139_s10, 2  ;;  %s1333_s22 = sand.u32 1, %s2119_s27  }
 0x7e3   : > { %p2743_p11 = scmp.ne.s32.totalorder %s2725_s14, 0  ;;  %s1334_s17 = scalar_lea.sflag [#allocation8], %s1333_s22 }
 0x7e5   : > { %p1690_p4 = pnand %p1706_p1, %p2743_p11 }
 0x7e7   : > { %2114 = dma.done.wait (!%p1690_p4), %s1334_s17, 256  }
 0x7e8   : > { %2116 = vsyncadd (!%p1690_p4), %s1334_s17, 4294967040  ;;  %s30_s10 = sadd.s32 1, %s2139_s10   ;;  %s2744_s27 = smov %s2123_s28 }
 0x7e9   : > { %p27_p6 = scmp.ge.s32.totalorder %s30_s10, 8   ;;  %s2745_s28 = smov %s2127_s29 }
 0x7ea   : > { %s2746_s29 = smov %s2418_s18  ;;  %s2747_s30 = smov %s2135_s9 }
 0x7eb   : > { %s2748_s9 = smov %s2750_s4  ;;  %29 = sbr.rel (!%p27_p6) target bundleno = 20 (0x14), region = 142 }
 0x7f2   :  { %1339 = vsyncpa [#allocation7], 1 }
 0x7f3   :  { %1341 = vsyncpa [#allocation7 + $0x1], 1 }
 0x7f4   :  { %1342 = vsyncpa [#allocation10], 1 }
 0x7f5   :  { %1343 = vsyncpa [#allocation13], 1 }
 0x7f6   :  { %1345 = vsyncpa [#allocation13 + $0x1], 1 }
 0x7f7   :  { %1346 = vsyncpa [#allocation16], 1 }
 0x7f8   :  { %1347 = vsyncpa [#allocation19], 1 }
 0x7f9   :  { %1348 = vsyncpa [#allocation8], 1 }
 0x7fa   :  { %1350 = vsyncpa [#allocation8 + $0x1], 1 }

// kernel: basic_dr_transformer_block.4
= control target key start
LH: loop header
LB: loop body
LE: loop exit
PB: predicated region body
PF: predicated region fallthrough
CT: control target
= control target key end

     0   :  { %s4386_s0 = inlined_call_operand.hbm [shape: f32[96,32], index: 0, kind: input, shape index: {}, may-alias: {0,3}]   ;;  %s4387_s1 = inlined_call_operand.hbm [shape: f32[1,32], index: 1, kind: input, shape index: {}]   ;;  %s4388_s2 = inlined_call_operand.hbm [shape: f32[1,32], index: 2, kind: input, shape index: {}]   ;;  %s4389_s3 = inlined_call_operand.hbm [shape: f32[96,32], index: 3, kind: input, shape index: {}, may-alias: {0,3}]   ;;  %s4390_s4 = inlined_call_operand.hbm [shape: f32[32,32], index: 4, kind: input, shape index: {}]   ;;  %s4391_s5 = inlined_call_operand.hbm [shape: f32[32,64], index: 5, kind: input, shape index: {}]   ;;  %s4392_s6 = inlined_call_operand.hbm [shape: f32[32,32], index: 6, kind: input, shape index: {}]   ;;  %s4393_s7 = inlined_call_operand.hbm [shape: f32[1,32], index: 7, kind: input, shape index: {}]   ;;  %s4394_s8 = inlined_call_operand.hbm [shape: f32[96,32], index: 8, kind: output, shape index: {}]  }
   0x1   :  { %4404 = sst [smem:[#allocation28_spill]] %s4386_s0 }
   0x2   :  { %4405 = sst [smem:[#allocation29_spill]] %s4387_s1 }
   0x3   :  { %4406 = sst [smem:[#allocation30_spill]] %s4388_s2 }
   0x4   :  { %4407 = sst [smem:[#allocation31_spill]] %s4390_s4 }
   0x5   :  { %4408 = sst [smem:[#allocation32_spill]] %s4391_s5 }
   0x6   :  { %4409 = sst [smem:[#allocation33_spill]] %s4392_s6 }
   0x7   :  { %4410 = sst [smem:[#allocation34_spill]] %s4394_s8 }
   0x8   :  { %13 = vsyncpa [#allocation7], 0 }
   0x9   :  { %15 = vsyncpa [#allocation7 + $0x1], 0 }
   0xa   :  { %16 = vsyncpa [#allocation10], 0 }
   0xb   :  { %17 = vsyncpa [#allocation13], 0 }
   0xc   :  { %19 = vsyncpa [#allocation13 + $0x1], 0 }
   0xd   :  { %20 = vsyncpa [#allocation16], 0 }
   0xe   :  { %21 = vsyncpa [#allocation19], 0 }
   0xf   :  { %22 = vsyncpa [#allocation8], 0 }
  0x10   :  { %24 = vsyncpa [#allocation8 + $0x1], 0  ;;  %s3387_s27 = smov 0   ;;  %s3389_s28 = smov 0  }
  0x11   :  { %s3391_s29 = smov 0   ;;  %s3393_s30 = smov 0  }
  0x12   :  { %s3395_s9 = smov 0   ;;  %s3397_s10 = smov 0  }
  0x13 LB: > { %s3418_s11 = sadd.s32 4294967295, %s3319_s10   ;;  %p2312_p0 = scmp.ge.s32.totalorder %s3319_s10, 1  ;;  %s3319_s10 = sphi %s3397_s10, %s30_s10   ;;  %s3315_s9 = sphi %s3395_s9, %s4449_s9   ;;  %s3311_s30 = sphi %s3393_s30, %s4448_s30   ;;  %s3307_s29 = sphi %s3391_s29, %s4447_s29   ;;  %s3303_s28 = sphi %s3389_s28, %s4446_s28   ;;  %s3299_s27 = sphi %s3387_s27, %s4445_s27  }
  0x14   : > { %p4395_p1 = scmp.eq.s32.totalorder %s3418_s11, 0  ;;  %p264_p2 = scmp.lt.s32.totalorder %s3319_s10, 3 }
  0x15   : > { %s3321_s13 = smov [#allocation9]   ;;  %s3322_s15 = smov [#allocation14]  }
  0x16   : > { %p3423_p3 = pnand %p2312_p0, %p264_p2  ;;  %s277_s14 = sshll.u32 %s3321_s13, 4  ;;  %s278_s14 = int_to_ptr.vmem [resolvable:$true] %s277_s14 }
  0x17   : > { %s298_s16 = sshll.u32 %s3322_s15, 4  ;;  %s3323_s18 = smov [#allocation15]   ;;  %s3436_s16 = int_to_ptr.vmem [resolvable:$true] %s298_s16 }
  0x18   : > { %s4411_s12 = scalar_select %p3423_p3, 1, 0 }
  0x19   : > { %p2728_p5 = pneg %p3423_p3  ;;  %s3438_s19 = sshll.u32 %s3323_s18, 4  ;;  %s312_s19 = int_to_ptr.vmem [resolvable:$true] %s3438_s19 }
  0x1a   : > { %s4413_s1 = sld [smem:[#allocation29_spill]] }
  0x1b   : > { %p3432_p6 = pnand %p2728_p5, %p4395_p1 }
  0x1d   : > { %p3448_p8 = pneg %p3432_p6 }
  0x20   : > { %s2989_s22 = scalar_lea.hbm %s4413_s1, 16 }
  0x21   : > { %p2990_p7 = scmp.ne.s32.totalorder %s4413_s1, %s2989_s22  ;;  %p2996_p11 = scmp.lt.u32.totalorder %s2989_s22, %s4413_s1 }
  0x23   : > { %p2992_p9 = pnand %p3448_p8, %p2990_p7 }
  0x25   : > { %p2993_p10 = pneg %p2992_p9 }
  0x27   : > { %p2998_p12 = pnand %p2996_p11, %p2993_p10 }
  0x29   : > { %3001 = shalt.err (!%p2998_p12)
}
  0x2a   : > { %s3002_s15 = scalar_lea.vmem %s278_s14, 16  ;;  %s3009_s18 = scalar_lea.vmem %s278_s14, 32 }
  0x2b   : > { %p3003_p13 = scmp.ne.s32.totalorder %s278_s14, %s3002_s15  ;;  %p3010_p5 = scmp.lt.s32.totalorder %s278_s14, %s278_s14 }
  0x2c   : > { %p3011_p4 = scmp.lt.s32.totalorder %s3009_s18, %s3002_s15 }
  0x2d   : > { %p3005_p0 = pnand %p3003_p13, %p3448_p8 }
  0x2e   : > { %p3012_p1 = por %p3011_p4, %p3010_p5 }
  0x2f   : > { %p3006_p2 = pneg %p3005_p0 }
  0x31   : > { %p3013_p3 = pnand %p3012_p1, %p3006_p2 }
  0x33   : > { %3016 = shalt.err (!%p3013_p3)
}
  0x34   : > { %2731 = dma.hbm_to_vmem [thread:$0]  (!%p3432_p6), %s4413_s1, 16, %s278_s14, [#allocation10]  }
  0x35   : > { %s4415_s4 = sld [smem:[#allocation31_spill]] }
  0x3b   : > { %s3017_s24 = scalar_lea.hbm %s4415_s4, 512 }
  0x3c   : > { %p3018_p7 = scmp.ne.s32.totalorder %s4415_s4, %s3017_s24  ;;  %p3024_p1 = scmp.lt.u32.totalorder %s3017_s24, %s4415_s4 }
  0x3e   : > { %p3020_p9 = pnand %p3018_p7, %p3448_p8 }
  0x40   : > { %p3021_p4 = pneg %p3020_p9 }
  0x42   : > { %p3026_p3 = pnand %p3024_p1, %p3021_p4 }
  0x44   : > { %3029 = shalt.err (!%p3026_p3)
}
  0x45   : > { %s3030_s14 = scalar_lea.vmem %s3436_s16, 512  ;;  %p3038_p13 = scmp.lt.s32.totalorder %s3436_s16, %s3436_s16 }
  0x46   : > { %p3031_p10 = scmp.ne.s32.totalorder %s3436_s16, %s3030_s14  ;;  %p3039_p0 = scmp.lt.s32.totalorder %s3030_s14, %s3030_s14 }
  0x48   : > { %p3033_p11 = pnand %p3031_p10, %p3448_p8  ;;  %p3040_p2 = por %p3039_p0, %p3038_p13 }
  0x4a   : > { %p3034_p12 = pneg %p3033_p11 }
  0x4c   : > { %p3041_p5 = pnand %p3040_p2, %p3034_p12 }
  0x4e   : > { %3044 = shalt.err (!%p3041_p5)
}
  0x4f   : > { %s4398_s20 = smov 128   ;;  %s4401_s21 = smov 8  }
  0x50   : > { %2737 = dma.hbm_to_vmem [thread:$0]  (!%p3432_p6), %s4415_s4, 512, %s3436_s16, [#allocation13], %s4398_s20, %s4398_s20, %s4401_s21  }
  0x51   : > { %s4416_s5 = sld [smem:[#allocation32_spill]] }
  0x57   : > { %s3045_s13 = scalar_lea.hbm %s4416_s5, 512 }
  0x58   : > { %p3046_p7 = scmp.ne.s32.totalorder %s4416_s5, %s3045_s13  ;;  %p3052_p1 = scmp.lt.u32.totalorder %s3045_s13, %s4416_s5 }
  0x5a   : > { %p3048_p9 = pnand %p3046_p7, %p3448_p8 }
  0x5c   : > { %p3049_p4 = pneg %p3048_p9 }
  0x5e   : > { %p3054_p3 = pnand %p3052_p1, %p3049_p4 }
  0x60   : > { %3057 = shalt.err (!%p3054_p3)
}
  0x61   : > { %s3058_s22 = scalar_lea.vmem %s312_s19, 512  ;;  %p3066_p13 = scmp.lt.s32.totalorder %s312_s19, %s312_s19 }
  0x62   : > { %p3059_p10 = scmp.ne.s32.totalorder %s312_s19, %s3058_s22  ;;  %p3067_p0 = scmp.lt.s32.totalorder %s3058_s22, %s3058_s22 }
  0x64   : > { %p3061_p11 = pnand %p3059_p10, %p3448_p8  ;;  %p3068_p2 = por %p3067_p0, %p3066_p13 }
  0x66   : > { %p3062_p12 = pneg %p3061_p11 }
  0x68   : > { %p3069_p5 = pnand %p3068_p2, %p3062_p12 }
  0x6a   : > { %3072 = shalt.err (!%p3069_p5)
}
  0x6b   : > { %2740 = dma.hbm_to_vmem [thread:$0]  (!%p3432_p6), %s4416_s5, 512, %s312_s19, [#allocation16], %s4398_s20, %s4398_s20, %s4401_s21  }
  0x6c   : > { %s3326_s23 = smov [#allocation11]   ;;  %s3327_s26 = smov [#allocation17]  }
  0x6d   : > { %s288_s24 = sshll.u32 %s3326_s23, 4  ;;  %s324_s13 = sshll.u32 %s3327_s26, 4  ;;  %s289_s24 = int_to_ptr.vmem [resolvable:$true] %s288_s24  ;;  %s325_s13 = int_to_ptr.vmem [resolvable:$true] %s324_s13 }
  0x6e   : > { %s4417_s2 = sld [smem:[#allocation30_spill]] }
  0x74   : > { %s3073_s14 = scalar_lea.hbm %s4417_s2, 16 }
  0x75   : > { %p3074_p7 = scmp.ne.s32.totalorder %s4417_s2, %s3073_s14  ;;  %p3080_p1 = scmp.lt.u32.totalorder %s3073_s14, %s4417_s2 }
  0x77   : > { %p3076_p9 = pnand %p3074_p7, %p3448_p8 }
  0x79   : > { %p3077_p4 = pneg %p3076_p9 }
  0x7b   : > { %p3082_p3 = pnand %p3080_p1, %p3077_p4 }
  0x7d   : > { %3085 = shalt.err (!%p3082_p3)
}
  0x7e   : > { %s3086_s19 = scalar_lea.vmem %s289_s24, 16  ;;  %s3093_s16 = scalar_lea.vmem %s289_s24, 32 }
  0x7f   : > { %p3087_p10 = scmp.ne.s32.totalorder %s289_s24, %s3086_s19  ;;  %p3094_p13 = scmp.lt.s32.totalorder %s289_s24, %s289_s24 }
  0x80   : > { %p3095_p0 = scmp.lt.s32.totalorder %s3093_s16, %s3086_s19 }
  0x81   : > { %p3089_p11 = pnand %p3087_p10, %p3448_p8 }
  0x82   : > { %p3096_p2 = por %p3095_p0, %p3094_p13 }
  0x83   : > { %p3090_p12 = pneg %p3089_p11 }
  0x85   : > { %p3097_p5 = pnand %p3096_p2, %p3090_p12 }
  0x87   : > { %3100 = shalt.err (!%p3097_p5)
}
  0x88   : > { %2734 = dma.hbm_to_vmem [thread:$0]  (!%p3432_p6), %s4417_s2, 16, %s289_s24, [#allocation10]  }
  0x89   : > { %s4418_s6 = sld [smem:[#allocation33_spill]] }
  0x8f   : > { %s3101_s15 = scalar_lea.hbm %s4418_s6, 512 }
  0x90   : > { %p3102_p7 = scmp.ne.s32.totalorder %s4418_s6, %s3101_s15  ;;  %p3108_p1 = scmp.lt.u32.totalorder %s3101_s15, %s4418_s6 }
  0x92   : > { %p3104_p9 = pnand %p3102_p7, %p3448_p8 }
  0x94   : > { %p3105_p4 = pneg %p3104_p9 }
  0x96   : > { %p3110_p3 = pnand %p3108_p1, %p3105_p4 }
  0x98   : > { %3113 = shalt.err (!%p3110_p3)
}
  0x99   : > { %s3114_s19 = scalar_lea.vmem %s325_s13, 512  ;;  %p3122_p13 = scmp.lt.s32.totalorder %s325_s13, %s325_s13 }
  0x9a   : > { %p3115_p10 = scmp.ne.s32.totalorder %s325_s13, %s3114_s19  ;;  %p3123_p0 = scmp.lt.s32.totalorder %s3114_s19, %s3114_s19 }
  0x9c   : > { %p3117_p11 = pnand %p3115_p10, %p3448_p8  ;;  %p3124_p2 = por %p3123_p0, %p3122_p13 }
  0x9e   : > { %p3118_p12 = pneg %p3117_p11 }
  0xa0   : > { %p3125_p5 = pnand %p3124_p2, %p3118_p12 }
  0xa2   : > { %3128 = shalt.err (!%p3125_p5)
}
  0xa3   : > { %2743 = dma.hbm_to_vmem [thread:$0]  (!%p3432_p6), %s4418_s6, 512, %s325_s13, [#allocation16], %s4398_s20, %s4398_s20, %s4401_s21  }
  0xa4   : > { %s3328_s4 = smov [#allocation18]   ;;  %s3129_s15 = scalar_lea.hbm %s4393_s7, 16 }
  0xa5   : > { %s338_s23 = sshll.u32 %s3328_s4, 4  ;;  %p3130_p7 = scmp.ne.s32.totalorder %s4393_s7, %s3129_s15  ;;  %s339_s23 = int_to_ptr.vmem [resolvable:$true] %s338_s23 }
  0xa6   : > { %p3136_p1 = scmp.lt.u32.totalorder %s3129_s15, %s4393_s7 }
  0xa7   : > { %p3132_p9 = pnand %p3130_p7, %p3448_p8 }
  0xa9   : > { %p3133_p4 = pneg %p3132_p9 }
  0xab   : > { %p3138_p3 = pnand %p3136_p1, %p3133_p4 }
  0xad   : > { %3141 = shalt.err (!%p3138_p3)
}
  0xae   : > { %s3142_s13 = scalar_lea.vmem %s339_s23, 16  ;;  %s3149_s19 = scalar_lea.vmem %s339_s23, 32 }
  0xaf   : > { %p3143_p10 = scmp.ne.s32.totalorder %s339_s23, %s3142_s13  ;;  %p3150_p13 = scmp.lt.s32.totalorder %s339_s23, %s339_s23 }
  0xb0   : > { %p3151_p0 = scmp.lt.s32.totalorder %s3149_s19, %s3142_s13 }
  0xb1   : > { %p3145_p11 = pnand %p3143_p10, %p3448_p8 }
  0xb2   : > { %p3152_p2 = por %p3151_p0, %p3150_p13 }
  0xb3   : > { %p3146_p12 = pneg %p3145_p11 }
  0xb5   : > { %p3153_p5 = pnand %p3152_p2, %p3146_p12 }
  0xb7   : > { %3156 = shalt.err (!%p3153_p5)
}
  0xb8   : > { %2746 = dma.hbm_to_vmem [thread:$0]  (!%p3432_p6), %s4393_s7, 16, %s339_s23, [#allocation19]  }
  0xb9   : > { %s2311_s25 = sadd.s32 4294967294, %s3319_s10   ;;  %s49_s4 = sadd.s32 1, %s3315_s9 }
  0xba   : > { %p51_p8 = scmp.ge.s32.totalorder %s49_s4, 2  ;;  %s58_s17 = sadd.s32 1, %s3307_s29 }
  0xbb   : > { %p65_p7 = scmp.ne.s32.totalorder %s3307_s29, %s3303_s28  ;;  %p66_p9 = scmp.eq.s32.totalorder %s3319_s10, 0 }
  0xbc   : > { %s4451_s4 = smov (%p51_p8, %s49_s4), 0  ;;  %p71_p6 = scmp.ne.s32.totalorder %s3303_s28, %s3299_s27 }
  0xbd   : > { %p3577_p4 = por %p66_p9, %p65_p7  ;;  %s55_s23 = ssub.s32 %s3315_s9, %s4451_s4 }
  0xbe   : > { %p251_p1 = scmp.eq.s32.totalorder %s3418_s11, 1  ;;  %p56_p3 = scmp.eq.s32.totalorder %s55_s23, 0 }
  0xbf   : > { %p4420_p10 = scmp.eq.s32.totalorder %s3418_s11, 0  ;;  %p257_p13 = scmp.eq.s32.totalorder %s2311_s25, 1 }
  0xc0   : > { %p3592_p12 = por %p251_p1, %p65_p7  ;;  %p2764_p2 = scmp.lt.s32.totalorder %s3319_s10, 2 }
  0xc1   : > { %p3588_p11 = por %p4420_p10, %p71_p6  ;;  %p3599_p0 = por %p257_p13, %p71_p6 }
  0xc2   : > { %s4422_s15 = scalar_select %p3592_p12, 1, 0 }
  0xc3   : > { %s3597_s18 = scalar_select %p56_p3, %s3307_s29, %s58_s17  }
  0xc4   : > { %s4423_s14 = scalar_select %p3599_p0, 1, 0 }
  0xc5   : > { %s349_s22 = sand.u32 1, %s3307_s29   ;;  %s4400_s1 = smul.u32 768, %s3315_s9 }
  0xc6   : > { %s3606_s13 = smul.u32 48, %s349_s22  ;;  %s4424_s0 = sld [smem:[#allocation28_spill]] }
  0xc7   : > { %p3617_p5 = pnand %p2764_p2, %p3577_p4  ;;  %s3625_s19 = scalar_lea.sflag [#allocation7], %s349_s22 }
  0xc8   : > { %s353_s23 = scalar_lea.vmem [#allocation6], %s3606_s13 }
  0xc9   : > { %s361_s20 = sshll.u32 %s353_s23, 4  ;;  %p3159_p7 = pneg %p3617_p5  ;;  %s3623_s20 = int_to_ptr.vmem [resolvable:$true] %s361_s20 }
  0xcc   : > { %s3613_s16 = scalar_lea.hbm %s4424_s0, %s4400_s1  ;;  %s3162_s21 = scalar_lea.hbm %s4424_s0, 1536 }
  0xcd   : > { %s3157_s24 = scalar_lea.hbm %s3613_s16, 768  ;;  %p3163_p6 = scmp.lt.u32.totalorder %s3613_s16, %s4424_s0 }
  0xce   : > { %p3158_p8 = scmp.ne.s32.totalorder %s3613_s16, %s3157_s24  ;;  %p3164_p1 = scmp.lt.u32.totalorder %s3162_s21, %s3157_s24 }
  0xcf   : > { %p3166_p10 = scmp.lt.u32.totalorder %s3157_s24, %s3613_s16 }
  0xd0   : > { %p3160_p9 = pnand %p3159_p7, %p3158_p8  ;;  %p3165_p3 = por %p3164_p1, %p3163_p6 }
  0xd2   : > { %p3161_p4 = pneg %p3160_p9  ;;  %p3167_p13 = por %p3166_p10, %p3165_p3 }
  0xd4   : > { %p3168_p2 = pnand %p3167_p13, %p3161_p4 }
  0xd6   : > { %3171 = shalt.err (!%p3168_p2)
}
  0xd7   : > { %s3172_s22 = scalar_lea.vmem %s3623_s20, 768  ;;  %s3329_s1 = smov [#allocation6]  }
  0xd8   : > { %p3173_p8 = scmp.ne.s32.totalorder %s3623_s20, %s3172_s22  ;;  %s3177_s23 = sshll.u32 %s3329_s1, 4  ;;  %s3178_s23 = int_to_ptr.vmem [resolvable:$false] %s3177_s23 }
  0xd9   : > { %s3179_s2 = scalar_lea.vmem %s3178_s23, 1536  ;;  %p3180_p12 = scmp.lt.s32.totalorder %s3623_s20, %s3178_s23 }
  0xda   : > { %p3175_p9 = pnand %p3173_p8, %p3159_p7  ;;  %p3181_p6 = scmp.lt.s32.totalorder %s3179_s2, %s3172_s22 }
  0xdc   : > { %p3176_p0 = pneg %p3175_p9  ;;  %p3182_p1 = por %p3181_p6, %p3180_p12 }
  0xde   : > { %p3183_p3 = pnand %p3182_p1, %p3176_p0 }
  0xe0   : > { %3186 = shalt.err (!%p3183_p3)
}
  0xe1   : > { %s4426_s21 = smov 8   ;;  %s4427_s17 = smov 128  }
  0xe2   : > { %2750 = dma.hbm_to_vmem [thread:$0]  (!%p3617_p5), %s3613_s16, 768, %s3623_s20, %s3625_s19, %s4427_s17, %s4427_s17, %s4426_s21  }
  0xe3   : > { %s4428_s24 = smul.u32 768, %s3315_s9  ;;  %s375_s23 = scalar_lea.vmem [#allocation12], %s3606_s13 }
  0xe4   : > { %s383_s2 = sshll.u32 %s375_s23, 4  ;;  %s4429_s0 = sand.u32 1, %s3319_s10   ;;  %s3664_s2 = int_to_ptr.vmem [resolvable:$true] %s383_s2 }
  0xe5   : > { %s3661_s22 = scalar_lea.hbm %s4389_s3, %s4428_s24  ;;  %s3668_s5 = scalar_lea.sflag [#allocation13], %s4429_s0 }
  0xe6   : > { %s3187_s6 = scalar_lea.hbm %s3661_s22, 768  ;;  %s3192_s19 = scalar_lea.hbm %s4389_s3, 1536 }
  0xe7   : > { %p3188_p12 = scmp.ne.s32.totalorder %s3661_s22, %s3187_s6  ;;  %p3193_p10 = scmp.lt.u32.totalorder %s3661_s22, %s4389_s3 }
  0xe8   : > { %p3194_p13 = scmp.lt.u32.totalorder %s3192_s19, %s3187_s6  ;;  %p3196_p8 = scmp.lt.u32.totalorder %s3187_s6, %s3661_s22 }
  0xe9   : > { %p3190_p0 = pnand %p3188_p12, %p3159_p7 }
  0xea   : > { %p3195_p2 = por %p3194_p13, %p3193_p10 }
  0xeb   : > { %p3191_p4 = pneg %p3190_p0 }
  0xec   : > { %p3197_p9 = por %p3196_p8, %p3195_p2 }
  0xee   : > { %p3198_p6 = pnand %p3197_p9, %p3191_p4 }
  0xf0   : > { %3201 = shalt.err (!%p3198_p6)
}
  0xf1   : > { %s3202_s0 = scalar_lea.vmem %s3664_s2, 768  ;;  %s3330_s13 = smov [#allocation12]  }
  0xf2   : > { %p3203_p1 = scmp.ne.s32.totalorder %s3664_s2, %s3202_s0  ;;  %s3207_s1 = sshll.u32 %s3330_s13, 4  ;;  %s3208_s1 = int_to_ptr.vmem [resolvable:$false] %s3207_s1 }
  0xf3   : > { %s3209_s23 = scalar_lea.vmem %s3208_s1, 1536  ;;  %p3210_p0 = scmp.lt.s32.totalorder %s3664_s2, %s3208_s1 }
  0xf4   : > { %p3205_p3 = pnand %p3203_p1, %p3159_p7  ;;  %p3211_p10 = scmp.lt.s32.totalorder %s3209_s23, %s3202_s0 }
  0xf6   : > { %p3206_p12 = pneg %p3205_p3  ;;  %p3212_p13 = por %p3211_p10, %p3210_p0 }
  0xf8   : > { %p3213_p2 = pnand %p3212_p13, %p3206_p12 }
  0xfa   : > { %3216 = shalt.err (!%p3213_p2)
}
  0xfb   : > { %2753 = dma.hbm_to_vmem [thread:$0]  (!%p3617_p5), %s3661_s22, 768, %s3664_s2, %s3668_s5, %s4427_s17, %s4427_s17, %s4426_s21  }
  0xfc   : > { %p4430_p7 = scmp.ne.s32.totalorder %s4411_s12, 0 }
  0xfd   : > { %s3700_s6 = sand.u32 (!%p4430_p7), 1, %s3303_s28  }
  0xfe   : > { %395 = sbr.rel (%p4430_p7) target bundleno = 2474 (0x9aa), region = 52  ;;  %s398_s25 = scalar_lea.sflag (!%p4430_p7), [#allocation7], %s3700_s6 }
  0xff   : > { %s3703_s20 = smul.u32 (!%p4430_p7), 48, %s3700_s6 }
 0x101   : > { %s3707_s16 = scalar_lea.vmem (!%p4430_p7), [#allocation6], %s3703_s20 }
 0x105   : > { %3270 = dma.done.wait (%p3588_p11), %s398_s25, 768  }
 0x106   : > { %3272 = vsyncadd (%p3588_p11), %s398_s25, 4294966528  ;;  %p4431_p5 = scmp.eq.s32.totalorder %s3418_s11, 0 }
 0x108   : > { %3274 = dma.done.wait (%p4431_p5), [#allocation10], 32   ;;  %p4432_p4 = pmov %p4431_p5 }
 0x109   : > { %s414_s5 = sand.u32 1, %s3418_s11   ;;  %s418_s21 = scalar_lea.vmem [#allocation12], %s3703_s20 }
 0x10a   : > { %3276 = vsyncadd (%p4432_p4), [#allocation10], 4294967264  ;;  %s415_s12 = scalar_lea.sflag [#allocation13], %s414_s5 }
 0x10b   : > { %3278 = dma.done.wait (%p3588_p11), %s415_s12, 768  }
 0x10c   : > { %3280 = vsyncadd (%p3588_p11), %s415_s12, 4294966528  ;;  %p4433_p8 = pmov %p4432_p4 }
 0x10d   : > { %p4434_p9 = pmov %p4432_p4 }
 0x10e   : > { %3282 = dma.done.wait (%p4433_p8), [#allocation13], 512  }
 0x10f   : > { %3284 = vsyncadd (%p4434_p9), [#allocation13], 4294966784  ;;  %p4435_p6 = pmov %p4432_p4 }
 0x110   : > { %p4436_p1 = pmov %p4432_p4 }
 0x111   : > { %3286 = dma.done.wait (%p4435_p6), [#allocation16], 1024  }
 0x112   : > { %3288 = vsyncadd (%p4436_p1), [#allocation16], 4294966272  ;;  %p4437_p3 = pmov %p4436_p1 }
 0x113   : > { %p4438_p12 = pmov %p4436_p1 }
 0x114   : > { %3290 = dma.done.wait (%p4437_p3), [#allocation19], 16  }
 0x115   : > { %3292 = vsyncadd (%p4438_p12), [#allocation19], 4294967280  ;;  %vm490_vm0 = vcmask 261120   ;;  %v742_v0 = vld [vmem:[%s418_s21] sm:$0xff]  ;;  %v744_v1 = vld [vmem:[%s418_s21 + $0x10] sm:$0xff]  ;;  %vm993_vm1 = vcmask 130048  }
 0x116   : > { %v743_v2 = vld [vmem:[%s418_s21 + $0x8] sm:$0xff]  ;;  %v749_v3 = vsel %vm490_vm0, %v742_v0, 0.0  ;;  %v755_v4 = vsel %vm490_vm0, %v744_v1, 0.0  ;;  %v745_v5 = vld [vmem:[%s418_s21 + $0x18] sm:$0xff]  ;;  %v746_v12 = vld [vmem:[%s418_s21 + $0x20] sm:$0xff]  ;;  %vm723_vm3 = vcmask 15360  }
 0x117   : > { %750 = vadd.xlane.f32.xlu0 %v749_v3  ;;  %756 = vadd.xlane.f32.xlu1 %v755_v4  ;;  %v752_v6 = vsel %vm490_vm0, %v743_v2, 0.0  ;;  %v758_v7 = vsel %vm490_vm0, %v745_v5, 0.0  ;;  %v484_v8 = vld [vmem:[%s3707_s16] sm:$0xff]  ;;  %v485_v9 = vld [vmem:[%s3707_s16 + $0x8] sm:$0xff]  ;;  %v761_v14 = vsel %vm490_vm0, %v746_v12, 0.0  ;;  %v486_v16 = vld [vmem:[%s3707_s16 + $0x10] sm:$0xff] }
 0x118   : > { %v491_v10 = vsel %vm490_vm0, %v484_v8, 0.0  ;;  %v494_v11 = vsel %vm490_vm0, %v485_v9, 0.0  ;;  %v747_v13 = vld [vmem:[%s418_s21 + $0x28] sm:$0xff]  ;;  %v487_v17 = vld [vmem:[%s3707_s16 + $0x18] sm:$0xff]  ;;  %v497_v18 = vsel %vm490_vm0, %v486_v16, 0.0  ;;  %v3750_v20 = vld [vmem:[%s3707_s16 + $0x20] sm:$0xff] }
 0x119   : > { %v764_v15 = vsel %vm490_vm0, %v747_v13, 0.0  ;;  %v500_v19 = vsel %vm490_vm0, %v487_v17, 0.0  ;;  %v3753_v21 = vld [vmem:[%s3707_s16 + $0x28] sm:$0xff]  ;;  %v503_v22 = vsel %vm490_vm0, %v3750_v20, 0.0  ;;  %vm3875_vm2 = vmpackc.low %vm993_vm1, %vm993_vm1  ;;  %vm1125_vm4 = vcmask 392192   ;;  %s3334_s11 = smov 96  }
 0x11a   : > { %v506_v23 = vsel %vm490_vm0, %v3753_v21, 0.0  ;;  %s3335_s26 = smov 112   ;;  %vm1885_vm5 = vcmask 7168   ;;  %s3337_s17 = smov 80  }
 0x11b   : > { %753 = vadd.xlane.f32.xlu0 %v752_v6  ;;  %759 = vadd.xlane.f32.xlu1 %v758_v7  ;;  %s3338_s22 = smov 16   ;;  %s471_s2 = scalar_lea.vmem [#allocation20], %s3703_s20 }
 0x11c   : > { %s2143_s19 = sshll.u32 %s471_s2, 4  ;;  %s2389_s24 = smul.u32 768, %s3311_s30  ;;  %s4330_s19 = int_to_ptr.vmem [resolvable:$true] %s2143_s19 }
 0x11d   : > { %s4441_s13 = sld [smem:[#allocation34_spill]]  ;;  %s2129_s23 = scalar_lea.sflag [#allocation8], %s3700_s6 }
 0x11e   : > { %s3217_s30 = scalar_lea.vmem %s4330_s19, 768  ;;  %p4442_p0 = scmp.ne.s32.totalorder %s4422_s15, 0 }
 0x11f   : > { %492 = vadd.xlane.f32.xlu0 %v491_v10  ;;  %495 = vadd.xlane.f32.xlu1 %v494_v11  ;;  %p3218_p11 = scmp.ne.s32.totalorder %s4330_s19, %s3217_s30  ;;  %s3339_s20 = smov [#allocation20]  }
 0x120   : > { %s3221_s25 = sshll.u32 %s3339_s20, 4  ;;  %s3222_s25 = int_to_ptr.vmem [resolvable:$false] %s3221_s25 }
 0x121   : > { %p3219_p10 = pnand %p3218_p11, %p4442_p0  ;;  %s3223_s16 = scalar_lea.vmem %s3222_s25, 1536 }
 0x122   : > { %p3224_p2 = scmp.lt.s32.totalorder %s4330_s19, %s3222_s25  ;;  %p3225_p7 = scmp.lt.s32.totalorder %s3223_s16, %s3217_s30 }
 0x123   : > { %762 = vadd.xlane.f32.xlu0 %v761_v14  ;;  %765 = vadd.xlane.f32.xlu1 %v764_v15  ;;  %s4335_s1 = scalar_lea.hbm %s4441_s13, %s2389_s24  ;;  %p3220_p13 = pneg %p3219_p10 }
 0x124   : > { %p3226_p5 = por %p3225_p7, %p3224_p2 }
 0x126   : > { %p3227_p4 = pnand %p3226_p5, %p3220_p13 }
 0x127   : > { %498 = vadd.xlane.f32.xlu0 %v497_v18  ;;  %501 = vadd.xlane.f32.xlu1 %v500_v19 }
 0x12b   : > { %504 = vadd.xlane.f32.xlu0 %v503_v22  ;;  %507 = vadd.xlane.f32.xlu1 %v506_v23  ;;  %v854_v23 = vld [vmem:[#allocation15 + $0x10] sm:$0xff] }
 0x1a4   : > { %v751_v24 = vpop.xlane.xlu0 %750  ;;  %v757_v25 = vpop.xlane.xlu1 %756 }
 0x1a5   : > { %v768_v26 = vmul.f32 0.03125, %v751_v24  ;;  %v770_v27 = vmul.f32 0.03125, %v757_v25  ;;  %v855_v24 = vld [vmem:[#allocation15 + $0x18] sm:$0xff] }
 0x1a6   : > { %v2617_v25 = vpack.c.bf16 %v855_v24, %v854_v23 }
 0x1a7   : > { %v3759_v28 = vsub.f32 %v742_v0, %v768_v26  ;;  %v3761_v29 = vsub.f32 %v744_v1, %v770_v27  ;;  %v594_v26 = vld [vmem:[#allocation14] sm:$0xff]  ;;  %v595_v27 = vld [vmem:[#allocation14 + $0x8] sm:$0xff] }
 0x1a8   : > { %v754_v30 = vpop.xlane.xlu0 %753  ;;  %v760_v31 = vpop.xlane.xlu1 %759 }
 0x1a9   : > { %v769_v32 = vmul.f32 0.03125, %v754_v30  ;;  %v771_v33 = vmul.f32 0.03125, %v760_v31  ;;  %v780_v34 = vmul.f32 %v3759_v28, %v3759_v28  ;;  %v782_v35 = vmul.f32 %v3761_v29, %v3761_v29  ;;  %v596_v31 = vld [vmem:[#allocation14 + $0x10] sm:$0xff] }
 0x1aa   : > { %v2605_v30 = vpack.c.bf16 %v595_v27, %v594_v26 }
 0x1ab   : > { %v3767_v36 = vsub.f32 %v743_v2, %v769_v32  ;;  %v3769_v37 = vsub.f32 %v745_v5, %v771_v33  ;;  %v786_v38 = vsel %vm490_vm0, %v780_v34, 0.0  ;;  %v792_v41 = vsel %vm490_vm0, %v782_v35, 0.0  ;;  %v597_v32 = vld [vmem:[#allocation14 + $0x18] sm:$0xff] }
 0x1ac   : > { %787 = vadd.xlane.f32.xlu0 %v786_v38  ;;  %v493_v39 = vpop.xlane.xlu0 %492  ;;  %v496_v40 = vpop.xlane.xlu1 %495  ;;  %2606 = vmatprep.subr.bf16.mxu0 %v2605_v30  ;;  %v2609_v33 = vpack.c.bf16 %v597_v32, %v596_v31 }
 0x1ad   : > { %v510_v42 = vmul.f32 0.03125, %v493_v39  ;;  %v781_v43 = vmul.f32 %v3767_v36, %v3767_v36  ;;  %v511_v44 = vmul.f32 0.03125, %v496_v40  ;;  %v783_v45 = vmul.f32 %v3769_v37, %v3769_v37  ;;  %2608 = vmatpush3.bf16.msra.mxu0 %v2605_v30 }
 0x1ae   : > { %2610 = vmatprep.subr.bf16.mxu0 %v2609_v33 }
 0x1af   : > { %v3777_v46 = vsub.f32 %v484_v8, %v510_v42  ;;  %v789_v47 = vsel %vm490_vm0, %v781_v43, 0.0  ;;  %v3780_v48 = vsub.f32 %v485_v9, %v511_v44  ;;  %v795_v50 = vsel %vm490_vm0, %v783_v45, 0.0 }
 0x1b0   : > { %790 = vadd.xlane.f32.xlu1 %v789_v47  ;;  %793 = vadd.xlane.f32.xlu0 %v792_v41  ;;  %v763_v49 = vpop.xlane.xlu0 %762  ;;  %v766_v51 = vpop.xlane.xlu1 %765 }
 0x1b1   : > { %v772_v52 = vmul.f32 0.03125, %v763_v49  ;;  %v773_v53 = vmul.f32 0.03125, %v766_v51  ;;  %v522_v54 = vmul.f32 %v3777_v46, %v3777_v46  ;;  %v523_v55 = vmul.f32 %v3780_v48, %v3780_v48  ;;  %2612 = vmatpush3.bf16.msra.mxu0 %v2609_v33 }
 0x1b3   : > { %v3787_v56 = vsub.f32 %v746_v12, %v772_v52  ;;  %v3789_v57 = vsub.f32 %v747_v13, %v773_v53  ;;  %v528_v58 = vsel %vm490_vm0, %v522_v54, 0.0  ;;  %v531_v60 = vsel %vm490_vm0, %v523_v55, 0.0 }
 0x1b4   : > { %796 = vadd.xlane.f32.xlu1 %v795_v50  ;;  %529 = vadd.xlane.f32.xlu0 %v528_v58  ;;  %v499_v59 = vpop.xlane.xlu0 %498  ;;  %v502_v61 = vpop.xlane.xlu1 %501 }
 0x1b5   : > { %v512_v62 = vmul.f32 0.03125, %v499_v59  ;;  %v513_v63 = vmul.f32 0.03125, %v502_v61  ;;  %v784_v0 = vmul.f32 %v3787_v56, %v3787_v56  ;;  %v785_v1 = vmul.f32 %v3789_v57, %v3789_v57 }
 0x1b7   : > { %v3797_v2 = vsub.f32 %v486_v16, %v512_v62  ;;  %v3799_v3 = vsub.f32 %v487_v17, %v513_v63  ;;  %v798_v4 = vsel %vm490_vm0, %v784_v0, 0.0  ;;  %v801_v6 = vsel %vm490_vm0, %v785_v1, 0.0  ;;  %v3821_v62 = vld [vmem:[#allocation9] ss:$0 sm:$0xff] }
 0x1b8   : > { %532 = vadd.xlane.f32.xlu1 %v531_v60  ;;  %799 = vadd.xlane.f32.xlu0 %v798_v4  ;;  %v505_v5 = vpop.xlane.xlu0 %504  ;;  %v508_v7 = vpop.xlane.xlu1 %507 }
 0x1b9   : > { %v514_v8 = vmul.f32 0.03125, %v505_v5  ;;  %v515_v9 = vmul.f32 0.03125, %v508_v7  ;;  %v524_v10 = vmul.f32 %v3797_v2, %v3797_v2  ;;  %v525_v11 = vmul.f32 %v3799_v3, %v3799_v3 }
 0x1bb   : > { %v3808_v12 = vsub.f32 %v3750_v20, %v514_v8  ;;  %v3811_v13 = vsub.f32 %v3753_v21, %v515_v9  ;;  %v534_v14 = vsel %vm490_vm0, %v524_v10, 0.0  ;;  %v537_v15 = vsel %vm490_vm0, %v525_v11, 0.0  ;;  %v852_v20 = vld [vmem:[#allocation15] sm:$0xff]  ;;  %v853_v21 = vld [vmem:[#allocation15 + $0x8] sm:$0xff] }
 0x1bc   : > { %802 = vadd.xlane.f32.xlu1 %v801_v6  ;;  %535 = vadd.xlane.f32.xlu0 %v534_v14  ;;  %v2613_v22 = vpack.c.bf16 %v853_v21, %v852_v20  ;;  %v3824_v6 = vld [vmem:[#allocation11] ss:$0 sm:$0xff] }
 0x1bd   : > { %v526_v16 = vmul.f32 %v3808_v12, %v3808_v12  ;;  %v527_v17 = vmul.f32 %v3811_v13, %v3811_v13 }
 0x1be   : > { %2614 = vmatprep.subr.bf16.mxu1 %v2613_v22 }
 0x1bf   : > { %v540_v18 = vsel %vm490_vm0, %v526_v16, 0.0  ;;  %v543_v19 = vsel %vm490_vm0, %v527_v17, 0.0  ;;  %2616 = vmatpush3.bf16.msra.mxu1 %v2613_v22 }
 0x1c0   : > { %538 = vadd.xlane.f32.xlu1 %v537_v15  ;;  %541 = vadd.xlane.f32.xlu0 %v540_v18 }
 0x1c1   : > { %2618 = vmatprep.subr.bf16.mxu1 %v2617_v25 }
 0x1c3   : > { %2620 = vmatpush3.bf16.msra.mxu1 %v2617_v25 }
 0x1c4   : > { %544 = vadd.xlane.f32.xlu1 %v543_v19 }
 0x239   : > { %v788_v34 = vpop.xlane.xlu0 %787 }
 0x23a   : > { %v804_v35 = vmul.f32 0.03125, %v788_v34 }
 0x23c   : > { %v810_v38 = vadd.f32 1e-05, %v804_v35 }
 0x23d   : > { %v791_v39 = vpop.xlane.xlu1 %790  ;;  %v794_v40 = vpop.xlane.xlu0 %793 }
 0x23e   : > { %2905 = vrsqrt.f32 %v810_v38  ;;  %v805_v41 = vmul.f32 0.03125, %v791_v39  ;;  %v806_v42 = vmul.f32 0.03125, %v794_v40 }
 0x240   : > { %v811_v43 = vadd.f32 1e-05, %v805_v41  ;;  %v812_v44 = vadd.f32 1e-05, %v806_v42 }
 0x241   : > { %v797_v45 = vpop.xlane.xlu1 %796  ;;  %v530_v47 = vpop.xlane.xlu0 %529 }
 0x242   : > { %2907 = vrsqrt.f32 %v811_v43  ;;  %v807_v49 = vmul.f32 0.03125, %v797_v45  ;;  %v546_v50 = vmul.f32 0.03125, %v530_v47 }
 0x243   : > { %2909 = vrsqrt.f32 %v812_v44 }
 0x244   : > { %v813_v51 = vadd.f32 1e-05, %v807_v49  ;;  %v552_v52 = vadd.f32 1e-05, %v546_v50 }
 0x245   : > { %v533_v53 = vpop.xlane.xlu1 %532  ;;  %v800_v54 = vpop.xlane.xlu0 %799 }
 0x246   : > { %2911 = vrsqrt.f32 %v813_v51  ;;  %v547_v55 = vmul.f32 0.03125, %v533_v53  ;;  %v808_v58 = vmul.f32 0.03125, %v800_v54 }
 0x247   : > { %2913 = vrsqrt.f32 %v552_v52 }
 0x248   : > { %v2906_v59 = vpop.eup %2905  ;;  %v553_v60 = vadd.f32 1e-05, %v547_v55  ;;  %v814_v61 = vadd.f32 1e-05, %v808_v58 }
 0x249   : > { %v803_v63 = vpop.xlane.xlu1 %802  ;;  %v536_v0 = vpop.xlane.xlu0 %535  ;;  %v822_v1 = vmul.f32 %v2906_v59, %v3759_v28 }
 0x24a   : > { %2915 = vrsqrt.f32 %v553_v60  ;;  %v809_v4 = vmul.f32 0.03125, %v803_v63  ;;  %v548_v5 = vmul.f32 0.03125, %v536_v0 }
 0x24b   : > { %2917 = vrsqrt.f32 %v814_v61  ;;  %v834_v7 = vmul.f32 %v3821_v62, %v822_v1 }
 0x24c   : > { %v2908_v8 = vpop.eup %2907  ;;  %v815_v9 = vadd.f32 1e-05, %v809_v4  ;;  %v554_v10 = vadd.f32 1e-05, %v548_v5 }
 0x24d   : > { %v2910_v11 = vpop.eup %2909  ;;  %v539_v14 = vpop.xlane.xlu1 %538  ;;  %v846_v16 = vadd.f32 %v3824_v6, %v834_v7  ;;  %v823_v17 = vmul.f32 %v2908_v8, %v3767_v36 }
 0x24e   : > { %v542_v15 = vpop.xlane.xlu0 %541  ;;  %2919 = vrsqrt.f32 %v815_v9  ;;  %v549_v28 = vmul.f32 0.03125, %v539_v14  ;;  %v824_v19 = vmul.f32 %v2910_v11, %v3761_v29 }
 0x24f   : > { %v550_v18 = vmul.f32 0.03125, %v542_v15  ;;  %2921 = vrsqrt.f32 %v554_v10  ;;  %2495 = vmatprep.mubr.msk.f32.mxu1 %vm490_vm0, %v846_v16  ;;  %v835_v20 = vmul.f32 %v3821_v62, %v823_v17 }
 0x250   : > { %v2912_v21 = vpop.eup %2911  ;;  %v555_v22 = vadd.f32 1e-05, %v549_v28  ;;  %v836_v24 = vmul.f32 %v3821_v62, %v824_v19 }
 0x251   : > { %v556_v23 = vadd.f32 1e-05, %v550_v18  ;;  %v2914_v25 = vpop.eup %2913  ;;  %v545_v26 = vpop.xlane.xlu1 %544  ;;  %v847_v27 = vadd.f32 %v3824_v6, %v835_v20  ;;  %v825_v36 = vmul.f32 %v2912_v21, %v3769_v37 }
 0x252   : > { %2923 = vrsqrt.f32 %v555_v22  ;;  %v551_v30 = vmul.f32 0.03125, %v545_v26  ;;  %v848_v29 = vadd.f32 %v3824_v6, %v836_v24  ;;  %v564_v31 = vmul.f32 %v2914_v25, %v3777_v46 }
 0x253   : > { %2925 = vrsqrt.f32 %v556_v23  ;;  %2496 = vmatmul.mubr.msk.f32.vlgmr.msra.gmra.mrb[0].mxu1 %vm490_vm0, %v847_v27  ;;  %v837_v32 = vmul.f32 %v3821_v62, %v825_v36 }
 0x254   : > { %v2916_v33 = vpop.eup %2915  ;;  %v557_v34 = vadd.f32 1e-05, %v551_v30  ;;  %2498 = vmatprep.mubr.msk.f32.mxu1 %vm490_vm0, %v848_v29  ;;  %v576_v35 = vmul.f32 %v3821_v62, %v564_v31 }
 0x255   : > { %v2918_v38 = vpop.eup %2917  ;;  %v849_v37 = vadd.f32 %v3824_v6, %v837_v32  ;;  %v565_v39 = vmul.f32 %v2916_v33, %v3780_v48  ;;  %v3331_v32 = vmov -inf  }
 0x256   : > { %2927 = vrsqrt.f32 %v557_v34  ;;  %v588_v40 = vadd.f32 %v3824_v6, %v576_v35  ;;  %v826_v46 = vmul.f32 %v2918_v38, %v3787_v56  ;;  %725 = vst.msk [vmem:[#allocation3 + $0x8] sm:$0xff] %vm723_vm3, %v3331_v32  ;;  %724 = vst.msk [vmem:[#allocation3] sm:$0xff] %vm723_vm3, %v3331_v32 }
 0x257   : > { %2499 = vmatmul.mubr.msk.f32.gmra.mrb[2].mxu1 %vm490_vm0, %v849_v37  ;;  %v577_v41 = vmul.f32 %v3821_v62, %v565_v39  ;;  %726 = vst.msk [vmem:[#allocation3 + $0x10] sm:$0xff] %vm723_vm3, %v3331_v32  ;;  %727 = vst.msk [vmem:[#allocation3 + $0x18] sm:$0xff] %vm723_vm3, %v3331_v32 }
 0x258   : > { %v2920_v42 = vpop.eup %2919  ;;  %2478 = vmatprep.mubr.msk.f32.mxu0 %vm490_vm0, %v588_v40  ;;  %v838_v43 = vmul.f32 %v3821_v62, %v826_v46  ;;  %728 = vst.msk [vmem:[#allocation3 + $0x20] sm:$0xff] %vm723_vm3, %v3331_v32  ;;  %729 = vst.msk [vmem:[#allocation3 + $0x28] sm:$0xff] %vm723_vm3, %v3331_v32 }
 0x259   : > { %v2922_v44 = vpop.eup %2921  ;;  %v589_v45 = vadd.f32 %v3824_v6, %v577_v41  ;;  %v827_v47 = vmul.f32 %v2920_v42, %v3789_v57 }
 0x25a   : > { %v850_v48 = vadd.f32 %v3824_v6, %v838_v43  ;;  %v566_v49 = vmul.f32 %v2922_v44, %v3797_v2 }
 0x25b   : > { %2479 = vmatmul.mubr.msk.f32.vlgmr.msra.gmra.mrb[0].mxu0 %vm490_vm0, %v589_v45  ;;  %v839_v56 = vmul.f32 %v3821_v62, %v827_v47  ;;  %v3332_v45 = vmov 0   ;;  %v3333_v47 = vmov 0.0  }
 0x25c   : > { %v2924_v50 = vpop.eup %2923  ;;  %2501 = vmatprep.mubr.msk.f32.mxu1 %vm490_vm0, %v850_v48  ;;  %v578_v51 = vmul.f32 %v3821_v62, %v566_v49  ;;  %2839 = vset.pattern.permute.xlu1 %v3332_v45  ;;  %736 = vst.msk [vmem:[#allocation5] sm:$0xff] %vm490_vm0, %v3333_v47  ;;  %737 = vst.msk [vmem:[#allocation5 + $0x8] sm:$0xff] %vm490_vm0, %v3333_v47 }
 0x25d   : > { %v2926_v52 = vpop.eup %2925  ;;  %v851_v53 = vadd.f32 %v3824_v6, %v839_v56  ;;  %v567_v54 = vmul.f32 %v2924_v50, %v3799_v3  ;;  %2838 = vset.pattern.permute.xlu0 %v3332_v45  ;;  %730 = vst.msk [vmem:[#allocation4] sm:$0xff] %vm723_vm3, %v3333_v47  ;;  %731 = vst.msk [vmem:[#allocation4 + $0x8] sm:$0xff] %vm723_vm3, %v3333_v47  ;;  %v3971_v48 = vld [vmem:[#allocation3 + $0x8] sm:$0xff]  ;;  %v3973_v49 = vld [vmem:[#allocation3] sm:$0xff] }
 0x25e   : > { %v590_v57 = vadd.f32 %v3824_v6, %v578_v51  ;;  %v568_v55 = vmul.f32 %v2926_v52, %v3808_v12  ;;  %732 = vst.msk [vmem:[#allocation4 + $0x10] sm:$0xff] %vm723_vm3, %v3333_v47  ;;  %733 = vst.msk [vmem:[#allocation4 + $0x18] sm:$0xff] %vm723_vm3, %v3333_v47 }
 0x25f   : > { %2502 = vmatmul.mubr.msk.f32.gmra.mrb[4].mxu1 %vm490_vm0, %v851_v53  ;;  %v579_v2 = vmul.f32 %v3821_v62, %v567_v54  ;;  %734 = vst.msk [vmem:[#allocation4 + $0x20] sm:$0xff] %vm723_vm3, %v3333_v47  ;;  %735 = vst.msk [vmem:[#allocation4 + $0x28] sm:$0xff] %vm723_vm3, %v3333_v47  ;;  %v3987_v53 = vld [vmem:[#allocation3 + $0x18] sm:$0xff] }
 0x260   : > { %v2928_v58 = vpop.eup %2927  ;;  %2481 = vmatprep.mubr.msk.f32.mxu0 %vm490_vm0, %v590_v57  ;;  %v580_v59 = vmul.f32 %v3821_v62, %v568_v55  ;;  %738 = vst.msk [vmem:[#allocation5 + $0x10] sm:$0xff] %vm490_vm0, %v3333_v47  ;;  %739 = vst.msk [vmem:[#allocation5 + $0x18] sm:$0xff] %vm490_vm0, %v3333_v47 }
 0x261   : > { %v591_v60 = vadd.f32 %v3824_v6, %v579_v2  ;;  %v569_v61 = vmul.f32 %v2928_v58, %v3811_v13  ;;  %740 = vst.msk [vmem:[#allocation5 + $0x20] sm:$0xff] %vm490_vm0, %v3333_v47  ;;  %741 = vst.msk [vmem:[#allocation5 + $0x28] sm:$0xff] %vm490_vm0, %v3333_v47  ;;  %v3994_v2 = vld [vmem:[#allocation3 + $0x10] sm:$0xff] }
 0x262   : > { %v592_v63 = vadd.f32 %v3824_v6, %v580_v59  ;;  %v4001_v59 = vld [vmem:[#allocation3 + $0x20] sm:$0xff] }
 0x263   : > { %2482 = vmatmul.mubr.msk.f32.gmra.mrb[2].mxu0 %vm490_vm0, %v591_v60  ;;  %v581_v3 = vmul.f32 %v3821_v62, %v569_v61 }
 0x264   : > { %2484 = vmatprep.mubr.msk.f32.mxu0 %vm490_vm0, %v592_v63  ;;  %v4008_v63 = vld [vmem:[#allocation3 + $0x28] sm:$0xff] }
 0x265   : > { %v593_v12 = vadd.f32 %v3824_v6, %v581_v3 }
 0x267   : > { %2485 = vmatmul.mubr.msk.f32.gmra.mrb[4].mxu0 %vm490_vm0, %v593_v12 }
 0x326   : > { %v2497_v0 = vpop.f32.mrb[0].mxu1 }
 0x327   : > { %v940_v1 = vpop.f32.mrb[1].mxu1 }
 0x328   : > { %v2621_v13 = vpack.c.bf16 %v2497_v0, %v940_v1  ;;  %v3879_v5 = vpack.i.bf16 %v2497_v0, %v940_v1 }
 0x32a   : > { %v2500_v7 = vpop.f32.mrb[2].mxu1  ;;  %2623 = vmatprep.subr.msk.bf16.mxu0 %vm3875_vm2, %v2621_v13 }
 0x32b   : > { %v950_v62 = vpop.f32.mrb[3].mxu1  ;;  %2626 = vmatpush3.bf16.xpose.msk.msra.mxu0 %vm3875_vm2, %v2621_v13 }
 0x32c   : > { %v2627_v6 = vpack.c.bf16 %v2500_v7, %v950_v62  ;;  %v3885_v8 = vpack.i.bf16 %v2500_v7, %v950_v62 }
 0x32e   : > { %v2480_v9 = vpop.f32.mrb[0].mxu0  ;;  %2629 = vmatprep.subr.msk.bf16.mxu0 %vm3875_vm2, %v2627_v6 }
 0x32f   : > { %v712_v10 = vmul.f32 0.25, %v2480_v9  ;;  %v682_v11 = vpop.f32.mrb[1].mxu0 }
 0x330   : > { %v711_v14 = vmul.f32 0.25, %v682_v11 }
 0x331   : > { %718 = vst.msk [vmem:[#allocation2 + $0x8] sm:$0xff] %vm490_vm0, %v712_v10 }
 0x332   : > { %717 = vst.msk [vmem:[#allocation2] sm:$0xff] %vm490_vm0, %v711_v14  ;;  %v2503_v15 = vpop.f32.mrb[4].mxu1 }
 0x333   : > { %v960_v16 = vpop.f32.mrb[5].mxu1  ;;  %2632 = vmatpush3.bf16.xpose.msk.msra.mxu0 %vm3875_vm2, %v2627_v6 }
 0x334   : > { %v2633_v17 = vpack.c.bf16 %v2503_v15, %v960_v16  ;;  %v3893_v28 = vpack.i.bf16 %v2503_v15, %v960_v16 }
 0x336   : > { %v2483_v18 = vpop.f32.mrb[2].mxu0  ;;  %2635 = vmatprep.subr.msk.bf16.mxu0 %vm3875_vm2, %v2633_v17 }
 0x337   : > { %v714_v19 = vmul.f32 0.25, %v2483_v18  ;;  %v692_v20 = vpop.f32.mrb[3].mxu0 }
 0x338   : > { %v713_v21 = vmul.f32 0.25, %v692_v20  ;;  %v3907_v27 = vld [vmem:[#allocation2 + $0x8] sm:$0xff] }
 0x339   : > { %720 = vst.msk [vmem:[#allocation2 + $0x18] sm:$0xff] %vm490_vm0, %v714_v19  ;;  %v3898_v22 = vld [vmem:[#allocation2] sm:$0xff] }
 0x33a   : > { %719 = vst.msk [vmem:[#allocation2 + $0x10] sm:$0xff] %vm490_vm0, %v713_v21  ;;  %v2486_v23 = vpop.f32.mrb[4].mxu0  ;;  %2516 = vmatprep.mubr.msk.f32.mxu0 %vm993_vm1, %v3898_v22 }
 0x33b   : > { %v716_v24 = vmul.f32 0.25, %v2486_v23  ;;  %v702_v25 = vpop.f32.mrb[5].mxu0  ;;  %2638 = vmatpush3.bf16.xpose.msk.msra.mxu0 %vm3875_vm2, %v2633_v17 }
 0x33c   : > { %v715_v26 = vmul.f32 0.25, %v702_v25 }
 0x33d   : > { %722 = vst.msk [vmem:[#allocation2 + $0x28] sm:$0xff] %vm490_vm0, %v716_v24 }
 0x33e   : > { %721 = vst.msk [vmem:[#allocation2 + $0x20] sm:$0xff] %vm490_vm0, %v715_v26 }
 0x340   : > { %v3915_v30 = vld [vmem:[#allocation2 + $0x18] sm:$0xff] }
 0x341   : > { %v3909_v36 = vld [vmem:[#allocation2 + $0x10] sm:$0xff] }
 0x342   : > { %2517 = vmatmul.mubr.msk.f32.vlgmr.msra.gmra.mrb[6].mxu0 %vm993_vm1, %v3907_v27 }
 0x343   : > { %2519 = vmatprep.mubr.msk.f32.mxu0 %vm993_vm1, %v3909_v36 }
 0x344   : > { %v3923_v31 = vld [vmem:[#allocation2 + $0x28] sm:$0xff] }
 0x345   : > { %v3917_v29 = vld [vmem:[#allocation2 + $0x20] sm:$0xff] }
 0x346   : > { %2520 = vmatmul.mubr.msk.f32.gmra.mrb[8].mxu0 %vm993_vm1, %v3915_v30 }
 0x347   : > { %2522 = vmatprep.mubr.msk.f32.mxu0 %vm993_vm1, %v3917_v29 }
 0x34a   : > { %2523 = vmatmul.mubr.msk.f32.gmra.mrb[10].mxu0 %vm993_vm1, %v3923_v31 }
 0x415   : > { %v3933_v33 = vpop.f32.mrb[6].mxu0 }
 0x416   : > { %v3935_v34 = vpop.f32.mrb[7].mxu0  ;;  %v1129_v35 = vsel %vm1125_vm4, %v3933_v33, -inf }
 0x417   : > { %1130 = vmax.xlane.f32.xlu1 %v1129_v35  ;;  %v1126_v38 = vsel %vm1125_vm4, %v3935_v34, -inf }
 0x418   : > { %1127 = vmax.xlane.f32.xlu0 %v1126_v38 }
 0x419   : > { %v3941_v37 = vpop.f32.mrb[8].mxu0 }
 0x41a   : > { %v3943_v39 = vpop.f32.mrb[9].mxu0  ;;  %v1135_v40 = vsel %vm1125_vm4, %v3941_v37, -inf }
 0x41b   : > { %1136 = vmax.xlane.f32.xlu1 %v1135_v40  ;;  %v1132_v46 = vsel %vm1125_vm4, %v3943_v39, -inf }
 0x41c   : > { %1133 = vmax.xlane.f32.xlu0 %v1132_v46 }
 0x41d   : > { %v3949_v41 = vpop.f32.mrb[10].mxu0 }
 0x41e   : > { %v3951_v42 = vpop.f32.mrb[11].mxu0  ;;  %v1141_v43 = vsel %vm1125_vm4, %v3949_v41, -inf }
 0x41f   : > { %1142 = vmax.xlane.f32.xlu1 %v1141_v43  ;;  %v1138_v44 = vsel %vm1125_vm4, %v3951_v42, -inf }
 0x420   : > { %1139 = vmax.xlane.f32.xlu0 %v1138_v44 }
 0x4a4   : > { %v1131_v56 = vpop.xlane.xlu1 %1130 }
 0x4a5   : > { %v3976_v50 = vmax.f32 %v3971_v48, %v1131_v56  ;;  %v1128_v51 = vpop.xlane.xlu0 %1127 }
 0x4a6   : > { %v3979_v52 = vmax.f32 %v3973_v49, %v1128_v51 }
 0x4a7   : > { %1175 = vperm.xlu1 %2839, %v3976_v50  }
 0x4a8   : > { %1170 = vperm.xlu0 %2838, %v3979_v52   ;;  %v1137_v54 = vpop.xlane.xlu1 %1136 }
 0x4a9   : > { %v1134_v57 = vpop.xlane.xlu0 %1133  ;;  %v3992_v55 = vmax.f32 %v3987_v53, %v1137_v54 }
 0x4aa   : > { %v3999_v58 = vmax.f32 %v3994_v2, %v1134_v57 }
 0x4ab   : > { %2841 = vrot.lane.b32.xlu1 %v3879_v5, %s3334_s11 }
 0x4ac   : > { %2856 = vrot.lane.b32.xlu0 %v3879_v5, %s3335_s26  ;;  %v1143_v3 = vpop.xlane.xlu1 %1142 }
 0x4ad   : > { %v1140_v60 = vpop.xlane.xlu0 %1139  ;;  %v4012_v12 = vmax.f32 %v4008_v63, %v1143_v3 }
 0x4ae   : > { %v4006_v61 = vmax.f32 %v4001_v59, %v1140_v60 }
 0x4af   : > { %2846 = vrot.lane.b32.xlu1 %v3885_v8, %s3334_s11 }
 0x4b0   : > { %2866 = vrot.lane.b32.xlu0 %v3893_v28, %s3335_s26 }
 0x4b3   : > { %2851 = vrot.lane.b32.xlu1 %v3893_v28, %s3334_s11 }
 0x4b4   : > { %1421 = vrot.lane.b32.xlu0 %v3907_v27, %s3335_s26 }
 0x4b7   : > { %1185 = vperm.xlu1 %2839, %v3992_v55  }
 0x4b8   : > { %1425 = vrot.lane.b32.xlu0 %v3915_v30, %s3335_s26 }
 0x4bb   : > { %1180 = vperm.xlu1 %2839, %v3999_v58  }
 0x4bc   : > { %1429 = vrot.lane.b32.xlu0 %v3923_v31, %s3335_s26 }
 0x4bf   : > { %1190 = vperm.xlu1 %2839, %v4006_v61  }
 0x4c3   : > { %1195 = vperm.xlu1 %2839, %v4012_v12  }
 0x4c7   : > { %2861 = vrot.lane.b32.xlu1 %v3885_v8, %s3335_s26 }
 0x4cb   : > { %1419 = vrot.lane.b32.xlu1 %v3898_v22, %s3335_s26 }
 0x4cf   : > { %1423 = vrot.lane.b32.xlu1 %v3909_v36, %s3335_s26 }
 0x4d3   : > { %1427 = vrot.lane.b32.xlu1 %v3917_v29, %s3335_s26 }
 0x526   : > { %v1176_v0 = vpop.permute.xlu1 %1175 }
 0x527   : > { %v1171_v1 = vpop.permute.xlu0 %1170  ;;  %v1199_v13 = vsub.f32 %v3933_v33, %v1176_v0 }
 0x528   : > { %v1198_v7 = vsub.f32 %v3935_v34, %v1171_v1 }
 0x529   : > { %v1206_v11 = vmul.f32 1.442695, %v1199_v13 }
 0x52a   : > { %v1204_v62 = vmul.f32 1.442695, %v1198_v7  ;;  %v2842_v6 = vpop.permute.xlu1 %2841 }
 0x52b   : > { %v2844_v9 = vunpack.i.h.bf16 %v2842_v6  ;;  %v2843_v10 = vunpack.i.l.bf16 %v2842_v6  ;;  %v2857_v18 = vpop.permute.xlu0 %2856 }
 0x52c   : > { %2929 = vpow2.f32 %v1204_v62  ;;  %v2859_v21 = vunpack.i.h.bf16 %v2857_v18  ;;  %v2858_v22 = vunpack.i.l.bf16 %v2857_v18 }
 0x52d   : > { %v2639_v14 = vpack.c.bf16 %v2844_v9, %v2843_v10  ;;  %2931 = vpow2.f32 %v1206_v11 }
 0x52e   : > { %v2847_v15 = vpop.permute.xlu1 %2846  ;;  %v2651_v36 = vpack.c.bf16 %v2859_v21, %v2858_v22 }
 0x52f   : > { %v2849_v16 = vunpack.i.h.bf16 %v2847_v15  ;;  %v2848_v17 = vunpack.i.l.bf16 %v2847_v15  ;;  %2640 = vmatprep.subr.bf16.mxu1 %v2639_v14  ;;  %v2867_v46 = vpop.permute.xlu0 %2866 }
 0x530   : > { %2642 = vmatpush3.bf16.msra.mxu1 %v2639_v14  ;;  %v2869_v44 = vunpack.i.h.bf16 %v2867_v46  ;;  %v2868_v56 = vunpack.i.l.bf16 %v2867_v46 }
 0x531   : > { %v2643_v19 = vpack.c.bf16 %v2849_v16, %v2848_v17 }
 0x532   : > { %v2852_v20 = vpop.permute.xlu1 %2851  ;;  %v2663_v3 = vpack.c.bf16 %v2869_v44, %v2868_v56 }
 0x533   : > { %v2854_v23 = vunpack.i.h.bf16 %v2852_v20  ;;  %v2853_v24 = vunpack.i.l.bf16 %v2852_v20  ;;  %2644 = vmatprep.subr.bf16.mxu1 %v2643_v19  ;;  %v1422_v13 = vpop.permute.xlu0 %1421 }
 0x534   : > { %2646 = vmatpush3.bf16.msra.mxu1 %v2643_v19 }
 0x535   : > { %v2647_v25 = vpack.c.bf16 %v2854_v23, %v2853_v24 }
 0x536   : > { %v4021_v26 = vpop.eup %2929  ;;  %v1186_v27 = vpop.permute.xlu1 %1185 }
 0x537   : > { %2648 = vmatprep.subr.bf16.mxu1 %v2647_v25  ;;  %2537 = vmatprep.mubr.msk.f32.mxu1 %vm1125_vm4, %v4021_v26  ;;  %v1201_v30 = vsub.f32 %v3941_v37, %v1186_v27  ;;  %v4028_v29 = vpop.eup %2931  ;;  %v1426_v62 = vpop.permute.xlu0 %1425 }
 0x538   : > { %2650 = vmatpush3.bf16.msra.mxu1 %v2647_v25 }
 0x539   : > { %2653 = vmatprep.subr.msk.bf16.mxu1 %vm3875_vm2, %v2651_v36  ;;  %v1210_v33 = vmul.f32 1.442695, %v1201_v30 }
 0x53a   : > { %v1181_v31 = vpop.permute.xlu1 %1180 }
 0x53b   : > { %v1200_v32 = vsub.f32 %v3943_v39, %v1181_v31  ;;  %2538 = vmatmul.mubr.msk.f32.vlgmr.msra.gmra.mrb[6].mxu1 %vm1125_vm4, %v4028_v29  ;;  %v1430_v9 = vpop.permute.xlu0 %1429  ;;  %v3336_v31 = vmov 1  }
 0x53c   : > { %2871 = vset.pattern.permute.xlu1 %v3336_v31  ;;  %2870 = vset.pattern.permute.xlu0 %v3336_v31 }
 0x53d   : > { %v1208_v34 = vmul.f32 1.442695, %v1200_v32 }
 0x53e   : > { %v1191_v35 = vpop.permute.xlu1 %1190 }
 0x53f   : > { %2933 = vpow2.f32 %v1208_v34  ;;  %v1202_v38 = vsub.f32 %v3951_v42, %v1191_v35 }
 0x540   : > { %2935 = vpow2.f32 %v1210_v33 }
 0x541   : > { %v1212_v37 = vmul.f32 1.442695, %v1202_v38  ;;  %2656 = vmatpush3.bf16.xpose.msk.msra.mxu1 %vm3875_vm2, %v2651_v36 }
 0x542   : > { %v1196_v40 = vpop.permute.xlu1 %1195 }
 0x543   : > { %2937 = vpow2.f32 %v1212_v37  ;;  %v1203_v43 = vsub.f32 %v3949_v41, %v1196_v40 }
 0x545   : > { %v1214_v39 = vmul.f32 1.442695, %v1203_v43 }
 0x546   : > { %v2862_v47 = vpop.permute.xlu1 %2861 }
 0x547   : > { %2939 = vpow2.f32 %v1214_v39  ;;  %v2864_v51 = vunpack.i.h.bf16 %v2862_v47  ;;  %v2863_v54 = vunpack.i.l.bf16 %v2862_v47 }
 0x549   : > { %v4037_v57 = vpop.eup %2933  ;;  %v2657_v42 = vpack.c.bf16 %v2864_v51, %v2863_v54 }
 0x54a   : > { %v4039_v60 = vpop.eup %2935  ;;  %2540 = vmatprep.mubr.msk.f32.mxu1 %vm1125_vm4, %v4037_v57  ;;  %v1420_v1 = vpop.permute.xlu1 %1419 }
 0x54b   : > { %2541 = vmatmul.mubr.msk.f32.gmra.mrb[8].mxu1 %vm1125_vm4, %v4039_v60  ;;  %2659 = vmatprep.subr.msk.bf16.mxu1 %vm3875_vm2, %v2657_v42 }
 0x54c   : > { %2662 = vmatpush3.bf16.xpose.msk.msra.mxu1 %vm3875_vm2, %v2657_v42 }
 0x54d   : > { %v4049_v41 = vpop.eup %2937  ;;  %2665 = vmatprep.subr.msk.bf16.mxu1 %vm3875_vm2, %v2663_v3 }
 0x54e   : > { %2543 = vmatprep.mubr.msk.f32.mxu1 %vm1125_vm4, %v4049_v41  ;;  %v1424_v7 = vpop.permute.xlu1 %1423 }
 0x551   : > { %v4055_v0 = vpop.eup %2939 }
 0x552   : > { %2544 = vmatmul.mubr.msk.f32.gmra.mrb[10].mxu1 %vm1125_vm4, %v4055_v0  ;;  %v1428_v6 = vpop.permute.xlu1 %1427 }
 0x553   : > { %2558 = vmatprep.mubr.msk.f32.mxu1 %vm993_vm1, %v1420_v1 }
 0x554   : > { %2668 = vmatpush3.bf16.xpose.msk.msra.mxu1 %vm3875_vm2, %v2663_v3 }
 0x55b   : > { %2559 = vmatmul.mubr.msk.f32.vlgmr.msra.gmra.mrb[12].mxu1 %vm993_vm1, %v1422_v13 }
 0x55c   : > { %2561 = vmatprep.mubr.msk.f32.mxu1 %vm993_vm1, %v1424_v7 }
 0x55f   : > { %2562 = vmatmul.mubr.msk.f32.gmra.mrb[14].mxu1 %vm993_vm1, %v1426_v62  ;;  %v1151_v62 = vsub.f32 %v3971_v48, %v3976_v50 }
 0x560   : > { %2564 = vmatprep.mubr.msk.f32.mxu1 %vm993_vm1, %v1428_v6 }
 0x561   : > { %v1158_v6 = vmul.f32 1.442695, %v1151_v62  ;;  %v1234_v62 = vsel %vm1125_vm4, %v4049_v41, 0.0 }
 0x563   : > { %2565 = vmatmul.mubr.msk.f32.gmra.mrb[16].mxu1 %vm993_vm1, %v1430_v9 }
 0x60e   : > { %v4067_v10 = vpop.f32.mrb[6].mxu1 }
 0x60f   : > { %v4069_v11 = vpop.f32.mrb[7].mxu1 }
 0x61e   : > { %v4071_v4 = vpop.f32.mrb[8].mxu1 }
 0x61f   : > { %v4073_v14 = vpop.f32.mrb[9].mxu1 }
 0x625   : > { %v4075_v15 = vpop.f32.mrb[10].mxu1 }
 0x626   : > { %v4077_v16 = vpop.f32.mrb[11].mxu1 }
 0x62e   : > { %v4079_v17 = vpop.f32.mrb[12].mxu1 }
 0x62f   : > { %v4081_v18 = vpop.f32.mrb[13].mxu1  ;;  %v1565_v19 = vsel %vm1125_vm4, %v4079_v17, -inf }
 0x630   : > { %1566 = vmax.xlane.f32.xlu0 %v1565_v19  ;;  %v1562_v20 = vsel %vm1125_vm4, %v4081_v18, -inf }
 0x631   : > { %1563 = vmax.xlane.f32.xlu1 %v1562_v20  ;;  %v1152_v20 = vsub.f32 %v3994_v2, %v3999_v58 }
 0x632   : > { %v4087_v21 = vpop.f32.mrb[14].mxu1 }
 0x633   : > { %v4089_v22 = vpop.f32.mrb[15].mxu1  ;;  %v1571_v23 = vsel %vm1125_vm4, %v4087_v21, -inf }
 0x634   : > { %v1568_v24 = vsel %vm1125_vm4, %v4089_v22, -inf }
 0x635   : > { %1572 = vmax.xlane.f32.xlu1 %v1571_v23  ;;  %1569 = vmax.xlane.f32.xlu0 %v1568_v24  ;;  %v1222_v23 = vsel %vm1125_vm4, %v4021_v26, 0.0  ;;  %v1228_v26 = vsel %vm1125_vm4, %v4037_v57, 0.0 }
 0x636   : > { %v4095_v25 = vpop.f32.mrb[16].mxu1 }
 0x637   : > { %v4097_v27 = vpop.f32.mrb[17].mxu1  ;;  %v1577_v36 = vsel %vm1125_vm4, %v4095_v25, -inf }
 0x638   : > { %v1574_v30 = vsel %vm1125_vm4, %v4097_v27, -inf }
 0x639   : > { %1578 = vmax.xlane.f32.xlu1 %v1577_v36  ;;  %1575 = vmax.xlane.f32.xlu0 %v1574_v30  ;;  %v1231_v36 = vsel %vm1125_vm4, %v4039_v60, 0.0 }
 0x6bd   : > { %v1567_v32 = vpop.xlane.xlu0 %1566 }
 0x6be   : > { %v1581_v33 = vmax.f32 %v3971_v48, %v1567_v32  ;;  %v1564_v34 = vpop.xlane.xlu1 %1563 }
 0x6bf   : > { %v1580_v35 = vmax.f32 %v3973_v49, %v1564_v34 }
 0x6c0   : > { %v1893_v38 = vsel %vm1885_vm5, %v3976_v50, %v1581_v33  ;;  %1611 = vperm.xlu1 %2871, %v1581_v33   ;;  %v1587_v9 = vsub.f32 %v3971_v48, %v1581_v33 }
 0x6c1   : > { %1900 = vst.msk [vmem:[#allocation3 + $0x8] sm:$0xff] %vm723_vm3, %v1893_v38  ;;  %v1892_v37 = vsel %vm1885_vm5, %v3979_v52, %v1580_v35  ;;  %1606 = vperm.xlu0 %2870, %v1580_v35   ;;  %v1586_v13 = vsub.f32 %v3973_v49, %v1580_v35 }
 0x6c2   : > { %1899 = vst.msk [vmem:[#allocation3] sm:$0xff] %vm723_vm3, %v1892_v37  ;;  %v1573_v40 = vpop.xlane.xlu1 %1572  ;;  %v1570_v46 = vpop.xlane.xlu0 %1569  ;;  %v1594_v19 = vmul.f32 1.442695, %v1587_v9 }
 0x6c3   : > { %v4114_v43 = vmax.f32 %v3987_v53, %v1573_v40  ;;  %v1582_v39 = vmax.f32 %v3994_v2, %v1570_v46  ;;  %v1592_v7 = vmul.f32 1.442695, %v1586_v13 }
 0x6c5   : > { %v1895_v44 = vsel %vm1885_vm5, %v3992_v55, %v4114_v43  ;;  %1621 = vperm.xlu1 %2871, %v4114_v43   ;;  %2887 = vset.pattern.permute.xlu0 %v3332_v45  ;;  %v1894_v47 = vsel %vm1885_vm5, %v3999_v58, %v1582_v39  ;;  %2941 = vpow2.f32 %v1592_v7  ;;  %v1588_v48 = vsub.f32 %v3994_v2, %v1582_v39 }
 0x6c6   : > { %1902 = vst.msk [vmem:[#allocation3 + $0x18] sm:$0xff] %vm723_vm3, %v1895_v44  ;;  %v1579_v56 = vpop.xlane.xlu1 %1578  ;;  %v1576_v51 = vpop.xlane.xlu0 %1575  ;;  %1901 = vst.msk [vmem:[#allocation3 + $0x10] sm:$0xff] %vm723_vm3, %v1894_v47  ;;  %2943 = vpow2.f32 %v1158_v6  ;;  %v1153_v58 = vsub.f32 %v3987_v53, %v3992_v55 }
 0x6c7   : > { %v4127_v54 = vmax.f32 %v4008_v63, %v1579_v56  ;;  %v4130_v42 = vmax.f32 %v4001_v59, %v1576_v51  ;;  %2945 = vpow2.f32 %v1594_v19 }
 0x6c9   : > { %v1897_v3 = vsel %vm1885_vm5, %v4012_v12, %v4127_v54  ;;  %1616 = vperm.xlu1 %2871, %v1582_v39   ;;  %v1896_v1 = vsel %vm1885_vm5, %v4006_v61, %v4130_v42 }
 0x6ca   : > { %1904 = vst.msk [vmem:[#allocation3 + $0x28] sm:$0xff] %vm723_vm3, %v1897_v3  ;;  %1903 = vst.msk [vmem:[#allocation3 + $0x20] sm:$0xff] %vm723_vm3, %v1896_v1 }
 0x6cd   : > { %1631 = vperm.xlu1 %2871, %v4127_v54  }
 0x6cf   : > { %v4153_v50 = vpop.eup %2941 }
 0x6d0   : > { %v4159_v24 = vpop.eup %2943 }
 0x6d1   : > { %1626 = vperm.xlu1 %2871, %v4130_v42   ;;  %v4167_v2 = vpop.eup %2945 }
 0x6d5   : > { %2873 = vrot.lane.b32.xlu1 %v3879_v5, %s3337_s17  ;;  %v1160_v5 = vmul.f32 1.442695, %v1152_v20 }
 0x6d7   : > { %2947 = vpow2.f32 %v1160_v5 }
 0x6d9   : > { %2878 = vrot.lane.b32.xlu1 %v3885_v8, %s3337_s17  ;;  %v1225_v8 = vsel %vm1125_vm4, %v4028_v29, 0.0  ;;  %v1162_v29 = vmul.f32 1.442695, %v1153_v58 }
 0x6dd   : > { %2883 = vrot.lane.b32.xlu1 %v3893_v28, %s3337_s17  ;;  %v1596_v28 = vmul.f32 1.442695, %v1588_v48 }
 0x6df   : > { %2949 = vpow2.f32 %v1596_v28 }
 0x6e0   : > { %1223 = vadd.xlane.f32.xlu0 %v1222_v23  ;;  %2951 = vpow2.f32 %v1162_v29 }
 0x6e1   : > { %1684 = vperm.xlu1 %2871, %v4153_v50   ;;  %v4173_v30 = vpop.eup %2947 }
 0x6e4   : > { %1226 = vadd.xlane.f32.xlu0 %v1225_v8 }
 0x6e5   : > { %2888 = vset.pattern.permute.xlu1 %v3332_v45 }
 0x6e6   : > { %1253 = vperm.xlu1 %2888, %v4159_v24  }
 0x6e8   : > { %1229 = vadd.xlane.f32.xlu0 %v1228_v26  ;;  %v1150_v26 = vsub.f32 %v3973_v49, %v3979_v52  ;;  %v1589_v49 = vsub.f32 %v3987_v53, %v4114_v43  ;;  %v1590_v53 = vsub.f32 %v4001_v59, %v4130_v42 }
 0x6e9   : > { %v4177_v55 = vpop.eup %2949 }
 0x6ea   : > { %2889 = vset.pattern.permute.xlu1 %v3336_v31  ;;  %v4181_v57 = vpop.eup %2951 }
 0x6eb   : > { %1689 = vperm.xlu1 %2889, %v4167_v2  }
 0x6ec   : > { %1232 = vadd.xlane.f32.xlu0 %v1231_v36 }
 0x6ef   : > { %2890 = vset.pattern.permute.xlu1 %v3332_v45 }
 0x6f0   : > { %1258 = vperm.xlu1 %2890, %v4173_v30  }
 0x6f4   : > { %2891 = vset.pattern.permute.xlu1 %v3336_v31 }
 0x6f5   : > { %1694 = vperm.xlu1 %2891, %v4177_v55  }
 0x6f9   : > { %2892 = vset.pattern.permute.xlu1 %v3332_v45 }
 0x6fa   : > { %1263 = vperm.xlu1 %2892, %v4181_v57  }
 0x6fe   : > { %2893 = vset.pattern.permute.xlu1 %v3336_v31 }
 0x73f   : > { %v1612_v60 = vpop.permute.xlu1 %1611 }
 0x740   : > { %v1635_v32 = vsub.f32 %v4079_v17, %v1612_v60  ;;  %v1607_v33 = vpop.permute.xlu0 %1606 }
 0x741   : > { %v1634_v34 = vsub.f32 %v4081_v18, %v1607_v33 }
 0x742   : > { %v1642_v35 = vmul.f32 1.442695, %v1635_v32 }
 0x743   : > { %v1640_v38 = vmul.f32 1.442695, %v1634_v34  ;;  %v1156_v34 = vmul.f32 1.442695, %v1150_v26 }
 0x744   : > { %2953 = vpow2.f32 %v1642_v35  ;;  %v1622_v37 = vpop.permute.xlu1 %1621  ;;  %v1154_v35 = vsub.f32 %v4001_v59, %v4006_v61  ;;  %v1591_v61 = vsub.f32 %v4008_v63, %v4127_v54  ;;  %v1600_v54 = vmul.f32 1.442695, %v1590_v53 }
 0x745   : > { %2955 = vpow2.f32 %v1640_v38  ;;  %v1637_v40 = vsub.f32 %v4087_v21, %v1622_v37  ;;  %v1155_v59 = vsub.f32 %v4008_v63, %v4012_v12 }
 0x747   : > { %v1646_v46 = vmul.f32 1.442695, %v1637_v40  ;;  %v1164_v40 = vmul.f32 1.442695, %v1154_v35 }
 0x748   : > { %v1617_v39 = vpop.permute.xlu1 %1616 }
 0x749   : > { %2957 = vpow2.f32 %v1646_v46  ;;  %v1636_v44 = vsub.f32 %v4089_v22, %v1617_v39  ;;  %v4220_v46 = vld [vmem:[#allocation5 + $0x8] sm:$0xff]  ;;  %v1598_v39 = vmul.f32 1.442695, %v1589_v49 }
 0x74b   : > { %v1644_v47 = vmul.f32 1.442695, %v1636_v44 }
 0x74c   : > { %v1632_v56 = vpop.permute.xlu1 %1631 }
 0x74d   : > { %2959 = vpow2.f32 %v1644_v47  ;;  %v1639_v17 = vsub.f32 %v4095_v25, %v1632_v56  ;;  %v1602_v47 = vmul.f32 1.442695, %v1591_v61 }
 0x74e   : > { %v4191_v51 = vpop.eup %2953 }
 0x74f   : > { %v2956_v18 = vpop.eup %2955  ;;  %v1650_v3 = vmul.f32 1.442695, %v1639_v17  ;;  %v1661_v1 = vsel %vm1125_vm4, %v4191_v51, 0.0 }
 0x750   : > { %1662 = vadd.xlane.f32.xlu0 %v1661_v1  ;;  %v1627_v13 = vpop.permute.xlu1 %1626  ;;  %2579 = vmatprep.mubr.msk.f32.mxu0 %vm1125_vm4, %v2956_v18  ;;  %v1658_v21 = vsel %vm1125_vm4, %v2956_v18, 0.0  ;;  %v4238_v18 = vld [vmem:[#allocation5 + $0x10] sm:$0xff] }
 0x751   : > { %2961 = vpow2.f32 %v1650_v3  ;;  %v1638_v22 = vsub.f32 %v4097_v27, %v1627_v13  ;;  %1659 = vadd.xlane.f32.xlu1 %v1658_v21  ;;  %v1237_v27 = vsel %vm1125_vm4, %v4055_v0, 0.0 }
 0x753   : > { %v4198_v7 = vpop.eup %2957  ;;  %v1648_v25 = vmul.f32 1.442695, %v1638_v22 }
 0x754   : > { %1235 = vadd.xlane.f32.xlu0 %v1234_v62  ;;  %v2874_v6 = vpop.permute.xlu1 %2873  ;;  %v1667_v9 = vsel %vm1125_vm4, %v4198_v7, 0.0 }
 0x755   : > { %2963 = vpow2.f32 %v1648_v25  ;;  %v2876_v19 = vunpack.i.h.bf16 %v2874_v6  ;;  %v2875_v20 = vunpack.i.l.bf16 %v2874_v6  ;;  %1668 = vadd.xlane.f32.xlu1 %v1667_v9  ;;  %v982_v6 = vld [vmem:[#allocation4 + $0x8] sm:$0xff] }
 0x756   : > { %2965 = vpow2.f32 %v1156_v34 }
 0x757   : > { %v2960_v23 = vpop.eup %2959  ;;  %v2669_v5 = vpack.c.bf16 %v2876_v19, %v2875_v20  ;;  %2967 = vpow2.f32 %v1164_v40  ;;  %v981_v19 = vld [vmem:[#allocation4] sm:$0xff] }
 0x758   : > { %1238 = vadd.xlane.f32.xlu0 %v1237_v27  ;;  %v2879_v48 = vpop.permute.xlu1 %2878  ;;  %v1664_v8 = vsel %vm1125_vm4, %v2960_v23, 0.0  ;;  %2969 = vpow2.f32 %v1598_v39 }
 0x759   : > { %v2881_v28 = vunpack.i.h.bf16 %v2879_v48  ;;  %v2880_v41 = vunpack.i.l.bf16 %v2879_v48  ;;  %2670 = vmatprep.subr.bf16.mxu0 %v2669_v5  ;;  %2689 = vmatprep.subr.bf16.mxu1 %v2669_v5  ;;  %2971 = vpow2.f32 %v1602_v47 }
 0x75a   : > { %1665 = vadd.xlane.f32.xlu1 %v1664_v8  ;;  %2672 = vmatpush3.bf16.msra.mxu0 %v2669_v5  ;;  %2973 = vpow2.f32 %v1600_v54  ;;  %v1652_v8 = vmul.f32 %v4153_v50, %v981_v19 }
 0x75b   : > { %v2962_v58 = vpop.eup %2961  ;;  %v2673_v29 = vpack.c.bf16 %v2881_v28, %v2880_v41  ;;  %2692 = vmatpush3.bf16.msra.mxu1 %v2669_v5  ;;  %v1653_v5 = vmul.f32 %v4167_v2, %v982_v6  ;;  %v984_v41 = vld [vmem:[#allocation4 + $0x18] sm:$0xff] }
 0x75c   : > { %v2884_v36 = vpop.permute.xlu1 %2883  ;;  %v1673_v60 = vsel %vm1125_vm4, %v2962_v58, 0.0 }
 0x75d   : > { %v2886_v0 = vunpack.i.h.bf16 %v2884_v36  ;;  %v2885_v32 = vunpack.i.l.bf16 %v2884_v36  ;;  %2674 = vmatprep.subr.bf16.mxu0 %v2673_v29  ;;  %2690 = vmatprep.subr.bf16.mxu1 %v2673_v29 }
 0x75e   : > { %1674 = vadd.xlane.f32.xlu1 %v1673_v60  ;;  %2676 = vmatpush3.bf16.msra.mxu0 %v2673_v29 }
 0x75f   : > { %v2964_v33 = vpop.eup %2963  ;;  %v2677_v38 = vpack.c.bf16 %v2886_v0, %v2885_v32  ;;  %2693 = vmatpush3.bf16.msra.mxu1 %v2673_v29  ;;  %v1219_v0 = vmul.f32 %v4181_v57, %v984_v41  ;;  %v983_v32 = vld [vmem:[#allocation4 + $0x10] sm:$0xff] }
 0x760   : > { %2585 = vmatprep.mubr.msk.f32.mxu1 %vm1125_vm4, %v2964_v33  ;;  %v4215_v52 = vpop.permute.xlu1 %1684  ;;  %v1670_v37 = vsel %vm1125_vm4, %v2964_v33, 0.0  ;;  %v2966_v17 = vpop.eup %2965  ;;  %v1218_v49 = vmul.f32 %v4173_v30, %v983_v32  ;;  %v1654_v57 = vmul.f32 %v4177_v55, %v983_v32 }
 0x761   : > { %2678 = vmatprep.subr.bf16.mxu0 %v2677_v38  ;;  %2691 = vmatprep.subr.bf16.mxu1 %v2677_v38  ;;  %v1216_v27 = vmul.f32 %v2966_v17, %v981_v19  ;;  %v1999_v19 = vld [vmem:[#allocation17 + $0x8] sm:$0xff] }
 0x762   : > { %1671 = vadd.xlane.f32.xlu1 %v1670_v37  ;;  %2680 = vmatpush3.bf16.msra.mxu0 %v2677_v38  ;;  %v986_v37 = vld [vmem:[#allocation4 + $0x28] sm:$0xff] }
 0x763   : > { %2694 = vmatpush3.bf16.msra.mxu1 %v2677_v38 }
 0x765   : > { %v1254_v43 = vpop.permute.xlu1 %1253  ;;  %2580 = vmatmul.mubr.msk.f32.vlgmr.msra.gmra.mrb[12].mxu0 %vm1125_vm4, %v4191_v51  ;;  %v1166_v51 = vmul.f32 1.442695, %v1155_v59  ;;  %v985_v59 = vld [vmem:[#allocation4 + $0x20] sm:$0xff] }
 0x766   : > { %v1277_v44 = vmul.f32 %v1254_v43, %v4220_v46  ;;  %2586 = vmatmul.mubr.msk.f32.vlgmr.msra.gmra.mrb[18].mxu1 %vm1125_vm4, %v2962_v58  ;;  %2582 = vmatprep.mubr.msk.f32.mxu0 %vm1125_vm4, %v2960_v23  ;;  %v1217_v23 = vmul.f32 %v4159_v24, %v982_v6 }
 0x767   : > { %2975 = vpow2.f32 %v1166_v51 }
 0x768   : > { %v4230_v56 = vadd.f32 %v4067_v10, %v1277_v44  ;;  %v4241_v10 = vpop.eup %2967 }
 0x769   : > { %2583 = vmatmul.mubr.msk.f32.gmra.mrb[14].mxu0 %vm1125_vm4, %v4198_v7  ;;  %v2970_v13 = vpop.eup %2969  ;;  %v1220_v55 = vmul.f32 %v4241_v10, %v985_v59 }
 0x76a   : > { %v4236_v42 = vpop.permute.xlu1 %1689  ;;  %v2972_v12 = vpop.eup %2971  ;;  %v1655_v2 = vmul.f32 %v2970_v13, %v984_v41 }
 0x76b   : > { %v4247_v21 = vpop.eup %2973  ;;  %v1657_v47 = vmul.f32 %v2972_v12, %v986_v37 }
 0x76d   : > { %v1224_v7 = vpop.xlane.xlu0 %1223 }
 0x76e   : > { %1248 = vperm.xlu0 %2887, %v2966_v17   ;;  %v1240_v29 = vadd.f32 %v1224_v7, %v1216_v27  ;;  %v2001_v27 = vld [vmem:[#allocation17 + $0x18] sm:$0xff] }
 0x76f   : > { %v1259_v3 = vpop.permute.xlu1 %1258 }
 0x770   : > { %v1278_v1 = vmul.f32 %v1259_v3, %v4238_v18 }
 0x771   : > { %v2976_v22 = vpop.eup %2975  ;;  %v1227_v25 = vpop.xlane.xlu0 %1226 }
 0x772   : > { %v4244_v63 = vadd.f32 %v4073_v14, %v1278_v1  ;;  %1268 = vperm.xlu0 %2887, %v4241_v10   ;;  %v1241_v28 = vadd.f32 %v1227_v25, %v1217_v23  ;;  %v1221_v43 = vmul.f32 %v2976_v22, %v986_v37 }
 0x773   : > { %1699 = vperm.xlu1 %2893, %v2970_v13   ;;  %v1656_v13 = vmul.f32 %v4247_v21, %v985_v59 }
 0x774   : > { %v4252_v14 = vpop.permute.xlu1 %1694 }
 0x775   : > { %v1230_v62 = vpop.xlane.xlu0 %1229 }
 0x776   : > { %2895 = vset.pattern.permute.xlu0 %v3336_v31  ;;  %v1242_v61 = vadd.f32 %v1230_v62, %v1218_v49 }
 0x777   : > { %1704 = vperm.xlu1 %2893, %v4247_v21   ;;  %1709 = vperm.xlu0 %2895, %v2972_v12  }
 0x779   : > { %v1233_v9 = vpop.xlane.xlu0 %1232  ;;  %v4254_v20 = vpop.permute.xlu1 %1263 }
 0x77a   : > { %v1243_v33 = vadd.f32 %v1233_v9, %v1219_v0  ;;  %v1998_v9 = vld [vmem:[#allocation17] sm:$0xff] }
 0x77b   : > { %2894 = vset.pattern.permute.xlu1 %v3332_v45  ;;  %v2681_v23 = vpack.c.bf16 %v1999_v19, %v1998_v9  ;;  %v992_v19 = vld [vmem:[#allocation5 + $0x28] sm:$0xff] }
 0x77c   : > { %1273 = vperm.xlu1 %2894, %v2976_v22  }
 0x77d   : > { %2682 = vmatprep.subr.bf16.mxu0 %v2681_v23 }
 0x77e   : > { %2684 = vmatpush3.bf16.msra.mxu0 %v2681_v23 }
 0x7dd   : > { %v1663_v48 = vpop.xlane.xlu0 %1662 }
 0x7de   : > { %v1677_v58 = vadd.f32 %v1663_v48, %v1653_v5  ;;  %v1660_v26 = vpop.xlane.xlu1 %1659  ;;  %v2000_v5 = vld [vmem:[#allocation17 + $0x10] sm:$0xff] }
 0x7df   : > { %v1676_v36 = vadd.f32 %v1660_v26, %v1652_v8  ;;  %v2685_v48 = vpack.c.bf16 %v2001_v27, %v2000_v5 }
 0x7e0   : > { %v1887_v60 = vsel %vm1885_vm5, %v1241_v28, %v1677_v58 }
 0x7e1   : > { %1906 = vst.msk [vmem:[#allocation4 + $0x8] sm:$0xff] %vm723_vm3, %v1887_v60  ;;  %2977 = vrcp.f32 %v1887_v60  ;;  %v1886_v24 = vsel %vm1885_vm5, %v1240_v29, %v1676_v36  ;;  %v1236_v34 = vpop.xlane.xlu0 %1235  ;;  %2686 = vmatprep.subr.bf16.mxu0 %v2685_v48 }
 0x7e2   : > { %1905 = vst.msk [vmem:[#allocation4] sm:$0xff] %vm723_vm3, %v1886_v24  ;;  %2979 = vrcp.f32 %v1886_v24  ;;  %v1669_v50 = vpop.xlane.xlu1 %1668  ;;  %v1244_v7 = vadd.f32 %v1236_v34, %v1220_v55  ;;  %2688 = vmatpush3.bf16.msra.mxu0 %v2685_v48 }
 0x7e3   : > { %v1679_v35 = vadd.f32 %v1669_v50, %v1655_v2 }
 0x7e5   : > { %v1889_v38 = vsel %vm1885_vm5, %v1243_v33, %v1679_v35  ;;  %v1239_v53 = vpop.xlane.xlu0 %1238 }
 0x7e6   : > { %1908 = vst.msk [vmem:[#allocation4 + $0x18] sm:$0xff] %vm723_vm3, %v1889_v38  ;;  %2981 = vrcp.f32 %v1889_v38  ;;  %v1245_v51 = vadd.f32 %v1239_v53, %v1221_v43 }
 0x7e7   : > { %v1666_v40 = vpop.xlane.xlu1 %1665 }
 0x7e8   : > { %v1678_v39 = vadd.f32 %v1666_v40, %v1654_v57  ;;  %v990_v40 = vld [vmem:[#allocation5 + $0x18] sm:$0xff] }
 0x7ea   : > { %v1888_v44 = vsel %vm1885_vm5, %v1242_v61, %v1678_v39  ;;  %v1713_v61 = vmul.f32 %v4236_v42, %v4220_v46  ;;  %v987_v39 = vld [vmem:[#allocation5] sm:$0xff] }
 0x7eb   : > { %v2978_v54 = vpop.eup %2977  ;;  %1907 = vst.msk [vmem:[#allocation4 + $0x10] sm:$0xff] %vm723_vm3, %v1888_v44  ;;  %v1675_v17 = vpop.xlane.xlu1 %1674  ;;  %2983 = vrcp.f32 %v1888_v44  ;;  %v1279_v44 = vmul.f32 %v4254_v20, %v990_v40  ;;  %v1712_v59 = vmul.f32 %v4215_v52, %v987_v39  ;;  %v1714_v20 = vmul.f32 %v4252_v14, %v4238_v18 }
 0x7ec   : > { %v2980_v30 = vpop.eup %2979  ;;  %v1681_v3 = vadd.f32 %v1675_v17, %v1657_v47  ;;  %1933 = vperm.xlu1 %2894, %v2978_v54  }
 0x7ed   : > { %1963 = vperm.xlu0 %2895, %v2980_v30   ;;  %v1249_v24 = vpop.permute.xlu0 %1248  ;;  %v1416_v55 = vadd.f32 %v4071_v4, %v1279_v44 }
 0x7ee   : > { %v1891_v1 = vsel %vm1885_vm5, %v1245_v51, %v1681_v3  ;;  %v1276_v47 = vmul.f32 %v1249_v24, %v987_v39 }
 0x7ef   : > { %1910 = vst.msk [vmem:[#allocation4 + $0x28] sm:$0xff] %vm723_vm3, %v1891_v1  ;;  %v1672_v12 = vpop.xlane.xlu1 %1671 }
 0x7f0   : > { %v2982_v22 = vpop.eup %2981  ;;  %v1680_v25 = vadd.f32 %v1672_v12, %v1656_v13  ;;  %2896 = vset.pattern.permute.xlu1 %v3336_v31  ;;  %v1413_v46 = vadd.f32 %v4069_v11, %v1276_v47  ;;  %v991_v13 = vld [vmem:[#allocation5 + $0x20] sm:$0xff] }
 0x7f1   : > { %2898 = vset.pattern.permute.xlu0 %v3332_v45  ;;  %1967 = vperm.xlu1 %2896, %v2978_v54   ;;  %v1269_v50 = vpop.permute.xlu0 %1268 }
 0x7f2   : > { %v1890_v62 = vsel %vm1885_vm5, %v1244_v7, %v1680_v25  ;;  %1943 = vperm.xlu0 %2898, %v2982_v22   ;;  %v1280_v11 = vmul.f32 %v1269_v50, %v991_v13 }
 0x7f3   : > { %1909 = vst.msk [vmem:[#allocation4 + $0x20] sm:$0xff] %vm723_vm3, %v1890_v62  ;;  %2985 = vrcp.f32 %v1890_v62 }
 0x7f4   : > { %2987 = vrcp.f32 %v1891_v1  ;;  %v1417_v48 = vadd.f32 %v4077_v16, %v1280_v11 }
 0x7f5   : > { %2897 = vset.pattern.permute.xlu1 %v3332_v45  ;;  %v2984_v10 = vpop.eup %2983 }
 0x7f6   : > { %2901 = vset.pattern.permute.xlu0 %v3336_v31  ;;  %1928 = vperm.xlu1 %2897, %v2980_v30   ;;  %v1710_v33 = vpop.permute.xlu0 %1709 }
 0x7f7   : > { %1971 = vperm.xlu0 %2901, %v2984_v10  }
 0x7fa   : > { %2899 = vset.pattern.permute.xlu1 %v3336_v31 }
 0x7fb   : > { %1975 = vperm.xlu1 %2899, %v2982_v22   ;;  %2902 = vset.pattern.permute.xlu0 %v3332_v45 }
 0x7fd   : > { %v2986_v21 = vpop.eup %2985 }
 0x7fe   : > { %1948 = vperm.xlu0 %2902, %v2986_v21   ;;  %v2988_v6 = vpop.eup %2987 }
 0x7ff   : > { %2900 = vset.pattern.permute.xlu1 %v3332_v45 }
 0x800   : > { %1938 = vperm.xlu1 %2900, %v2984_v10  }
 0x802   : > { %2904 = vset.pattern.permute.xlu0 %v3336_v31 }
 0x804   : > { %1953 = vperm.xlu1 %2900, %v2988_v6  }
 0x808   : > { %2903 = vset.pattern.permute.xlu1 %v3336_v31  ;;  %v1700_v31 = vpop.permute.xlu1 %1699 }
 0x809   : > { %1979 = vperm.xlu1 %2903, %v2986_v21   ;;  %v1715_v17 = vmul.f32 %v1700_v31, %v990_v40 }
 0x80c   : > { %v1705_v29 = vpop.permute.xlu1 %1704 }
 0x80d   : > { %v1716_v10 = vmul.f32 %v1705_v29, %v991_v13 }
 0x810   : > { %v1274_v36 = vpop.permute.xlu1 %1273 }
 0x838   : > { %v2581_v8 = vpop.f32.mrb[12].mxu0 }
 0x839   : > { %v2587_v45 = vpop.f32.mrb[18].mxu1  ;;  %v1820_v28 = vpop.f32.mrb[13].mxu0  ;;  %1857 = vrot.lane.b32.xlu1 %v2581_v8, %s3338_s22  ;;  %v1281_v8 = vmul.f32 %v1274_v36, %v992_v19 }
 0x83a   : > { %v1840_v41 = vpop.f32.mrb[19].mxu1 }
 0x83b   : > { %v1418_v16 = vadd.f32 %v4075_v15, %v1281_v8  ;;  %v2377_v15 = vld [vmem:[#allocation18] ss:$0 sm:$0xff] }
 0x83c   : > { %v2584_v58 = vpop.f32.mrb[14].mxu0 }
 0x83d   : > { %v1830_v26 = vpop.f32.mrb[15].mxu0  ;;  %1861 = vrot.lane.b32.xlu0 %v2584_v58, %s3338_s22  ;;  %1855 = vrot.lane.b32.xlu1 %v1820_v28, %s3338_s22 }
 0x841   : > { %1983 = vperm.xlu0 %2904, %v2988_v6   ;;  %1859 = vrot.lane.b32.xlu1 %v1830_v26, %s3338_s22 }
 0x845   : > { %1863 = vrot.lane.b32.xlu1 %v1840_v41, %s3338_s22  ;;  %v1717_v41 = vmul.f32 %v1710_v33, %v992_v19 }
 0x849   : > { %1865 = vrot.lane.b32.xlu1 %v2587_v45, %s3338_s22 }
 0x86b   : > { %v1934_v60 = vpop.permute.xlu1 %1933 }
 0x86c   : > { %v1964_v34 = vpop.permute.xlu0 %1963 }
 0x870   : > { %v1968_v0 = vpop.permute.xlu1 %1967 }
 0x871   : > { %v1944_v38 = vpop.permute.xlu0 %1943 }
 0x875   : > { %v1929_v2 = vpop.permute.xlu1 %1928 }
 0x876   : > { %v1972_v57 = vpop.permute.xlu0 %1971 }
 0x87a   : > { %v1976_v32 = vpop.permute.xlu1 %1975 }
 0x87d   : > { %v1949_v53 = vpop.permute.xlu0 %1948 }
 0x87f   : > { %v1939_v35 = vpop.permute.xlu1 %1938 }
 0x883   : > { %v4285_v49 = vpop.permute.xlu1 %1953 }
 0x888   : > { %v1980_v37 = vpop.permute.xlu1 %1979 }
 0x8ab   : > { %v1858_v43 = vpop.permute.xlu1 %1857 }
 0x8ac   : > { %v1874_v54 = vadd.f32 %v1858_v43, %v1713_v61 }
 0x8ae   : > { %v1880_v30 = vsel %vm993_vm1, %v4230_v56, %v1874_v54 }
 0x8af   : > { %1912 = vst.msk [vmem:[#allocation5 + $0x8] sm:$0xff] %vm490_vm0, %v1880_v30  ;;  %v1856_v51 = vpop.permute.xlu1 %1855  ;;  %v1862_v3 = vpop.permute.xlu0 %1861  ;;  %v1957_v12 = vmul.f32 %v1934_v60, %v1880_v30  ;;  %v1987_v52 = vmul.f32 %v1968_v0, %v1880_v30 }
 0x8b0   : > { %v1873_v42 = vadd.f32 %v1856_v51, %v1712_v59  ;;  %v1876_v1 = vadd.f32 %v1862_v3, %v1715_v17 }
 0x8b1   : > { %v1993_v9 = vsel %vm993_vm1, %v1957_v12, %v1987_v52 }
 0x8b2   : > { %v1879_v22 = vsel %vm993_vm1, %v1413_v46, %v1873_v42  ;;  %v1882_v56 = vsel %vm993_vm1, %v1416_v55, %v1876_v1 }
 0x8b3   : > { %1911 = vst.msk [vmem:[#allocation5] sm:$0xff] %vm490_vm0, %v1879_v22  ;;  %v1956_v7 = vmul.f32 %v1929_v2, %v1879_v22  ;;  %v1986_v25 = vmul.f32 %v1964_v34, %v1879_v22  ;;  %1914 = vst.msk [vmem:[#allocation5 + $0x18] sm:$0xff] %vm490_vm0, %v1882_v56  ;;  %v1860_v4 = vpop.permute.xlu1 %1859  ;;  %v1959_v18 = vmul.f32 %v1944_v38, %v1882_v56 }
 0x8b4   : > { %v1875_v62 = vadd.f32 %v1860_v4, %v1714_v20  ;;  %v1989_v14 = vmul.f32 %v1976_v32, %v1882_v56 }
 0x8b5   : > { %v1992_v21 = vsel %vm993_vm1, %v1956_v7, %v1986_v25 }
 0x8b6   : > { %v1881_v6 = vsel %vm993_vm1, %v4244_v63, %v1875_v62  ;;  %2596 = vmatprep.mubr.msk.f32.mxu0 %vm490_vm0, %v1992_v21  ;;  %v1995_v58 = vsel %vm993_vm1, %v1959_v18, %v1989_v14 }
 0x8b7   : > { %1913 = vst.msk [vmem:[#allocation5 + $0x10] sm:$0xff] %vm490_vm0, %v1881_v6  ;;  %v1958_v23 = vmul.f32 %v1939_v35, %v1881_v6  ;;  %v1988_v5 = vmul.f32 %v1972_v57, %v1881_v6  ;;  %v1864_v27 = vpop.permute.xlu1 %1863  ;;  %2597 = vmatmul.mubr.msk.f32.vlgmr.msra.gmra.mrb[16].mxu0 %vm490_vm0, %v1993_v9 }
 0x8b8   : > { %v1877_v45 = vadd.f32 %v1864_v27, %v1716_v10 }
 0x8b9   : > { %v1994_v28 = vsel %vm993_vm1, %v1958_v23, %v1988_v5 }
 0x8ba   : > { %v1883_v63 = vsel %vm993_vm1, %v1417_v48, %v1877_v45  ;;  %2599 = vmatprep.mubr.msk.f32.mxu0 %vm490_vm0, %v1994_v28 }
 0x8bb   : > { %1915 = vst.msk [vmem:[#allocation5 + $0x20] sm:$0xff] %vm490_vm0, %v1883_v63  ;;  %v1960_v26 = vmul.f32 %v1949_v53, %v1883_v63  ;;  %v1990_v31 = vmul.f32 %v1980_v37, %v1883_v63  ;;  %v1866_v29 = vpop.permute.xlu1 %1865  ;;  %2600 = vmatmul.mubr.msk.f32.gmra.mrb[18].mxu0 %vm490_vm0, %v1995_v58 }
 0x8bc   : > { %v1878_v36 = vadd.f32 %v1866_v29, %v1717_v41 }
 0x8bd   : > { %v1996_v60 = vsel %vm993_vm1, %v1960_v26, %v1990_v31 }
 0x8be   : > { %2602 = vmatprep.mubr.msk.f32.mxu0 %vm490_vm0, %v1996_v60  ;;  %v1884_v0 = vsel %vm993_vm1, %v1418_v16, %v1878_v36 }
 0x8bf   : > { %1916 = vst.msk [vmem:[#allocation5 + $0x28] sm:$0xff] %vm490_vm0, %v1884_v0  ;;  %v1961_v2 = vmul.f32 %v4285_v49, %v1884_v0 }
 0x8c0   : > { %v1984_v24 = vpop.permute.xlu0 %1983 }
 0x8c1   : > { %v1991_v50 = vmul.f32 %v1984_v24, %v1884_v0 }
 0x8c3   : > { %v1997_v32 = vsel %vm993_vm1, %v1961_v2, %v1991_v50 }
 0x8c4   : > { %2603 = vmatmul.mubr.msk.f32.gmra.mrb[20].mxu0 %vm490_vm0, %v1997_v32 }
 0x98a   : > { %v2598_v33 = vpop.f32.mrb[16].mxu0 }
 0x98b   : > { %v2099_v34 = vadd.f32 %v2598_v33, %v2377_v15  ;;  %v2093_v35 = vpop.f32.mrb[17].mxu0 }
 0x98c   : > { %v2094_v38 = vadd.f32 %v2377_v15, %v2093_v35 }
 0x98d   : > { %2123 = vst.msk [vmem:[%s471_s2 + $0x8] sm:$0xff] %vm490_vm0, %v2099_v34 }
 0x98e   : > { %2122 = vst.msk [vmem:[%s471_s2] sm:$0xff] %vm490_vm0, %v2094_v38  ;;  %v2601_v57 = vpop.f32.mrb[18].mxu0 }
 0x98f   : > { %v2109_v37 = vadd.f32 %v2601_v57, %v2377_v15  ;;  %v2103_v49 = vpop.f32.mrb[19].mxu0 }
 0x990   : > { %v2104_v40 = vadd.f32 %v2377_v15, %v2103_v49 }
 0x991   : > { %2125 = vst.msk [vmem:[%s471_s2 + $0x18] sm:$0xff] %vm490_vm0, %v2109_v37 }
 0x992   : > { %2124 = vst.msk [vmem:[%s471_s2 + $0x10] sm:$0xff] %vm490_vm0, %v2104_v40 }
 0x997   : > { %v2604_v61 = vpop.f32.mrb[20].mxu0 }
 0x998   : > { %v2119_v39 = vadd.f32 %v2604_v61, %v2377_v15  ;;  %v2113_v53 = vpop.f32.mrb[21].mxu0 }
 0x999   : > { %v2114_v43 = vadd.f32 %v2377_v15, %v2113_v53 }
 0x99a   : > { %2127 = vst.msk [vmem:[%s471_s2 + $0x28] sm:$0xff] %vm490_vm0, %v2119_v39 }
 0x99b   : > { %2126 = vst.msk [vmem:[%s471_s2 + $0x20] sm:$0xff] %vm490_vm0, %v2114_v43 }
 0x99c   : > { %3230 = shalt.err (!%p3227_p4)
}
 0x99d   : > { %s3231_s5 = scalar_lea.hbm %s4335_s1, 768  ;;  %s3235_s11 = scalar_lea.hbm %s4441_s13, 1536 }
 0x99e   : > { %p3232_p8 = scmp.ne.s32.totalorder %s4335_s1, %s3231_s5  ;;  %p3236_p1 = scmp.lt.u32.totalorder %s4335_s1, %s4441_s13 }
 0x99f   : > { %p3237_p3 = scmp.lt.u32.totalorder %s3235_s11, %s3231_s5  ;;  %p3239_p11 = scmp.lt.u32.totalorder %s3231_s5, %s4335_s1 }
 0x9a0   : > { %p3233_p9 = pnand %p3232_p8, %p4442_p0 }
 0x9a1   : > { %p3238_p12 = por %p3237_p3, %p3236_p1 }
 0x9a2   : > { %p3234_p6 = pneg %p3233_p9 }
 0x9a3   : > { %p3240_p10 = por %p3239_p11, %p3238_p12 }
 0x9a5   : > { %p3241_p13 = pnand %p3240_p10, %p3234_p6 }
 0x9a7   : > { %3244 = shalt.err (!%p3241_p13)
}
 0x9a8   : > { %s3340_s22 = smov 128   ;;  %s3341_s2 = smov 8  }
 0x9a9   : > { %2726 = dma.vmem_to_hbm [thread:$0]  (%p4442_p0), %s4330_s19, 768, %s4335_s1, %s2129_s23, %s3340_s22, %s3340_s22, %s3341_s2  }
 0x9aa PF: > { %s2158_s24 = sand.u32 1, %s3299_s27   ;;  %p4443_p2 = scmp.ne.s32.totalorder %s4423_s14, 0 }
 0x9ab   : > { %p4444_p7 = scmp.ge.s32.totalorder %s3319_s10, 2  ;;  %s2159_s8 = scalar_lea.sflag [#allocation8], %s2158_s24 }
 0x9ad   : > { %p2755_p5 = pnand %p4444_p7, %p4443_p2 }
 0x9af   : > { %3294 = dma.done.wait (!%p2755_p5), %s2159_s8, 768  }
 0x9b0   : > { %3296 = vsyncadd (!%p2755_p5), %s2159_s8, 4294966528  ;;  %s30_s10 = sadd.s32 1, %s3319_s10   ;;  %s4445_s27 = smov %s3303_s28 }
 0x9b1   : > { %p27_p4 = scmp.ge.s32.totalorder %s30_s10, 4   ;;  %s4446_s28 = smov %s3307_s29 }
 0x9b2   : > { %s4447_s29 = smov %s3597_s18  ;;  %s4448_s30 = smov %s3315_s9 }
 0x9b3   : > { %s4449_s9 = smov %s4451_s4  ;;  %29 = sbr.rel (!%p27_p4) target bundleno = 19 (0x13), region = 142 }
 0x9ba   :  { %2164 = vsyncpa [#allocation7], 1 }
 0x9bb   :  { %2166 = vsyncpa [#allocation7 + $0x1], 1 }
 0x9bc   :  { %2167 = vsyncpa [#allocation10], 1 }
 0x9bd   :  { %2168 = vsyncpa [#allocation13], 1 }
 0x9be   :  { %2170 = vsyncpa [#allocation13 + $0x1], 1 }
 0x9bf   :  { %2171 = vsyncpa [#allocation16], 1 }
 0x9c0   :  { %2172 = vsyncpa [#allocation19], 1 }
 0x9c1   :  { %2173 = vsyncpa [#allocation8], 1 }
 0x9c2   :  { %2175 = vsyncpa [#allocation8 + $0x1], 1 }

// kernel: basic_dr_transformer_block.5
= control target key start
LH: loop header
LB: loop body
LE: loop exit
PB: predicated region body
PF: predicated region fallthrough
CT: control target
= control target key end

     0   :  { %s6753_s0 = inlined_call_operand.hbm [shape: f32[96,32], index: 0, kind: input, shape index: {}, may-alias: {0,3}]   ;;  %s6754_s1 = inlined_call_operand.hbm [shape: f32[1,32], index: 1, kind: input, shape index: {}]   ;;  %s6755_s2 = inlined_call_operand.hbm [shape: f32[1,32], index: 2, kind: input, shape index: {}]   ;;  %s6756_s3 = inlined_call_operand.hbm [shape: f32[96,32], index: 3, kind: input, shape index: {}, may-alias: {0,3}]   ;;  %s6757_s4 = inlined_call_operand.hbm [shape: f32[32,64], index: 4, kind: input, shape index: {}]   ;;  %s6758_s5 = inlined_call_operand.hbm [shape: f32[32,96], index: 5, kind: input, shape index: {}]   ;;  %s6759_s6 = inlined_call_operand.hbm [shape: f32[96,32], index: 6, kind: input, shape index: {}, may-alias: {6,7}]   ;;  %s6760_s7 = inlined_call_operand.hbm [shape: f32[96,32], index: 7, kind: input, shape index: {}, may-alias: {6,7}]   ;;  %s6761_s8 = inlined_call_operand.hbm [shape: f32[32,32], index: 8, kind: input, shape index: {}]   ;;  %s6762_s9 = inlined_call_operand.hbm [shape: f32[1,32], index: 9, kind: input, shape index: {}]   ;;  %s6763_s10 = inlined_call_operand.hbm [shape: f32[96,32], index: 10, kind: output, shape index: {}]  }
   0x1   :  { %6798 = sst [smem:[#allocation42_spill]] %s6753_s0 }
   0x2   :  { %6799 = sst [smem:[#allocation43_spill]] %s6754_s1 }
   0x3   :  { %6800 = sst [smem:[#allocation44_spill]] %s6756_s3 }
   0x4   :  { %6801 = sst [smem:[#allocation45_spill]] %s6757_s4 }
   0x5   :  { %6802 = sst [smem:[#allocation46_spill]] %s6758_s5 }
   0x6   :  { %6803 = sst [smem:[#allocation47_spill]] %s6760_s7 }
   0x7   :  { %6804 = sst [smem:[#allocation48_spill]] %s6763_s10 }
   0x8   :  { %15 = vsyncpa [#allocation7], 0 }
   0x9   :  { %17 = vsyncpa [#allocation7 + $0x1], 0 }
   0xa   :  { %18 = vsyncpa [#allocation10], 0 }
   0xb   :  { %19 = vsyncpa [#allocation13], 0 }
   0xc   :  { %21 = vsyncpa [#allocation13 + $0x1], 0 }
   0xd   :  { %22 = vsyncpa [#allocation16], 0 }
   0xe   :  { %23 = vsyncpa [#allocation21], 0 }
   0xf   :  { %24 = vsyncpa [#allocation8], 0 }
  0x10   :  { %26 = vsyncpa [#allocation8 + $0x1], 0  ;;  %s5052_s13 = smov 0   ;;  %s5054_s14 = smov 0  }
  0x11   :  { %s5056_s15 = smov 0   ;;  %s5058_s16 = smov 0  }
  0x12   :  { %s5060_s17 = smov 0   ;;  %s5062_s18 = smov 0  }
  0x13 LB: > { %6805 = sst [smem:[#allocation33_spill]] %s4944_s13  ;;  %s4966_s19 = smov [#allocation14]   ;;  %s4964_s18 = sphi %s5062_s18, %s32_s18   ;;  %s4960_s17 = sphi %s5060_s17, %s6884_s17   ;;  %s4956_s16 = sphi %s5058_s16, %s6883_s16   ;;  %s4952_s15 = sphi %s5056_s15, %s6882_s15   ;;  %s4948_s14 = sphi %s5054_s14, %s6886_s14   ;;  %s4944_s13 = sphi %s5052_s13, %s6885_s13  }
  0x14   : > { %6806 = sst [smem:[#allocation34_spill]] %s4952_s15  ;;  %s356_s20 = sshll.u32 %s4966_s19, 4  ;;  %s5088_s20 = int_to_ptr.vmem [resolvable:$true] %s356_s20 }
  0x15   : > { %6807 = sst [smem:[#allocation35_spill]] %s4956_s16  ;;  %s5083_s21 = sadd.s32 4294967295, %s4964_s18  }
  0x16   : > { %6808 = sst [smem:[#allocation36_spill]] %s4960_s17  ;;  %p3869_p0 = scmp.ge.s32.totalorder %s4964_s18, 1 }
  0x17   : > { %6809 = sst [smem:[#allocation37_spill]] %s4964_s18  ;;  %p6767_p1 = scmp.eq.s32.totalorder %s5083_s21, 0 }
  0x18   : > { %p322_p2 = scmp.lt.s32.totalorder %s4964_s18, 4  ;;  %s4967_s24 = smov [#allocation9]  }
  0x19   : > { %s335_s25 = sshll.u32 %s4967_s24, 4  ;;  %s4968_s26 = smov [#allocation15]   ;;  %s5102_s25 = int_to_ptr.vmem [resolvable:$true] %s335_s25 }
  0x1a   : > { %p5090_p3 = pnand %p3869_p0, %p322_p2  ;;  %s5104_s27 = sshll.u32 %s4968_s26, 4  ;;  %s370_s27 = int_to_ptr.vmem [resolvable:$true] %s5104_s27 }
  0x1b   : > { %s6813_s4 = sld [smem:[#allocation45_spill]] }
  0x1c   : > { %s6810_s22 = scalar_select %p5090_p3, 1, 0 }
  0x1d   : > { %p4302_p4 = pneg %p5090_p3 }
  0x1e   : > { %6811 = sst [smem:[#allocation38_spill]] %s6810_s22 }
  0x1f   : > { %p5098_p5 = pnand %p4302_p4, %p6767_p1 }
  0x21   : > { %s6812_s23 = scalar_select %p5098_p5, 1, 0 }
  0x22   : > { %s4562_s30 = scalar_lea.hbm %s6813_s4, 512  ;;  %p5114_p7 = pneg %p5098_p5 }
  0x23   : > { %p4563_p6 = scmp.ne.s32.totalorder %s6813_s4, %s4562_s30  ;;  %p4569_p10 = scmp.lt.u32.totalorder %s4562_s30, %s6813_s4 }
  0x24   : > { %s6814_s19 = scalar_select %p5114_p7, 1, 0 }
  0x25   : > { %p4565_p8 = pnand %p5114_p7, %p4563_p6 }
  0x27   : > { %p4566_p9 = pneg %p4565_p8 }
  0x29   : > { %p4571_p11 = pnand %p4569_p10, %p4566_p9 }
  0x2b   : > { %4574 = shalt.err (!%p4571_p11)
}
  0x2c   : > { %s4575_s28 = scalar_lea.vmem %s5088_s20, 512  ;;  %p4583_p2 = scmp.lt.s32.totalorder %s5088_s20, %s5088_s20 }
  0x2d   : > { %p4576_p12 = scmp.ne.s32.totalorder %s5088_s20, %s4575_s28  ;;  %p4584_p4 = scmp.lt.s32.totalorder %s4575_s28, %s4575_s28 }
  0x2f   : > { %p4578_p13 = pnand %p4576_p12, %p5114_p7  ;;  %p4585_p6 = por %p4584_p4, %p4583_p2 }
  0x31   : > { %p4579_p0 = pneg %p4578_p13 }
  0x33   : > { %p4586_p8 = pnand %p4585_p6, %p4579_p0 }
  0x35   : > { %4589 = shalt.err (!%p4586_p8)
}
  0x36   : > { %s6769_s29 = smov 128   ;;  %s6771_s30 = smov 8  }
  0x37   : > { %4311 = dma.hbm_to_vmem [thread:$0]  (!%p5098_p5), %s6813_s4, 512, %s5088_s20, [#allocation13], %s6769_s29, %s6769_s29, %s6771_s30  }
  0x38   : > { %s6815_s1 = sld [smem:[#allocation43_spill]] }
  0x3e   : > { %s4590_s28 = scalar_lea.hbm %s6815_s1, 16 }
  0x3f   : > { %p4591_p9 = scmp.ne.s32.totalorder %s6815_s1, %s4590_s28  ;;  %p4597_p12 = scmp.lt.u32.totalorder %s4590_s28, %s6815_s1 }
  0x41   : > { %p4593_p10 = pnand %p4591_p9, %p5114_p7 }
  0x43   : > { %p4594_p11 = pneg %p4593_p10 }
  0x45   : > { %p4599_p13 = pnand %p4597_p12, %p4594_p11 }
  0x47   : > { %4602 = shalt.err (!%p4599_p13)
}
  0x48   : > { %s4603_s20 = scalar_lea.vmem %s5102_s25, 16  ;;  %s4610_s10 = scalar_lea.vmem %s5102_s25, 32 }
  0x49   : > { %p4604_p0 = scmp.ne.s32.totalorder %s5102_s25, %s4603_s20  ;;  %p4611_p6 = scmp.lt.s32.totalorder %s5102_s25, %s5102_s25 }
  0x4a   : > { %p4612_p8 = scmp.lt.s32.totalorder %s4610_s10, %s4603_s20 }
  0x4b   : > { %p4606_p2 = pnand %p4604_p0, %p5114_p7 }
  0x4c   : > { %p4613_p9 = por %p4612_p8, %p4611_p6 }
  0x4d   : > { %p4607_p4 = pneg %p4606_p2 }
  0x4f   : > { %p4614_p10 = pnand %p4613_p9, %p4607_p4 }
  0x51   : > { %4617 = shalt.err (!%p4614_p10)
}
  0x52   : > { %4305 = dma.hbm_to_vmem [thread:$0]  (!%p5098_p5), %s6815_s1, 16, %s5102_s25, [#allocation10]  }
  0x53   : > { %s6816_s5 = sld [smem:[#allocation46_spill]] }
  0x59   : > { %s4618_s12 = scalar_lea.hbm %s6816_s5, 512 }
  0x5a   : > { %p4619_p11 = scmp.ne.s32.totalorder %s6816_s5, %s4618_s12  ;;  %p4625_p0 = scmp.lt.u32.totalorder %s4618_s12, %s6816_s5 }
  0x5c   : > { %p4621_p12 = pnand %p4619_p11, %p5114_p7 }
  0x5e   : > { %p4622_p13 = pneg %p4621_p12 }
  0x60   : > { %p4627_p2 = pnand %p4625_p0, %p4622_p13 }
  0x62   : > { %4630 = shalt.err (!%p4627_p2)
}
  0x63   : > { %s4631_s10 = scalar_lea.vmem %s370_s27, 512  ;;  %p4639_p9 = scmp.lt.s32.totalorder %s370_s27, %s370_s27 }
  0x64   : > { %p4632_p4 = scmp.ne.s32.totalorder %s370_s27, %s4631_s10  ;;  %p4640_p10 = scmp.lt.s32.totalorder %s4631_s10, %s4631_s10 }
  0x66   : > { %p4634_p6 = pnand %p4632_p4, %p5114_p7  ;;  %p4641_p1 = por %p4640_p10, %p4639_p9 }
  0x68   : > { %p4635_p8 = pneg %p4634_p6 }
  0x6a   : > { %p4642_p3 = pnand %p4641_p1, %p4635_p8 }
  0x6c   : > { %4645 = shalt.err (!%p4642_p3)
}
  0x6d   : > { %4314 = dma.hbm_to_vmem [thread:$0]  (!%p5098_p5), %s6816_s5, 512, %s370_s27, [#allocation16], %s6769_s29, %s6769_s29, %s6771_s30  }
  0x6e   : > { %s3868_s16 = sadd.s32 4294967294, %s4964_s18   ;;  %s51_s22 = sadd.s32 1, %s4960_s17 }
  0x6f   : > { %s60_s11 = sadd.s32 1, %s4952_s15  ;;  %p53_p1 = scmp.ge.s32.totalorder %s51_s22, 3 }
  0x70   : > { %p67_p3 = scmp.ne.s32.totalorder %s4952_s15, %s4948_s14  ;;  %p68_p11 = scmp.eq.s32.totalorder %s4964_s18, 0 }
  0x71   : > { %p73_p12 = scmp.ne.s32.totalorder %s4948_s14, %s4944_s13  ;;  %s6888_s22 = smov (%p53_p1, %s51_s22), 0 }
  0x72   : > { %6817 = sst [smem:[#allocation39_spill]] %s6888_s22  ;;  %p5194_p13 = por %p68_p11, %p67_p3 }
  0x73   : > { %p6819_p0 = scmp.eq.s32.totalorder %s5083_s21, 0  ;;  %s57_s24 = ssub.s32 %s4960_s17, %s6888_s22 }
  0x74   : > { %p309_p4 = scmp.eq.s32.totalorder %s5083_s21, 2  ;;  %p58_p6 = scmp.eq.s32.totalorder %s57_s24, 0 }
  0x75   : > { %p5200_p2 = por %p6819_p0, %p73_p12  ;;  %p315_p8 = scmp.eq.s32.totalorder %s3868_s16, 2 }
  0x76   : > { %p5207_p9 = por %p309_p4, %p67_p3  ;;  %p4344_p10 = scmp.lt.s32.totalorder %s4964_s18, 3 }
  0x77   : > { %s6820_s27 = scalar_select %p5200_p2, 1, 0 }
  0x78   : > { %s6821_s26 = scalar_select %p5207_p9, 1, 0 }
  0x79   : > { %s5213_s28 = scalar_select %p58_p6, %s4952_s15, %s60_s11  }
  0x7a   : > { %p5215_p1 = por %p315_p8, %p73_p12  ;;  %s409_s25 = sand.u32 1, %s4952_s15  }
  0x7b   : > { %6822 = sst [smem:[#allocation40_spill]] %s5213_s28  ;;  %s5221_s7 = sshll.u32 %s409_s25, 5 }
  0x7c   : > { %s6823_s20 = scalar_select %p5215_p1, 1, 0 }
  0x7d   : > { %s5224_s29 = sshll.u32 %s4960_s17, 9  ;;  %s6825_s0 = sld [smem:[#allocation42_spill]] }
  0x7e   : > { %6824 = sst [smem:[#allocation41_spill]] %s6823_s20  ;;  %s411_s11 = scalar_lea.vmem [#allocation6], %s5221_s7 }
  0x7f   : > { %s419_s1 = sshll.u32 %s411_s11, 4  ;;  %p5235_p3 = pnand %p4344_p10, %p5194_p13  ;;  %s5239_s1 = int_to_ptr.vmem [resolvable:$true] %s419_s1 }
  0x80   : > { %s6827_s25 = sand.u32 1, %s4964_s18  }
  0x81   : > { %s6826_s10 = scalar_select %p5235_p3, 1, 0 }
  0x82   : > { %s5243_s4 = scalar_lea.sflag [#allocation7], %s6827_s25  ;;  %p5249_p12 = pneg %p5235_p3 }
  0x83   : > { %s5230_s30 = scalar_lea.hbm %s6825_s0, %s5224_s29  ;;  %s4651_s5 = scalar_lea.hbm %s6825_s0, 1536 }
  0x84   : > { %s4646_s16 = scalar_lea.hbm %s5230_s30, 512  ;;  %p4652_p4 = scmp.lt.u32.totalorder %s5230_s30, %s6825_s0 }
  0x85   : > { %p4647_p11 = scmp.ne.s32.totalorder %s5230_s30, %s4646_s16  ;;  %p4653_p6 = scmp.lt.u32.totalorder %s4651_s5, %s4646_s16 }
  0x86   : > { %s6828_s24 = scalar_select %p5249_p12, 1, 0 }
  0x87   : > { %p4649_p0 = pnand %p5249_p12, %p4647_p11  ;;  %p4654_p8 = por %p4653_p6, %p4652_p4 }
  0x88   : > { %p4655_p10 = scmp.lt.u32.totalorder %s4646_s16, %s5230_s30 }
  0x89   : > { %p4650_p13 = pneg %p4649_p0 }
  0x8a   : > { %p4656_p1 = por %p4655_p10, %p4654_p8 }
  0x8c   : > { %p4657_p9 = pnand %p4656_p1, %p4650_p13 }
  0x8e   : > { %4660 = shalt.err (!%p4657_p9)
}
  0x8f   : > { %s4661_s25 = scalar_lea.vmem %s5239_s1, 512  ;;  %s4971_s12 = smov [#allocation6]  }
  0x90   : > { %p4662_p11 = scmp.ne.s32.totalorder %s5239_s1, %s4661_s25  ;;  %s4666_s11 = sshll.u32 %s4971_s12, 4  ;;  %s4667_s11 = int_to_ptr.vmem [resolvable:$false] %s4666_s11 }
  0x91   : > { %s4668_s17 = scalar_lea.vmem %s4667_s11, 1024  ;;  %p4669_p5 = scmp.lt.s32.totalorder %s5239_s1, %s4667_s11 }
  0x92   : > { %p4664_p0 = pnand %p4662_p11, %p5249_p12  ;;  %p4670_p7 = scmp.lt.s32.totalorder %s4668_s17, %s4661_s25 }
  0x94   : > { %p4665_p2 = pneg %p4664_p0  ;;  %p4671_p4 = por %p4670_p7, %p4669_p5 }
  0x96   : > { %p4672_p6 = pnand %p4671_p4, %p4665_p2 }
  0x98   : > { %4675 = shalt.err (!%p4672_p6)
}
  0x99   : > { %s6829_s5 = smov 8   ;;  %s6830_s22 = smov 128  }
  0x9a   : > { %4324 = dma.hbm_to_vmem [thread:$0]  (!%p5235_p3), %s5230_s30, 512, %s5239_s1, %s5243_s4, %s6830_s22, %s6830_s22, %s6829_s5  }
  0x9b   : > { %s6831_s3 = sld [smem:[#allocation44_spill]]  ;;  %s433_s11 = scalar_lea.vmem [#allocation12], %s5221_s7 }
  0x9c   : > { %s441_s17 = sshll.u32 %s433_s11, 4  ;;  %s6832_s0 = sand.u32 1, %s4964_s18   ;;  %s5283_s17 = int_to_ptr.vmem [resolvable:$true] %s441_s17 }
  0x9d   : > { %s5287_s28 = scalar_lea.sflag [#allocation13], %s6832_s0 }
  0xa1   : > { %s5280_s25 = scalar_lea.hbm %s6831_s3, %s5224_s29  ;;  %s4681_s16 = scalar_lea.hbm %s6831_s3, 1536 }
  0xa2   : > { %s4676_s15 = scalar_lea.hbm %s5280_s25, 512  ;;  %p4682_p9 = scmp.lt.u32.totalorder %s5280_s25, %s6831_s3 }
  0xa3   : > { %p4677_p5 = scmp.ne.s32.totalorder %s5280_s25, %s4676_s15  ;;  %p4683_p1 = scmp.lt.u32.totalorder %s4681_s16, %s4676_s15 }
  0xa4   : > { %p4685_p8 = scmp.lt.u32.totalorder %s4676_s15, %s5280_s25 }
  0xa5   : > { %p4679_p7 = pnand %p4677_p5, %p5249_p12  ;;  %p4684_p13 = por %p4683_p1, %p4682_p9 }
  0xa7   : > { %p4680_p2 = pneg %p4679_p7  ;;  %p4686_p10 = por %p4685_p8, %p4684_p13 }
  0xa9   : > { %p4687_p11 = pnand %p4686_p10, %p4680_p2 }
  0xab   : > { %4690 = shalt.err (!%p4687_p11)
}
  0xac   : > { %s4691_s0 = scalar_lea.vmem %s5283_s17, 512  ;;  %s4972_s11 = smov [#allocation12]  }
  0xad   : > { %p4692_p0 = scmp.ne.s32.totalorder %s5283_s17, %s4691_s0  ;;  %s4696_s1 = sshll.u32 %s4972_s11, 4  ;;  %s4697_s1 = int_to_ptr.vmem [resolvable:$false] %s4696_s1 }
  0xae   : > { %s4698_s20 = scalar_lea.vmem %s4697_s1, 1024  ;;  %p4699_p5 = scmp.lt.s32.totalorder %s5283_s17, %s4697_s1 }
  0xaf   : > { %p4694_p4 = pnand %p4692_p0, %p5249_p12  ;;  %p4700_p7 = scmp.lt.s32.totalorder %s4698_s20, %s4691_s0 }
  0xb1   : > { %p4695_p6 = pneg %p4694_p4  ;;  %p4701_p9 = por %p4700_p7, %p4699_p5 }
  0xb3   : > { %p4702_p1 = pnand %p4701_p9, %p4695_p6 }
  0xb5   : > { %4705 = shalt.err (!%p4702_p1)
}
  0xb6   : > { %4327 = dma.hbm_to_vmem [thread:$0]  (!%p5235_p3), %s5280_s25, 512, %s5283_s17, %s5287_s28, %s6830_s22, %s6830_s22, %s6829_s5  }
  0xb7   : > { %s4973_s15 = smov [#allocation11]   ;;  %s4974_s16 = smov [#allocation19]  }
  0xb8   : > { %s346_s30 = sshll.u32 %s4973_s15, 4  ;;  %s382_s12 = sshll.u32 %s4974_s16, 4  ;;  %s347_s30 = int_to_ptr.vmem [resolvable:$true] %s346_s30  ;;  %s383_s12 = int_to_ptr.vmem [resolvable:$true] %s382_s12 }
  0xb9   : > { %s4706_s1 = scalar_lea.hbm %s6755_s2, 16  ;;  %p6833_p13 = scmp.ne.s32.totalorder %s6814_s19, 0 }
  0xba   : > { %p4707_p2 = scmp.ne.s32.totalorder %s6755_s2, %s4706_s1  ;;  %p4713_p11 = scmp.lt.u32.totalorder %s4706_s1, %s6755_s2 }
  0xbc   : > { %p4709_p8 = pnand %p4707_p2, %p6833_p13 }
  0xbe   : > { %p4710_p10 = pneg %p4709_p8 }
  0xc0   : > { %p4715_p0 = pnand %p4713_p11, %p4710_p10 }
  0xc2   : > { %4718 = shalt.err (!%p4715_p0)
}
  0xc3   : > { %s4719_s25 = scalar_lea.vmem %s347_s30, 16  ;;  %s4726_s17 = scalar_lea.vmem %s347_s30, 32 }
  0xc4   : > { %p4720_p4 = scmp.ne.s32.totalorder %s347_s30, %s4719_s25  ;;  %p4727_p7 = scmp.lt.s32.totalorder %s347_s30, %s347_s30 }
  0xc5   : > { %p4728_p9 = scmp.lt.s32.totalorder %s4726_s17, %s4719_s25 }
  0xc6   : > { %p4722_p6 = pnand %p4720_p4, %p6833_p13 }
  0xc7   : > { %p4729_p1 = por %p4728_p9, %p4727_p7 }
  0xc8   : > { %p4723_p5 = pneg %p4722_p6 }
  0xca   : > { %p4730_p3 = pnand %p4729_p1, %p4723_p5 }
  0xcc   : > { %4733 = shalt.err (!%p4730_p3)
}
  0xcd   : > { %p6834_p2 = scmp.ne.s32.totalorder %s6812_s23, 0  ;;  %s4734_s16 = scalar_lea.hbm %s6761_s8, 512 }
  0xce   : > { %p4735_p8 = scmp.ne.s32.totalorder %s6761_s8, %s4734_s16  ;;  %p4741_p3 = scmp.lt.u32.totalorder %s4734_s16, %s6761_s8 }
  0xcf   : > { %4308 = dma.hbm_to_vmem [thread:$0]  (!%p6834_p2), %s6755_s2, 16, %s347_s30, [#allocation10]  }
  0xd0   : > { %p4737_p10 = pnand %p4735_p8, %p6833_p13 }
  0xd2   : > { %p4738_p11 = pneg %p4737_p10 }
  0xd4   : > { %p4743_p0 = pnand %p4741_p3, %p4738_p11 }
  0xd6   : > { %4746 = shalt.err (!%p4743_p0)
}
  0xd7   : > { %s4747_s25 = scalar_lea.vmem %s383_s12, 512  ;;  %p4755_p7 = scmp.lt.s32.totalorder %s383_s12, %s383_s12 }
  0xd8   : > { %p4748_p4 = scmp.ne.s32.totalorder %s383_s12, %s4747_s25  ;;  %p4756_p9 = scmp.lt.s32.totalorder %s4747_s25, %s4747_s25 }
  0xda   : > { %p4750_p6 = pnand %p4748_p4, %p6833_p13  ;;  %p4757_p1 = por %p4756_p9, %p4755_p7 }
  0xdc   : > { %p4751_p5 = pneg %p4750_p6 }
  0xde   : > { %p4758_p12 = pnand %p4757_p1, %p4751_p5 }
  0xe0   : > { %4761 = shalt.err (!%p4758_p12)
}
  0xe1   : > { %4317 = dma.hbm_to_vmem [thread:$0]  (!%p6834_p2), %s6761_s8, 512, %s383_s12, [#allocation16], %s6830_s22, %s6830_s22, %s6829_s5  }
  0xe2   : > { %s4975_s3 = smov [#allocation20]   ;;  %s5357_s16 = scalar_lea.hbm %s6759_s6, %s5224_s29 }
  0xe3   : > { %s396_s15 = sshll.u32 %s4975_s3, 4  ;;  %s4762_s1 = scalar_lea.hbm %s6762_s9, 16  ;;  %s397_s15 = int_to_ptr.vmem [resolvable:$true] %s396_s15 }
  0xe4   : > { %p4763_p12 = scmp.ne.s32.totalorder %s6762_s9, %s4762_s1  ;;  %p4769_p11 = scmp.lt.u32.totalorder %s4762_s1, %s6762_s9 }
  0xe6   : > { %p4765_p8 = pnand %p4763_p12, %p6833_p13 }
  0xe8   : > { %p4766_p10 = pneg %p4765_p8 }
  0xea   : > { %p4771_p3 = pnand %p4769_p11, %p4766_p10 }
  0xec   : > { %4774 = shalt.err (!%p4771_p3)
}
  0xed   : > { %s4775_s17 = scalar_lea.vmem %s397_s15, 16  ;;  %s4782_s3 = scalar_lea.vmem %s397_s15, 32 }
  0xee   : > { %p4776_p0 = scmp.ne.s32.totalorder %s397_s15, %s4775_s17  ;;  %p4783_p5 = scmp.lt.s32.totalorder %s397_s15, %s397_s15 }
  0xef   : > { %p4784_p7 = scmp.lt.s32.totalorder %s4782_s3, %s4775_s17 }
  0xf0   : > { %p4778_p4 = pnand %p4776_p0, %p6833_p13 }
  0xf1   : > { %p4785_p9 = por %p4784_p7, %p4783_p5 }
  0xf2   : > { %p4779_p6 = pneg %p4778_p4 }
  0xf4   : > { %p4786_p1 = pnand %p4785_p9, %p4779_p6 }
  0xf6   : > { %4789 = shalt.err (!%p4786_p1)
}
  0xf7   : > { %4320 = dma.hbm_to_vmem [thread:$0]  (!%p6834_p2), %s6762_s9, 16, %s397_s15, [#allocation21]  }
  0xf8   : > { %s455_s19 = scalar_lea.vmem [#allocation17], %s5221_s7  ;;  %s6835_s20 = sld [smem:[#allocation47_spill]] }
  0xf9   : > { %s463_s11 = sshll.u32 %s455_s19, 4  ;;  %s4790_s23 = scalar_lea.hbm %s5357_s16, 512  ;;  %s5378_s11 = int_to_ptr.vmem [resolvable:$true] %s463_s11 }
  0xfa   : > { %p4791_p13 = scmp.ne.s32.totalorder %s5357_s16, %s4790_s23  ;;  %p6836_p12 = scmp.ne.s32.totalorder %s6828_s24, 0 }
  0xfb   : > { %s4795_s17 = scalar_lea.hbm %s6759_s6, 1536  ;;  %p4796_p2 = scmp.lt.u32.totalorder %s5357_s16, %s6759_s6 }
  0xfc   : > { %p4793_p8 = pnand %p4791_p13, %p6836_p12  ;;  %p4797_p11 = scmp.lt.u32.totalorder %s4795_s17, %s4790_s23 }
  0xfd   : > { %p4799_p0 = scmp.lt.u32.totalorder %s4790_s23, %s5357_s16 }
  0xfe   : > { %s5384_s25 = scalar_lea.hbm %s6835_s20, %s5224_s29  ;;  %p4794_p10 = pneg %p4793_p8 }
  0xff   : > { %p4798_p3 = por %p4797_p11, %p4796_p2 }
 0x101   : > { %p4800_p4 = por %p4799_p0, %p4798_p3 }
 0x103   : > { %p4801_p6 = pnand %p4800_p4, %p4794_p10 }
 0x105   : > { %4804 = shalt.err (!%p4801_p6)
}
 0x106   : > { %s4805_s29 = scalar_lea.vmem %s5378_s11, 512  ;;  %s4976_s13 = smov [#allocation17]  }
 0x107   : > { %p4806_p5 = scmp.ne.s32.totalorder %s5378_s11, %s4805_s29  ;;  %s4810_s18 = sshll.u32 %s4976_s13, 4  ;;  %s4811_s18 = int_to_ptr.vmem [resolvable:$false] %s4810_s18 }
 0x108   : > { %s4812_s19 = scalar_lea.vmem %s4811_s18, 1024  ;;  %p4813_p1 = scmp.lt.s32.totalorder %s5378_s11, %s4811_s18 }
 0x109   : > { %p4808_p7 = pnand %p4806_p5, %p6836_p12  ;;  %p4814_p13 = scmp.lt.s32.totalorder %s4812_s19, %s4805_s29 }
 0x10b   : > { %p4809_p9 = pneg %p4808_p7  ;;  %p4815_p8 = por %p4814_p13, %p4813_p1 }
 0x10d   : > { %p4816_p2 = pnand %p4815_p8, %p4809_p9 }
 0x10f   : > { %4819 = shalt.err (!%p4816_p2)
}
 0x110   : > { %p6837_p10 = scmp.ne.s32.totalorder %s6826_s10, 0  ;;  %s477_s0 = scalar_lea.vmem [#allocation18], %s5221_s7 }
 0x111   : > { %s485_s1 = sshll.u32 %s477_s0, 4  ;;  %s4820_s23 = scalar_lea.hbm %s5384_s25, 512  ;;  %s5412_s1 = int_to_ptr.vmem [resolvable:$true] %s485_s1 }
 0x112   : > { %4330 = dma.hbm_to_vmem [thread:$0]  (!%p6837_p10), %s5357_s16, 512, %s5378_s11, %s5243_s4, %s6830_s22, %s6830_s22, %s6829_s5  }
 0x113   : > { %p4821_p11 = scmp.ne.s32.totalorder %s5384_s25, %s4820_s23  ;;  %s4825_s17 = scalar_lea.hbm %s6835_s20, 1536 }
 0x114   : > { %p4826_p4 = scmp.lt.u32.totalorder %s5384_s25, %s6835_s20  ;;  %p4827_p6 = scmp.lt.u32.totalorder %s4825_s17, %s4820_s23 }
 0x115   : > { %p4823_p3 = pnand %p4821_p11, %p6836_p12  ;;  %p4829_p7 = scmp.lt.u32.totalorder %s4820_s23, %s5384_s25 }
 0x116   : > { %p4828_p5 = por %p4827_p6, %p4826_p4 }
 0x117   : > { %p4824_p0 = pneg %p4823_p3 }
 0x118   : > { %p4830_p9 = por %p4829_p7, %p4828_p5 }
 0x11a   : > { %p4831_p1 = pnand %p4830_p9, %p4824_p0 }
 0x11c   : > { %4834 = shalt.err (!%p4831_p1)
}
 0x11d   : > { %s4835_s4 = scalar_lea.vmem %s5412_s1, 512  ;;  %s4977_s7 = smov [#allocation18]  }
 0x11e   : > { %p4836_p13 = scmp.ne.s32.totalorder %s5412_s1, %s4835_s4  ;;  %s4840_s16 = sshll.u32 %s4977_s7, 4  ;;  %s4841_s16 = int_to_ptr.vmem [resolvable:$false] %s4840_s16 }
 0x11f   : > { %s4842_s11 = scalar_lea.vmem %s4841_s16, 1024  ;;  %p4843_p11 = scmp.lt.s32.totalorder %s5412_s1, %s4841_s16 }
 0x120   : > { %p4838_p8 = pnand %p4836_p13, %p6836_p12  ;;  %p4844_p3 = scmp.lt.s32.totalorder %s4842_s11, %s4835_s4 }
 0x122   : > { %p4839_p2 = pneg %p4838_p8  ;;  %p4845_p4 = por %p4844_p3, %p4843_p11 }
 0x124   : > { %p4846_p6 = pnand %p4845_p4, %p4839_p2 }
 0x126   : > { %4849 = shalt.err (!%p4846_p6)
}
 0x127   : > { %4333 = dma.hbm_to_vmem [thread:$0]  (!%p6837_p10), %s5384_s25, 512, %s5412_s1, %s5287_s28, %s6830_s22, %s6830_s22, %s6829_s5  }
 0x128   : > { %s6838_s24 = sld [smem:[#allocation38_spill]] }
 0x12e   : > { %p6839_p12 = scmp.ne.s32.totalorder %s6838_s24, 0 }
 0x12f   : > { %s499_s29 = sand.u32 (!%p6839_p12), 1, %s5083_s21   ;;  %s501_s13 = sand.u32 (!%p6839_p12), 1, %s4948_s14  }
 0x130   : > { %497 = sbr.rel (%p6839_p12) target bundleno = 2622 (0xa3e), region = 60  ;;  %s5445_s18 = sshll.u32 (!%p6839_p12), %s501_s13, 5 }
 0x131   : > { %s500_s10 = scalar_lea.sflag (!%p6839_p12), [#allocation7], %s499_s29  ;;  %s5448_s19 = scalar_lea.vmem (!%p6839_p12), [#allocation6], %s5445_s18 }
 0x132   : > { %p6840_p0 = scmp.ne.s32.totalorder (!%p6839_p12), %s6820_s27, 0 }
 0x137   : > { %4903 = dma.done.wait (%p6840_p0), %s500_s10, 512  }
 0x138   : > { %4905 = vsyncadd (%p6840_p0), %s500_s10, 4294966784  ;;  %p6841_p10 = scmp.eq.s32.totalorder %s5083_s21, 0 }
 0x13a   : > { %4907 = dma.done.wait (%p6841_p10), [#allocation10], 32   ;;  %p6842_p5 = pmov %p6841_p10 }
 0x13b   : > { %s517_s28 = scalar_lea.sflag [#allocation13], %s499_s29  ;;  %s520_s5 = scalar_lea.vmem [#allocation12], %s5445_s18 }
 0x13c   : > { %4909 = vsyncadd (%p6842_p5), [#allocation10], 4294967264 }
 0x13d   : > { %4911 = dma.done.wait (%p6840_p0), %s517_s28, 512  }
 0x13e   : > { %4913 = vsyncadd (%p6840_p0), %s517_s28, 4294966784  ;;  %p6843_p7 = pmov %p6842_p5 }
 0x13f   : > { %p6844_p9 = pmov %p6842_p5 }
 0x140   : > { %4915 = dma.done.wait (%p6843_p7), [#allocation13], 512  }
 0x141   : > { %4917 = vsyncadd (%p6844_p9), [#allocation13], 4294966784  ;;  %p6845_p1 = pmov %p6842_p5 }
 0x143   : > { %4919 = dma.done.wait (%p6845_p1), [#allocation16], 512   ;;  %p6846_p13 = pmov %p6845_p1 }
 0x144   : > { %s5472_s22 = scalar_lea.vmem [#allocation17], %s5445_s18 }
 0x145   : > { %4921 = vsyncadd (%p6846_p13), [#allocation16], 4294966784 }
 0x146   : > { %4923 = dma.done.wait (%p6840_p0), %s500_s10, 512  }
 0x147   : > { %4925 = vsyncadd (%p6840_p0), %s500_s10, 4294966784  ;;  %s5479_s25 = scalar_lea.vmem [#allocation18], %s5445_s18 }
 0x148   : > { %4927 = dma.done.wait (%p6840_p0), %s517_s28, 512  }
 0x149   : > { %4929 = vsyncadd (%p6840_p0), %s517_s28, 4294966784  ;;  %p6847_p8 = pmov %p6845_p1 }
 0x14a   : > { %p6848_p2 = pmov %p6845_p1 }
 0x14b   : > { %4931 = dma.done.wait (%p6847_p8), [#allocation16], 512  }
 0x14c   : > { %4933 = vsyncadd (%p6848_p2), [#allocation16], 4294966784  ;;  %p6849_p11 = pmov %p6845_p1 }
 0x14d   : > { %p6850_p3 = pmov %p6845_p1 }
 0x14e   : > { %4935 = dma.done.wait (%p6849_p11), [#allocation21], 16  }
 0x14f   : > { %4937 = vsyncadd (%p6850_p3), [#allocation21], 4294967280  ;;  %vm626_vm0 = vcmask 261120   ;;  %v1698_v0 = vld [vmem:[%s520_s5] sm:$0xff]  ;;  %v1699_v1 = vld [vmem:[%s520_s5 + $0x8] sm:$0xff]  ;;  %s4984_s21 = smov 32  }
 0x150   : > { %v622_v2 = vld [vmem:[%s5448_s19] sm:$0xff]  ;;  %v1703_v3 = vsel %vm626_vm0, %v1698_v0, 0.0  ;;  %v623_v5 = vld [vmem:[%s5448_s19 + $0x8] sm:$0xff]  ;;  %v1706_v6 = vsel %vm626_vm0, %v1699_v1, 0.0  ;;  %v1700_v8 = vld [vmem:[%s520_s5 + $0x10] sm:$0xff]  ;;  %s4985_s27 = smov 96  }
 0x151   : > { %v627_v4 = vsel %vm626_vm0, %v622_v2, 0.0  ;;  %1704 = vadd.xlane.f32.xlu0 %v1703_v3  ;;  %v630_v7 = vsel %vm626_vm0, %v623_v5, 0.0  ;;  %v1701_v9 = vld [vmem:[%s520_s5 + $0x18] sm:$0xff]  ;;  %v1709_v10 = vsel %vm626_vm0, %v1700_v8, 0.0  ;;  %v624_v12 = vld [vmem:[%s5448_s19 + $0x10] sm:$0xff]  ;;  %v1776_v56 = vld [vmem:[#allocation15] sm:$0xff] }
 0x152   : > { %628 = vadd.xlane.f32.xlu1 %v627_v4  ;;  %v1712_v11 = vsel %vm626_vm0, %v1701_v9, 0.0  ;;  %v625_v13 = vld [vmem:[%s5448_s19 + $0x18] sm:$0xff]  ;;  %v633_v14 = vsel %vm626_vm0, %v624_v12, 0.0  ;;  %v1777_v57 = vld [vmem:[#allocation15 + $0x8] sm:$0xff]  ;;  %v700_v59 = vld [vmem:[#allocation14] sm:$0xff]  ;;  %s4989_s0 = smov 64  }
 0x153   : > { %v636_v15 = vsel %vm626_vm0, %v625_v13, 0.0  ;;  %v4176_v58 = vpack.c.bf16 %v1777_v57, %v1776_v56  ;;  %v701_v60 = vld [vmem:[#allocation14 + $0x8] sm:$0xff]  ;;  %v1778_v61 = vld [vmem:[#allocation15 + $0x10] sm:$0xff]  ;;  %v1779_v63 = vld [vmem:[#allocation15 + $0x18] sm:$0xff]  ;;  %s4990_s1 = smov 112   ;;  %s4992_s23 = smov 48  }
 0x154   : > { %v4168_v62 = vpack.c.bf16 %v701_v60, %v700_v59  ;;  %v5546_v4 = vld [vmem:[%s5479_s25 + $0x8] sm:$0xff]  ;;  %v4983_v59 = vmov 1326507024   ;;  %s4993_s12 = smov 16   ;;  %s6873_s30 = sld [smem:[#allocation35_spill]] }
 0x155   : > { %1707 = vadd.xlane.f32.xlu0 %v1706_v6  ;;  %4177 = vmatprep.subr.bf16.mxu1 %v4176_v58  ;;  %v1984_v6 = vand.u32 2147483647, %v5546_v4  ;;  %vm1986_vm13 = vcmp.lt.s32.totalorder %v5546_v4, 0  ;;  %s605_s17 = scalar_lea.vmem [#allocation22], %s5445_s18  ;;  %s6874_s16 = sld [smem:[#allocation48_spill]] }
 0x156   : > { %631 = vadd.xlane.f32.xlu1 %v630_v7  ;;  %4179 = vmatpush3.bf16.msra.mxu1 %v4176_v58  ;;  %v1987_v7 = vand.u32 2139095040, %v5546_v4  ;;  %s3658_s3 = sshll.u32 %s605_s17, 4  ;;  %s6707_s29 = scalar_lea.sflag [#allocation8], %s501_s13  ;;  %s6695_s3 = int_to_ptr.vmem [resolvable:$true] %s3658_s3 }
 0x157   : > { %4169 = vmatprep.subr.bf16.mxu0 %v4168_v62  ;;  %vm5660_vm15 = vcmp.le.f32.partialorder %v1984_v6, 0.7853982  ;;  %s4850_s18 = scalar_lea.vmem %s6695_s3, 512  ;;  %p6876_p6 = scmp.ne.s32.totalorder %s6821_s26, 0 }
 0x158   : > { %4171 = vmatpush3.bf16.msra.mxu0 %v4168_v62  ;;  %p4851_p4 = scmp.ne.s32.totalorder %s6695_s3, %s4850_s18  ;;  %s4994_s10 = smov [#allocation22]  }
 0x159   : > { %1710 = vadd.xlane.f32.xlu0 %v1709_v10  ;;  %s4854_s19 = sshll.u32 %s4994_s10, 4  ;;  %s4855_s19 = int_to_ptr.vmem [resolvable:$false] %s4854_s19 }
 0x15a   : > { %1713 = vadd.xlane.f32.xlu1 %v1712_v11  ;;  %v1988_v11 = vshrl.u32 %v1987_v7, 23  ;;  %s4011_s15 = sshll.u32 %s6873_s30, 9  ;;  %p4852_p12 = pnand %p4851_p4, %p6876_p6 }
 0x15b   : > { %s6875_s11 = smov %s6874_s16  ;;  %s6701_s24 = scalar_lea.hbm %s6874_s16, %s4011_s15 }
 0x15c   : > { %p4853_p0 = pneg %p4852_p12  ;;  %s4856_s28 = scalar_lea.vmem %s4855_s19, 1024 }
 0x15d   : > { %634 = vadd.xlane.f32.xlu0 %v633_v14  ;;  %p4857_p10 = scmp.lt.s32.totalorder %s6695_s3, %s4855_s19  ;;  %p4858_p5 = scmp.lt.s32.totalorder %s4856_s28, %s4850_s18 }
 0x15e   : > { %637 = vadd.xlane.f32.xlu1 %v636_v15 }
 0x15f   : > { %p4859_p7 = por %p4858_p5, %p4857_p10 }
 0x161   : > { %p4860_p9 = pnand %p4859_p7, %p4853_p0 }
 0x1de   : > { %v1705_v16 = vpop.xlane.xlu0 %1704 }
 0x1df   : > { %v629_v17 = vpop.xlane.xlu1 %628  ;;  %v1716_v18 = vmul.f32 0.03125, %v1705_v16  ;;  %v3945_v16 = vadd.s32 4294967169, %v1988_v11 }
 0x1e0   : > { %v640_v19 = vmul.f32 0.03125, %v629_v17 }
 0x1e1   : > { %v5505_v20 = vsub.f32 %v1698_v0, %v1716_v18  ;;  %v4180_v0 = vpack.c.bf16 %v1779_v63, %v1778_v61 }
 0x1e2   : > { %v5507_v21 = vsub.f32 %v622_v2, %v640_v19  ;;  %v1708_v22 = vpop.xlane.xlu0 %1707  ;;  %v703_v2 = vld [vmem:[#allocation14 + $0x18] sm:$0xff] }
 0x1e3   : > { %v632_v23 = vpop.xlane.xlu1 %631  ;;  %v1717_v24 = vmul.f32 0.03125, %v1708_v22  ;;  %v1724_v25 = vmul.f32 %v5505_v20, %v5505_v20  ;;  %4181 = vmatprep.subr.bf16.mxu1 %v4180_v0  ;;  %v1994_v22 = vadd.s32 1, %v3945_v16 }
 0x1e4   : > { %v641_v26 = vmul.f32 0.03125, %v632_v23  ;;  %v648_v27 = vmul.f32 %v5507_v21, %v5507_v21  ;;  %4183 = vmatpush3.bf16.msra.mxu1 %v4180_v0 }
 0x1e5   : > { %v5513_v28 = vsub.f32 %v1699_v1, %v1717_v24  ;;  %v1728_v29 = vsel %vm626_vm0, %v1724_v25, 0.0  ;;  %v702_v1 = vld [vmem:[#allocation14 + $0x10] sm:$0xff]  ;;  %vm1995_vm1 = vcmp.gt.s32.totalorder %v1994_v22, 0 }
 0x1e6   : > { %v5516_v30 = vsub.f32 %v623_v5, %v641_v26  ;;  %v1711_v31 = vpop.xlane.xlu0 %1710  ;;  %1729 = vadd.xlane.f32.xlu0 %v1728_v29  ;;  %v652_v32 = vsel %vm626_vm0, %v648_v27, 0.0  ;;  %v4172_v3 = vpack.c.bf16 %v703_v2, %v702_v1  ;;  %v5549_v5 = vld [vmem:[%s5472_s22] sm:$0xff]  ;;  %v1996_v27 = vsel %vm1995_vm1, %v1994_v22, 0 }
 0x1e7   : > { %v1714_v33 = vpop.xlane.xlu1 %1713  ;;  %v1718_v34 = vmul.f32 0.03125, %v1711_v31  ;;  %v1725_v35 = vmul.f32 %v5513_v28, %v5513_v28  ;;  %v808_v10 = vand.u32 2139095040, %v5549_v5  ;;  %v1997_v29 = vshrl.u32 %v1996_v27, 5 }
 0x1e8   : > { %v1719_v36 = vmul.f32 0.03125, %v1714_v33  ;;  %v649_v37 = vmul.f32 %v5516_v30, %v5516_v30  ;;  %4173 = vmatprep.subr.bf16.mxu0 %v4172_v3  ;;  %v1998_v31 = vand.u32 31, %v1996_v27 }
 0x1e9   : > { %v5523_v38 = vsub.f32 %v1700_v8, %v1718_v34  ;;  %v1731_v39 = vsel %vm626_vm0, %v1725_v35, 0.0  ;;  %4175 = vmatpush3.bf16.msra.mxu0 %v4172_v3  ;;  %v5554_v8 = vld [vmem:[%s5479_s25] sm:$0xff]  ;;  %vm2016_vm3 = vcmp.lt.s32.totalorder %v1997_v29, 1  ;;  %vm2017_vm4 = vcmp.lt.s32.totalorder %v1997_v29, 2 }
 0x1ea   : > { %v5526_v40 = vsub.f32 %v1701_v9, %v1719_v36  ;;  %v635_v41 = vpop.xlane.xlu0 %634  ;;  %1732 = vadd.xlane.f32.xlu1 %v1731_v39  ;;  %653 = vadd.xlane.f32.xlu0 %v652_v32  ;;  %v655_v42 = vsel %vm626_vm0, %v649_v37, 0.0  ;;  %v805_v9 = vand.u32 2147483647, %v5549_v5  ;;  %v1884_v15 = vand.u32 2139095040, %v5554_v8 }
 0x1eb   : > { %v638_v43 = vpop.xlane.xlu1 %637  ;;  %v642_v44 = vmul.f32 0.03125, %v635_v41  ;;  %v1726_v45 = vmul.f32 %v5523_v38, %v5523_v38  ;;  %v1881_v25 = vand.u32 2147483647, %v5554_v8  ;;  %v1999_v39 = vsub.s32 32, %v1998_v31 }
 0x1ec   : > { %v643_v46 = vmul.f32 0.03125, %v638_v43  ;;  %v1727_v47 = vmul.f32 %v5526_v40, %v5526_v40  ;;  %v812_v14 = vand.u32 8388607, %v805_v9  ;;  %v1885_v18 = vshrl.u32 %v1884_v15, 23 }
 0x1ed   : > { %v5533_v48 = vsub.f32 %v624_v12, %v642_v44  ;;  %v1734_v49 = vsel %vm626_vm0, %v1726_v45, 0.0  ;;  %v1991_v12 = vand.u32 8388607, %v1984_v6  ;;  %v5570_v36 = vand.u32 8388607, %v1881_v25 }
 0x1ee   : > { %v5536_v50 = vsub.f32 %v625_v13, %v643_v46  ;;  %1735 = vadd.xlane.f32.xlu0 %v1734_v49  ;;  %656 = vadd.xlane.f32.xlu1 %v655_v42  ;;  %v1737_v52 = vsel %vm626_vm0, %v1727_v47, 0.0  ;;  %v809_v13 = vshrl.u32 %v808_v10, 23  ;;  %v813_v23 = vor.u32 8388608, %v812_v14 }
 0x1ef   : > { %v650_v51 = vmul.f32 %v5533_v48, %v5533_v48  ;;  %v1992_v19 = vor.u32 8388608, %v1991_v12  ;;  %v3941_v26 = vadd.s32 4294967169, %v1885_v18  ;;  %v4978_v41 = vmov 683565275  }
 0x1f0   : > { %v651_v53 = vmul.f32 %v5536_v50, %v5536_v50  ;;  %v3905_v17 = vadd.s32 4294967169, %v809_v13  ;;  %v5566_v35 = vshll.u32 %v813_v23, 8  ;;  %v2001_v42 = vshll.u32 %v4978_v41, %v1998_v31 }
 0x1f1   : > { %v658_v54 = vsel %vm626_vm0, %v650_v51, 0.0  ;;  %v5564_v32 = vshll.u32 %v1992_v19, 8  ;;  %v5572_v37 = vadd.s32 1, %v3941_v26  ;;  %v4979_v43 = vmov 2475754826  }
 0x1f2   : > { %659 = vadd.xlane.f32.xlu0 %v658_v54  ;;  %1738 = vadd.xlane.f32.xlu1 %v1737_v52  ;;  %v661_v55 = vsel %vm626_vm0, %v651_v53, 0.0  ;;  %v815_v24 = vadd.s32 1, %v3905_v17  ;;  %v2004_v44 = vshll.u32 %v4979_v43, %v1998_v31  ;;  %v4980_v45 = vmov 2131351028  }
 0x1f3   : > { %v2007_v46 = vshll.u32 %v4980_v45, %v1998_v31  ;;  %v4981_v47 = vmov 2102212464   ;;  %v4982_v51 = vmov 920167782   ;;  %v2000_v54 = vshrl.u32 %v4978_v41, %v1999_v39 }
 0x1f4   : > { %vm816_vm2 = vcmp.gt.s32.totalorder %v815_v24, 0  ;;  %v2010_v49 = vshll.u32 %v4981_v47, %v1998_v31  ;;  %v2013_v52 = vshll.u32 %v4982_v51, %v1998_v31  ;;  %v2005_v56 = vshrl.u32 %v4980_v45, %v1999_v39 }
 0x1f5   : > { %v817_v33 = vsel %vm816_vm2, %v815_v24, 0  ;;  %v2008_v57 = vshrl.u32 %v4981_v47, %v1999_v39  ;;  %v2011_v58 = vshrl.u32 %v4982_v51, %v1999_v39  ;;  %v2014_v60 = vshrl.u32 %v4983_v59, %v1999_v39 }
 0x1f6   : > { %662 = vadd.xlane.f32.xlu1 %v661_v55  ;;  %v819_v34 = vand.u32 31, %v817_v33  ;;  %v5579_v53 = vshrl.u32 %v817_v33, 5  ;;  %v2002_v55 = vshrl.u32 %v4979_v43, %v1999_v39  ;;  %vm2019_vm5 = vcmp.lt.s32.totalorder %v1997_v29, 4 }
 0x1f7   : > { %v2006_v62 = vor.u32 %v2005_v56, %v2004_v44  ;;  %v2009_v63 = vor.u32 %v2008_v57, %v2007_v46  ;;  %v2012_v1 = vor.u32 %v2011_v58, %v2010_v49  ;;  %v2015_v2 = vor.u32 %v2014_v60, %v2013_v52 }
 0x1f8   : > { %v2003_v61 = vor.u32 %v2002_v55, %v2001_v42  ;;  %v820_v0 = vsub.s32 32, %v819_v34  ;;  %vm2018_vm6 = vcmp.lt.s32.totalorder %v1997_v29, 3  ;;  %v822_v3 = vshll.u32 %v4978_v41, %v819_v34 }
 0x1f9   : > { %v2021_v10 = vsel %vm2019_vm5, %v2009_v63, 2102212464  ;;  %v2028_v12 = vsel %vm2016_vm3, %v2006_v62, %v2009_v63  ;;  %v2025_v14 = vsel %vm2019_vm5, %v2012_v1, 920167782  ;;  %v2029_v15 = vsel %vm2019_vm5, %v2015_v2, 1326507024 }
 0x1fa   : > { %v2020_v7 = vsel %vm2016_vm3, %v2000_v54, %v2003_v61  ;;  %v2024_v11 = vsel %vm2016_vm3, %v2003_v61, %v2006_v62  ;;  %v2022_v13 = vsel %vm2018_vm6, %v2006_v62, %v2021_v10  ;;  %v825_v16 = vshll.u32 %v4979_v43, %v819_v34 }
 0x1fb   : > { %vm1892_vm7 = vcmp.gt.s32.totalorder %v5572_v37, 0  ;;  %v2026_v17 = vsel %vm2018_vm6, %v2009_v63, %v2025_v14  ;;  %v2030_v18 = vsel %vm2018_vm6, %v2012_v1, %v2029_v15  ;;  %v821_v19 = vshrl.u32 %v4978_v41, %v820_v0 }
 0x1fc   : > { %v823_v22 = vshrl.u32 %v4979_v43, %v820_v0  ;;  %v2023_v23 = vsel %vm2017_vm4, %v2020_v7, %v2022_v13  ;;  %v2027_v24 = vsel %vm2017_vm4, %v2024_v11, %v2026_v17  ;;  %v2031_v26 = vsel %vm2017_vm4, %v2028_v12, %v2030_v18 }
 0x1fd   : > { %v826_v27 = vshrl.u32 %v4980_v45, %v820_v0  ;;  %v5600_v31 = vmul.u32.u64.low %v5564_v32, %v2031_v26  ;;  %v5601_v33 = vmul.u32.u64.high %v5564_v32, %v2031_v26, %v5600_v31  ;;  %v828_v49 = vshll.u32 %v4980_v45, %v819_v34 }
 0x1fe   : > { %v5604_v39 = vmul.u32.u64.low %v5564_v32, %v2027_v24  ;;  %v5605_v42 = vmul.u32.u64.high %v5564_v32, %v2027_v24, %v5604_v39  ;;  %v824_v44 = vor.u32 %v823_v22, %v822_v3  ;;  %v829_v52 = vshrl.u32 %v4981_v47, %v820_v0  ;;  %v5638_v22 = vld [vmem:[%s5472_s22 + $0x8] sm:$0xff] }
 0x1ff   : > { %v827_v46 = vor.u32 %v826_v27, %v825_v16  ;;  %v831_v29 = vshll.u32 %v4981_v47, %v819_v34  ;;  %v832_v54 = vshrl.u32 %v4982_v51, %v820_v0  ;;  %v834_v55 = vshll.u32 %v4982_v51, %v819_v34 }
 0x200   : > { %v835_v56 = vshrl.u32 %v4983_v59, %v820_v0  ;;  %v2039_v57 = vmul.u32 %v5564_v32, %v2023_v23  ;;  %v830_v58 = vor.u32 %v829_v52, %v828_v49  ;;  %vm837_vm8 = vcmp.lt.s32.totalorder %v5579_v53, 1 }
 0x201   : > { %vm838_vm9 = vcmp.lt.s32.totalorder %v5579_v53, 2  ;;  %vm2041_vm10 = vc.u32 %v5601_v33, %v5604_v39  ;;  %v2042_v60 = vadd.s32 1, %v5605_v42  ;;  %v833_v61 = vor.u32 %v832_v54, %v831_v29 }
 0x202   : > { %vm839_vm11 = vcmp.lt.s32.totalorder %v5579_v53, 3  ;;  %v836_v62 = vor.u32 %v835_v56, %v834_v55  ;;  %vm840_vm12 = vcmp.lt.s32.totalorder %v5579_v53, 4  ;;  %v841_v34 = vsel %vm837_vm8, %v821_v19, %v824_v44 }
 0x203   : > { %v845_v63 = vsel %vm837_vm8, %v824_v44, %v827_v46  ;;  %v2043_v32 = vsel %vm2041_vm10, %v2042_v60, %v5605_v42  ;;  %v842_v0 = vsel %vm840_vm12, %v830_v58, 2102212464  ;;  %v846_v1 = vsel %vm840_vm12, %v833_v61, 920167782 }
 0x204   : > { %v849_v2 = vsel %vm837_vm8, %v827_v46, %v830_v58  ;;  %v2044_v3 = vadd.s32 %v2043_v32, %v2039_v57  ;;  %v843_v7 = vsel %vm839_vm11, %v827_v46, %v842_v0  ;;  %v847_v10 = vsel %vm839_vm11, %v830_v58, %v846_v1 }
 0x205   : > { %v850_v11 = vsel %vm840_vm12, %v836_v62, 1326507024  ;;  %v844_v12 = vsel %vm838_vm9, %v841_v34, %v843_v7  ;;  %v848_v13 = vsel %vm838_vm9, %v845_v63, %v847_v10  ;;  %v1893_v15 = vsel %vm1892_vm7, %v5572_v37, 0 }
 0x206   : > { %v851_v14 = vsel %vm839_vm11, %v833_v61, %v850_v11  ;;  %v2045_v16 = vadd.s32 536870912, %v2044_v3  ;;  %v5633_v18 = vmul.u32.u64.low %v5566_v35, %v848_v13  ;;  %v5634_v19 = vmul.u32.u64.high %v5566_v35, %v848_v13, %v5633_v18 }
 0x207   : > { %v852_v17 = vsel %vm838_vm9, %v849_v2, %v851_v14  ;;  %v1889_v26 = vor.u32 8388608, %v5570_v36  ;;  %v908_v27 = vand.u32 2147483647, %v5638_v22  ;;  %v1895_v31 = vand.u32 31, %v1893_v15 }
 0x208   : > { %v5641_v23 = vmul.u32.u64.low %v5566_v35, %v852_v17  ;;  %v5642_v24 = vmul.u32.u64.high %v5566_v35, %v852_v17, %v5641_v23  ;;  %v2046_v37 = vshrl.u32 %v2045_v16, 30  ;;  %v860_v53 = vmul.u32 %v5566_v35, %v844_v12 }
 0x209   : > { %v863_v44 = vadd.s32 1, %v5634_v19  ;;  %v1896_v46 = vsub.s32 32, %v1895_v31  ;;  %v5651_v49 = vshll.u32 %v1889_v26, 8  ;;  %v911_v52 = vand.u32 2139095040, %v5638_v22 }
 0x20a   : > { %v2047_v42 = vshll.u32 %v2046_v37, 30  ;;  %vm862_vm14 = vc.u32 %v5642_v24, %v5633_v18  ;;  %v5656_v36 = vand.u32 8388607, %v908_v27  ;;  %v2070_v54 = vsub.s32 4, %v2046_v37 }
 0x20b   : > { %v864_v55 = vsel %vm862_vm14, %v863_v44, %v5634_v19  ;;  %v1894_v56 = vshrl.u32 %v1893_v15, 5  ;;  %v1898_v58 = vshll.u32 %v4978_v41, %v1895_v31  ;;  %v1899_v60 = vshrl.u32 %v4979_v43, %v1896_v46 }
 0x20c   : > { %v5664_v29 = vsub.s32 %v2044_v3, %v2047_v42  ;;  %v865_v57 = vadd.s32 %v864_v55, %v860_v53  ;;  %v1901_v61 = vshll.u32 %v4979_v43, %v1895_v31  ;;  %v1902_v6 = vshrl.u32 %v4980_v45, %v1896_v46 }
 0x20d   : > { %v1904_v34 = vshll.u32 %v4980_v45, %v1895_v31  ;;  %v1905_v63 = vshrl.u32 %v4981_v47, %v1896_v46  ;;  %v2040_v32 = vadd.s32 %v5604_v39, %v5601_v33  ;;  %v1907_v1 = vshll.u32 %v4981_v47, %v1895_v31 }
 0x20e   : > { %v2050_v62 = vsub.s32 0, %v5664_v29  ;;  %v866_v0 = vadd.s32 536870912, %v865_v57  ;;  %v912_v2 = vshrl.u32 %v911_v52, 23  ;;  %v2071_v7 = vsel %vm1986_vm13, %v2070_v54, %v2046_v37 }
 0x20f   : > { %v1908_v10 = vshrl.u32 %v4982_v51, %v1896_v46  ;;  %vm1916_vm1 = vcmp.lt.s32.totalorder %v1894_v56, 4  ;;  %v1897_v12 = vshrl.u32 %v4978_v41, %v1896_v46  ;;  %v1910_v13 = vshll.u32 %v4982_v51, %v1895_v31 }
 0x210   : > { %v3946_v3 = vmin.u32 %v2050_v62, %v5664_v29  ;;  %v5681_v11 = vshrl.u32 %v866_v0, 30  ;;  %v1911_v33 = vshrl.u32 %v4983_v59, %v1896_v46  ;;  %v1900_v14 = vor.u32 %v1899_v60, %v1898_v58 }
 0x211   : > { %v1903_v15 = vor.u32 %v1902_v6, %v1901_v61  ;;  %v1906_v16 = vor.u32 %v1905_v63, %v1904_v34  ;;  %v1909_v19 = vor.u32 %v1908_v10, %v1907_v1  ;;  %vm1913_vm2 = vcmp.lt.s32.totalorder %v1894_v56, 1 }
 0x212   : > { %v2052_v39 = vclz %v3946_v3  ;;  %v868_v17 = vshll.u32 %v5681_v11, 30  ;;  %vm1915_vm3 = vcmp.lt.s32.totalorder %v1894_v56, 3  ;;  %v1912_v26 = vor.u32 %v1911_v33, %v1910_v13 }
 0x213   : > { %v1918_v37 = vsel %vm1916_vm1, %v1906_v16, 2102212464  ;;  %v3909_v53 = vadd.s32 4294967169, %v912_v2  ;;  %v5690_v42 = vsel %vm5660_vm15, 0, %v2071_v7  ;;  %vm1914_vm4 = vcmp.lt.s32.totalorder %v1894_v56, 2 }
 0x214   : > { %v3947_v23 = vadd.s32 4294967294, %v2052_v39  ;;  %v5692_v31 = vsub.s32 %v865_v57, %v868_v17  ;;  %v1922_v44 = vsel %vm1916_vm1, %v1909_v19, 920167782  ;;  %v1917_v46 = vsel %vm1913_vm2, %v1897_v12, %v1900_v14 }
 0x215   : > { %v1921_v52 = vsel %vm1913_vm2, %v1900_v14, %v1903_v15  ;;  %v1923_v54 = vsel %vm1915_vm3, %v1906_v16, %v1922_v44  ;;  %v1919_v60 = vsel %vm1915_vm3, %v1903_v15, %v1918_v37  ;;  %v1925_v61 = vsel %vm1913_vm2, %v1903_v15, %v1906_v16 }
 0x216   : > { %vm3948_vm5 = vcmp.lt.s32.totalorder %v3947_v23, 0  ;;  %v871_v58 = vsub.s32 0, %v5692_v31  ;;  %v1926_v34 = vsel %vm1916_vm1, %v1912_v26, 1326507024  ;;  %vm807_vm6 = vcmp.lt.s32.totalorder %v5549_v5, 0 }
 0x217   : > { %v2055_v55 = vsel %vm3948_vm5, 0, %v3947_v23  ;;  %v1924_v0 = vsel %vm1914_vm4, %v1921_v52, %v1923_v54  ;;  %v1927_v1 = vsel %vm1915_vm3, %v1909_v19, %v1926_v34  ;;  %v918_v10 = vadd.s32 1, %v3909_v53 }
 0x218   : > { %v2056_v62 = vsub.s32 32, %v2055_v55  ;;  %v2057_v57 = vshll.u32 %v5664_v29, %v2055_v55  ;;  %v2060_v6 = vsub.s32 4294967266, %v2055_v55  ;;  %v3906_v63 = vmin.u32 %v871_v58, %v5692_v31 }
 0x219   : > { %v1928_v7 = vsel %vm1914_vm4, %v1925_v61, %v1927_v1  ;;  %v2494_v12 = vadd.s32 3, %v5690_v42  ;;  %v1920_v29 = vsel %vm1914_vm4, %v1917_v46, %v1919_v60  ;;  %v916_v33 = vor.u32 8388608, %v5656_v36 }
 0x21a   : > { %v2058_v2 = vshrl.u32 %v2040_v32, %v2056_v62  ;;  %v2061_v3 = vadd.s32 127, %v2060_v6  ;;  %v873_v13 = vclz %v3906_v63  ;;  %vm919_vm7 = vcmp.gt.s32.totalorder %v918_v10, 0 }
 0x21b   : > { %v5712_v15 = vmul.u32.u64.low %v5651_v49, %v1928_v7  ;;  %v5713_v16 = vmul.u32.u64.high %v5651_v49, %v1928_v7, %v5712_v15  ;;  %v5716_v32 = vmul.u32.u64.low %v5651_v49, %v1924_v0  ;;  %v5717_v19 = vmul.u32.u64.high %v5651_v49, %v1924_v0, %v5716_v32 }
 0x21c   : > { %v2059_v39 = vor.u32 %v2058_v2, %v2057_v57  ;;  %v2062_v14 = vshll.u32 %v2061_v3, 23  ;;  %v3907_v17 = vadd.s32 4294967294, %v873_v13  ;;  %v891_v56 = vsub.s32 4, %v5681_v11 }
 0x21d   : > { %v920_v37 = vsel %vm919_vm7, %v918_v10, 0  ;;  %v5721_v53 = vand.u32 3, %v2494_v12  ;;  %v861_v44 = vadd.s32 %v5633_v18, %v5642_v24  ;;  %v1936_v55 = vmul.u32 %v5651_v49, %v1920_v29 }
 0x21e   : > { %v2063_v23 = vor.u32 4788187, %v2062_v14  ;;  %v2066_v26 = vcvt.s32.f32 %v2059_v39  ;;  %vm3908_vm8 = vcmp.lt.s32.totalorder %v3907_v17, 0  ;;  %v922_v46 = vand.u32 31, %v920_v37 }
 0x21f   : > { %v876_v54 = vsel %vm3908_vm8, 0, %v3907_v17  ;;  %vm1938_vm9 = vc.u32 %v5713_v16, %v5716_v32  ;;  %vm5730_vm10 = vcmp.le.f32.partialorder %v805_v9, 0.7853982  ;;  %v1939_v18 = vadd.s32 1, %v5717_v19 }
 0x220   : > { %v2064_v52 = vand.u32 2147483647, %v2063_v23  ;;  %v877_v60 = vsub.s32 32, %v876_v54  ;;  %v878_v61 = vshll.u32 %v5692_v31, %v876_v54  ;;  %v881_v62 = vsub.s32 4294967266, %v876_v54 }
 0x221   : > { %v892_v49 = vsel %vm807_vm6, %v891_v56, %v5681_v11  ;;  %v5739_v57 = vshrl.u32 %v920_v37, 5  ;;  %v923_v6 = vsub.s32 32, %v922_v46  ;;  %v1940_v9 = vsel %vm1938_vm9, %v1939_v18, %v5717_v19 }
 0x222   : > { %v2067_v24 = vmul.f32 %v2066_v26, %v2064_v52  ;;  %v879_v34 = vshrl.u32 %v861_v44, %v877_v60  ;;  %v882_v63 = vadd.s32 127, %v881_v62  ;;  %v925_v0 = vshll.u32 %v4978_v41, %v922_v46 }
 0x223   : > { %v1941_v2 = vadd.s32 %v1940_v9, %v1936_v55  ;;  %v926_v31 = vshrl.u32 %v4979_v43, %v923_v6  ;;  %v928_v3 = vshll.u32 %v4979_v43, %v922_v46  ;;  %v929_v12 = vshrl.u32 %v4980_v45, %v923_v6 }
 0x224   : > { %v2068_v1 = vxor.u32 2147483648, %v2067_v24  ;;  %v880_v7 = vor.u32 %v879_v34, %v878_v61  ;;  %v883_v10 = vshll.u32 %v882_v63, 23  ;;  %v931_v11 = vshll.u32 %v4980_v45, %v922_v46 }
 0x225   : > { %v1942_v29 = vadd.s32 536870912, %v1941_v2  ;;  %v932_v39 = vshrl.u32 %v4981_v47, %v923_v6  ;;  %v934_v14 = vshll.u32 %v4981_v47, %v922_v46  ;;  %v927_v23 = vor.u32 %v926_v31, %v925_v0 }
 0x226   : > { %v2069_v13 = vsel %vm1986_vm13, %v2068_v1, %v2067_v24  ;;  %v884_v17 = vor.u32 4788187, %v883_v10  ;;  %v887_v19 = vcvt.s32.f32 %v880_v7  ;;  %v930_v56 = vor.u32 %v929_v12, %v928_v3 }
 0x227   : > { %v2072_v15 = vsel %vm5660_vm15, %v5546_v4, %v2069_v13  ;;  %v1943_v26 = vshrl.u32 %v1942_v29, 30  ;;  %v935_v37 = vshrl.u32 %v4982_v51, %v923_v6  ;;  %v937_v52 = vshll.u32 %v4982_v51, %v922_v46 }
 0x228   : > { %4474 = vcosq.f32 %v2072_v15  ;;  %v885_v44 = vand.u32 2147483647, %v884_v17  ;;  %v938_v54 = vshrl.u32 %v4983_v59, %v923_v6  ;;  %v5759_v55 = vsel %vm5730_vm10, 0, %v892_v49 }
 0x229   : > { %4476 = vsinq.f32 %v2072_v15  ;;  %v1944_v35 = vshll.u32 %v1943_v26, 30  ;;  %v936_v60 = vor.u32 %v935_v37, %v934_v14  ;;  %vm940_vm11 = vcmp.lt.s32.totalorder %v5739_v57, 1 }
 0x22a   : > { %v888_v61 = vmul.f32 %v887_v19, %v885_v44  ;;  %v924_v62 = vshrl.u32 %v4978_v41, %v923_v6  ;;  %v933_v18 = vor.u32 %v932_v39, %v931_v11  ;;  %v5765_v24 = vshll.u32 %v916_v33, 8 }
 0x22b   : > { %vm2496_vm12 = vcmp.lt.s32.totalorder %v5721_v53, 2  ;;  %vm1883_vm13 = vcmp.lt.s32.totalorder %v5554_v8, 0  ;;  %v5769_v46 = vsub.s32 %v1941_v2, %v1944_v35  ;;  %v939_v49 = vor.u32 %v938_v54, %v937_v52  ;;  %v5823_v35 = vld [vmem:[%s5479_s25 + $0x18] sm:$0xff] }
 0x22c   : > { %vm942_vm14 = vcmp.lt.s32.totalorder %v5739_v57, 3  ;;  %vm943_vm15 = vcmp.lt.s32.totalorder %v5739_v57, 4  ;;  %vm2076_vm1 = vweird.f32 %v5546_v4  ;;  %v889_v34 = vxor.u32 2147483648, %v888_v61 }
 0x22d   : > { %vm941_vm2 = vcmp.lt.s32.totalorder %v5739_v57, 2  ;;  %v945_v36 = vsel %vm943_vm15, %v933_v18, 2102212464  ;;  %v948_v33 = vsel %vm940_vm11, %v927_v23, %v930_v56  ;;  %v1314_v6 = vadd.s32 3, %v5759_v55 }
 0x22e   : > { %v1947_v63 = vsub.s32 0, %v5769_v46  ;;  %v1967_v9 = vsub.s32 4, %v1943_v26  ;;  %v949_v0 = vsel %vm943_vm15, %v936_v60, 920167782  ;;  %v890_v1 = vsel %vm807_vm6, %v889_v34, %v888_v61 }
 0x22f   : > { %v944_v2 = vsel %vm940_vm11, %v924_v62, %v927_v23  ;;  %v946_v31 = vsel %vm942_vm14, %v930_v56, %v945_v36  ;;  %v950_v3 = vsel %vm942_vm14, %v933_v18, %v949_v0  ;;  %v893_v7 = vsel %vm5730_vm10, %v5549_v5, %v890_v1 }
 0x230   : > { %v3942_v10 = vmin.u32 %v1947_v63, %v5769_v46  ;;  %v951_v12 = vsel %vm941_vm2, %v948_v33, %v950_v3  ;;  %v952_v11 = vsel %vm940_vm11, %v930_v56, %v933_v18  ;;  %4478 = vcosq.f32 %v893_v7 }
 0x231   : > { %v953_v13 = vsel %vm943_vm15, %v939_v49, 1326507024  ;;  %v5802_v29 = vmul.u32.u64.low %v5765_v24, %v951_v12  ;;  %v5803_v39 = vmul.u32.u64.high %v5765_v24, %v951_v12, %v5802_v29  ;;  %vm2497_vm3 = vcmp.eq.s32.totalorder %v5721_v53, 0 }
 0x232   : > { %v5806_v58 = vpop.eup %4474  ;;  %vm2500_vm4 = vcmp.eq.s32.totalorder %v5721_v53, 2  ;;  %4480 = vsinq.f32 %v893_v7  ;;  %v1949_v14 = vclz %v3942_v10  ;;  %v1315_v19 = vand.u32 3, %v1314_v6 }
 0x233   : > { %v5810_v15 = vpop.eup %4476  ;;  %v6796_v17 = vxor.u32 2147483648, %v5806_v58  ;;  %v947_v23 = vsel %vm941_vm2, %v944_v2, %v946_v31  ;;  %v954_v56 = vsel %vm942_vm14, %v936_v60, %v953_v13  ;;  %v1937_v44 = vadd.s32 %v5716_v32, %v5713_v16 }
 0x234   : > { %v6797_v37 = vxor.u32 2147483648, %v5810_v15  ;;  %v3943_v52 = vadd.s32 4294967294, %v1949_v14  ;;  %v955_v54 = vsel %vm941_vm2, %v952_v11, %v954_v56  ;;  %v1968_v62 = vsel %vm1883_vm13, %v1967_v9, %v1943_v26 }
 0x235   : > { %v2502_v61 = vsel %vm2500_vm4, %v6796_v17, %v5810_v15  ;;  %v5831_v60 = vmul.u32.u64.low %v5765_v24, %v955_v54  ;;  %v5832_v18 = vmul.u32.u64.high %v5765_v24, %v955_v54, %v5831_v60  ;;  %v963_v32 = vmul.u32 %v5765_v24, %v947_v23 }
 0x236   : > { %v2499_v16 = vsel %vm2497_vm3, %v5806_v58, %v6797_v37  ;;  %vm3944_vm5 = vcmp.lt.s32.totalorder %v3943_v52, 0  ;;  %v966_v57 = vadd.s32 1, %v5803_v39  ;;  %v2190_v26 = vand.u32 2147483647, %v5823_v35 }
 0x237   : > { %v2503_v49 = vsel %vm2496_vm12, %v2499_v16, %v2502_v61  ;;  %v1952_v34 = vsel %vm3944_vm5, 0, %v3943_v52  ;;  %v2193_v36 = vand.u32 2139095040, %v5823_v35  ;;  %vm897_vm6 = vweird.f32 %v5549_v5 }
 0x238   : > { %v2504_v33 = vsel %vm2076_vm1, nan, %v2503_v49  ;;  %v1953_v6 = vsub.s32 32, %v1952_v34  ;;  %v1954_v63 = vshll.u32 %v5769_v46, %v1952_v34  ;;  %v1957_v9 = vsub.s32 4294967266, %v1952_v34 }
 0x239   : > { %2719 = vrot.lane.b32.xlu1 %v2504_v33, %s4984_s21  ;;  %vm5852_vm7 = vcmp.le.f32.partialorder %v1881_v25, 0.7853982  ;;  %vm965_vm8 = vc.u32 %v5832_v18, %v5802_v29  ;;  %v2194_v24 = vshrl.u32 %v2193_v36, 23  ;;  %vm1317_vm9 = vcmp.eq.s32.totalorder %v1315_v19, 0 }
 0x23a   : > { %v1955_v0 = vshrl.u32 %v1937_v44, %v1953_v6  ;;  %v1958_v1 = vadd.s32 127, %v1957_v9  ;;  %v967_v46 = vsel %vm965_vm8, %v966_v57, %v5803_v39  ;;  %v5859_v2 = vpop.eup %4478  ;;  %vm1320_vm10 = vcmp.eq.s32.totalorder %v1315_v19, 2 }
 0x23b   : > { %v5863_v31 = vsel %vm5852_vm7, 0, %v1968_v62  ;;  %v968_v25 = vadd.s32 %v967_v46, %v963_v32  ;;  %v3953_v3 = vadd.s32 4294967169, %v2194_v24  ;;  %v6790_v10 = vxor.u32 2147483648, %v5859_v2  ;;  %v5877_v62 = vld [vmem:[%s5479_s25 + $0x10] sm:$0xff] }
 0x23c   : > { %v5865_v7 = vpop.eup %4480  ;;  %v1956_v12 = vor.u32 %v1955_v0, %v1954_v63  ;;  %v1959_v11 = vshll.u32 %v1958_v1, 23  ;;  %v2197_v13 = vand.u32 8388607, %v2190_v26  ;;  %vm1316_vm11 = vcmp.lt.s32.totalorder %v1315_v19, 2 }
 0x23d   : > { %v6791_v39 = vxor.u32 2147483648, %v5865_v7  ;;  %vm910_vm12 = vcmp.lt.s32.totalorder %v5638_v22, 0  ;;  %v969_v14 = vadd.s32 536870912, %v968_v25  ;;  %v2200_v23 = vadd.s32 1, %v3953_v3 }
 0x23e   : > { %v1322_v44 = vsel %vm1320_vm10, %v6790_v10, %v5865_v7  ;;  %v1960_v52 = vor.u32 4788187, %v1959_v11  ;;  %v1963_v54 = vcvt.s32.f32 %v1956_v12  ;;  %v2390_v61 = vadd.s32 3, %v5863_v31 }
 0x23f   : > { %v1319_v16 = vsel %vm1317_vm9, %v5859_v2, %v6791_v39  ;;  %v970_v32 = vshrl.u32 %v969_v14, 30  ;;  %vm2201_vm14 = vcmp.gt.s32.totalorder %v2200_v23, 0  ;;  %v2198_v34 = vor.u32 8388608, %v2197_v13 }
 0x240   : > { %v1323_v57 = vsel %vm1316_vm11, %v1319_v16, %v1322_v44  ;;  %v1961_v49 = vand.u32 2147483647, %v1960_v52  ;;  %v2202_v36 = vsel %vm2201_vm14, %v2200_v23, 0  ;;  %vm5887_vm15 = vcmp.le.f32.partialorder %v908_v27, 0.7853982 }
 0x241   : > { %v1324_v6 = vsel %vm897_vm6, nan, %v1323_v57  ;;  %v971_v9 = vshll.u32 %v970_v32, 30  ;;  %v2090_v19 = vand.u32 2139095040, %v5877_v62  ;;  %v5893_v46 = vand.u32 3, %v2390_v61 }
 0x242   : > { %1641 = vrot.lane.b32.xlu1 %v1324_v6, %s4984_s21  ;;  %v1964_v1 = vmul.f32 %v1963_v54, %v1961_v49  ;;  %v994_v3 = vsub.s32 4, %v970_v32  ;;  %v5895_v12 = vand.u32 31, %v2202_v36  ;;  %v5901_v23 = vadd.s32 %v5802_v29, %v5832_v18 }
 0x243   : > { %v5897_v27 = vsub.s32 %v968_v25, %v971_v9  ;;  %v5906_v44 = vshll.u32 %v2198_v34, 8  ;;  %v5913_v29 = vshrl.u32 %v2202_v36, 5  ;;  %v2087_v18 = vand.u32 2147483647, %v5877_v62 }
 0x244   : > { %v1965_v14 = vxor.u32 2147483648, %v1964_v1  ;;  %v995_v49 = vsel %vm910_vm12, %v994_v3, %v970_v32  ;;  %vm2393_vm2 = vcmp.eq.s32.totalorder %v5893_v46, 0  ;;  %vm2392_vm3 = vcmp.lt.s32.totalorder %v5893_v46, 2 }
 0x245   : > { %v974_v61 = vsub.s32 0, %v5897_v27  ;;  %v5928_v53 = vsel %vm5887_vm15, 0, %v995_v49  ;;  %vm1973_vm4 = vweird.f32 %v5554_v8  ;;  %vm2223_vm8 = vcmp.lt.s32.totalorder %v5913_v29, 2 }
 0x246   : > { %v1966_v25 = vsel %vm1883_vm13, %v1965_v14, %v1964_v1  ;;  %vm2396_vm13 = vcmp.eq.s32.totalorder %v5893_v46, 2  ;;  %vm2224_vm9 = vcmp.lt.s32.totalorder %v5913_v29, 3  ;;  %vm2225_vm10 = vcmp.lt.s32.totalorder %v5913_v29, 4 }
 0x247   : > { %v1969_v6 = vsel %vm5852_vm7, %v5554_v8, %v1966_v25  ;;  %v3910_v9 = vmin.u32 %v974_v61, %v5897_v27  ;;  %vm2222_vm7 = vcmp.lt.s32.totalorder %v5913_v29, 1  ;;  %vm1000_vm14 = vweird.f32 %v5638_v22 }
 0x273   : > { %v1730_v56 = vpop.xlane.xlu0 %1729 }
 0x274   : > { %v1740_v60 = vmul.f32 0.03125, %v1730_v56  ;;  %v5904_v56 = vsub.s32 32, %v5895_v12 }
 0x276   : > { %v1744_v33 = vadd.f32 1e-05, %v1740_v60  ;;  %v2091_v60 = vshrl.u32 %v2090_v19, 23  ;;  %v2207_v19 = vshll.u32 %v4978_v41, %v5895_v12  ;;  %v2208_v32 = vshrl.u32 %v4979_v43, %v5904_v56 }
 0x277   : > { %v654_v24 = vpop.xlane.xlu0 %653  ;;  %v1733_v0 = vpop.xlane.xlu1 %1732 }
 0x278   : > { %4482 = vrsqrt.f32 %v1744_v33  ;;  %v664_v11 = vmul.f32 0.03125, %v654_v24  ;;  %v1741_v13 = vmul.f32 0.03125, %v1733_v0  ;;  %v5924_v0 = vadd.s32 4294967169, %v2091_v60 }
 0x279   : > { %v5938_v60 = vor.u32 %v2208_v32, %v2207_v19 }
 0x27a   : > { %v668_v52 = vadd.f32 1e-05, %v664_v11  ;;  %v1745_v54 = vadd.f32 1e-05, %v1741_v13  ;;  %v976_v11 = vclz %v3910_v9  ;;  %v2210_v13 = vshll.u32 %v4979_v43, %v5895_v12 }
 0x27b   : > { %v1736_v16 = vpop.xlane.xlu0 %1735  ;;  %v657_v57 = vpop.xlane.xlu1 %656  ;;  %v2097_v63 = vadd.s32 1, %v5924_v0 }
 0x27c   : > { %4484 = vrsqrt.f32 %v668_v52  ;;  %v1742_v34 = vmul.f32 0.03125, %v1736_v16  ;;  %v665_v33 = vmul.f32 0.03125, %v657_v57  ;;  %v3911_v61 = vadd.s32 4294967294, %v976_v11 }
 0x27d   : > { %4486 = vrsqrt.f32 %v1745_v54  ;;  %v5935_v54 = vshrl.u32 %v4978_v41, %v5904_v56  ;;  %v2211_v16 = vshrl.u32 %v4980_v45, %v5904_v56  ;;  %v2217_v11 = vshrl.u32 %v4982_v51, %v5904_v56 }
 0x27e   : > { %v1746_v36 = vadd.f32 1e-05, %v1742_v34  ;;  %v669_v24 = vadd.f32 1e-05, %v665_v33  ;;  %4488 = vcosq.f32 %v1969_v6  ;;  %v5942_v34 = vld [vmem:[#allocation9] ss:$0 sm:$0xff]  ;;  %v2213_v33 = vshll.u32 %v4980_v45, %v5895_v12 }
 0x27f   : > { %v660_v1 = vpop.xlane.xlu0 %659  ;;  %v1739_v3 = vpop.xlane.xlu1 %1738  ;;  %4490 = vsinq.f32 %v1969_v6  ;;  %v2214_v6 = vshrl.u32 %v4981_v47, %v5904_v56  ;;  %vm3912_vm5 = vcmp.lt.s32.totalorder %v3911_v61, 0  ;;  %v5951_v32 = vor.u32 %v2211_v16, %v2210_v13 }
 0x280   : > { %4492 = vrsqrt.f32 %v1746_v36  ;;  %v666_v14 = vmul.f32 0.03125, %v660_v1  ;;  %v1743_v52 = vmul.f32 0.03125, %v1739_v3  ;;  %v2216_v36 = vshll.u32 %v4981_v47, %v5895_v12  ;;  %v5955_v1 = vld [vmem:[#allocation11] ss:$0 sm:$0xff] }
 0x281   : > { %4494 = vrsqrt.f32 %v669_v24  ;;  %v979_v3 = vsel %vm3912_vm5, 0, %v3911_v61  ;;  %v5961_v10 = vor.u32 %v2214_v6, %v2213_v33 }
 0x282   : > { %v4483_v57 = vpop.eup %4482  ;;  %v670_v25 = vadd.f32 1e-05, %v666_v14  ;;  %v1747_v49 = vadd.f32 1e-05, %v1743_v52  ;;  %v981_v52 = vshll.u32 %v5897_v27, %v979_v3  ;;  %v984_v16 = vsub.s32 4294967266, %v979_v3 }
 0x283   : > { %v663_v9 = vpop.xlane.xlu1 %662  ;;  %v1752_v19 = vmul.f32 %v4483_v57, %v5505_v20  ;;  %v980_v20 = vsub.s32 32, %v979_v3 }
 0x284   : > { %4496 = vrsqrt.f32 %v670_v25  ;;  %v667_v24 = vmul.f32 0.03125, %v663_v9  ;;  %v5965_v25 = vshll.u32 %v4982_v51, %v5895_v12  ;;  %v985_v6 = vadd.s32 127, %v984_v16 }
 0x285   : > { %4498 = vrsqrt.f32 %v1747_v49  ;;  %v1762_v14 = vmul.f32 %v5942_v34, %v1752_v19  ;;  %v982_v49 = vshrl.u32 %v5901_v23, %v980_v20  ;;  %v2220_v19 = vshrl.u32 %v4983_v59, %v5904_v56 }
 0x286   : > { %v4485_v57 = vpop.eup %4484  ;;  %v671_v13 = vadd.f32 1e-05, %v667_v24  ;;  %v2218_v24 = vor.u32 %v2217_v11, %v2216_v36 }
 0x287   : > { %v4487_v9 = vpop.eup %4486  ;;  %v1772_v61 = vadd.f32 %v5955_v1, %v1762_v14  ;;  %v676_v39 = vmul.f32 %v4485_v57, %v5507_v21  ;;  %v983_v14 = vor.u32 %v982_v49, %v981_v52  ;;  %v986_v57 = vshll.u32 %v985_v6, 23 }
 0x288   : > { %v5972_v27 = vpop.eup %4488  ;;  %4500 = vrsqrt.f32 %v671_v13  ;;  %v1753_v33 = vmul.f32 %v4487_v9, %v5513_v28  ;;  %v2221_v28 = vor.u32 %v2220_v19, %v5965_v25 }
 0x289   : > { %v5975_v3 = vpop.eup %4490  ;;  %4092 = vmatprep.mubr.msk.f32.mxu1 %vm626_vm0, %v1772_v61  ;;  %v686_v12 = vmul.f32 %v5942_v34, %v676_v39  ;;  %v6794_v21 = vxor.u32 2147483648, %v5972_v27  ;;  %v990_v52 = vcvt.s32.f32 %v983_v14  ;;  %v987_v61 = vor.u32 4788187, %v986_v57 }
 0x28a   : > { %v4493_v23 = vpop.eup %4492  ;;  %v1763_v56 = vmul.f32 %v5942_v34, %v1753_v33  ;;  %v6795_v20 = vxor.u32 2147483648, %v5975_v3 }
 0x28b   : > { %v4495_v36 = vpop.eup %4494  ;;  %v696_v11 = vadd.f32 %v5955_v1, %v686_v12  ;;  %v1754_v13 = vmul.f32 %v4493_v23, %v5523_v38  ;;  %v2398_v39 = vsel %vm2396_vm13, %v6794_v21, %v5975_v3  ;;  %v988_v6 = vand.u32 2147483647, %v987_v61 }
 0x28c   : > { %v1773_v16 = vadd.f32 %v5955_v1, %v1763_v56  ;;  %v677_v9 = vmul.f32 %v4495_v36, %v5516_v30  ;;  %v2395_v25 = vsel %vm2393_vm2, %v5972_v27, %v6795_v20  ;;  %v2226_v23 = vsel %vm2222_vm7, %v5935_v54, %v5938_v60 }
 0x28d   : > { %4078 = vmatprep.mubr.msk.f32.mxu0 %vm626_vm0, %v696_v11  ;;  %v1764_v38 = vmul.f32 %v5942_v34, %v1754_v13  ;;  %v2399_v49 = vsel %vm2392_vm3, %v2395_v25, %v2398_v39  ;;  %v2227_v56 = vsel %vm2225_vm10, %v5961_v10, 2102212464  ;;  %v991_v11 = vmul.f32 %v990_v52, %v988_v6 }
 0x28e   : > { %v4497_v19 = vpop.eup %4496  ;;  %4093 = vmatmul.mubr.msk.f32.vlgmr.msra.gmra.mrb[0].mxu1 %vm626_vm0, %v1773_v16  ;;  %v687_v30 = vmul.f32 %v5942_v34, %v677_v9  ;;  %v2400_v33 = vsel %vm1973_vm4, nan, %v2399_v49  ;;  %v2228_v54 = vsel %vm2224_vm9, %v5951_v32, %v2227_v56  ;;  %v2231_v39 = vsel %vm2225_vm10, %v2218_v24, 920167782  ;;  %v6075_v56 = vld [vmem:[%s5472_s22 + $0x18] sm:$0xff] }
 0x28f   : > { %v4499_v12 = vpop.eup %4498  ;;  %v1774_v14 = vadd.f32 %v5955_v1, %v1764_v38  ;;  %v678_v46 = vmul.f32 %v4497_v19, %v5533_v48  ;;  %2717 = vrot.lane.b32.xlu0 %v2400_v33, %s4984_s21  ;;  %v2230_v48 = vsel %vm2222_vm7, %v5938_v60, %v5951_v32  ;;  %v992_v16 = vxor.u32 2147483648, %v991_v11 }
 0x290   : > { %v697_v57 = vadd.f32 %v5955_v1, %v687_v30  ;;  %v1755_v36 = vmul.f32 %v4499_v12, %v5526_v40  ;;  %v2234_v40 = vsel %vm2222_vm7, %v5951_v32, %v5961_v10  ;;  %v2232_v9 = vsel %vm2224_vm9, %v5961_v10, %v2231_v39 }
 0x291   : > { %4095 = vmatprep.mubr.msk.f32.mxu1 %vm626_vm0, %v1774_v14  ;;  %v688_v13 = vmul.f32 %v5942_v34, %v678_v46  ;;  %v2235_v25 = vsel %vm2225_vm10, %v2221_v28, 1326507024  ;;  %v2233_v32 = vsel %vm2223_vm8, %v2230_v48, %v2232_v9  ;;  %v993_v30 = vsel %vm910_vm12, %v992_v16, %v991_v11 }
 0x292   : > { %v4501_v52 = vpop.eup %4500  ;;  %4079 = vmatmul.mubr.msk.f32.vlgmr.msra.gmra.mrb[0].mxu0 %vm626_vm0, %v697_v57  ;;  %v1765_v60 = vmul.f32 %v5942_v34, %v1755_v36  ;;  %v2236_v49 = vsel %vm2224_vm9, %v2218_v24, %v2235_v25  ;;  %v1418_v10 = vadd.s32 3, %v5928_v53  ;;  %v996_v33 = vsel %vm5887_vm15, %v5638_v22, %v993_v30 }
 0x293   : > { %v698_v61 = vadd.f32 %v5955_v1, %v688_v13  ;;  %v679_v38 = vmul.f32 %v4501_v52, %v5536_v50  ;;  %v2237_v28 = vsel %vm2223_vm8, %v2234_v40, %v2236_v49  ;;  %4502 = vcosq.f32 %v996_v33 }
 0x294   : > { %v1775_v19 = vadd.f32 %v5955_v1, %v1765_v60  ;;  %v6061_v24 = vmul.u32.u64.low %v5906_v44, %v2237_v28  ;;  %v6062_v6 = vmul.u32.u64.high %v5906_v44, %v2237_v28, %v6061_v24  ;;  %v2229_v12 = vsel %vm2223_vm8, %v2226_v23, %v2228_v54 }
 0x295   : > { %4081 = vmatprep.mubr.msk.f32.mxu0 %vm626_vm0, %v698_v61  ;;  %v689_v50 = vmul.f32 %v5942_v34, %v679_v38  ;;  %v6068_v14 = vmul.u32.u64.low %v5906_v44, %v2233_v32  ;;  %v6069_v46 = vmul.u32.u64.high %v5906_v44, %v2233_v32, %v6068_v14  ;;  %4504 = vsinq.f32 %v996_v33 }
 0x296   : > { %4096 = vmatmul.mubr.msk.f32.gmra.mrb[2].mxu1 %vm626_vm0, %v1775_v19  ;;  %v1419_v57 = vand.u32 3, %v1418_v10  ;;  %v2245_v36 = vmul.u32 %v5906_v44, %v2229_v12  ;;  %vm2098_vm12 = vcmp.gt.s32.totalorder %v2097_v63, 0  ;;  %v2094_v23 = vand.u32 8388607, %v2087_v18 }
 0x297   : > { %v699_v34 = vadd.f32 %v5955_v1, %v689_v50  ;;  %vm2247_vm11 = vc.u32 %v6062_v6, %v6068_v14  ;;  %v2248_v29 = vadd.s32 1, %v6069_v46  ;;  %v2099_v1 = vsel %vm2098_vm12, %v2097_v63, 0 }
 0x298   : > { %v1117_v11 = vand.u32 2139095040, %v6075_v56  ;;  %v2101_v0 = vand.u32 31, %v2099_v1  ;;  %vm1420_vm15 = vcmp.lt.s32.totalorder %v1419_v57, 2  ;;  %vm1421_vm13 = vcmp.eq.s32.totalorder %v1419_v57, 0 }
 0x299   : > { %4082 = vmatmul.mubr.msk.f32.gmra.mrb[2].mxu0 %vm626_vm0, %v699_v34  ;;  %vm1424_vm2 = vcmp.eq.s32.totalorder %v1419_v57, 2  ;;  %v2249_v44 = vsel %vm2247_vm11, %v2248_v29, %v6069_v46  ;;  %v2095_v40 = vor.u32 8388608, %v2094_v23  ;;  %v2100_v52 = vshrl.u32 %v2099_v1, 5 }
 0x29a   : > { %v2250_v48 = vadd.s32 %v2249_v44, %v2245_v36  ;;  %v2102_v13 = vsub.s32 32, %v2101_v0  ;;  %v2104_v54 = vshll.u32 %v4978_v41, %v2101_v0  ;;  %v2107_v39 = vshll.u32 %v4979_v43, %v2101_v0 }
 0x29b   : > { %v2113_v60 = vshll.u32 %v4981_v47, %v2101_v0  ;;  %v1118_v16 = vshrl.u32 %v1117_v11, 23  ;;  %v2110_v38 = vshll.u32 %v4980_v45, %v2101_v0  ;;  %v2116_v30 = vshll.u32 %v4982_v51, %v2101_v0 }
 0x29c   : > { %v2251_v9 = vadd.s32 536870912, %v2250_v48  ;;  %v2105_v25 = vshrl.u32 %v4979_v43, %v2102_v13  ;;  %v2108_v61 = vshrl.u32 %v4980_v45, %v2102_v13  ;;  %v2111_v49 = vshrl.u32 %v4981_v47, %v2102_v13 }
 0x29d   : > { %v6093_v32 = vpop.eup %4502  ;;  %v2114_v19 = vshrl.u32 %v4982_v51, %v2102_v13  ;;  %v2117_v10 = vshrl.u32 %v4983_v59, %v2102_v13  ;;  %v2103_v34 = vshrl.u32 %v4978_v41, %v2102_v13  ;;  %vm2119_vm3 = vcmp.lt.s32.totalorder %v2100_v52, 1 }
 0x29e   : > { %v6792_v50 = vxor.u32 2147483648, %v6093_v32  ;;  %v2252_v33 = vshrl.u32 %v2251_v9, 30  ;;  %v2106_v24 = vor.u32 %v2105_v25, %v2104_v54  ;;  %v2109_v12 = vor.u32 %v2108_v61, %v2107_v39 }
 0x29f   : > { %v6099_v28 = vpop.eup %4504  ;;  %v2115_v63 = vor.u32 %v2114_v19, %v2113_v60  ;;  %v2112_v23 = vor.u32 %v2111_v49, %v2110_v38  ;;  %vm2120_vm5 = vcmp.lt.s32.totalorder %v2100_v52, 2  ;;  %v2118_v11 = vor.u32 %v2117_v10, %v2116_v30 }
 0x2a0   : > { %v6793_v46 = vxor.u32 2147483648, %v6099_v28  ;;  %v1426_v36 = vsel %vm1424_vm2, %v6792_v50, %v6099_v28  ;;  %v2253_v29 = vshll.u32 %v2252_v33, 30  ;;  %vm2121_vm7 = vcmp.lt.s32.totalorder %v2100_v52, 3 }
 0x2a1   : > { %vm2122_vm8 = vcmp.lt.s32.totalorder %v2100_v52, 4  ;;  %v2127_v54 = vsel %vm2119_vm3, %v2106_v24, %v2109_v12  ;;  %v2135_v9 = vshll.u32 %v2095_v40, 8  ;;  %v2123_v61 = vsel %vm2119_vm3, %v2103_v34, %v2106_v24 }
 0x2a2   : > { %v1423_v1 = vsel %vm1421_vm13, %v6093_v32, %v6793_v46  ;;  %v2254_v44 = vsub.s32 %v2250_v48, %v2253_v29  ;;  %v2124_v13 = vsel %vm2122_vm8, %v2112_v23, 2102212464  ;;  %v2128_v60 = vsel %vm2122_vm8, %v2115_v63, 920167782 }
 0x2a3   : > { %v1427_v0 = vsel %vm1420_vm15, %v1423_v1, %v1426_v36  ;;  %v2129_v38 = vsel %vm2121_vm7, %v2112_v23, %v2128_v60  ;;  %v2125_v49 = vsel %vm2121_vm7, %v2109_v12, %v2124_v13  ;;  %v2131_v48 = vsel %vm2119_vm3, %v2109_v12, %v2112_v23 }
 0x2a4   : > { %v1428_v39 = vsel %vm1000_vm14, nan, %v1427_v0  ;;  %v2256_v25 = vsub.s32 0, %v2254_v44  ;;  %v2130_v57 = vsel %vm2120_vm5, %v2127_v54, %v2129_v38  ;;  %v2132_v19 = vsel %vm2122_vm8, %v2118_v11, 1326507024  ;;  %v6148_v38 = vld [vmem:[%s5472_s22 + $0x10] sm:$0xff] }
 0x2a5   : > { %1643 = vrot.lane.b32.xlu1 %v1428_v39, %s4984_s21  ;;  %v2276_v10 = vsub.s32 4, %v2252_v33  ;;  %v2133_v36 = vsel %vm2121_vm7, %v2115_v63, %v2132_v19  ;;  %v3917_v29 = vadd.s32 4294967169, %v1118_v16  ;;  %v2126_v34 = vsel %vm2120_vm5, %v2123_v61, %v2125_v49 }
 0x2a6   : > { %v3954_v30 = vmin.u32 %v2256_v25, %v2254_v44  ;;  %v2134_v40 = vsel %vm2120_vm5, %v2131_v48, %v2133_v36  ;;  %v6124_v1 = vmul.u32.u64.low %v2135_v9, %v2130_v57  ;;  %v6125_v0 = vmul.u32.u64.high %v2135_v9, %v2130_v57, %v6124_v1 }
 0x2a7   : > { %v1114_v13 = vand.u32 2147483647, %v6075_v56  ;;  %vm2192_vm9 = vcmp.lt.s32.totalorder %v5823_v35, 0  ;;  %v6131_v12 = vmul.u32.u64.low %v2135_v9, %v2134_v40  ;;  %v6132_v23 = vmul.u32.u64.high %v2135_v9, %v2134_v40, %v6131_v12 }
 0x2a8   : > { %v2258_v24 = vclz %v3954_v30  ;;  %v1124_v11 = vadd.s32 1, %v3917_v29  ;;  %v2277_v16 = vsel %vm2192_vm9, %v2276_v10, %v2252_v33  ;;  %vm6138_vm10 = vcmp.le.f32.partialorder %v2190_v26, 0.7853982 }
 0x2a9   : > { %v2142_v52 = vmul.u32 %v2135_v9, %v2126_v34  ;;  %v2145_v39 = vadd.s32 1, %v6125_v0  ;;  %v2246_v60 = vadd.s32 %v6068_v14, %v6062_v6  ;;  %v1121_v25 = vand.u32 8388607, %v1114_v13 }
 0x2aa   : > { %v3955_v63 = vadd.s32 4294967294, %v2258_v24  ;;  %vm1125_vm11 = vcmp.gt.s32.totalorder %v1124_v11, 0  ;;  %v6152_v26 = vsel %vm6138_vm10, 0, %v2277_v16  ;;  %vm2144_vm15 = vc.u32 %v6132_v23, %v6124_v1 }
 0x2ab   : > { %v1126_v61 = vsel %vm1125_vm11, %v1124_v11, 0  ;;  %v2146_v6 = vsel %vm2144_vm15, %v2145_v39, %v6125_v0  ;;  %v1011_v19 = vand.u32 2147483647, %v6148_v38  ;;  %v1014_v30 = vand.u32 2139095040, %v6148_v38 }
 0x2ac   : > { %vm3956_vm12 = vcmp.lt.s32.totalorder %v3955_v63, 0  ;;  %v2147_v14 = vadd.s32 %v2146_v6, %v2142_v52  ;;  %v1128_v48 = vand.u32 31, %v1126_v61  ;;  %v2702_v29 = vadd.s32 3, %v6152_v26 }
 0x2ad   : > { %v2261_v33 = vsel %vm3956_vm12, 0, %v3955_v63  ;;  %v1122_v40 = vor.u32 8388608, %v1121_v25  ;;  %v1127_v34 = vshrl.u32 %v1126_v61, 5  ;;  %vm2282_vm12 = vweird.f32 %v5823_v35 }
 0x2ae   : > { %v2262_v9 = vsub.s32 32, %v2261_v33  ;;  %v2263_v49 = vshll.u32 %v2254_v44, %v2261_v33  ;;  %v2266_v57 = vsub.s32 4294967266, %v2261_v33  ;;  %v2148_v24 = vadd.s32 536870912, %v2147_v14 }
 0x2af   : > { %v1129_v12 = vsub.s32 32, %v1128_v48  ;;  %v1131_v11 = vshll.u32 %v4978_v41, %v1128_v48  ;;  %v1134_v0 = vshll.u32 %v4979_v43, %v1128_v48  ;;  %v1140_v16 = vshll.u32 %v4981_v47, %v1128_v48 }
 0x2b0   : > { %v2264_v10 = vshrl.u32 %v2246_v60, %v2262_v9  ;;  %v2267_v36 = vadd.s32 127, %v2266_v57  ;;  %v6163_v52 = vshrl.u32 %v2148_v24, 30  ;;  %v1137_v33 = vshll.u32 %v4980_v45, %v1128_v48 }
 0x2b1   : > { %v1132_v39 = vshrl.u32 %v4979_v43, %v1129_v12  ;;  %v1135_v60 = vshrl.u32 %v4980_v45, %v1129_v12  ;;  %v1138_v61 = vshrl.u32 %v4981_v47, %v1129_v12  ;;  %v1141_v57 = vshrl.u32 %v4982_v51, %v1129_v12 }
 0x2b2   : > { %v2265_v44 = vor.u32 %v2264_v10, %v2263_v49  ;;  %v2268_v63 = vshll.u32 %v2267_v36, 23  ;;  %v2150_v49 = vshll.u32 %v6163_v52, 30  ;;  %vm1146_vm13 = vcmp.lt.s32.totalorder %v1127_v34, 1 }
 0x2b3   : > { %v1133_v6 = vor.u32 %v1132_v39, %v1131_v11  ;;  %v1015_v10 = vshrl.u32 %v1014_v30, 23  ;;  %v1136_v24 = vor.u32 %v1135_v60, %v1134_v0  ;;  %v1142_v50 = vor.u32 %v1141_v57, %v1140_v16 }
 0x2b4   : > { %v2269_v25 = vor.u32 4788187, %v2268_v63  ;;  %v2272_v9 = vcvt.s32.f32 %v2265_v44  ;;  %v1143_v46 = vshll.u32 %v4982_v51, %v1128_v48  ;;  %v6172_v21 = vsub.s32 %v2147_v14, %v2150_v49 }
 0x2b5   : > { %v1139_v20 = vor.u32 %v1138_v61, %v1137_v33  ;;  %v1144_v63 = vshrl.u32 %v4983_v59, %v1129_v12  ;;  %vm1149_vm2 = vcmp.lt.s32.totalorder %v1127_v34, 4  ;;  %v1130_v17 = vshrl.u32 %v4978_v41, %v1129_v12 }
 0x2b6   : > { %v2270_v36 = vand.u32 2147483647, %v2269_v25  ;;  %vm1148_vm3 = vcmp.lt.s32.totalorder %v1127_v34, 3  ;;  %v6176_v37 = vshll.u32 %v1122_v40, 8  ;;  %v2153_v11 = vsub.s32 0, %v6172_v21 }
 0x2b7   : > { %v1145_v30 = vor.u32 %v1144_v63, %v1143_v46  ;;  %vm1147_vm5 = vcmp.lt.s32.totalorder %v1127_v34, 2  ;;  %v3913_v0 = vadd.s32 4294967169, %v1015_v10  ;;  %v1151_v48 = vsel %vm1149_vm2, %v1139_v20, 2102212464 }
 0x2b8   : > { %v2273_v44 = vmul.f32 %v2272_v9, %v2270_v36  ;;  %v1154_v14 = vsel %vm1146_vm13, %v1133_v6, %v1136_v24  ;;  %v1155_v39 = vsel %vm1149_vm2, %v1142_v50, 920167782  ;;  %v3950_v60 = vmin.u32 %v2153_v11, %v6172_v21 }
 0x2b9   : > { %v1156_v33 = vsel %vm1148_vm3, %v1139_v20, %v1155_v39  ;;  %v1158_v12 = vsel %vm1146_vm13, %v1136_v24, %v1139_v20  ;;  %v1159_v40 = vsel %vm1149_vm2, %v1145_v30, 1326507024  ;;  %v6188_v25 = vand.u32 3, %v2702_v29 }
 0x2ba   : > { %v2274_v16 = vxor.u32 2147483648, %v2273_v44  ;;  %v1150_v9 = vsel %vm1146_vm13, %v1130_v17, %v1133_v6  ;;  %v1160_v61 = vsel %vm1148_vm3, %v1142_v50, %v1159_v40  ;;  %v2155_v49 = vclz %v3950_v60 }
 0x2bb   : > { %v1152_v10 = vsel %vm1148_vm3, %v1136_v24, %v1151_v48  ;;  %v1157_v20 = vsel %vm1147_vm5, %v1154_v14, %v1156_v33  ;;  %v1161_v36 = vsel %vm1147_vm5, %v1158_v12, %v1160_v61  ;;  %v6200_v29 = vand.u32 8388607, %v1011_v19 }
 0x2bc   : > { %v2275_v46 = vsel %vm2192_vm9, %v2274_v16, %v2273_v44  ;;  %v1021_v63 = vadd.s32 1, %v3913_v0  ;;  %v3951_v17 = vadd.s32 4294967294, %v2155_v49  ;;  %v1153_v54 = vsel %vm1147_vm5, %v1150_v9, %v1152_v10 }
 0x2bd   : > { %v2278_v57 = vsel %vm6138_vm10, %v5823_v35, %v2275_v46  ;;  %v6203_v50 = vmul.u32.u64.low %v6176_v37, %v1161_v36  ;;  %v6204_v6 = vmul.u32.u64.high %v6176_v37, %v1161_v36, %v6203_v50  ;;  %v2143_v11 = vadd.s32 %v6124_v1, %v6132_v23 }
 0x2be   : > { %4506 = vcosq.f32 %v2278_v57  ;;  %v6208_v24 = vmul.u32.u64.low %v6176_v37, %v1157_v20  ;;  %v6209_v44 = vmul.u32.u64.high %v6176_v37, %v1157_v20, %v6208_v24  ;;  %vm1022_vm7 = vcmp.gt.s32.totalorder %v1021_v63, 0 }
 0x2bf   : > { %4508 = vsinq.f32 %v2278_v57  ;;  %vm3952_vm8 = vcmp.lt.s32.totalorder %v3951_v17, 0  ;;  %v1023_v30 = vsel %vm1022_vm7, %v1021_v63, 0  ;;  %vm2704_vm9 = vcmp.lt.s32.totalorder %v6188_v25, 2 }
 0x2c0   : > { %vm2705_vm10 = vcmp.eq.s32.totalorder %v6188_v25, 0  ;;  %vm2708_vm11 = vcmp.eq.s32.totalorder %v6188_v25, 2  ;;  %v2158_v0 = vsel %vm3952_vm8, 0, %v3951_v17  ;;  %v1025_v34 = vand.u32 31, %v1023_v30 }
 0x2c1   : > { %v2159_v16 = vsub.s32 32, %v2158_v0  ;;  %v2160_v48 = vshll.u32 %v6172_v21, %v2158_v0  ;;  %v2163_v14 = vsub.s32 4294967266, %v2158_v0  ;;  %v1169_v39 = vmul.u32 %v6176_v37, %v1153_v54 }
 0x2c2   : > { %vm1171_vm15 = vc.u32 %v6204_v6, %v6208_v24  ;;  %v1172_v1 = vadd.s32 1, %v6209_v44  ;;  %v1019_v23 = vor.u32 8388608, %v6200_v29  ;;  %v1026_v60 = vsub.s32 32, %v1025_v34 }
 0x2c3   : > { %vm2089_vm13 = vcmp.lt.s32.totalorder %v5877_v62, 0  ;;  %v2161_v33 = vshrl.u32 %v2143_v11, %v2159_v16  ;;  %v2164_v12 = vadd.s32 127, %v2163_v14  ;;  %v2173_v40 = vsub.s32 4, %v6163_v52 }
 0x2c4   : > { %v6226_v46 = vshrl.u32 %v1023_v30, 5  ;;  %v1173_v21 = vsel %vm1171_vm15, %v1172_v1, %v6209_v44  ;;  %v1028_v37 = vshll.u32 %v4978_v41, %v1025_v34  ;;  %v1029_v9 = vshrl.u32 %v4979_v43, %v1026_v60 }
 0x2c5   : > { %v1031_v61 = vshll.u32 %v4979_v43, %v1025_v34  ;;  %vm6234_vm2 = vcmp.le.f32.partialorder %v2087_v18, 0.7853982  ;;  %v2162_v49 = vor.u32 %v2161_v33, %v2160_v48  ;;  %v2165_v10 = vshll.u32 %v2164_v12, 23 }
 0x2c6   : > { %v1174_v20 = vadd.s32 %v1173_v21, %v1169_v39  ;;  %v1034_v36 = vshll.u32 %v4980_v45, %v1025_v34  ;;  %v1032_v63 = vshrl.u32 %v4980_v45, %v1026_v60  ;;  %v1035_v17 = vshrl.u32 %v4981_v47, %v1026_v60 }
 0x2c7   : > { %v1037_v50 = vshll.u32 %v4981_v47, %v1025_v34  ;;  %v1038_v43 = vshrl.u32 %v4982_v51, %v1026_v60  ;;  %v2166_v44 = vor.u32 4788187, %v2165_v10  ;;  %v2169_v11 = vcvt.s32.f32 %v2162_v49 }
 0x2c8   : > { %v6239_v29 = vpop.eup %4506  ;;  %v1175_v30 = vadd.s32 536870912, %v1174_v20  ;;  %v1027_v16 = vshrl.u32 %v4978_v41, %v1026_v60  ;;  %v1030_v48 = vor.u32 %v1029_v9, %v1028_v37  ;;  %v1040_v45 = vshll.u32 %v4982_v51, %v1025_v34 }
 0x2c9   : > { %v6245_v54 = vpop.eup %4508  ;;  %v2289_v18 = vxor.u32 2147483648, %v6239_v29  ;;  %v2167_v14 = vand.u32 2147483647, %v2166_v44  ;;  %v1041_v1 = vshrl.u32 %v4983_v59, %v1026_v60  ;;  %v1033_v33 = vor.u32 %v1032_v63, %v1031_v61 }
 0x2ca   : > { %v2286_v0 = vxor.u32 2147483648, %v6245_v54  ;;  %v6256_v39 = vshrl.u32 %v1175_v30, 30  ;;  %v1036_v12 = vor.u32 %v1035_v17, %v1034_v36  ;;  %v1039_v51 = vor.u32 %v1038_v43, %v1037_v50 }
 0x2cb   : > { %v2710_v47 = vsel %vm2708_vm11, %v2289_v18, %v6245_v54  ;;  %v2170_v21 = vmul.f32 %v2169_v11, %v2167_v14  ;;  %vm1043_vm3 = vcmp.lt.s32.totalorder %v6226_v46, 1  ;;  %v2174_v60 = vsel %vm2089_vm13, %v2173_v40, %v6163_v52 }
 0x2cc   : > { %v2707_v41 = vsel %vm2705_vm10, %v6239_v29, %v2286_v0  ;;  %v1177_v37 = vshll.u32 %v6256_v39, 30  ;;  %v1042_v9 = vor.u32 %v1041_v1, %v1040_v45  ;;  %vm1046_vm5 = vcmp.lt.s32.totalorder %v6226_v46, 4 }
 0x2cd   : > { %v2711_v34 = vsel %vm2704_vm9, %v2707_v41, %v2710_v47  ;;  %v2171_v61 = vxor.u32 2147483648, %v2170_v21  ;;  %vm1045_vm7 = vcmp.lt.s32.totalorder %v6226_v46, 3  ;;  %v1048_v49 = vsel %vm1046_vm5, %v1036_v12, 2102212464 }
 0x2ce   : > { %v2712_v59 = vsel %vm2282_vm12, nan, %v2711_v34  ;;  %v1178_v25 = vsub.s32 %v1174_v20, %v1177_v37  ;;  %vm1044_vm8 = vcmp.lt.s32.totalorder %v6226_v46, 2  ;;  %v1051_v10 = vsel %vm1043_vm3, %v1030_v48, %v1033_v33 }
 0x2cf   : > { %2723 = vrot.lane.b32.xlu1 %v2712_v59, %s4984_s21  ;;  %v1052_v52 = vsel %vm1046_vm5, %v1039_v51, 920167782  ;;  %v1059_v40 = vshll.u32 %v1019_v23, 8  ;;  %v2172_v36 = vsel %vm2089_vm13, %v2171_v61, %v2170_v21  ;;  %v6287_v20 = vsel %vm6234_vm2, 0, %v2174_v60 }
 0x2d0   : > { %v1180_v63 = vsub.s32 0, %v1178_v25  ;;  %v1047_v17 = vsel %vm1043_vm3, %v1027_v16, %v1030_v48  ;;  %v2175_v50 = vsel %vm6234_vm2, %v5877_v62, %v2172_v36  ;;  %v1049_v43 = vsel %vm1045_vm7, %v1033_v33, %v1048_v49 }
 0x2d1   : > { %v1053_v23 = vsel %vm1045_vm7, %v1036_v12, %v1052_v52  ;;  %v1056_v44 = vsel %vm1046_vm5, %v1042_v9, 1326507024  ;;  %4510 = vcosq.f32 %v2175_v50  ;;  %v1055_v16 = vsel %vm1043_vm3, %v1033_v33, %v1036_v12 }
 0x2d2   : > { %v3918_v11 = vmin.u32 %v1180_v63, %v1178_v25  ;;  %v1054_v30 = vsel %vm1044_vm8, %v1051_v10, %v1053_v23  ;;  %4512 = vsinq.f32 %v2175_v50  ;;  %v1057_v57 = vsel %vm1045_vm7, %v1039_v51, %v1056_v44 }
 0x2d3   : > { %v6306_v48 = vmul.u32.u64.low %v1059_v40, %v1054_v30  ;;  %v6307_v45 = vmul.u32.u64.high %v1059_v40, %v1054_v30, %v6306_v48  ;;  %v2598_v47 = vadd.s32 3, %v6287_v20  ;;  %v1058_v1 = vsel %vm1044_vm8, %v1055_v16, %v1057_v57 }
 0x2d4   : > { %v1182_v14 = vclz %v3918_v11  ;;  %v1050_v34 = vsel %vm1044_vm8, %v1047_v17, %v1049_v43  ;;  %v6314_v21 = vmul.u32.u64.low %v1059_v40, %v1058_v1  ;;  %v6315_v37 = vmul.u32.u64.high %v1059_v40, %v1058_v1, %v6314_v21 }
 0x2d5   : > { %v2599_v33 = vand.u32 3, %v2598_v47  ;;  %v1170_v12 = vadd.s32 %v6208_v24, %v6204_v6  ;;  %v1069_v51 = vadd.s32 1, %v6307_v45  ;;  %v1066_v60 = vmul.u32 %v1059_v40, %v1050_v34 }
 0x2d6   : > { %v3919_v41 = vadd.s32 4294967294, %v1182_v14  ;;  %vm1068_vm10 = vc.u32 %v6315_v37, %v6306_v48  ;;  %vm2179_vm2 = vweird.f32 %v5877_v62  ;;  %v1200_v47 = vsub.s32 4, %v6256_v39 }
 0x2d7   : > { %vm2604_vm11 = vcmp.eq.s32.totalorder %v2599_v33, 2  ;;  %v1070_v36 = vsel %vm1068_vm10, %v1069_v51, %v6307_v45  ;;  %vm2601_vm15 = vcmp.eq.s32.totalorder %v2599_v33, 0  ;;  %vm2600_vm13 = vcmp.lt.s32.totalorder %v2599_v33, 2 }
 0x2d8   : > { %vm3920_vm9 = vcmp.lt.s32.totalorder %v3919_v41, 0  ;;  %v1071_v24 = vadd.s32 %v1070_v36, %v1066_v60  ;;  %vm1116_vm3 = vcmp.lt.s32.totalorder %v6075_v56, 0  ;;  %vm1115_vm5 = vcmp.le.f32.partialorder %v1114_v13, 0.7853982 }
 0x2d9   : > { %v1185_v59 = vsel %vm3920_vm9, 0, %v3919_v41  ;;  %v1201_v21 = vsel %vm1116_vm3, %v1200_v47, %v6256_v39 }
 0x2da   : > { %v1186_v9 = vsub.s32 32, %v1185_v59  ;;  %v1187_v61 = vshll.u32 %v1178_v25, %v1185_v59  ;;  %v1190_v49 = vsub.s32 4294967266, %v1185_v59  ;;  %v1072_v43 = vadd.s32 536870912, %v1071_v24 }
 0x2db   : > { %v6321_v10 = vpop.eup %4510  ;;  %v1203_v59 = vsel %vm1115_vm5, 0, %v1201_v21 }
 0x2dc   : > { %v1188_v46 = vshrl.u32 %v1170_v12, %v1186_v9  ;;  %v1191_v52 = vadd.s32 127, %v1190_v49  ;;  %v6324_v63 = vpop.eup %4512  ;;  %v2186_v6 = vxor.u32 2147483648, %v6321_v10  ;;  %v6335_v16 = vshrl.u32 %v1072_v43, 30 }
 0x2dd   : > { %v2183_v40 = vxor.u32 2147483648, %v6324_v63  ;;  %v1207_v13 = vand.u32 3, %v1203_v59 }
 0x2de   : > { %v1189_v25 = vor.u32 %v1188_v46, %v1187_v61  ;;  %v1192_v17 = vshll.u32 %v1191_v52, 23  ;;  %v2606_v50 = vsel %vm2604_vm11, %v2186_v6, %v6324_v63  ;;  %v1074_v14 = vshll.u32 %v6335_v16, 30 }
 0x2df   : > { %v2603_v23 = vsel %vm2601_vm15, %v6321_v10, %v2183_v40  ;;  %v1626_v61 = vadd.s32 3, %v1203_v59  ;;  %v1067_v46 = vadd.s32 %v6306_v48, %v6315_v37  ;;  %vm1212_vm10 = vcmp.eq.s32.totalorder %v1207_v13, 2 }
 0x2e0   : > { %v1193_v44 = vor.u32 4788187, %v1192_v17  ;;  %v1196_v11 = vcvt.s32.f32 %v1189_v25  ;;  %v2607_v30 = vsel %vm2600_vm13, %v2603_v23, %v2606_v50  ;;  %v1075_v41 = vsub.s32 %v1071_v24, %v1074_v14 }
 0x2e1   : > { %v2608_v57 = vsel %vm2179_vm2, nan, %v2607_v30  ;;  %v1627_v52 = vand.u32 3, %v1626_v61  ;;  %vm1209_vm11 = vcmp.eq.s32.totalorder %v1207_v13, 0  ;;  %vm1206_vm15 = vweird.f32 %v6075_v56 }
 0x2e2   : > { %v1194_v45 = vand.u32 2147483647, %v1193_v44  ;;  %2721 = vrot.lane.b32.xlu0 %v2608_v57, %s4984_s21  ;;  %v1077_v33 = vsub.s32 0, %v1075_v41  ;;  %v2283_v59 = vand.u32 3, %v6152_v26 }
 0x2e3   : > { %vm1629_vm8 = vcmp.eq.s32.totalorder %v1627_v52, 0  ;;  %vm1632_vm9 = vcmp.eq.s32.totalorder %v1627_v52, 2  ;;  %vm1628_vm13 = vcmp.lt.s32.totalorder %v1627_v52, 2 }
 0x2e4   : > { %v1197_v1 = vmul.f32 %v1196_v11, %v1194_v45  ;;  %v3914_v60 = vmin.u32 %v1077_v33, %v1075_v41 }
 0x2e6   : > { %v1198_v34 = vxor.u32 2147483648, %v1197_v1  ;;  %v1079_v9 = vclz %v3914_v60  ;;  %v2180_v60 = vand.u32 3, %v6287_v20 }
 0x2e8   : > { %v1199_v12 = vsel %vm1116_vm3, %v1198_v34, %v1197_v1  ;;  %v3915_v49 = vadd.s32 4294967294, %v1079_v9  ;;  %vm1208_vm3 = vcmp.lt.s32.totalorder %v1207_v13, 2  ;;  %v1097_v1 = vsub.s32 4, %v6335_v16 }
 0x2e9   : > { %v1202_v51 = vsel %vm1115_vm5, %v6075_v56, %v1199_v12  ;;  %vm1013_vm5 = vcmp.lt.s32.totalorder %v6148_v38, 0 }
 0x2ea   : > { %4514 = vcosq.f32 %v1202_v51  ;;  %vm3916_vm7 = vcmp.lt.s32.totalorder %v3915_v49, 0  ;;  %v1098_v9 = vsel %vm1013_vm5, %v1097_v1, %v6335_v16 }
 0x2eb   : > { %4516 = vsinq.f32 %v1202_v51  ;;  %v1082_v36 = vsel %vm3916_vm7, 0, %v3915_v49  ;;  %vm1012_vm7 = vcmp.le.f32.partialorder %v1011_v19, 0.7853982 }
 0x2ec   : > { %v1083_v24 = vsub.s32 32, %v1082_v36  ;;  %v1084_v25 = vshll.u32 %v1075_v41, %v1082_v36  ;;  %v1087_v39 = vsub.s32 4294967266, %v1082_v36  ;;  %v1100_v52 = vsel %vm1012_vm7, 0, %v1098_v9 }
 0x2ed   : > { %v1104_v13 = vand.u32 3, %v1100_v52 }
 0x2ee   : > { %v1085_v17 = vshrl.u32 %v1067_v46, %v1083_v24  ;;  %v1088_v50 = vadd.s32 127, %v1087_v39 }
 0x2f0   : > { %v1086_v11 = vor.u32 %v1085_v17, %v1084_v25  ;;  %v1089_v30 = vshll.u32 %v1088_v50, 23 }
 0x2f2   : > { %v1090_v57 = vor.u32 4788187, %v1089_v30  ;;  %v1093_v45 = vcvt.s32.f32 %v1086_v11 }
 0x2f4   : > { %v4515_v43 = vpop.eup %4514  ;;  %v1091_v21 = vand.u32 2147483647, %v1090_v57 }
 0x2f5   : > { %v4517_v23 = vpop.eup %4516  ;;  %v1213_v44 = vxor.u32 2147483648, %v4515_v43 }
 0x2f6   : > { %v1210_v48 = vxor.u32 2147483648, %v4517_v23  ;;  %v1094_v56 = vmul.f32 %v1093_v45, %v1091_v21 }
 0x2f7   : > { %v1634_v37 = vsel %vm1632_vm9, %v1213_v44, %v4517_v23  ;;  %v1214_v47 = vsel %vm1212_vm10, %v1213_v44, %v4517_v23  ;;  %vm2285_vm9 = vcmp.eq.s32.totalorder %v2283_v59, 0  ;;  %vm2288_vm10 = vcmp.eq.s32.totalorder %v2283_v59, 2  ;;  %v2720_v44 = vpop.permute.xlu1 %2719 }
 0x2f8   : > { %v1631_v14 = vsel %vm1629_vm8, %v4515_v43, %v1210_v48  ;;  %v1211_v41 = vsel %vm1209_vm11, %v4515_v43, %v1210_v48  ;;  %v1095_v61 = vxor.u32 2147483648, %v1094_v56  ;;  %vm2284_vm8 = vcmp.lt.s32.totalorder %v2283_v59, 2 }
 0x2f9   : > { %v1635_v34 = vsel %vm1628_vm13, %v1631_v14, %v1634_v37  ;;  %v1215_v33 = vsel %vm1208_vm3, %v1211_v41, %v1214_v47  ;;  %v2287_v49 = vsel %vm2285_vm9, %v6239_v29, %v2286_v0  ;;  %vm2182_vm11 = vcmp.eq.s32.totalorder %v2180_v60, 0 }
 0x2fa   : > { %v1636_v12 = vsel %vm1206_vm15, nan, %v1635_v34  ;;  %v6351_v51 = vsel %vm1206_vm15, nan, %v1215_v33  ;;  %v1096_v46 = vsel %vm1013_vm5, %v1095_v61, %v1094_v56  ;;  %v2290_v26 = vsel %vm2288_vm10, %v2289_v18, %v6245_v54 }
 0x2fb   : > { %1647 = vrot.lane.b32.xlu1 %v1636_v12, %s4984_s21  ;;  %v2184_v20 = vsel %vm2182_vm11, %v6321_v10, %v2183_v40  ;;  %v1099_v19 = vsel %vm1012_vm7, %v6148_v38, %v1096_v46  ;;  %v2291_v16 = vsel %vm2284_vm8, %v2287_v49, %v2290_v26  ;;  %vm2181_vm15 = vcmp.lt.s32.totalorder %v2180_v60, 2  ;;  %v1642_v11 = vpop.permute.xlu1 %1641 }
 0x2fc   : > { %vm2185_vm13 = vcmp.eq.s32.totalorder %v2180_v60, 2  ;;  %4518 = vcosq.f32 %v1099_v19  ;;  %v2292_v0 = vsel %vm2282_vm12, nan, %v2291_v16  ;;  %v1522_v29 = vadd.s32 3, %v1100_v52 }
 0x2fd   : > { %4520 = vsinq.f32 %v1099_v19  ;;  %v2187_v36 = vsel %vm2185_vm13, %v2186_v6, %v6324_v63  ;;  %vm1109_vm5 = vcmp.eq.s32.totalorder %v1104_v13, 2  ;;  %vm1106_vm8 = vcmp.eq.s32.totalorder %v1104_v13, 0 }
 0x2fe   : > { %v2188_v54 = vsel %vm2181_vm15, %v2184_v20, %v2187_v36  ;;  %v1523_v40 = vand.u32 3, %v1522_v29  ;;  %vm1105_vm9 = vcmp.lt.s32.totalorder %v1104_v13, 2  ;;  %vm1103_vm10 = vweird.f32 %v6148_v38 }
 0x2ff   : > { %v2189_v18 = vsel %vm2179_vm2, nan, %v2188_v54  ;;  %v2077_v29 = vand.u32 3, %v5690_v42  ;;  %v1974_v54 = vand.u32 3, %v5863_v31  ;;  %v6865_v31 = vxor.u32 2147483648, %v5975_v3 }
 0x300   : > { %vm1528_vm3 = vcmp.eq.s32.totalorder %v1523_v40, 2  ;;  %vm1525_vm7 = vcmp.eq.s32.totalorder %v1523_v40, 0  ;;  %vm1524_vm12 = vcmp.lt.s32.totalorder %v1523_v40, 2  ;;  %v6863_v40 = vxor.u32 2147483648, %v5810_v15 }
 0x301   : > { %v2718_v30 = vpop.permute.xlu0 %2717  ;;  %vm2079_vm2 = vcmp.eq.s32.totalorder %v2077_v29, 0  ;;  %vm2082_vm11 = vcmp.eq.s32.totalorder %v2077_v29, 2  ;;  %vm1976_vm15 = vcmp.eq.s32.totalorder %v1974_v54, 0  ;;  %vm1979_vm13 = vcmp.eq.s32.totalorder %v1974_v54, 2 }
 0x302   : > { %v2081_v13 = vsel %vm2079_vm2, %v5806_v58, %v6863_v40  ;;  %v4987_v40 = vmov 0  }
 0x303   : > { %4427 = vset.pattern.permute.xlu1 %v4987_v40  ;;  %4426 = vset.pattern.permute.xlu0 %v4987_v40 }
 0x306   : > { %v4519_v24 = vpop.eup %4518 }
 0x307   : > { %v4521_v25 = vpop.eup %4520  ;;  %v1110_v39 = vxor.u32 2147483648, %v4519_v24 }
 0x308   : > { %v1107_v35 = vxor.u32 2147483648, %v4521_v25 }
 0x309   : > { %v1530_v10 = vsel %vm1528_vm3, %v1110_v39, %v4521_v25  ;;  %v1111_v63 = vsel %vm1109_vm5, %v1110_v39, %v4521_v25  ;;  %vm2078_vm5 = vcmp.lt.s32.totalorder %v2077_v29, 2  ;;  %v4986_v29 = vmov -inf  }
 0x30a   : > { %v1527_v6 = vsel %vm1525_vm7, %v4519_v24, %v1107_v35  ;;  %v1108_v17 = vsel %vm1106_vm8, %v4519_v24, %v1107_v35  ;;  %v6864_v24 = vxor.u32 2147483648, %v5806_v58  ;;  %vm1975_vm8 = vcmp.lt.s32.totalorder %v1974_v54, 2 }
 0x30b   : > { %v1531_v62 = vsel %vm1524_vm12, %v1527_v6, %v1530_v10  ;;  %v1112_v50 = vsel %vm1105_vm9, %v1108_v17, %v1111_v63  ;;  %v6867_v35 = vxor.u32 2147483648, %v6099_v28  ;;  %v6868_v58 = vxor.u32 2147483648, %v6093_v32 }
 0x30c   : > { %v1532_v43 = vsel %vm1103_vm10, nan, %v1531_v62  ;;  %v1113_v23 = vsel %vm1103_vm10, nan, %v1112_v50  ;;  %v2084_v42 = vsel %vm2082_vm11, %v6864_v24, %v5810_v15  ;;  %v6869_v6 = vxor.u32 2147483648, %v5865_v7 }
 0x30d   : > { %1645 = vrot.lane.b32.xlu0 %v1532_v43, %s4984_s21  ;;  %v2085_v39 = vsel %vm2078_vm5, %v2081_v13, %v2084_v42  ;;  %vm2769_vm11 = vcmask 130048  }
 0x30e   : > { %v2086_v62 = vsel %vm2076_vm1, nan, %v2085_v39  ;;  %vm6451_vm1 = vmpackc.low %vm2769_vm11, %vm2769_vm11 }
 0x317   : > { %v1644_v37 = vpop.permute.xlu1 %1643 }
 0x341   : > { %v2724_v21 = vpop.permute.xlu1 %2723 }
 0x354   : > { %v2722_v33 = vpop.permute.xlu0 %2721 }
 0x361   : > { %v6379_v48 = vpop.f32.mrb[0].mxu1 }
 0x362   : > { %v6381_v57 = vpop.f32.mrb[1].mxu1  ;;  %v2730_v38 = vmul.f32 %v6379_v48, %v2720_v44 }
 0x363   : > { %v2729_v45 = vmul.f32 %v2718_v30, %v6381_v57  ;;  %v6387_v47 = vpack.i.bf16 %v6379_v48, %v6381_v57 }
 0x364   : > { %2739 = vrot.lane.b32.xlu1 %v2730_v38, %s4985_s27 }
 0x365   : > { %2737 = vrot.lane.b32.xlu0 %v2729_v45, %s4985_s27  ;;  %v6389_v14 = vpop.f32.mrb[0].mxu0 }
 0x366   : > { %v1654_v1 = vmul.f32 %v6389_v14, %v1644_v37  ;;  %v6392_v41 = vpop.f32.mrb[1].mxu0 }
 0x367   : > { %v1653_v34 = vmul.f32 %v1642_v11, %v6392_v41 }
 0x368   : > { %1663 = vrot.lane.b32.xlu1 %v1654_v1, %s4985_s27 }
 0x369   : > { %v4097_v12 = vpop.f32.mrb[2].mxu1  ;;  %1661 = vrot.lane.b32.xlu0 %v1653_v34, %s4985_s27 }
 0x36a   : > { %v1868_v56 = vpop.f32.mrb[3].mxu1  ;;  %v2732_v59 = vmul.f32 %v4097_v12, %v2724_v21  ;;  %v6395_v60 = vmul.f32 %v4097_v12, %v2292_v0 }
 0x36b   : > { %v2731_v9 = vmul.f32 %v2722_v33, %v1868_v56  ;;  %v6397_v61 = vmul.f32 %v2189_v18, %v1868_v56  ;;  %v6399_v49 = vpack.i.bf16 %v4097_v12, %v1868_v56  ;;  %v1001_v18 = vand.u32 3, %v5928_v53 }
 0x36c   : > { %2743 = vrot.lane.b32.xlu1 %v2732_v59, %s4985_s27  ;;  %v4083_v46 = vpop.f32.mrb[2].mxu0  ;;  %v1978_v53 = vsel %vm1976_vm15, %v5972_v27, %v6865_v31 }
 0x36d   : > { %2741 = vrot.lane.b32.xlu0 %v2731_v9, %s4985_s27  ;;  %v6402_v52 = vmul.f32 %v4083_v46, %v6351_v51  ;;  %v792_v26 = vpop.f32.mrb[3].mxu0  ;;  %v1648_v19 = vpop.permute.xlu1 %1647  ;;  %v898_v51 = vand.u32 3, %v5759_v55  ;;  %vm1003_vm3 = vcmp.eq.s32.totalorder %v1001_v18, 0  ;;  %vm1006_vm7 = vcmp.eq.s32.totalorder %v1001_v18, 2 }
 0x36e   : > { %v6404_v20 = vmul.f32 %v1113_v23, %v792_v26  ;;  %v1656_v16 = vmul.f32 %v4083_v46, %v1648_v19  ;;  %v6866_v55 = vxor.u32 2147483648, %v5972_v27  ;;  %vm1002_vm10 = vcmp.lt.s32.totalorder %v1001_v18, 2 }
 0x36f   : > { %vm900_vm12 = vcmp.eq.s32.totalorder %v898_v51, 0  ;;  %vm903_vm9 = vcmp.eq.s32.totalorder %v898_v51, 2  ;;  %v1005_v10 = vsel %vm1003_vm3, %v6093_v32, %v6867_v35  ;;  %v1008_v15 = vsel %vm1006_vm7, %v6868_v58, %v6099_v28 }
 0x370   : > { %1667 = vrot.lane.b32.xlu1 %v1656_v16, %s4985_s27  ;;  %v1981_v25 = vsel %vm1979_vm13, %v6866_v55, %v5975_v3  ;;  %vm899_vm2 = vcmp.lt.s32.totalorder %v898_v51, 2  ;;  %v902_v17 = vsel %vm900_vm12, %v5859_v2, %v6869_v6  ;;  %v6870_v27 = vxor.u32 2147483648, %v5859_v2 }
 0x371   : > { %v1982_v63 = vsel %vm1975_vm8, %v1978_v53, %v1981_v25  ;;  %v1009_v50 = vsel %vm1002_vm10, %v1005_v10, %v1008_v15  ;;  %v2294_v32 = vmul.f32 %v6379_v48, %v2086_v62  ;;  %v4988_v53 = vmov 0.0  }
 0x372   : > { %v905_v3 = vsel %vm903_vm9, %v6870_v27, %v5865_v7  ;;  %v1983_v43 = vsel %vm1973_vm4, nan, %v1982_v63  ;;  %v1010_v28 = vsel %vm1000_vm14, nan, %v1009_v50  ;;  %1694 = vst.msk [vmem:[#allocation5] sm:$0xff] %vm626_vm0, %v4988_v53  ;;  %1695 = vst.msk [vmem:[#allocation5 + $0x8] sm:$0xff] %vm626_vm0, %v4988_v53  ;;  %vm3454_vm4 = vcmask 7168  }
 0x373   : > { %v906_v23 = vsel %vm899_vm2, %v902_v17, %v905_v3  ;;  %v2293_v11 = vmul.f32 %v1983_v43, %v6381_v57  ;;  %v1218_v8 = vmul.f32 %v6389_v14, %v1010_v28  ;;  %1696 = vst.msk [vmem:[#allocation5 + $0x10] sm:$0xff] %vm626_vm0, %v4988_v53  ;;  %1697 = vst.msk [vmem:[#allocation5 + $0x18] sm:$0xff] %vm626_vm0, %v4988_v53 }
 0x374   : > { %v907_v2 = vsel %vm897_vm6, nan, %v906_v23  ;;  %vm1685_vm6 = vcmask 15360  }
 0x375   : > { %v1217_v22 = vmul.f32 %v907_v2, %v6392_v41  ;;  %1687 = vst.msk [vmem:[#allocation3 + $0x8] sm:$0xff] %vm1685_vm6, %v4986_v29  ;;  %1686 = vst.msk [vmem:[#allocation3] sm:$0xff] %vm1685_vm6, %v4986_v29 }
 0x376   : > { %1688 = vst.msk [vmem:[#allocation3 + $0x10] sm:$0xff] %vm1685_vm6, %v4986_v29  ;;  %1689 = vst.msk [vmem:[#allocation3 + $0x18] sm:$0xff] %vm1685_vm6, %v4986_v29 }
 0x377   : > { %1692 = vst.msk [vmem:[#allocation4 + $0x10] sm:$0xff] %vm1685_vm6, %v4988_v53  ;;  %1690 = vst.msk [vmem:[#allocation4] sm:$0xff] %vm1685_vm6, %v4988_v53 }
 0x378   : > { %1691 = vst.msk [vmem:[#allocation4 + $0x8] sm:$0xff] %vm1685_vm6, %v4988_v53  ;;  %1693 = vst.msk [vmem:[#allocation4 + $0x18] sm:$0xff] %vm1685_vm6, %v4988_v53  ;;  %v4991_v53 = vmov 1  }
 0x37c   : > { %v6515_v55 = vld [vmem:[#allocation3 + $0x8] sm:$0xff]  ;;  %v6517_v25 = vld [vmem:[#allocation3] sm:$0xff] }
 0x37d   : > { %v6529_v15 = vld [vmem:[#allocation3 + $0x10] sm:$0xff]  ;;  %v6534_v17 = vld [vmem:[#allocation3 + $0x18] sm:$0xff] }
 0x37f   : > { %v1646_v36 = vpop.permute.xlu0 %1645 }
 0x380   : > { %v1655_v0 = vmul.f32 %v1646_v36, %v792_v26 }
 0x382   : > { %1665 = vrot.lane.b32.xlu0 %v1655_v0, %s4985_s27 }
 0x3d6   : > { %v2740_v44 = vpop.permute.xlu1 %2739 }
 0x3d7   : > { %v6444_v7 = vadd.f32 %v2740_v44, %v2294_v32  ;;  %v2738_v4 = vpop.permute.xlu0 %2737 }
 0x3d8   : > { %v6446_v30 = vadd.f32 %v2738_v4, %v2293_v11 }
 0x3da   : > { %v4438_v37 = vpack.i.bf16 %v6444_v7, %v6446_v30  ;;  %v4184_v5 = vpack.c.bf16 %v6444_v7, %v6446_v30  ;;  %v1664_v57 = vpop.permute.xlu1 %1663 }
 0x3db   : > { %v1674_v38 = vadd.f32 %v1664_v57, %v1218_v8  ;;  %v1662_v45 = vpop.permute.xlu0 %1661 }
 0x3dc   : > { %v1673_v1 = vadd.f32 %v1662_v45, %v1217_v22  ;;  %4186 = vmatprep.subr.msk.bf16.mxu0 %vm6451_vm1, %v4184_v5 }
 0x3dd   : > { %v1678_v14 = vmul.f32 0.25, %v1674_v38  ;;  %4189 = vmatpush3.bf16.xpose.msk.msra.mxu0 %vm6451_vm1, %v4184_v5 }
 0x3de   : > { %v1677_v34 = vmul.f32 0.25, %v1673_v1  ;;  %v2744_v21 = vpop.permute.xlu1 %2743 }
 0x3df   : > { %1682 = vst.msk [vmem:[#allocation2 + $0x8] sm:$0xff] %vm626_vm0, %v1678_v14  ;;  %v6466_v41 = vadd.f32 %v2744_v21, %v6395_v60  ;;  %v2742_v33 = vpop.permute.xlu0 %2741 }
 0x3e0   : > { %1681 = vst.msk [vmem:[#allocation2] sm:$0xff] %vm626_vm0, %v1677_v34  ;;  %v6470_v12 = vadd.f32 %v2742_v33, %v6397_v61 }
 0x3e2   : > { %v4443_v56 = vpack.i.bf16 %v6466_v41, %v6470_v12  ;;  %v4190_v59 = vpack.c.bf16 %v6466_v41, %v6470_v12  ;;  %v1668_v60 = vpop.permute.xlu1 %1667 }
 0x3e3   : > { %v1676_v9 = vadd.f32 %v1668_v60, %v6402_v52 }
 0x3e4   : > { %4192 = vmatprep.subr.msk.bf16.mxu0 %vm6451_vm1, %v4190_v59 }
 0x3e5   : > { %4195 = vmatpush3.bf16.xpose.msk.msra.mxu0 %vm6451_vm1, %v4190_v59  ;;  %v1680_v61 = vmul.f32 0.25, %v1676_v9 }
 0x3e6   : > { %v2754_v26 = vld [vmem:[#allocation2 + $0x8] sm:$0xff] }
 0x3e7   : > { %v6481_v46 = vld [vmem:[#allocation2] sm:$0xff]  ;;  %1684 = vst.msk [vmem:[#allocation2 + $0x18] sm:$0xff] %vm626_vm0, %v1680_v61 }
 0x3e8   : > { %4106 = vmatprep.mubr.msk.f32.mxu0 %vm2769_vm11, %v6481_v46 }
 0x3ec   : > { %4107 = vmatmul.mubr.msk.f32.vlgmr.msra.gmra.mrb[4].mxu0 %vm2769_vm11, %v2754_v26 }
 0x3ee   : > { %v2756_v52 = vld [vmem:[#allocation2 + $0x18] sm:$0xff] }
 0x3f4   : > { %v1666_v19 = vpop.permute.xlu0 %1665 }
 0x3f5   : > { %v1675_v16 = vadd.f32 %v1666_v19, %v6404_v20 }
 0x3f7   : > { %v1679_v36 = vmul.f32 0.25, %v1675_v16 }
 0x3f9   : > { %1683 = vst.msk [vmem:[#allocation2 + $0x10] sm:$0xff] %vm626_vm0, %v1679_v36 }
 0x400   : > { %v2755_v0 = vld [vmem:[#allocation2 + $0x10] sm:$0xff] }
 0x401   : > { %4109 = vmatprep.mubr.msk.f32.mxu0 %vm2769_vm11, %v2755_v0 }
 0x402   : > { %4110 = vmatmul.mubr.msk.f32.gmra.mrb[6].mxu0 %vm2769_vm11, %v2756_v52 }
 0x4bf   : > { %v4108_v20 = vpop.f32.mrb[4].mxu0 }
 0x4c0   : > { %v2860_v54 = vpop.f32.mrb[5].mxu0  ;;  %v2882_v18 = vsel %vm626_vm0, %v4108_v20, -inf }
 0x4c1   : > { %2883 = vmax.xlane.f32.xlu1 %v2882_v18  ;;  %v2879_v51 = vsel %vm626_vm0, %v2860_v54, -inf }
 0x4c2   : > { %2880 = vmax.xlane.f32.xlu0 %v2879_v51 }
 0x4d5   : > { %v6499_v13 = vpop.f32.mrb[6].mxu0 }
 0x4d6   : > { %v6501_v24 = vpop.f32.mrb[7].mxu0  ;;  %v2888_v31 = vsel %vm626_vm0, %v6499_v13, -inf }
 0x4d7   : > { %v2885_v42 = vsel %vm626_vm0, %v6501_v24, -inf }
 0x4d8   : > { %2886 = vmax.xlane.f32.xlu0 %v2885_v42 }
 0x4dc   : > { %2889 = vmax.xlane.f32.xlu0 %v2888_v31 }
 0x54e   : > { %v2884_v39 = vpop.xlane.xlu1 %2883 }
 0x54f   : > { %v6520_v35 = vmax.f32 %v6515_v55, %v2884_v39  ;;  %v2881_v10 = vpop.xlane.xlu0 %2880 }
 0x550   : > { %v6523_v58 = vmax.f32 %v6517_v25, %v2881_v10 }
 0x551   : > { %2914 = vperm.xlu1 %4427, %v6520_v35  }
 0x552   : > { %2909 = vperm.xlu0 %4426, %v6523_v58  }
 0x555   : > { %4429 = vrot.lane.b32.xlu1 %v6387_v47, %s4989_s0 }
 0x556   : > { %3102 = vrot.lane.b32.xlu0 %v2754_v26, %s4990_s1 }
 0x557   : > { %4448 = vset.pattern.permute.xlu0 %v4991_v53 }
 0x559   : > { %4434 = vrot.lane.b32.xlu1 %v6399_v49, %s4989_s0 }
 0x55a   : > { %3106 = vrot.lane.b32.xlu0 %v2756_v52, %s4990_s1 }
 0x565   : > { %v2887_v63 = vpop.xlane.xlu0 %2886 }
 0x566   : > { %v6532_v6 = vmax.f32 %v6529_v15, %v2887_v63 }
 0x568   : > { %2919 = vperm.xlu1 %4427, %v6532_v6  }
 0x569   : > { %v2890_v27 = vpop.xlane.xlu0 %2889 }
 0x56a   : > { %v6538_v3 = vmax.f32 %v6534_v17, %v2890_v27 }
 0x56c   : > { %2924 = vperm.xlu1 %4427, %v6538_v3  }
 0x570   : > { %4439 = vrot.lane.b32.xlu1 %v4438_v37, %s4990_s1 }
 0x571   : > { %4449 = vset.pattern.permute.xlu1 %v4991_v53 }
 0x574   : > { %4444 = vrot.lane.b32.xlu1 %v4443_v56, %s4990_s1 }
 0x578   : > { %3100 = vrot.lane.b32.xlu1 %v6481_v46, %s4990_s1 }
 0x57c   : > { %3104 = vrot.lane.b32.xlu1 %v2755_v0, %s4990_s1 }
 0x5d0   : > { %v2915_v62 = vpop.permute.xlu1 %2914 }
 0x5d1   : > { %v2928_v50 = vsub.f32 %v4108_v20, %v2915_v62  ;;  %v2910_v43 = vpop.permute.xlu0 %2909 }
 0x5d2   : > { %v2927_v23 = vsub.f32 %v2860_v54, %v2910_v43 }
 0x5d3   : > { %v2933_v32 = vmul.f32 1.442695, %v2928_v50 }
 0x5d4   : > { %v2931_v28 = vmul.f32 1.442695, %v2927_v23  ;;  %v4430_v44 = vpop.permute.xlu1 %4429 }
 0x5d5   : > { %v4432_v11 = vunpack.i.h.bf16 %v4430_v44  ;;  %v4431_v2 = vunpack.i.l.bf16 %v4430_v44  ;;  %v3103_v19 = vpop.permute.xlu0 %3102 }
 0x5d6   : > { %4522 = vpow2.f32 %v2931_v28 }
 0x5d7   : > { %4524 = vpow2.f32 %v2933_v32  ;;  %v4196_v7 = vpack.c.bf16 %v4432_v11, %v4431_v2 }
 0x5d8   : > { %v4435_v4 = vpop.permute.xlu1 %4434 }
 0x5d9   : > { %v4437_v30 = vunpack.i.h.bf16 %v4435_v4  ;;  %v4436_v8 = vunpack.i.l.bf16 %v4435_v4  ;;  %4197 = vmatprep.subr.bf16.mxu1 %v4196_v7  ;;  %v3107_v36 = vpop.permute.xlu0 %3106 }
 0x5da   : > { %4199 = vmatpush3.bf16.msra.mxu1 %v4196_v7 }
 0x5db   : > { %v4200_v22 = vpack.c.bf16 %v4437_v30, %v4436_v8 }
 0x5dd   : > { %4201 = vmatprep.subr.bf16.mxu1 %v4200_v22 }
 0x5de   : > { %4203 = vmatpush3.bf16.msra.mxu1 %v4200_v22 }
 0x5e0   : > { %v6548_v37 = vpop.eup %4522 }
 0x5e1   : > { %v6550_v5 = vpop.eup %4524  ;;  %4120 = vmatprep.mubr.msk.f32.mxu1 %vm626_vm0, %v6548_v37  ;;  %v2943_v4 = vsel %vm626_vm0, %v6548_v37, 0.0 }
 0x5e2   : > { %4121 = vmatmul.mubr.msk.f32.vlgmr.msra.gmra.mrb[4].mxu1 %vm626_vm0, %v6550_v5  ;;  %v2946_v30 = vsel %vm626_vm0, %v6550_v5, 0.0 }
 0x5e7   : > { %v2920_v57 = vpop.permute.xlu1 %2919 }
 0x5e8   : > { %v2929_v38 = vsub.f32 %v6501_v24, %v2920_v57 }
 0x5ea   : > { %v2935_v45 = vmul.f32 1.442695, %v2929_v38 }
 0x5eb   : > { %v2925_v1 = vpop.permute.xlu1 %2924 }
 0x5ec   : > { %4526 = vpow2.f32 %v2935_v45  ;;  %v2930_v14 = vsub.f32 %v6499_v13, %v2925_v1 }
 0x5ee   : > { %v2937_v34 = vmul.f32 1.442695, %v2930_v14 }
 0x5ef   : > { %v4440_v21 = vpop.permute.xlu1 %4439 }
 0x5f0   : > { %4528 = vpow2.f32 %v2937_v34  ;;  %v4442_v41 = vunpack.i.h.bf16 %v4440_v21  ;;  %v4441_v33 = vunpack.i.l.bf16 %v4440_v21 }
 0x5f2   : > { %v4204_v12 = vpack.c.bf16 %v4442_v41, %v4441_v33 }
 0x5f3   : > { %v4445_v56 = vpop.permute.xlu1 %4444 }
 0x5f4   : > { %v4447_v59 = vunpack.i.h.bf16 %v4445_v56  ;;  %v4446_v60 = vunpack.i.l.bf16 %v4445_v56  ;;  %4206 = vmatprep.subr.msk.bf16.mxu1 %vm6451_vm1, %v4204_v12 }
 0x5f5   : > { %4209 = vmatpush3.bf16.xpose.msk.msra.mxu1 %vm6451_vm1, %v4204_v12 }
 0x5f6   : > { %v4527_v9 = vpop.eup %4526  ;;  %v4210_v46 = vpack.c.bf16 %v4447_v59, %v4446_v60 }
 0x5f7   : > { %4123 = vmatprep.mubr.msk.f32.mxu1 %vm626_vm0, %v4527_v9  ;;  %v3101_v26 = vpop.permute.xlu1 %3100  ;;  %v2949_v2 = vsel %vm626_vm0, %v4527_v9, 0.0 }
 0x5f8   : > { %4212 = vmatprep.subr.msk.bf16.mxu1 %vm6451_vm1, %v4210_v46 }
 0x5fa   : > { %v4529_v61 = vpop.eup %4528 }
 0x5fb   : > { %4124 = vmatmul.mubr.msk.f32.gmra.mrb[6].mxu1 %vm626_vm0, %v4529_v61  ;;  %v3105_v16 = vpop.permute.xlu1 %3104  ;;  %v2952_v7 = vsel %vm626_vm0, %v4529_v61, 0.0 }
 0x5fc   : > { %4134 = vmatprep.mubr.msk.f32.mxu1 %vm2769_vm11, %v3101_v26  ;;  %v2895_v26 = vsub.f32 %v6517_v25, %v6523_v58 }
 0x5fd   : > { %4215 = vmatpush3.bf16.xpose.msk.msra.mxu1 %vm6451_vm1, %v4210_v46 }
 0x604   : > { %4135 = vmatmul.mubr.msk.f32.vlgmr.msra.gmra.mrb[8].mxu1 %vm2769_vm11, %v3103_v19 }
 0x605   : > { %4137 = vmatprep.mubr.msk.f32.mxu1 %vm2769_vm11, %v3105_v16 }
 0x608   : > { %4138 = vmatmul.mubr.msk.f32.gmra.mrb[10].mxu1 %vm2769_vm11, %v3107_v36 }
 0x6b5   : > { %v6572_v0 = vpop.f32.mrb[4].mxu1 }
 0x6b6   : > { %v6574_v52 = vpop.f32.mrb[5].mxu1 }
 0x6ce   : > { %v6576_v29 = vpop.f32.mrb[6].mxu1 }
 0x6cf   : > { %v6578_v20 = vpop.f32.mrb[7].mxu1 }
 0x6d7   : > { %v4136_v54 = vpop.f32.mrb[8].mxu1 }
 0x6d8   : > { %v3198_v48 = vpop.f32.mrb[9].mxu1  ;;  %v3220_v18 = vsel %vm626_vm0, %v4136_v54, -inf }
 0x6d9   : > { %3221 = vmax.xlane.f32.xlu0 %v3220_v18  ;;  %v3217_v51 = vsel %vm626_vm0, %v3198_v48, -inf }
 0x6da   : > { %3218 = vmax.xlane.f32.xlu1 %v3217_v51 }
 0x6db   : > { %v4139_v13 = vpop.f32.mrb[10].mxu1 }
 0x6dc   : > { %v3208_v24 = vpop.f32.mrb[11].mxu1  ;;  %v3226_v42 = vsel %vm626_vm0, %v4139_v13, -inf }
 0x6dd   : > { %v3223_v31 = vsel %vm626_vm0, %v3208_v24, -inf }
 0x6de   : > { %3227 = vmax.xlane.f32.xlu1 %v3226_v42  ;;  %3224 = vmax.xlane.f32.xlu0 %v3223_v31  ;;  %v2897_v42 = vsub.f32 %v6529_v15, %v6532_v6 }
 0x766   : > { %v3222_v39 = vpop.xlane.xlu0 %3221 }
 0x767   : > { %v6587_v10 = vmax.f32 %v6515_v55, %v3222_v39  ;;  %v3219_v63 = vpop.xlane.xlu1 %3218  ;;  %v2903_v39 = vmul.f32 1.442695, %v2897_v42  ;;  %v3533_v42 = vld [vmem:[#allocation19 + $0x10] sm:$0xff] }
 0x768   : > { %v6590_v27 = vmax.f32 %v6517_v25, %v3219_v63 }
 0x769   : > { %v3460_v62 = vsel %vm3454_vm4, %v6520_v35, %v6587_v10  ;;  %3252 = vperm.xlu1 %4449, %v6587_v10  }
 0x76a   : > { %3465 = vst.msk [vmem:[#allocation3 + $0x8] sm:$0xff] %vm1685_vm6, %v3460_v62  ;;  %v3459_v50 = vsel %vm3454_vm4, %v6523_v58, %v6590_v27  ;;  %3247 = vperm.xlu0 %4448, %v6590_v27   ;;  %v3233_v51 = vsub.f32 %v6517_v25, %v6590_v27  ;;  %v2896_v25 = vsub.f32 %v6515_v55, %v6520_v35 }
 0x76b   : > { %3464 = vst.msk [vmem:[#allocation3] sm:$0xff] %vm1685_vm6, %v3459_v50  ;;  %v3228_v43 = vpop.xlane.xlu1 %3227  ;;  %v3225_v23 = vpop.xlane.xlu0 %3224  ;;  %v2898_v62 = vsub.f32 %v6534_v17, %v6538_v3 }
 0x76c   : > { %v6603_v32 = vmax.f32 %v6534_v17, %v3228_v43  ;;  %v6606_v28 = vmax.f32 %v6529_v15, %v3225_v23  ;;  %v3237_v58 = vmul.f32 1.442695, %v3233_v51  ;;  %v2901_v27 = vmul.f32 1.442695, %v2896_v25 }
 0x76d   : > { %v2905_v50 = vmul.f32 1.442695, %v2898_v62 }
 0x76e   : > { %v3462_v44 = vsel %vm3454_vm4, %v6538_v3, %v6603_v32  ;;  %3257 = vperm.xlu1 %4449, %v6606_v28   ;;  %4461 = vset.pattern.permute.xlu0 %v4987_v40  ;;  %v3461_v11 = vsel %vm3454_vm4, %v6532_v6, %v6606_v28  ;;  %v3236_v23 = vsub.f32 %v6534_v17, %v6603_v32 }
 0x76f   : > { %3467 = vst.msk [vmem:[#allocation3 + $0x18] sm:$0xff] %vm1685_vm6, %v3462_v44  ;;  %3466 = vst.msk [vmem:[#allocation3 + $0x10] sm:$0xff] %vm1685_vm6, %v3461_v11 }
 0x770   : > { %v3243_v3 = vmul.f32 1.442695, %v3236_v23 }
 0x772   : > { %3262 = vperm.xlu1 %4449, %v6603_v32  }
 0x776   : > { %4451 = vrot.lane.b32.xlu1 %v6387_v47, %s4992_s23 }
 0x777   : > { %4460 = vset.pattern.permute.xlu1 %v4987_v40 }
 0x77a   : > { %4456 = vrot.lane.b32.xlu1 %v6399_v49, %s4992_s23 }
 0x789   : > { %2950 = vadd.xlane.f32.xlu0 %v2949_v2  ;;  %v2762_v2 = vld [vmem:[#allocation4 + $0x8] sm:$0xff] }
 0x78d   : > { %2953 = vadd.xlane.f32.xlu0 %v2952_v7 }
 0x79e   : > { %2944 = vadd.xlane.f32.xlu1 %v2943_v4 }
 0x7a2   : > { %2947 = vadd.xlane.f32.xlu1 %v2946_v30 }
 0x7e8   : > { %v3253_v8 = vpop.permute.xlu1 %3252 }
 0x7e9   : > { %v3266_v47 = vsub.f32 %v4136_v54, %v3253_v8  ;;  %v3248_v22 = vpop.permute.xlu0 %3247  ;;  %v2761_v8 = vld [vmem:[#allocation4] sm:$0xff] }
 0x7ea   : > { %v3265_v57 = vsub.f32 %v3198_v48, %v3248_v22  ;;  %v2899_v48 = vmul.f32 1.442695, %v2895_v26  ;;  %v2763_v22 = vld [vmem:[#allocation4 + $0x10] sm:$0xff] }
 0x7eb   : > { %v3271_v38 = vmul.f32 1.442695, %v3266_v47 }
 0x7ec   : > { %v3269_v49 = vmul.f32 1.442695, %v3265_v57 }
 0x7ed   : > { %4530 = vpow2.f32 %v3271_v38  ;;  %v3258_v45 = vpop.permute.xlu1 %3257 }
 0x7ee   : > { %4532 = vpow2.f32 %v3269_v49  ;;  %v3267_v1 = vsub.f32 %v3208_v24, %v3258_v45  ;;  %v3235_v24 = vsub.f32 %v6529_v15, %v6606_v28  ;;  %v3234_v15 = vsub.f32 %v6515_v55, %v6587_v10 }
 0x7f0   : > { %v3273_v14 = vmul.f32 1.442695, %v3267_v1  ;;  %v3241_v31 = vmul.f32 1.442695, %v3235_v24  ;;  %v3239_v6 = vmul.f32 1.442695, %v3234_v15 }
 0x7f1   : > { %v3263_v34 = vpop.permute.xlu1 %3262 }
 0x7f2   : > { %4534 = vpow2.f32 %v3273_v14  ;;  %v3268_v21 = vsub.f32 %v4139_v13, %v3263_v34 }
 0x7f4   : > { %v3275_v37 = vmul.f32 1.442695, %v3268_v21 }
 0x7f5   : > { %v4452_v41 = vpop.permute.xlu1 %4451 }
 0x7f6   : > { %4536 = vpow2.f32 %v3275_v37  ;;  %v4454_v33 = vunpack.i.h.bf16 %v4452_v41  ;;  %v4453_v5 = vunpack.i.l.bf16 %v4452_v41  ;;  %v2764_v41 = vld [vmem:[#allocation4 + $0x18] sm:$0xff] }
 0x7f7   : > { %v4531_v12 = vpop.eup %4530  ;;  %4538 = vpow2.f32 %v2899_v48 }
 0x7f8   : > { %v4533_v56 = vpop.eup %4532  ;;  %v4216_v59 = vpack.c.bf16 %v4454_v33, %v4453_v5  ;;  %v3284_v60 = vsel %vm626_vm0, %v4531_v12, 0.0  ;;  %4540 = vpow2.f32 %v3237_v58  ;;  %v3532_v58 = vld [vmem:[#allocation19 + $0x8] sm:$0xff] }
 0x7f9   : > { %3285 = vadd.xlane.f32.xlu1 %v3284_v60  ;;  %v4457_v9 = vpop.permute.xlu1 %4456  ;;  %4148 = vmatprep.mubr.msk.f32.mxu0 %vm626_vm0, %v4533_v56  ;;  %v3281_v36 = vsel %vm626_vm0, %v4533_v56, 0.0  ;;  %4542 = vpow2.f32 %v3241_v31  ;;  %v3534_v31 = vld [vmem:[#allocation19 + $0x18] sm:$0xff] }
 0x7fa   : > { %v4459_v46 = vunpack.i.h.bf16 %v4457_v9  ;;  %v4458_v61 = vunpack.i.l.bf16 %v4457_v9  ;;  %4217 = vmatprep.subr.bf16.mxu0 %v4216_v59  ;;  %4544 = vpow2.f32 %v2903_v39  ;;  %v4228_v25 = vpack.c.bf16 %v3534_v31, %v3533_v42 }
 0x7fb   : > { %4219 = vmatpush3.bf16.msra.mxu0 %v4216_v59  ;;  %4546 = vpow2.f32 %v2901_v27 }
 0x7fc   : > { %v4535_v19 = vpop.eup %4534  ;;  %v4220_v16 = vpack.c.bf16 %v4459_v46, %v4458_v61  ;;  %4548 = vpow2.f32 %v2905_v50 }
 0x7fd   : > { %3282 = vadd.xlane.f32.xlu1 %v3281_v36  ;;  %v3287_v54 = vsel %vm626_vm0, %v4535_v19, 0.0  ;;  %4550 = vpow2.f32 %v3239_v6 }
 0x7fe   : > { %3288 = vadd.xlane.f32.xlu0 %v3287_v54  ;;  %4221 = vmatprep.subr.bf16.mxu0 %v4220_v16  ;;  %4552 = vpow2.f32 %v3243_v3 }
 0x7ff   : > { %4223 = vmatpush3.bf16.msra.mxu0 %v4220_v16 }
 0x800   : > { %v4537_v18 = vpop.eup %4536 }
 0x801   : > { %v3290_v13 = vsel %vm626_vm0, %v4537_v18, 0.0  ;;  %v4539_v63 = vpop.eup %4538 }
 0x802   : > { %3291 = vadd.xlane.f32.xlu0 %v3290_v13  ;;  %4149 = vmatmul.mubr.msk.f32.vlgmr.msra.gmra.mrb[8].mxu0 %vm626_vm0, %v4531_v12  ;;  %v4541_v43 = vpop.eup %4540  ;;  %v2939_v45 = vmul.f32 %v4539_v63, %v2761_v8  ;;  %v3531_v13 = vld [vmem:[#allocation19] sm:$0xff] }
 0x803   : > { %4151 = vmatprep.mubr.msk.f32.mxu0 %vm626_vm0, %v4535_v19  ;;  %v4543_v35 = vpop.eup %4542  ;;  %v3277_v14 = vmul.f32 %v4541_v43, %v2761_v8  ;;  %v4224_v24 = vpack.c.bf16 %v3532_v58, %v3531_v13 }
 0x804   : > { %v4545_v28 = vpop.eup %4544  ;;  %v3279_v37 = vmul.f32 %v4543_v35, %v2763_v22 }
 0x805   : > { %v4547_v44 = vpop.eup %4546  ;;  %v2941_v34 = vmul.f32 %v4545_v28, %v2763_v22  ;;  %4225 = vmatprep.subr.bf16.mxu0 %v4224_v24  ;;  %4232 = vmatprep.subr.bf16.mxu1 %v4224_v24 }
 0x806   : > { %4152 = vmatmul.mubr.msk.f32.gmra.mrb[10].mxu0 %vm626_vm0, %v4537_v18  ;;  %v4549_v55 = vpop.eup %4548  ;;  %v2940_v4 = vmul.f32 %v4547_v44, %v2762_v2  ;;  %4234 = vmatpush3.bf16.msra.mxu1 %v4224_v24 }
 0x807   : > { %v4551_v10 = vpop.eup %4550  ;;  %v2942_v9 = vmul.f32 %v4549_v55, %v2764_v41  ;;  %4227 = vmatpush3.bf16.msra.mxu0 %v4224_v24  ;;  %4233 = vmatprep.subr.bf16.mxu1 %v4228_v25 }
 0x808   : > { %v4553_v11 = vpop.eup %4552  ;;  %v3278_v30 = vmul.f32 %v4551_v10, %v2762_v2  ;;  %4229 = vmatprep.subr.bf16.mxu0 %v4228_v25 }
 0x809   : > { %v3280_v61 = vmul.f32 %v4553_v11, %v2764_v41 }
 0x80a   : > { %4235 = vmatpush3.bf16.msra.mxu1 %v4228_v25 }
 0x80b   : > { %4231 = vmatpush3.bf16.msra.mxu0 %v4228_v25 }
 0x80e   : > { %2961 = vperm.xlu1 %4460, %v4539_v63  }
 0x812   : > { %4462 = vset.pattern.permute.xlu1 %v4991_v53 }
 0x813   : > { %3299 = vperm.xlu1 %4462, %v4541_v43  }
 0x816   : > { %v2951_v32 = vpop.xlane.xlu0 %2950 }
 0x817   : > { %3309 = vperm.xlu1 %4462, %v4543_v35   ;;  %v2957_v56 = vadd.f32 %v2951_v32, %v2941_v34 }
 0x818   : > { %2971 = vperm.xlu0 %4461, %v4545_v28  }
 0x81a   : > { %v2954_v57 = vpop.xlane.xlu0 %2953 }
 0x81b   : > { %4463 = vset.pattern.permute.xlu1 %v4987_v40  ;;  %v2958_v19 = vadd.f32 %v2954_v57, %v2942_v9 }
 0x81c   : > { %2966 = vperm.xlu1 %4463, %v4547_v44   ;;  %4468 = vset.pattern.permute.xlu0 %v4991_v53 }
 0x820   : > { %2976 = vperm.xlu1 %4463, %v4549_v55  }
 0x824   : > { %4464 = vset.pattern.permute.xlu1 %v4991_v53 }
 0x825   : > { %3304 = vperm.xlu1 %4464, %v4551_v10  }
 0x829   : > { %3314 = vperm.xlu1 %4464, %v4553_v11   ;;  %v2765_v11 = vld [vmem:[#allocation5] sm:$0xff] }
 0x82b   : > { %v2945_v17 = vpop.xlane.xlu1 %2944 }
 0x82c   : > { %v2955_v33 = vadd.f32 %v2945_v17, %v2939_v45  ;;  %v2768_v45 = vld [vmem:[#allocation5 + $0x18] sm:$0xff] }
 0x82d   : > { %4465 = vset.pattern.permute.xlu1 %v4987_v40 }
 0x82f   : > { %v2948_v7 = vpop.xlane.xlu1 %2947 }
 0x830   : > { %v2956_v38 = vadd.f32 %v2948_v7, %v2940_v4  ;;  %v2767_v7 = vld [vmem:[#allocation5 + $0x10] sm:$0xff]  ;;  %v2766_v4 = vld [vmem:[#allocation5 + $0x8] sm:$0xff] }
 0x886   : > { %v3286_v47 = vpop.xlane.xlu1 %3285 }
 0x887   : > { %v3294_v49 = vadd.f32 %v3286_v47, %v3278_v30 }
 0x889   : > { %v3456_v1 = vsel %vm3454_vm4, %v2956_v38, %v3294_v49 }
 0x88a   : > { %3469 = vst.msk [vmem:[#allocation4 + $0x8] sm:$0xff] %vm1685_vm6, %v3456_v1  ;;  %4554 = vrcp.f32 %v3456_v1  ;;  %v3283_v21 = vpop.xlane.xlu1 %3282 }
 0x88b   : > { %v3293_v5 = vadd.f32 %v3283_v21, %v3277_v14  ;;  %v3289_v12 = vpop.xlane.xlu0 %3288 }
 0x88c   : > { %v3295_v59 = vadd.f32 %v3289_v12, %v3279_v37 }
 0x88d   : > { %v3455_v60 = vsel %vm3454_vm4, %v2955_v33, %v3293_v5 }
 0x88e   : > { %3468 = vst.msk [vmem:[#allocation4] sm:$0xff] %vm1685_vm6, %v3455_v60  ;;  %4556 = vrcp.f32 %v3455_v60  ;;  %v3457_v46 = vsel %vm3454_vm4, %v2957_v56, %v3295_v59  ;;  %v2962_v27 = vpop.permute.xlu1 %2961 }
 0x88f   : > { %3470 = vst.msk [vmem:[#allocation4 + $0x10] sm:$0xff] %vm1685_vm6, %v3457_v46  ;;  %v3292_v26 = vpop.xlane.xlu0 %3291  ;;  %v2979_v2 = vmul.f32 %v2962_v27, %v2765_v11 }
 0x890   : > { %v3296_v16 = vadd.f32 %v3292_v26, %v3280_v61 }
 0x891   : > { %v3096_v57 = vadd.f32 %v6574_v52, %v2979_v2 }
 0x892   : > { %v3458_v36 = vsel %vm3454_vm4, %v2958_v19, %v3296_v16  ;;  %v3300_v62 = vpop.permute.xlu1 %3299 }
 0x893   : > { %3471 = vst.msk [vmem:[#allocation4 + $0x18] sm:$0xff] %vm1685_vm6, %v3458_v36  ;;  %4558 = vrcp.f32 %v3458_v36  ;;  %v3317_v30 = vmul.f32 %v3300_v62, %v2765_v11 }
 0x894   : > { %v4555_v54 = vpop.eup %4554  ;;  %4560 = vrcp.f32 %v3457_v46 }
 0x895   : > { %3490 = vperm.xlu1 %4465, %v4555_v54  }
 0x896   : > { %v3310_v50 = vpop.permute.xlu1 %3309 }
 0x897   : > { %v2972_v44 = vpop.permute.xlu0 %2971  ;;  %v3319_v1 = vmul.f32 %v3310_v50, %v2767_v7 }
 0x898   : > { %v4557_v48 = vpop.eup %4556  ;;  %v2981_v8 = vmul.f32 %v2972_v44, %v2767_v7 }
 0x899   : > { %4466 = vset.pattern.permute.xlu1 %v4991_v53  ;;  %3508 = vperm.xlu0 %4468, %v4557_v48  }
 0x89a   : > { %3512 = vperm.xlu1 %4466, %v4555_v54   ;;  %v3098_v21 = vadd.f32 %v6578_v20, %v2981_v8 }
 0x89b   : > { %v2967_v43 = vpop.permute.xlu1 %2966 }
 0x89c   : > { %v2980_v38 = vmul.f32 %v2967_v43, %v2766_v4 }
 0x89d   : > { %v4559_v18 = vpop.eup %4558  ;;  %4469 = vset.pattern.permute.xlu0 %v4987_v40 }
 0x89e   : > { %4467 = vset.pattern.permute.xlu1 %v4987_v40  ;;  %3500 = vperm.xlu0 %4469, %v4559_v18   ;;  %v4561_v51 = vpop.eup %4560  ;;  %v3097_v12 = vadd.f32 %v6572_v0, %v2980_v38 }
 0x89f   : > { %3485 = vperm.xlu1 %4467, %v4557_v48   ;;  %v2977_v15 = vpop.permute.xlu1 %2976 }
 0x8a0   : > { %v2982_v56 = vmul.f32 %v2977_v15, %v2768_v45 }
 0x8a2   : > { %4473 = vset.pattern.permute.xlu0 %v4991_v53  ;;  %v3099_v36 = vadd.f32 %v6576_v29, %v2982_v56  ;;  %v3997_v29 = vld [vmem:[#allocation20] ss:$0 sm:$0xff] }
 0x8a3   : > { %4470 = vset.pattern.permute.xlu1 %v4991_v53 }
 0x8a4   : > { %3520 = vperm.xlu1 %4470, %v4559_v18   ;;  %v3305_v35 = vpop.permute.xlu1 %3304 }
 0x8a5   : > { %v3318_v14 = vmul.f32 %v3305_v35, %v2766_v4 }
 0x8a8   : > { %4471 = vset.pattern.permute.xlu1 %v4987_v40  ;;  %v3315_v6 = vpop.permute.xlu1 %3314 }
 0x8a9   : > { %3495 = vperm.xlu1 %4471, %v4561_v51   ;;  %v3320_v9 = vmul.f32 %v3315_v6, %v2768_v45 }
 0x8ad   : > { %4472 = vset.pattern.permute.xlu1 %v4991_v53 }
 0x8ae   : > { %3516 = vperm.xlu1 %4472, %v4561_v51  }
 0x8d5   : > { %v4150_v39 = vpop.f32.mrb[8].mxu0 }
 0x8d6   : > { %v3411_v40 = vpop.f32.mrb[9].mxu0 }
 0x8d7   : > { %3434 = vrot.lane.b32.xlu0 %v3411_v40, %s4993_s12 }
 0x8d9   : > { %v4153_v53 = vpop.f32.mrb[10].mxu0 }
 0x8da   : > { %v3421_v63 = vpop.f32.mrb[11].mxu0 }
 0x8db   : > { %3438 = vrot.lane.b32.xlu1 %v3421_v63, %s4993_s12  ;;  %3436 = vrot.lane.b32.xlu0 %v4150_v39, %s4993_s12 }
 0x8df   : > { %3440 = vrot.lane.b32.xlu1 %v4153_v53, %s4993_s12 }
 0x914   : > { %v3491_v23 = vpop.permute.xlu1 %3490 }
 0x918   : > { %v3509_v10 = vpop.permute.xlu0 %3508 }
 0x919   : > { %v3513_v28 = vpop.permute.xlu1 %3512 }
 0x91d   : > { %v3501_v32 = vpop.permute.xlu0 %3500 }
 0x91e   : > { %v3486_v3 = vpop.permute.xlu1 %3485 }
 0x923   : > { %v3521_v55 = vpop.permute.xlu1 %3520 }
 0x928   : > { %v3496_v17 = vpop.permute.xlu1 %3495 }
 0x92d   : > { %v3517_v47 = vpop.permute.xlu1 %3516 }
 0x949   : > { %v3435_v22 = vpop.permute.xlu0 %3434 }
 0x94a   : > { %v3446_v49 = vadd.f32 %v3435_v22, %v3317_v30 }
 0x94c   : > { %v3450_v34 = vsel %vm2769_vm11, %v3096_v57, %v3446_v49 }
 0x94d   : > { %3472 = vst.msk [vmem:[#allocation5] sm:$0xff] %vm626_vm0, %v3450_v34  ;;  %v3503_v37 = vmul.f32 %v3486_v3, %v3450_v34  ;;  %v3523_v41 = vmul.f32 %v3509_v10, %v3450_v34  ;;  %v3439_v33 = vpop.permute.xlu1 %3438  ;;  %v3437_v5 = vpop.permute.xlu0 %3436 }
 0x94e   : > { %v3448_v59 = vadd.f32 %v3439_v33, %v3319_v1  ;;  %v3447_v52 = vadd.f32 %v3437_v5, %v3318_v14 }
 0x94f   : > { %v3527_v60 = vsel %vm2769_vm11, %v3503_v37, %v3523_v41 }
 0x950   : > { %v3452_v46 = vsel %vm2769_vm11, %v3098_v21, %v3448_v59  ;;  %v3451_v61 = vsel %vm2769_vm11, %v3097_v12, %v3447_v52  ;;  %4162 = vmatprep.mubr.msk.f32.mxu0 %vm626_vm0, %v3527_v60 }
 0x951   : > { %3474 = vst.msk [vmem:[#allocation5 + $0x10] sm:$0xff] %vm626_vm0, %v3452_v46  ;;  %v3505_v20 = vmul.f32 %v3496_v17, %v3452_v46  ;;  %v3525_v26 = vmul.f32 %v3517_v47, %v3452_v46  ;;  %3473 = vst.msk [vmem:[#allocation5 + $0x8] sm:$0xff] %vm626_vm0, %v3451_v61  ;;  %v3504_v19 = vmul.f32 %v3491_v23, %v3451_v61  ;;  %v3441_v16 = vpop.permute.xlu1 %3440 }
 0x952   : > { %v3524_v0 = vmul.f32 %v3513_v28, %v3451_v61  ;;  %v3449_v54 = vadd.f32 %v3441_v16, %v3320_v9 }
 0x953   : > { %v3529_v18 = vsel %vm2769_vm11, %v3505_v20, %v3525_v26 }
 0x954   : > { %v3528_v48 = vsel %vm2769_vm11, %v3504_v19, %v3524_v0  ;;  %v3453_v51 = vsel %vm2769_vm11, %v3099_v36, %v3449_v54  ;;  %4165 = vmatprep.mubr.msk.f32.mxu1 %vm626_vm0, %v3529_v18 }
 0x955   : > { %4163 = vmatmul.mubr.msk.f32.vlgmr.msra.gmra.mrb[12].mxu0 %vm626_vm0, %v3528_v48  ;;  %3475 = vst.msk [vmem:[#allocation5 + $0x18] sm:$0xff] %vm626_vm0, %v3453_v51  ;;  %v3506_v13 = vmul.f32 %v3501_v32, %v3453_v51  ;;  %v3526_v58 = vmul.f32 %v3521_v55, %v3453_v51 }
 0x957   : > { %v3530_v24 = vsel %vm2769_vm11, %v3506_v13, %v3526_v58 }
 0x958   : > { %4166 = vmatmul.mubr.msk.f32.vlgmr.msra.gmra.mrb[12].mxu1 %vm626_vm0, %v3530_v24 }
 0xa28   : > { %v4164_v42 = vpop.f32.mrb[12].mxu0 }
 0xa29   : > { %v3626_v31 = vadd.f32 %v4164_v42, %v3997_v29  ;;  %v3620_v25 = vpop.f32.mrb[13].mxu0 }
 0xa2a   : > { %v3621_v39 = vadd.f32 %v3997_v29, %v3620_v25 }
 0xa2b   : > { %3640 = vst.msk [vmem:[%s605_s17 + $0x8] sm:$0xff] %vm626_vm0, %v3626_v31  ;;  %v4167_v40 = vpop.f32.mrb[12].mxu1 }
 0xa2c   : > { %3639 = vst.msk [vmem:[%s605_s17] sm:$0xff] %vm626_vm0, %v3621_v39  ;;  %v3636_v53 = vadd.f32 %v4167_v40, %v3997_v29  ;;  %v3630_v63 = vpop.f32.mrb[13].mxu1 }
 0xa2d   : > { %v3631_v27 = vadd.f32 %v3997_v29, %v3630_v63 }
 0xa2e   : > { %3642 = vst.msk [vmem:[%s605_s17 + $0x18] sm:$0xff] %vm626_vm0, %v3636_v53 }
 0xa2f   : > { %3641 = vst.msk [vmem:[%s605_s17 + $0x10] sm:$0xff] %vm626_vm0, %v3631_v27 }
 0xa30   : > { %4863 = shalt.err (!%p4860_p9)
}
 0xa31   : > { %s4864_s13 = scalar_lea.hbm %s6701_s24, 512  ;;  %s4868_s25 = scalar_lea.hbm %s6875_s11, 1536 }
 0xa32   : > { %p4865_p1 = scmp.ne.s32.totalorder %s6701_s24, %s4864_s13  ;;  %p4869_p2 = scmp.lt.u32.totalorder %s6701_s24, %s6875_s11 }
 0xa33   : > { %p4870_p11 = scmp.lt.u32.totalorder %s4868_s25, %s4864_s13  ;;  %p4872_p4 = scmp.lt.u32.totalorder %s4864_s13, %s6701_s24 }
 0xa34   : > { %p4866_p13 = pnand %p4865_p1, %p6876_p6 }
 0xa35   : > { %p4871_p3 = por %p4870_p11, %p4869_p2 }
 0xa36   : > { %p4867_p8 = pneg %p4866_p13 }
 0xa37   : > { %p4873_p12 = por %p4872_p4, %p4871_p3 }
 0xa39   : > { %p4874_p0 = pnand %p4873_p12, %p4867_p8 }
 0xa3b   : > { %4877 = shalt.err (!%p4874_p0)
}
 0xa3c   : > { %s4995_s0 = smov 128   ;;  %s4996_s1 = smov 8  }
 0xa3d   : > { %4300 = dma.vmem_to_hbm [thread:$0]  (%p6876_p6), %s6695_s3, 512, %s6701_s24, %s6707_s29, %s4995_s0, %s4995_s0, %s4996_s1  }
 0xa3e PF: > { %s6877_s23 = sld [smem:[#allocation37_spill]]  ;;  %s6878_s12 = sld [smem:[#allocation33_spill]] }
 0xa3f   : > { %s6879_s30 = sld [smem:[#allocation41_spill]] }
 0xa44   : > { %p4351_p10 = scmp.ge.s32.totalorder %s6877_s23, 2  ;;  %s3673_s17 = sand.u32 1, %s6878_s12  }
 0xa45   : > { %p6880_p5 = scmp.ne.s32.totalorder %s6879_s30, 0  ;;  %s3674_s15 = scalar_lea.sflag [#allocation8], %s3673_s17 }
 0xa47   : > { %p4335_p7 = pnand %p4351_p10, %p6880_p5 }
 0xa49   : > { %4939 = dma.done.wait (!%p4335_p7), %s3674_s15, 512  }
 0xa4a   : > { %4941 = vsyncadd (!%p4335_p7), %s3674_s15, 4294966784  ;;  %s32_s18 = sadd.s32 1, %s6877_s23   ;;  %s6881_s4 = sld [smem:[#allocation34_spill]] }
 0xa4b   : > { %p29_p9 = scmp.ge.s32.totalorder %s32_s18, 5   ;;  %s6882_s15 = sld [smem:[#allocation40_spill]] }
 0xa4c   : > { %s6883_s16 = sld [smem:[#allocation36_spill]]  ;;  %s6884_s17 = sld [smem:[#allocation39_spill]] }
 0xa4d   : > { %s6885_s13 = smov %s4948_s14  ;;  %31 = sbr.rel (!%p29_p9) target bundleno = 19 (0x13), region = 172 }
 0xa50   : > { %s6886_s14 = smov %s6881_s4 }
 0xa54   :  { %3679 = vsyncpa [#allocation7], 1 }
 0xa55   :  { %3681 = vsyncpa [#allocation7 + $0x1], 1 }
 0xa56   :  { %3682 = vsyncpa [#allocation10], 1 }
 0xa57   :  { %3683 = vsyncpa [#allocation13], 1 }
 0xa58   :  { %3685 = vsyncpa [#allocation13 + $0x1], 1 }
 0xa59   :  { %3686 = vsyncpa [#allocation16], 1 }
 0xa5a   :  { %3687 = vsyncpa [#allocation21], 1 }
 0xa5b   :  { %3688 = vsyncpa [#allocation8], 1 }
 0xa5c   :  { %3690 = vsyncpa [#allocation8 + $0x1], 1 }

// kernel: basic_dr_transformer_block.7
= control target key start
LH: loop header
LB: loop body
LE: loop exit
PB: predicated region body
PF: predicated region fallthrough
CT: control target
= control target key end

     0   :  { %s3239_s0 = inlined_call_operand.hbm [shape: f32[96,32], index: 0, kind: input, shape index: {}]   ;;  %s3240_s1 = inlined_call_operand.hbm [shape: f32[96,32], index: 1, kind: input, shape index: {}]   ;;  %s3241_s2 = inlined_call_operand.hbm [shape: f32[96,32], index: 2, kind: input, shape index: {}]   ;;  %s3242_s3 = inlined_call_operand.hbm [shape: f32[96,32], index: 3, kind: input, shape index: {}]   ;;  %s3243_s4 = inlined_call_operand.hbm [shape: f32[1,32], index: 4, kind: input, shape index: {}]   ;;  %s3244_s5 = inlined_call_operand.hbm [shape: f32[1,32], index: 5, kind: input, shape index: {}]   ;;  %s3245_s6 = inlined_call_operand.hbm [shape: f32[32,128], index: 6, kind: input, shape index: {}]   ;;  %s3246_s7 = inlined_call_operand.hbm [shape: f32[1,128], index: 7, kind: input, shape index: {}]   ;;  %s3247_s8 = inlined_call_operand.hbm [shape: f32[32,128], index: 8, kind: input, shape index: {}]   ;;  %s3248_s9 = inlined_call_operand.hbm [shape: f32[1,128], index: 9, kind: input, shape index: {}]   ;;  %s3249_s10 = inlined_call_operand.hbm [shape: f32[128,32], index: 10, kind: input, shape index: {}]   ;;  %s3250_s11 = inlined_call_operand.hbm [shape: f32[1,32], index: 11, kind: input, shape index: {}]   ;;  %s3251_s12 = inlined_call_operand.hbm [shape: f32[96,32], index: 12, kind: output, shape index: {}]  }
   0x1   :  { %3279 = sst [smem:[#allocation40_spill]] %s3240_s1 }
   0x2   :  { %3280 = sst [smem:[#allocation41_spill]] %s3242_s3 }
   0x3   :  { %3281 = sst [smem:[#allocation42_spill]] %s3243_s4 }
   0x4   :  { %3282 = sst [smem:[#allocation43_spill]] %s3244_s5 }
   0x5   :  { %3283 = sst [smem:[#allocation44_spill]] %s3246_s7 }
   0x6   :  { %3284 = sst [smem:[#allocation45_spill]] %s3248_s9 }
   0x7   :  { %3285 = sst [smem:[#allocation46_spill]] %s3251_s12 }
   0x8   :  { %17 = vsyncpa [#allocation3], 0 }
   0x9   :  { %19 = vsyncpa [#allocation3 + $0x1], 0 }
   0xa   :  { %20 = vsyncpa [#allocation6], 0 }
   0xb   :  { %22 = vsyncpa [#allocation6 + $0x1], 0 }
   0xc   :  { %23 = vsyncpa [#allocation9], 0 }
   0xd   :  { %25 = vsyncpa [#allocation9 + $0x1], 0 }
   0xe   :  { %26 = vsyncpa [#allocation12], 0 }
   0xf   :  { %27 = vsyncpa [#allocation15], 0 }
  0x10   :  { %28 = vsyncpa [#allocation18], 0 }
  0x11   :  { %29 = vsyncpa [#allocation21], 0 }
  0x12   :  { %30 = vsyncpa [#allocation4], 0 }
  0x13   :  { %32 = vsyncpa [#allocation4 + $0x1], 0  ;;  %s2488_s21 = smov 0   ;;  %s2490_s22 = smov 0  }
  0x14   :  { %s2492_s23 = smov 0   ;;  %s2494_s24 = smov 0  }
  0x15 LB: > { %3286 = sst [smem:[#allocation32_spill]] %s2392_s21  ;;  %s2406_s25 = smov [#allocation10]   ;;  %s2404_s24 = sphi %s2494_s24, %s3337_s24   ;;  %s2400_s23 = sphi %s2492_s23, %s3341_s23   ;;  %s2396_s22 = sphi %s2490_s22, %s3340_s22   ;;  %s2392_s21 = sphi %s2488_s21, %s3339_s21  }
  0x16   : > { %s354_s26 = sshll.u32 %s2406_s25, 4  ;;  %s2509_s27 = sadd.s32 4294967295, %s2404_s24   ;;  %s2514_s26 = int_to_ptr.vmem [resolvable:$true] %s354_s26 }
  0x17   : > { %3287 = sst [smem:[#allocation33_spill]] %s2509_s27  ;;  %p1566_p0 = scmp.ge.s32.totalorder %s2404_s24, 1 }
  0x18   : > { %p3255_p1 = scmp.eq.s32.totalorder %s2509_s27, 0  ;;  %p341_p2 = scmp.lt.s32.totalorder %s2404_s24, 3 }
  0x19   : > { %s2407_s29 = smov [#allocation11]   ;;  %s2408_s13 = smov [#allocation14]  }
  0x1a   : > { %p2516_p3 = pnand %p1566_p0, %p341_p2  ;;  %s365_s30 = sshll.u32 %s2407_s29, 4  ;;  %s2523_s30 = int_to_ptr.vmem [resolvable:$true] %s365_s30 }
  0x1b   : > { %s389_s14 = sshll.u32 %s2408_s13, 4  ;;  %s2409_s16 = smov [#allocation17]   ;;  %s2531_s14 = int_to_ptr.vmem [resolvable:$true] %s389_s14 }
  0x1c   : > { %s3288_s28 = scalar_select %p2516_p3, 1, 0 }
  0x1d   : > { %p1826_p5 = pneg %p2516_p3  ;;  %s2533_s17 = sshll.u32 %s2409_s16, 4  ;;  %s414_s17 = int_to_ptr.vmem [resolvable:$true] %s2533_s17 }
  0x1e   : > { %3289 = sst [smem:[#allocation34_spill]] %s3288_s28  ;;  %s3291_s4 = sld [smem:[#allocation42_spill]] }
  0x1f   : > { %p2527_p6 = pnand %p1826_p5, %p3255_p1 }
  0x21   : > { %s3290_s15 = scalar_select %p2527_p6, 1, 0 }
  0x22   : > { %p2543_p8 = pneg %p2527_p6 }
  0x24   : > { %s1966_s20 = scalar_lea.hbm %s3291_s4, 16 }
  0x25   : > { %p1967_p7 = scmp.ne.s32.totalorder %s3291_s4, %s1966_s20  ;;  %p1973_p11 = scmp.lt.u32.totalorder %s1966_s20, %s3291_s4 }
  0x26   : > { %s3292_s13 = scalar_select %p2543_p8, 1, 0 }
  0x27   : > { %p1969_p9 = pnand %p2543_p8, %p1967_p7 }
  0x29   : > { %p1970_p10 = pneg %p1969_p9 }
  0x2b   : > { %p1975_p12 = pnand %p1973_p11, %p1970_p10 }
  0x2d   : > { %1978 = shalt.err (!%p1975_p12)
}
  0x2e   : > { %s1979_s18 = scalar_lea.vmem %s2514_s26, 16  ;;  %s1986_s19 = scalar_lea.vmem %s2514_s26, 32 }
  0x2f   : > { %p1980_p13 = scmp.ne.s32.totalorder %s2514_s26, %s1979_s18  ;;  %p1987_p5 = scmp.lt.s32.totalorder %s2514_s26, %s2514_s26 }
  0x30   : > { %p1988_p7 = scmp.lt.s32.totalorder %s1986_s19, %s1979_s18 }
  0x31   : > { %p1982_p0 = pnand %p1980_p13, %p2543_p8 }
  0x32   : > { %p1989_p9 = por %p1988_p7, %p1987_p5 }
  0x33   : > { %p1983_p2 = pneg %p1982_p0 }
  0x35   : > { %p1990_p4 = pnand %p1989_p9, %p1983_p2 }
  0x37   : > { %1993 = shalt.err (!%p1990_p4)
}
  0x38   : > { %1829 = dma.hbm_to_vmem [thread:$0]  (!%p2527_p6), %s3291_s4, 16, %s2514_s26, [#allocation9]  }
  0x39   : > { %s3293_s5 = sld [smem:[#allocation43_spill]] }
  0x3f   : > { %s1994_s16 = scalar_lea.hbm %s3293_s5, 16 }
  0x40   : > { %p1995_p10 = scmp.ne.s32.totalorder %s3293_s5, %s1994_s16  ;;  %p2001_p4 = scmp.lt.u32.totalorder %s1994_s16, %s3293_s5 }
  0x42   : > { %p1997_p11 = pnand %p1995_p10, %p2543_p8 }
  0x44   : > { %p1998_p12 = pneg %p1997_p11 }
  0x46   : > { %p2003_p13 = pnand %p2001_p4, %p1998_p12 }
  0x48   : > { %2006 = shalt.err (!%p2003_p13)
}
  0x49   : > { %s2007_s26 = scalar_lea.vmem %s2523_s30, 16  ;;  %s2014_s3 = scalar_lea.vmem %s2523_s30, 32 }
  0x4a   : > { %p2008_p0 = scmp.ne.s32.totalorder %s2523_s30, %s2007_s26  ;;  %p2015_p7 = scmp.lt.s32.totalorder %s2523_s30, %s2523_s30 }
  0x4b   : > { %p2016_p9 = scmp.lt.s32.totalorder %s2014_s3, %s2007_s26 }
  0x4c   : > { %p2010_p2 = pnand %p2008_p0, %p2543_p8 }
  0x4d   : > { %p2017_p10 = por %p2016_p9, %p2015_p7 }
  0x4e   : > { %p2011_p5 = pneg %p2010_p2 }
  0x50   : > { %p2018_p11 = pnand %p2017_p10, %p2011_p5 }
  0x52   : > { %2021 = shalt.err (!%p2018_p11)
}
  0x53   : > { %1832 = dma.hbm_to_vmem [thread:$0]  (!%p2527_p6), %s3293_s5, 16, %s2523_s30, [#allocation12]  }
  0x54   : > { %s3294_s7 = sld [smem:[#allocation44_spill]] }
  0x5a   : > { %s2022_s29 = scalar_lea.hbm %s3294_s7, 16 }
  0x5b   : > { %p2023_p12 = scmp.ne.s32.totalorder %s3294_s7, %s2022_s29  ;;  %p2029_p0 = scmp.lt.u32.totalorder %s2022_s29, %s3294_s7 }
  0x5d   : > { %p2025_p4 = pnand %p2023_p12, %p2543_p8 }
  0x5f   : > { %p2026_p13 = pneg %p2025_p4 }
  0x61   : > { %p2031_p2 = pnand %p2029_p0, %p2026_p13 }
  0x63   : > { %2034 = shalt.err (!%p2031_p2)
}
  0x64   : > { %s2035_s30 = scalar_lea.vmem %s2531_s14, 16  ;;  %s2042_s3 = scalar_lea.vmem %s2531_s14, 32 }
  0x65   : > { %p2036_p5 = scmp.ne.s32.totalorder %s2531_s14, %s2035_s30  ;;  %p2043_p10 = scmp.lt.s32.totalorder %s2531_s14, %s2531_s14 }
  0x66   : > { %p2044_p11 = scmp.lt.s32.totalorder %s2042_s3, %s2035_s30 }
  0x67   : > { %p2038_p7 = pnand %p2036_p5, %p2543_p8 }
  0x68   : > { %p2045_p12 = por %p2044_p11, %p2043_p10 }
  0x69   : > { %p2039_p9 = pneg %p2038_p7 }
  0x6b   : > { %p2046_p4 = pnand %p2045_p12, %p2039_p9 }
  0x6d   : > { %2049 = shalt.err (!%p2046_p4)
}
  0x6e   : > { %1838 = dma.hbm_to_vmem [thread:$0]  (!%p2527_p6), %s3294_s7, 16, %s2531_s14, [#allocation15]  }
  0x6f   : > { %s3295_s9 = sld [smem:[#allocation45_spill]] }
  0x75   : > { %s2050_s29 = scalar_lea.hbm %s3295_s9, 16 }
  0x76   : > { %p2051_p13 = scmp.ne.s32.totalorder %s3295_s9, %s2050_s29  ;;  %p2057_p5 = scmp.lt.u32.totalorder %s2050_s29, %s3295_s9 }
  0x78   : > { %p2053_p0 = pnand %p2051_p13, %p2543_p8 }
  0x7a   : > { %p2054_p2 = pneg %p2053_p0 }
  0x7c   : > { %p2059_p7 = pnand %p2057_p5, %p2054_p2 }
  0x7e   : > { %2062 = shalt.err (!%p2059_p7)
}
  0x7f   : > { %s2063_s30 = scalar_lea.vmem %s414_s17, 16  ;;  %s2070_s14 = scalar_lea.vmem %s414_s17, 32 }
  0x80   : > { %p2064_p9 = scmp.ne.s32.totalorder %s414_s17, %s2063_s30  ;;  %p2071_p12 = scmp.lt.s32.totalorder %s414_s17, %s414_s17 }
  0x81   : > { %p2072_p4 = scmp.lt.s32.totalorder %s2070_s14, %s2063_s30 }
  0x82   : > { %p2066_p10 = pnand %p2064_p9, %p2543_p8 }
  0x83   : > { %p2073_p1 = por %p2072_p4, %p2071_p12 }
  0x84   : > { %p2067_p11 = pneg %p2066_p10 }
  0x86   : > { %p2074_p3 = pnand %p2073_p1, %p2067_p11 }
  0x88   : > { %2077 = shalt.err (!%p2074_p3)
}
  0x89   : > { %1844 = dma.hbm_to_vmem [thread:$0]  (!%p2527_p6), %s3295_s9, 16, %s414_s17, [#allocation18]  }
  0x8a   : > { %s1565_s12 = sadd.s32 4294967294, %s2404_s24   ;;  %s2634_s20 = sadd.s32 1, %s2404_s24  }
  0x8b   : > { %3296 = sst [smem:[#allocation35_spill]] %s2634_s20  ;;  %s42_s25 = ssub.s32 %s2404_s24, %s2634_s20 }
  0x8c   : > { %s45_s29 = sadd.s32 1, %s2400_s23  ;;  %p43_p1 = scmp.eq.s32.totalorder %s42_s25, 0 }
  0x8d   : > { %p52_p3 = scmp.ne.s32.totalorder %s2400_s23, %s2396_s22  ;;  %p53_p13 = scmp.eq.s32.totalorder %s2404_s24, 0 }
  0x8e   : > { %p58_p0 = scmp.ne.s32.totalorder %s2396_s22, %s2392_s21  ;;  %p3298_p5 = scmp.eq.s32.totalorder %s2509_s27, 0 }
  0x8f   : > { %s2645_s16 = scalar_select %p43_p1, %s2400_s23, %s45_s29  }
  0x90   : > { %p54_p2 = por %p53_p13, %p52_p3  ;;  %p2649_p7 = por %p3298_p5, %p58_p0 }
  0x91   : > { %3297 = sst [smem:[#allocation36_spill]] %s2645_s16  ;;  %p328_p9 = scmp.eq.s32.totalorder %s2509_s27, 1 }
  0x92   : > { %s3299_s17 = scalar_select %p2649_p7, 1, 0 }
  0x93   : > { %p334_p10 = scmp.eq.s32.totalorder %s1565_s12, 1  ;;  %p2654_p11 = por %p328_p9, %p52_p3 }
  0x94   : > { %3300 = sst [smem:[#allocation37_spill]] %s3299_s17  ;;  %p1876_p4 = scmp.lt.s32.totalorder %s2404_s24, 2 }
  0x95   : > { %s3301_s18 = scalar_select %p2654_p11, 1, 0 }
  0x96   : > { %p2658_p12 = por %p334_p10, %p58_p0  ;;  %s3257_s26 = sand.u32 1, %s2400_s23  }
  0x97   : > { %3302 = sst [smem:[#allocation38_spill]] %s3301_s18  ;;  %s2666_s30 = smul.u32 48, %s3257_s26 }
  0x98   : > { %s3303_s19 = scalar_select %p2658_p12, 1, 0 }
  0x99   : > { %s3261_s14 = sand.u32 1, %s2404_s24   ;;  %s2670_s3 = smul.u32 768, %s2404_s24 }
  0x9a   : > { %3304 = sst [smem:[#allocation39_spill]] %s3303_s19  ;;  %p2672_p1 = pnand %p1876_p4, %p54_p2 }
  0x9b   : > { %s3306_s1 = sld [smem:[#allocation40_spill]]  ;;  %s473_s26 = scalar_lea.vmem [#allocation5], %s2666_s30 }
  0x9c   : > { %s3305_s28 = scalar_select %p2672_p1, 1, 0 }
  0x9d   : > { %s480_s4 = sshll.u32 %s473_s26, 4  ;;  %s2687_s5 = scalar_lea.sflag [#allocation6], %s3261_s14  ;;  %s2683_s4 = int_to_ptr.vmem [resolvable:$true] %s480_s4 }
  0x9e   : > { %p2693_p13 = pneg %p2672_p1 }
  0xa0   : > { %s3307_s9 = scalar_select %p2693_p13, 1, 0 }
  0xa1   : > { %s2680_s29 = scalar_lea.hbm %s3306_s1, %s2670_s3  ;;  %s2083_s26 = scalar_lea.hbm %s3306_s1, 1536 }
  0xa2   : > { %s2078_s7 = scalar_lea.hbm %s2680_s29, 768  ;;  %p2084_p5 = scmp.lt.u32.totalorder %s2680_s29, %s3306_s1 }
  0xa3   : > { %p2079_p3 = scmp.ne.s32.totalorder %s2680_s29, %s2078_s7  ;;  %p2085_p9 = scmp.lt.u32.totalorder %s2083_s26, %s2078_s7 }
  0xa4   : > { %p2087_p4 = scmp.lt.u32.totalorder %s2078_s7, %s2680_s29 }
  0xa5   : > { %p2081_p0 = pnand %p2693_p13, %p2079_p3  ;;  %p2086_p10 = por %p2085_p9, %p2084_p5 }
  0xa7   : > { %p2082_p2 = pneg %p2081_p0  ;;  %p2088_p12 = por %p2087_p4, %p2086_p10 }
  0xa9   : > { %p2089_p11 = pnand %p2088_p12, %p2082_p2 }
  0xab   : > { %2092 = shalt.err (!%p2089_p11)
}
  0xac   : > { %s2093_s14 = scalar_lea.vmem %s2683_s4, 768  ;;  %s2410_s12 = smov [#allocation5]  }
  0xad   : > { %p2094_p3 = scmp.ne.s32.totalorder %s2683_s4, %s2093_s14  ;;  %s2098_s25 = sshll.u32 %s2410_s12, 4  ;;  %s2099_s25 = int_to_ptr.vmem [resolvable:$false] %s2098_s25 }
  0xae   : > { %s2100_s20 = scalar_lea.vmem %s2099_s25, 1536  ;;  %p2101_p6 = scmp.lt.s32.totalorder %s2683_s4, %s2099_s25 }
  0xaf   : > { %p2096_p0 = pnand %p2094_p3, %p2693_p13  ;;  %p2102_p8 = scmp.lt.s32.totalorder %s2100_s20, %s2093_s14 }
  0xb1   : > { %p2097_p7 = pneg %p2096_p0  ;;  %p2103_p5 = por %p2102_p8, %p2101_p6 }
  0xb3   : > { %p2104_p9 = pnand %p2103_p5, %p2097_p7 }
  0xb5   : > { %2107 = shalt.err (!%p2104_p9)
}
  0xb6   : > { %s2411_s7 = smov 128   ;;  %s2412_s16 = smov 8  }
  0xb7   : > { %1857 = dma.hbm_to_vmem [thread:$0]  (!%p2672_p1), %s2680_s29, 768, %s2683_s4, %s2687_s5, %s2411_s7, %s2411_s7, %s2412_s16  }
  0xb8   : > { %s2413_s26 = smov [#allocation13]   ;;  %s2414_s25 = smov [#allocation16]  }
  0xb9   : > { %s375_s12 = sshll.u32 %s2413_s26, 4  ;;  %s399_s14 = sshll.u32 %s2414_s25, 4  ;;  %s376_s12 = int_to_ptr.vmem [resolvable:$true] %s375_s12  ;;  %s400_s14 = int_to_ptr.vmem [resolvable:$true] %s399_s14 }
  0xba   : > { %s2108_s19 = scalar_lea.hbm %s3245_s6, 512  ;;  %p3308_p8 = scmp.ne.s32.totalorder %s3292_s13, 0 }
  0xbb   : > { %p2109_p6 = scmp.ne.s32.totalorder %s3245_s6, %s2108_s19  ;;  %p2115_p12 = scmp.lt.u32.totalorder %s2108_s19, %s3245_s6 }
  0xbd   : > { %p2111_p7 = pnand %p2109_p6, %p3308_p8 }
  0xbf   : > { %p2112_p11 = pneg %p2111_p7 }
  0xc1   : > { %p2117_p2 = pnand %p2115_p12, %p2112_p11 }
  0xc3   : > { %2120 = shalt.err (!%p2117_p2)
}
  0xc4   : > { %s2121_s4 = scalar_lea.vmem %s376_s12, 512  ;;  %p2129_p0 = scmp.lt.s32.totalorder %s376_s12, %s376_s12 }
  0xc5   : > { %p2122_p10 = scmp.ne.s32.totalorder %s376_s12, %s2121_s4  ;;  %p2130_p5 = scmp.lt.s32.totalorder %s2121_s4, %s2121_s4 }
  0xc7   : > { %p2124_p4 = pnand %p2122_p10, %p3308_p8  ;;  %p2131_p9 = por %p2130_p5, %p2129_p0 }
  0xc9   : > { %p2125_p3 = pneg %p2124_p4 }
  0xcb   : > { %p2132_p1 = pnand %p2131_p9, %p2125_p3 }
  0xcd   : > { %2135 = shalt.err (!%p2132_p1)
}
  0xce   : > { %p3309_p6 = scmp.ne.s32.totalorder %s3290_s15, 0  ;;  %s2136_s18 = scalar_lea.hbm %s3247_s8, 512 }
  0xcf   : > { %p2137_p7 = scmp.ne.s32.totalorder %s3247_s8, %s2136_s18  ;;  %p2143_p12 = scmp.lt.u32.totalorder %s2136_s18, %s3247_s8 }
  0xd0   : > { %1835 = dma.hbm_to_vmem [thread:$0]  (!%p3309_p6), %s3245_s6, 512, %s376_s12, [#allocation12], %s2411_s7, %s2411_s7, %s2412_s16  }
  0xd1   : > { %p2139_p1 = pnand %p2137_p7, %p3308_p8 }
  0xd3   : > { %p2140_p11 = pneg %p2139_p1 }
  0xd5   : > { %p2145_p2 = pnand %p2143_p12, %p2140_p11 }
  0xd7   : > { %2148 = shalt.err (!%p2145_p2)
}
  0xd8   : > { %s2149_s20 = scalar_lea.vmem %s400_s14, 512  ;;  %p2157_p0 = scmp.lt.s32.totalorder %s400_s14, %s400_s14 }
  0xd9   : > { %p2150_p10 = scmp.ne.s32.totalorder %s400_s14, %s2149_s20  ;;  %p2158_p5 = scmp.lt.s32.totalorder %s2149_s20, %s2149_s20 }
  0xdb   : > { %p2152_p4 = pnand %p2150_p10, %p3308_p8  ;;  %p2159_p9 = por %p2158_p5, %p2157_p0 }
  0xdd   : > { %p2153_p3 = pneg %p2152_p4 }
  0xdf   : > { %p2160_p13 = pnand %p2159_p9, %p2153_p3 }
  0xe1   : > { %2163 = shalt.err (!%p2160_p13)
}
  0xe2   : > { %1841 = dma.hbm_to_vmem [thread:$0]  (!%p3309_p6), %s3247_s8, 512, %s400_s14, [#allocation15], %s2411_s7, %s2411_s7, %s2412_s16  }
  0xe3   : > { %s2415_s1 = smov [#allocation19]   ;;  %s2416_s27 = smov [#allocation20]  }
  0xe4   : > { %s423_s21 = sshll.u32 %s2415_s1, 4  ;;  %s437_s17 = sshll.u32 %s2416_s27, 4  ;;  %s424_s21 = int_to_ptr.vmem [resolvable:$true] %s423_s21  ;;  %s438_s17 = int_to_ptr.vmem [resolvable:$true] %s437_s17 }
  0xe5   : > { %s2164_s29 = scalar_lea.hbm %s3249_s10, 2048 }
  0xe6   : > { %p2165_p13 = scmp.ne.s32.totalorder %s3249_s10, %s2164_s29  ;;  %p2171_p11 = scmp.lt.u32.totalorder %s2164_s29, %s3249_s10 }
  0xe8   : > { %p2167_p7 = pnand %p2165_p13, %p3308_p8 }
  0xea   : > { %p2168_p1 = pneg %p2167_p7 }
  0xec   : > { %p2173_p12 = pnand %p2171_p11, %p2168_p1 }
  0xee   : > { %2176 = shalt.err (!%p2173_p12)
}
  0xef   : > { %s2177_s14 = scalar_lea.vmem %s424_s21, 2048  ;;  %p2185_p3 = scmp.lt.s32.totalorder %s424_s21, %s424_s21 }
  0xf0   : > { %p2178_p2 = scmp.ne.s32.totalorder %s424_s21, %s2177_s14  ;;  %p2186_p0 = scmp.lt.s32.totalorder %s2177_s14, %s2177_s14 }
  0xf2   : > { %p2180_p10 = pnand %p2178_p2, %p3308_p8  ;;  %p2187_p5 = por %p2186_p0, %p2185_p3 }
  0xf4   : > { %p2181_p4 = pneg %p2180_p10 }
  0xf6   : > { %p2188_p9 = pnand %p2187_p5, %p2181_p4 }
  0xf8   : > { %2191 = shalt.err (!%p2188_p9)
}
  0xf9   : > { %1847 = dma.hbm_to_vmem [thread:$0]  (!%p3309_p6), %s3249_s10, 2048, %s424_s21, [#allocation18], %s2411_s7, %s2411_s7, %s2412_s16  }
  0xfa   : > { %s2192_s19 = scalar_lea.hbm %s3250_s11, 16 }
  0xfb   : > { %p2193_p13 = scmp.ne.s32.totalorder %s3250_s11, %s2192_s19  ;;  %p2199_p11 = scmp.lt.u32.totalorder %s2192_s19, %s3250_s11 }
  0xfd   : > { %p2195_p7 = pnand %p2193_p13, %p3308_p8 }
  0xff   : > { %p2196_p1 = pneg %p2195_p7 }
 0x101   : > { %p2201_p12 = pnand %p2199_p11, %p2196_p1 }
 0x103   : > { %2204 = shalt.err (!%p2201_p12)
}
 0x104   : > { %s2205_s12 = scalar_lea.vmem %s438_s17, 16  ;;  %s2212_s21 = scalar_lea.vmem %s438_s17, 32 }
 0x105   : > { %p2206_p2 = scmp.ne.s32.totalorder %s438_s17, %s2205_s12  ;;  %p2213_p3 = scmp.lt.s32.totalorder %s438_s17, %s438_s17 }
 0x106   : > { %p2214_p0 = scmp.lt.s32.totalorder %s2212_s21, %s2205_s12 }
 0x107   : > { %p2208_p10 = pnand %p2206_p2, %p3308_p8 }
 0x108   : > { %p2215_p5 = por %p2214_p0, %p2213_p3 }
 0x109   : > { %p2209_p4 = pneg %p2208_p10 }
 0x10b   : > { %p2216_p9 = pnand %p2215_p5, %p2209_p4 }
 0x10d   : > { %2219 = shalt.err (!%p2216_p9)
}
 0x10e   : > { %1850 = dma.hbm_to_vmem [thread:$0]  (!%p3309_p6), %s3250_s11, 16, %s438_s17, [#allocation21]  }
 0x10f   : > { %s2805_s27 = scalar_lea.hbm %s3239_s0, %s2670_s3  ;;  %s452_s18 = scalar_lea.vmem [#allocation2], %s2666_s30 }
 0x110   : > { %s459_s15 = sshll.u32 %s452_s18, 4  ;;  %s2814_s26 = scalar_lea.hbm %s3241_s2, %s2670_s3  ;;  %s2808_s15 = int_to_ptr.vmem [resolvable:$true] %s459_s15 }
 0x111   : > { %s3310_s25 = sand.u32 1, %s2400_s23   ;;  %s2220_s20 = scalar_lea.hbm %s2805_s27, 768 }
 0x112   : > { %s2818_s17 = scalar_lea.sflag [#allocation3], %s3310_s25  ;;  %p2221_p8 = scmp.ne.s32.totalorder %s2805_s27, %s2220_s20 }
 0x113   : > { %p3311_p6 = scmp.ne.s32.totalorder %s3307_s9, 0  ;;  %s2225_s14 = scalar_lea.hbm %s3239_s0, 1536 }
 0x114   : > { %p2226_p1 = scmp.lt.u32.totalorder %s2805_s27, %s3239_s0  ;;  %p2227_p11 = scmp.lt.u32.totalorder %s2225_s14, %s2220_s20 }
 0x115   : > { %p2223_p13 = pnand %p2221_p8, %p3311_p6  ;;  %p2229_p2 = scmp.lt.u32.totalorder %s2220_s20, %s2805_s27 }
 0x116   : > { %p2228_p12 = por %p2227_p11, %p2226_p1 }
 0x117   : > { %p2224_p7 = pneg %p2223_p13 }
 0x118   : > { %p2230_p10 = por %p2229_p2, %p2228_p12 }
 0x11a   : > { %p2231_p4 = pnand %p2230_p10, %p2224_p7 }
 0x11c   : > { %2234 = shalt.err (!%p2231_p4)
}
 0x11d   : > { %s2235_s1 = scalar_lea.vmem %s2808_s15, 768  ;;  %s2417_s18 = smov [#allocation2]  }
 0x11e   : > { %p2236_p3 = scmp.ne.s32.totalorder %s2808_s15, %s2235_s1  ;;  %s2240_s19 = sshll.u32 %s2417_s18, 4  ;;  %s2241_s19 = int_to_ptr.vmem [resolvable:$false] %s2240_s19 }
 0x11f   : > { %s2242_s29 = scalar_lea.vmem %s2241_s19, 1536  ;;  %p2243_p9 = scmp.lt.s32.totalorder %s2808_s15, %s2241_s19 }
 0x120   : > { %p2238_p0 = pnand %p2236_p3, %p3311_p6  ;;  %p2244_p8 = scmp.lt.s32.totalorder %s2242_s29, %s2235_s1 }
 0x122   : > { %p2239_p5 = pneg %p2238_p0  ;;  %p2245_p13 = por %p2244_p8, %p2243_p9 }
 0x124   : > { %p2246_p1 = pnand %p2245_p13, %p2239_p5 }
 0x126   : > { %2249 = shalt.err (!%p2246_p1)
}
 0x127   : > { %p3312_p7 = scmp.ne.s32.totalorder %s3305_s28, 0  ;;  %s494_s25 = scalar_lea.vmem [#allocation7], %s2666_s30 }
 0x128   : > { %s501_s20 = sshll.u32 %s494_s25, 4  ;;  %s3313_s14 = sld [smem:[#allocation41_spill]]  ;;  %s2846_s20 = int_to_ptr.vmem [resolvable:$true] %s501_s20 }
 0x129   : > { %1854 = dma.hbm_to_vmem [thread:$0]  (!%p3312_p7), %s2805_s27, 768, %s2808_s15, %s2818_s17, %s2411_s7, %s2411_s7, %s2412_s16  }
 0x12a   : > { %s2250_s13 = scalar_lea.hbm %s2814_s26, 768  ;;  %s2255_s19 = scalar_lea.hbm %s3241_s2, 1536 }
 0x12b   : > { %p2251_p11 = scmp.ne.s32.totalorder %s2814_s26, %s2250_s13  ;;  %p2256_p10 = scmp.lt.u32.totalorder %s2814_s26, %s3241_s2 }
 0x12c   : > { %p2257_p4 = scmp.lt.u32.totalorder %s2255_s19, %s2250_s13  ;;  %p2259_p0 = scmp.lt.u32.totalorder %s2250_s13, %s2814_s26 }
 0x12d   : > { %p2253_p12 = pnand %p2251_p11, %p3311_p6 }
 0x12e   : > { %s2852_s4 = scalar_lea.hbm %s3313_s14, %s2670_s3  ;;  %p2258_p3 = por %p2257_p4, %p2256_p10 }
 0x12f   : > { %p2254_p2 = pneg %p2253_p12 }
 0x130   : > { %p2260_p5 = por %p2259_p0, %p2258_p3 }
 0x132   : > { %p2261_p9 = pnand %p2260_p5, %p2254_p2 }
 0x134   : > { %2264 = shalt.err (!%p2261_p9)
}
 0x135   : > { %s2265_s3 = scalar_lea.vmem %s2846_s20, 768  ;;  %s2418_s15 = smov [#allocation7]  }
 0x136   : > { %p2266_p8 = scmp.ne.s32.totalorder %s2846_s20, %s2265_s3  ;;  %s2270_s17 = sshll.u32 %s2418_s15, 4  ;;  %s2271_s17 = int_to_ptr.vmem [resolvable:$false] %s2270_s17 }
 0x137   : > { %s2272_s25 = scalar_lea.vmem %s2271_s17, 1536  ;;  %p2273_p11 = scmp.lt.s32.totalorder %s2846_s20, %s2271_s17 }
 0x138   : > { %p2268_p13 = pnand %p2266_p8, %p3311_p6  ;;  %p2274_p12 = scmp.lt.s32.totalorder %s2272_s25, %s2265_s3 }
 0x13a   : > { %p2269_p1 = pneg %p2268_p13  ;;  %p2275_p10 = por %p2274_p12, %p2273_p11 }
 0x13c   : > { %p2276_p4 = pnand %p2275_p10, %p2269_p1 }
 0x13e   : > { %2279 = shalt.err (!%p2276_p4)
}
 0x13f   : > { %1860 = dma.hbm_to_vmem [thread:$0]  (!%p3312_p7), %s2814_s26, 768, %s2846_s20, %s2687_s5, %s2411_s7, %s2411_s7, %s2412_s16  }
 0x140   : > { %s515_s12 = scalar_lea.vmem [#allocation8], %s2666_s30  ;;  %s3314_s13 = sand.u32 1, %s2404_s24  }
 0x141   : > { %s522_s21 = sshll.u32 %s515_s12, 4  ;;  %s2884_s1 = scalar_lea.sflag [#allocation9], %s3314_s13  ;;  %s2880_s21 = int_to_ptr.vmem [resolvable:$true] %s522_s21 }
 0x142   : > { %s2280_s18 = scalar_lea.hbm %s2852_s4, 768  ;;  %s2285_s27 = scalar_lea.hbm %s3313_s14, 1536 }
 0x143   : > { %p2281_p2 = scmp.ne.s32.totalorder %s2852_s4, %s2280_s18  ;;  %p2286_p5 = scmp.lt.u32.totalorder %s2852_s4, %s3313_s14 }
 0x144   : > { %p2287_p9 = scmp.lt.u32.totalorder %s2285_s27, %s2280_s18  ;;  %p2289_p13 = scmp.lt.u32.totalorder %s2280_s18, %s2852_s4 }
 0x145   : > { %p2283_p3 = pnand %p2281_p2, %p3311_p6 }
 0x146   : > { %p2288_p8 = por %p2287_p9, %p2286_p5 }
 0x147   : > { %p2284_p0 = pneg %p2283_p3 }
 0x148   : > { %p2290_p1 = por %p2289_p13, %p2288_p8 }
 0x14a   : > { %p2291_p11 = pnand %p2290_p1, %p2284_p0 }
 0x14c   : > { %2294 = shalt.err (!%p2291_p11)
}
 0x14d   : > { %s2295_s5 = scalar_lea.vmem %s2880_s21, 768  ;;  %s2419_s30 = smov [#allocation8]  }
 0x14e   : > { %p2296_p12 = scmp.ne.s32.totalorder %s2880_s21, %s2295_s5  ;;  %s2300_s26 = sshll.u32 %s2419_s30, 4  ;;  %s2301_s26 = int_to_ptr.vmem [resolvable:$false] %s2300_s26 }
 0x14f   : > { %s2302_s20 = scalar_lea.vmem %s2301_s26, 1536  ;;  %p2303_p2 = scmp.lt.s32.totalorder %s2880_s21, %s2301_s26 }
 0x150   : > { %p2298_p10 = pnand %p2296_p12, %p3311_p6  ;;  %p2304_p3 = scmp.lt.s32.totalorder %s2302_s20, %s2295_s5 }
 0x152   : > { %p2299_p4 = pneg %p2298_p10  ;;  %p2305_p5 = por %p2304_p3, %p2303_p2 }
 0x154   : > { %p2306_p9 = pnand %p2305_p5, %p2299_p4 }
 0x156   : > { %2309 = shalt.err (!%p2306_p9)
}
 0x157   : > { %1863 = dma.hbm_to_vmem [thread:$0]  (!%p3312_p7), %s2852_s4, 768, %s2880_s21, %s2884_s1, %s2411_s7, %s2411_s7, %s2412_s16  }
 0x158   : > { %s3315_s9 = sld [smem:[#allocation34_spill]] }
 0x15e   : > { %p3316_p6 = scmp.ne.s32.totalorder %s3315_s9, 0 }
 0x15f   : > { %s3317_s17 = sld [smem:[#allocation37_spill]] (!%p3316_p6)  ;;  %s2914_s25 = sand.u32 (!%p3316_p6), 1, %s2396_s22  }
 0x160   : > { %534 = sbr.rel (%p3316_p6) target bundleno = 1232 (0x4d0), region = 68  ;;  %s537_s28 = scalar_lea.sflag (!%p3316_p6), [#allocation3], %s2914_s25 }
 0x161   : > { %s2917_s12 = smul.u32 (!%p3316_p6), 48, %s2914_s25 }
 0x163   : > { %s2921_s13 = scalar_lea.vmem (!%p3316_p6), [#allocation2], %s2917_s12 }
 0x165   : > { %p3318_p0 = scmp.ne.s32.totalorder (!%p3316_p6), %s3317_s17, 0 }
 0x167   : > { %2355 = dma.done.wait (%p3318_p0), %s537_s28, 768  }
 0x168   : > { %2357 = vsyncadd (%p3318_p0), %s537_s28, 4294966528  ;;  %s3319_s7 = sld [smem:[#allocation33_spill]]  ;;  %s2929_s21 = scalar_lea.vmem [#allocation5], %s2917_s12 }
 0x16e   : > { %s545_s16 = sand.u32 1, %s3319_s7  }
 0x16f   : > { %s546_s4 = scalar_lea.sflag [#allocation6], %s545_s16 }
 0x170   : > { %2359 = dma.done.wait (%p3318_p0), %s546_s4, 1536  }
 0x171   : > { %2361 = vsyncadd (%p3318_p0), %s546_s4, 4294965760  ;;  %s2936_s1 = scalar_lea.vmem [#allocation7], %s2917_s12  ;;  %s564_s18 = scalar_lea.sflag [#allocation9], %s545_s16 }
 0x172   : > { %s2939_s19 = scalar_lea.vmem [#allocation8], %s2917_s12 }
 0x173   : > { %2363 = dma.done.wait (%p3318_p0), %s564_s18, 768  }
 0x174   : > { %2365 = vsyncadd (%p3318_p0), %s564_s18, 4294966528  ;;  %p3320_p7 = scmp.eq.s32.totalorder %s3319_s7, 0 }
 0x176   : > { %2367 = dma.done.wait (%p3320_p7), [#allocation9], 16   ;;  %p3321_p8 = pmov %p3320_p7 }
 0x177   : > { %p3322_p13 = pmov %p3320_p7 }
 0x178   : > { %2369 = vsyncadd (%p3321_p8), [#allocation9], 4294967280 }
 0x179   : > { %2371 = dma.done.wait (%p3322_p13), [#allocation12], 528   ;;  %p3323_p1 = pmov %p3320_p7 }
 0x17b   : > { %2373 = vsyncadd (%p3323_p1), [#allocation12], 4294966768  ;;  %p3324_p11 = pmov %p3323_p1 }
 0x17c   : > { %p3325_p12 = pmov %p3323_p1 }
 0x17d   : > { %2375 = dma.done.wait (%p3324_p11), [#allocation15], 528  }
 0x17e   : > { %2377 = vsyncadd (%p3325_p12), [#allocation15], 4294966768  ;;  %p3326_p10 = pmov %p3323_p1 }
 0x17f   : > { %p3327_p4 = pmov %p3323_p1 }
 0x180   : > { %2379 = dma.done.wait (%p3326_p10), [#allocation18], 2064  }
 0x181   : > { %2381 = vsyncadd (%p3327_p4), [#allocation18], 4294965232  ;;  %p3328_p2 = pmov %p3323_p1 }
 0x182   : > { %p3329_p3 = pmov %p3323_p1 }
 0x183   : > { %2383 = dma.done.wait (%p3328_p2), [#allocation21], 16  }
 0x184   : > { %2385 = vsyncadd (%p3329_p3), [#allocation21], 4294967280  ;;  %v660_v0 = vld [vmem:[%s2921_s13] sm:$0xff]  ;;  %v662_v4 = vld [vmem:[%s2921_s13 + $0x10] sm:$0xff]  ;;  %vm702_vm0 = vcmask 261120   ;;  %s654_s29 = scalar_lea.vmem [#allocation22], %s2917_s12 }
 0x185   : > { %v666_v1 = vld [vmem:[%s2929_s21] sm:$0xff]  ;;  %v668_v5 = vld [vmem:[%s2929_s21 + $0x10] sm:$0xff]  ;;  %v661_v9 = vld [vmem:[%s2921_s13 + $0x8] sm:$0xff]  ;;  %s3330_s27 = sld [smem:[#allocation38_spill]]  ;;  %s1350_s3 = sshll.u32 %s654_s29, 4  ;;  %s3186_s3 = int_to_ptr.vmem [resolvable:$true] %s1350_s3 }
 0x186   : > { %v678_v2 = vld [vmem:[%s2936_s1] sm:$0xff]  ;;  %v672_v3 = vadd.f32 %v666_v1, %v660_v0  ;;  %v674_v7 = vadd.f32 %v668_v5, %v662_v4  ;;  %v680_v8 = vld [vmem:[%s2936_s1 + $0x10] sm:$0xff]  ;;  %v667_v12 = vld [vmem:[%s2929_s21 + $0x8] sm:$0xff]  ;;  %s1613_s15 = smul.u32 768, %s3319_s7  ;;  %s3331_s26 = sld [smem:[#allocation46_spill]] }
 0x187   : > { %v690_v6 = vld [vmem:[%s2939_s19] sm:$0xff]  ;;  %v692_v11 = vld [vmem:[%s2939_s19 + $0x10] sm:$0xff]  ;;  %v679_v13 = vld [vmem:[%s2936_s1 + $0x8] sm:$0xff]  ;;  %v673_v15 = vadd.f32 %v667_v12, %v661_v9  ;;  %s1337_s9 = scalar_lea.sflag [#allocation4], %s2914_s25  ;;  %s2310_s17 = scalar_lea.vmem %s3186_s3, 768 }
 0x188   : > { %v684_v10 = vadd.f32 %v678_v2, %v672_v3  ;;  %v686_v14 = vadd.f32 %v680_v8, %v674_v7  ;;  %v663_v16 = vld [vmem:[%s2921_s13 + $0x18] sm:$0xff]  ;;  %v691_v20 = vld [vmem:[%s2939_s19 + $0x8] sm:$0xff]  ;;  %v664_v22 = vld [vmem:[%s2921_s13 + $0x20] sm:$0xff]  ;;  %p2311_p5 = scmp.ne.s32.totalorder %s3186_s3, %s2310_s17  ;;  %s2420_s12 = smov [#allocation22]  }
 0x189   : > { %v669_v17 = vld [vmem:[%s2929_s21 + $0x18] sm:$0xff]  ;;  %v670_v23 = vld [vmem:[%s2929_s21 + $0x20] sm:$0xff]  ;;  %v685_v25 = vadd.f32 %v679_v13, %v673_v15  ;;  %v665_v29 = vld [vmem:[%s2921_s13 + $0x28] sm:$0xff]  ;;  %s2314_s28 = sshll.u32 %s2420_s12, 4  ;;  %s2315_s28 = int_to_ptr.vmem [resolvable:$false] %s2314_s28 }
 0x18a   : > { %v681_v18 = vld [vmem:[%s2936_s1 + $0x18] sm:$0xff]  ;;  %v2979_v19 = vadd.f32 %v690_v6, %v684_v10  ;;  %v675_v21 = vadd.f32 %v669_v17, %v663_v16  ;;  %v2984_v24 = vadd.f32 %v692_v11, %v686_v14  ;;  %v676_v27 = vadd.f32 %v670_v23, %v664_v22  ;;  %v682_v28 = vld [vmem:[%s2936_s1 + $0x20] sm:$0xff]  ;;  %v671_v33 = vld [vmem:[%s2929_s21 + $0x28] sm:$0xff]  ;;  %s2316_s13 = scalar_lea.vmem %s2315_s28, 1536  ;;  %p2317_p7 = scmp.lt.s32.totalorder %s3186_s3, %s2315_s28 }
 0x18b   : > { %v693_v26 = vld [vmem:[%s2939_s19 + $0x18] sm:$0xff]  ;;  %v694_v32 = vld [vmem:[%s2939_s19 + $0x20] sm:$0xff]  ;;  %v683_v34 = vld [vmem:[%s2936_s1 + $0x28] sm:$0xff]  ;;  %v2996_v36 = vadd.f32 %v691_v20, %v685_v25  ;;  %v677_v38 = vadd.f32 %v671_v33, %v665_v29  ;;  %p3332_p9 = scmp.ne.s32.totalorder %s3330_s27, 0  ;;  %p2318_p8 = scmp.lt.s32.totalorder %s2316_s13, %s2310_s17 }
 0x18c   : > { %v703_v30 = vsel %vm702_vm0, %v2979_v19, 0.0  ;;  %v687_v31 = vadd.f32 %v681_v18, %v675_v21  ;;  %v709_v35 = vsel %vm702_vm0, %v2984_v24, 0.0  ;;  %v688_v37 = vadd.f32 %v682_v28, %v676_v27  ;;  %v695_v40 = vld [vmem:[%s2939_s19 + $0x28] sm:$0xff]  ;;  %s3192_s20 = scalar_lea.hbm %s3331_s26, %s1613_s15 }
 0x18d   : > { %704 = vadd.xlane.f32.xlu0 %v703_v30  ;;  %710 = vadd.xlane.f32.xlu1 %v709_v35  ;;  %v706_v41 = vsel %vm702_vm0, %v2996_v36, 0.0  ;;  %v689_v43 = vadd.f32 %v683_v34, %v677_v38  ;;  %v808_v14 = vld [vmem:[#allocation13] sm:$0xff]  ;;  %v809_v15 = vld [vmem:[#allocation13 + $0x8] sm:$0xff]  ;;  %v810_v17 = vld [vmem:[#allocation13 + $0x10] sm:$0xff]  ;;  %p2312_p6 = pnand %p2311_p5, %p3332_p9  ;;  %p2319_p13 = por %p2318_p8, %p2317_p7 }
 0x18e   : > { %v2998_v39 = vadd.f32 %v693_v26, %v687_v31  ;;  %v3003_v42 = vadd.f32 %v694_v32, %v688_v37  ;;  %v1731_v16 = vpack.c.bf16 %v809_v15, %v808_v14  ;;  %v811_v18 = vld [vmem:[#allocation13 + $0x18] sm:$0xff]  ;;  %v932_v21 = vld [vmem:[#allocation16] sm:$0xff]  ;;  %v933_v22 = vld [vmem:[#allocation16 + $0x8] sm:$0xff] }
 0x18f   : > { %v3007_v45 = vadd.f32 %v695_v40, %v689_v43  ;;  %v1735_v20 = vpack.c.bf16 %v811_v18, %v810_v17  ;;  %v1739_v23 = vpack.c.bf16 %v933_v22, %v932_v21  ;;  %v1208_v15 = vld [vmem:[#allocation19 + $0x10] sm:$0xff]  ;;  %v1210_v18 = vld [vmem:[#allocation19 + $0x20] sm:$0xff]  ;;  %p2313_p0 = pneg %p2312_p6 }
 0x190   : > { %v712_v44 = vsel %vm702_vm0, %v2998_v39, 0.0  ;;  %v715_v46 = vsel %vm702_vm0, %v3003_v42, 0.0  ;;  %1732 = vmatprep.subr.bf16.mxu1 %v1731_v16  ;;  %v1212_v22 = vld [vmem:[#allocation19 + $0x30] sm:$0xff] }
 0x191   : > { %707 = vadd.xlane.f32.xlu0 %v706_v41  ;;  %713 = vadd.xlane.f32.xlu1 %v712_v44  ;;  %v718_v47 = vsel %vm702_vm0, %v3007_v45, 0.0  ;;  %p2320_p1 = pnand %p2319_p13, %p2313_p0 }
 0x192   : > { %1734 = vmatpush3.bf16.msra.mxu1 %v1731_v16  ;;  %v1209_v16 = vld [vmem:[#allocation19 + $0x18] sm:$0xff] }
 0x193   : > { %1736 = vmatprep.subr.bf16.mxu1 %v1735_v20  ;;  %v1751_v17 = vpack.c.bf16 %v1209_v16, %v1208_v15 }
 0x195   : > { %716 = vadd.xlane.f32.xlu0 %v715_v46  ;;  %719 = vadd.xlane.f32.xlu1 %v718_v47 }
 0x196   : > { %1738 = vmatpush3.bf16.msra.mxu1 %v1735_v20  ;;  %v1211_v20 = vld [vmem:[#allocation19 + $0x28] sm:$0xff] }
 0x197   : > { %1740 = vmatprep.subr.bf16.mxu1 %v1739_v23  ;;  %v1755_v21 = vpack.c.bf16 %v1211_v20, %v1210_v18 }
 0x21a   : > { %v705_v48 = vpop.xlane.xlu0 %704  ;;  %v711_v50 = vpop.xlane.xlu1 %710 }
 0x21b   : > { %v722_v49 = vmul.f32 0.03125, %v705_v48  ;;  %v724_v51 = vmul.f32 0.03125, %v711_v50  ;;  %v1589_v48 = vld [vmem:[#allocation10] ss:$0 sm:$0xff]  ;;  %v1590_v50 = vld [vmem:[#allocation11] ss:$0 sm:$0xff] }
 0x21d   : > { %v3014_v52 = vsub.f32 %v2979_v19, %v722_v49  ;;  %v3017_v53 = vsub.f32 %v2984_v24, %v724_v51 }
 0x21e   : > { %v708_v54 = vpop.xlane.xlu0 %707  ;;  %v714_v56 = vpop.xlane.xlu1 %713 }
 0x21f   : > { %v723_v55 = vmul.f32 0.03125, %v708_v54  ;;  %v734_v57 = vmul.f32 %v3014_v52, %v3014_v52  ;;  %v725_v58 = vmul.f32 0.03125, %v714_v56  ;;  %v736_v59 = vmul.f32 %v3017_v53, %v3017_v53 }
 0x221   : > { %v3024_v60 = vsub.f32 %v2996_v36, %v723_v55  ;;  %v740_v61 = vsel %vm702_vm0, %v734_v57, 0.0  ;;  %v3028_v62 = vsub.f32 %v2998_v39, %v725_v58  ;;  %v746_v2 = vsel %vm702_vm0, %v736_v59, 0.0  ;;  %v934_v59 = vld [vmem:[#allocation16 + $0x10] sm:$0xff] }
 0x222   : > { %741 = vadd.xlane.f32.xlu0 %v740_v61  ;;  %v717_v63 = vpop.xlane.xlu0 %716  ;;  %v720_v1 = vpop.xlane.xlu1 %719  ;;  %v935_v61 = vld [vmem:[#allocation16 + $0x18] sm:$0xff] }
 0x223   : > { %v726_v0 = vmul.f32 0.03125, %v717_v63  ;;  %v735_v3 = vmul.f32 %v3024_v60, %v3024_v60  ;;  %v727_v4 = vmul.f32 0.03125, %v720_v1  ;;  %v737_v5 = vmul.f32 %v3028_v62, %v3028_v62 }
 0x225   : > { %v3036_v6 = vsub.f32 %v3003_v42, %v726_v0  ;;  %v743_v7 = vsel %vm702_vm0, %v735_v3, 0.0  ;;  %v3040_v8 = vsub.f32 %v3007_v45, %v727_v4  ;;  %v749_v9 = vsel %vm702_vm0, %v737_v5, 0.0 }
 0x226   : > { %747 = vadd.xlane.f32.xlu0 %v746_v2  ;;  %744 = vadd.xlane.f32.xlu1 %v743_v7  ;;  %v1743_v4 = vpack.c.bf16 %v935_v61, %v934_v59 }
 0x227   : > { %v738_v10 = vmul.f32 %v3036_v6, %v3036_v6  ;;  %v739_v11 = vmul.f32 %v3040_v8, %v3040_v8 }
 0x229   : > { %v752_v12 = vsel %vm702_vm0, %v738_v10, 0.0  ;;  %v755_v13 = vsel %vm702_vm0, %v739_v11, 0.0 }
 0x22a   : > { %750 = vadd.xlane.f32.xlu1 %v749_v9  ;;  %753 = vadd.xlane.f32.xlu0 %v752_v12 }
 0x22e   : > { %756 = vadd.xlane.f32.xlu1 %v755_v13  ;;  %v1207_v13 = vld [vmem:[#allocation19 + $0x8] sm:$0xff] }
 0x2af   : > { %v742_v25 = vpop.xlane.xlu0 %741 }
 0x2b0   : > { %v758_v26 = vmul.f32 0.03125, %v742_v25 }
 0x2b2   : > { %v764_v27 = vadd.f32 1e-05, %v758_v26  ;;  %v1214_v26 = vld [vmem:[#allocation19 + $0x40] sm:$0xff] }
 0x2b3   : > { %v745_v28 = vpop.xlane.xlu1 %744  ;;  %v748_v29 = vpop.xlane.xlu0 %747 }
 0x2b4   : > { %1930 = vrsqrt.f32 %v764_v27  ;;  %v759_v30 = vmul.f32 0.03125, %v745_v28  ;;  %v760_v31 = vmul.f32 0.03125, %v748_v29  ;;  %v1215_v27 = vld [vmem:[#allocation19 + $0x48] sm:$0xff]  ;;  %v1216_v29 = vld [vmem:[#allocation19 + $0x50] sm:$0xff] }
 0x2b5   : > { %v1763_v28 = vpack.c.bf16 %v1215_v27, %v1214_v26 }
 0x2b6   : > { %v765_v32 = vadd.f32 1e-05, %v759_v30  ;;  %v766_v33 = vadd.f32 1e-05, %v760_v31  ;;  %v1217_v30 = vld [vmem:[#allocation19 + $0x58] sm:$0xff] }
 0x2b7   : > { %v751_v34 = vpop.xlane.xlu1 %750  ;;  %v754_v35 = vpop.xlane.xlu0 %753  ;;  %v1767_v31 = vpack.c.bf16 %v1217_v30, %v1216_v29 }
 0x2b8   : > { %1932 = vrsqrt.f32 %v765_v32  ;;  %v761_v37 = vmul.f32 0.03125, %v751_v34  ;;  %v762_v38 = vmul.f32 0.03125, %v754_v35  ;;  %v1218_v32 = vld [vmem:[#allocation19 + $0x60] sm:$0xff]  ;;  %v1220_v35 = vld [vmem:[#allocation19 + $0x70] sm:$0xff] }
 0x2b9   : > { %1934 = vrsqrt.f32 %v766_v33  ;;  %v1219_v33 = vld [vmem:[#allocation19 + $0x68] sm:$0xff] }
 0x2ba   : > { %v767_v40 = vadd.f32 1e-05, %v761_v37  ;;  %v768_v41 = vadd.f32 1e-05, %v762_v38  ;;  %v1771_v34 = vpack.c.bf16 %v1219_v33, %v1218_v32  ;;  %v1221_v37 = vld [vmem:[#allocation19 + $0x78] sm:$0xff] }
 0x2bb   : > { %v757_v43 = vpop.xlane.xlu1 %756  ;;  %v1775_v38 = vpack.c.bf16 %v1221_v37, %v1220_v35 }
 0x2bc   : > { %1936 = vrsqrt.f32 %v767_v40  ;;  %v763_v44 = vmul.f32 0.03125, %v757_v43 }
 0x2bd   : > { %1938 = vrsqrt.f32 %v768_v41 }
 0x2be   : > { %v1931_v46 = vpop.eup %1930  ;;  %v769_v47 = vadd.f32 1e-05, %v763_v44 }
 0x2bf   : > { %v776_v49 = vmul.f32 %v1931_v46, %v3014_v52 }
 0x2c0   : > { %1940 = vrsqrt.f32 %v769_v47 }
 0x2c1   : > { %v789_v51 = vmul.f32 %v1589_v48, %v776_v49 }
 0x2c2   : > { %v1933_v54 = vpop.eup %1932 }
 0x2c3   : > { %v1935_v55 = vpop.eup %1934  ;;  %v802_v56 = vadd.f32 %v1590_v50, %v789_v51  ;;  %v777_v57 = vmul.f32 %v1933_v54, %v3024_v60 }
 0x2c4   : > { %v778_v58 = vmul.f32 %v1935_v55, %v3017_v53 }
 0x2c5   : > { %1664 = vmatprep.mubr.msk.f32.mxu1 %vm702_vm0, %v802_v56  ;;  %v790_v63 = vmul.f32 %v1589_v48, %v777_v57 }
 0x2c6   : > { %v1937_v0 = vpop.eup %1936  ;;  %v791_v1 = vmul.f32 %v1589_v48, %v778_v58 }
 0x2c7   : > { %v1939_v2 = vpop.eup %1938  ;;  %v803_v3 = vadd.f32 %v1590_v50, %v790_v63  ;;  %v779_v52 = vmul.f32 %v1937_v0, %v3028_v62 }
 0x2c8   : > { %v804_v5 = vadd.f32 %v1590_v50, %v791_v1  ;;  %v780_v7 = vmul.f32 %v1939_v2, %v3036_v6 }
 0x2c9   : > { %1665 = vmatmul.mubr.msk.f32.vlgmr.msra.gmra.mrb[0].mxu1 %vm702_vm0, %v803_v3  ;;  %v792_v60 = vmul.f32 %v1589_v48, %v779_v52 }
 0x2ca   : > { %v1941_v9 = vpop.eup %1940  ;;  %1742 = vmatpush3.bf16.msra.mxu1 %v1739_v23  ;;  %1667 = vmatprep.mubr.msk.f32.mxu1 %vm702_vm0, %v804_v5  ;;  %v793_v53 = vmul.f32 %v1589_v48, %v780_v7  ;;  %v1213_v23 = vld [vmem:[#allocation19 + $0x38] sm:$0xff] }
 0x2cb   : > { %v805_v10 = vadd.f32 %v1590_v50, %v792_v60  ;;  %1744 = vmatprep.subr.bf16.mxu1 %v1743_v4  ;;  %v781_v11 = vmul.f32 %v1941_v9, %v3040_v8  ;;  %v1206_v8 = vld [vmem:[#allocation19] sm:$0xff]  ;;  %v1759_v25 = vpack.c.bf16 %v1213_v23, %v1212_v22 }
 0x2cc   : > { %v806_v12 = vadd.f32 %v1590_v50, %v793_v53  ;;  %v1747_v14 = vpack.c.bf16 %v1207_v13, %v1206_v8 }
 0x2cd   : > { %1668 = vmatmul.mubr.msk.f32.gmra.mrb[2].mxu1 %vm702_vm0, %v805_v10  ;;  %v794_v62 = vmul.f32 %v1589_v48, %v781_v11  ;;  %v1598_v48 = vld [vmem:[#allocation17] ss:$0 sm:$0xff] }
 0x2ce   : > { %1670 = vmatprep.mubr.msk.f32.mxu1 %vm702_vm0, %v806_v12  ;;  %1746 = vmatpush3.bf16.msra.mxu1 %v1743_v4 }
 0x2cf   : > { %v807_v6 = vadd.f32 %v1590_v50, %v794_v62  ;;  %1748 = vmatprep.subr.bf16.mxu0 %v1747_v14 }
 0x2d0   : > { %1750 = vmatpush3.bf16.msra.mxu0 %v1747_v14 }
 0x2d1   : > { %1671 = vmatmul.mubr.msk.f32.gmra.mrb[4].mxu1 %vm702_vm0, %v807_v6  ;;  %1752 = vmatprep.subr.bf16.mxu0 %v1751_v17 }
 0x2d2   : > { %1681 = vmatprep.mubr.msk.f32.mxu1 %vm702_vm0, %v802_v56 }
 0x2d4   : > { %1754 = vmatpush3.bf16.msra.mxu0 %v1751_v17 }
 0x2d5   : > { %1682 = vmatmul.mubr.msk.f32.vlgmr.msra.gmra.mrb[6].mxu1 %vm702_vm0, %v803_v3  ;;  %1756 = vmatprep.subr.bf16.mxu0 %v1755_v21 }
 0x2d6   : > { %1684 = vmatprep.mubr.msk.f32.mxu1 %vm702_vm0, %v804_v5 }
 0x2d8   : > { %1758 = vmatpush3.bf16.msra.mxu0 %v1755_v21 }
 0x2d9   : > { %1685 = vmatmul.mubr.msk.f32.gmra.mrb[8].mxu1 %vm702_vm0, %v805_v10  ;;  %1760 = vmatprep.subr.bf16.mxu0 %v1759_v25 }
 0x2da   : > { %1687 = vmatprep.mubr.msk.f32.mxu1 %vm702_vm0, %v806_v12 }
 0x2dc   : > { %1762 = vmatpush3.bf16.msra.mxu0 %v1759_v25 }
 0x2dd   : > { %1688 = vmatmul.mubr.msk.f32.gmra.mrb[10].mxu1 %vm702_vm0, %v807_v6  ;;  %1764 = vmatprep.subr.bf16.mxu0 %v1763_v28 }
 0x2e0   : > { %1766 = vmatpush3.bf16.msra.mxu0 %v1763_v28 }
 0x2e1   : > { %1768 = vmatprep.subr.bf16.mxu0 %v1767_v31 }
 0x2e4   : > { %1770 = vmatpush3.bf16.msra.mxu0 %v1767_v31 }
 0x2e5   : > { %1772 = vmatprep.subr.bf16.mxu0 %v1771_v34 }
 0x2e8   : > { %1774 = vmatpush3.bf16.msra.mxu0 %v1771_v34 }
 0x2e9   : > { %1776 = vmatprep.subr.bf16.mxu0 %v1775_v38 }
 0x2ec   : > { %1778 = vmatpush3.bf16.msra.mxu0 %v1775_v38 }
 0x39c   : > { %v3067_v40 = vpop.f32.mrb[0].mxu1 }
 0x39d   : > { %v3069_v41 = vpop.f32.mrb[1].mxu1 }
 0x3a0   : > { %v3071_v43 = vpop.f32.mrb[2].mxu1 }
 0x3a1   : > { %v3073_v44 = vpop.f32.mrb[3].mxu1 }
 0x3a4   : > { %v3075_v46 = vpop.f32.mrb[4].mxu1 }
 0x3a5   : > { %v3077_v47 = vpop.f32.mrb[5].mxu1 }
 0x3a8   : > { %v1683_v49 = vpop.f32.mrb[6].mxu1 }
 0x3a9   : > { %v3079_v50 = vadd.f32 %v1683_v49, %v1598_v48  ;;  %v1009_v51 = vpop.f32.mrb[7].mxu1 }
 0x3aa   : > { %v3081_v54 = vadd.f32 %v1598_v48, %v1009_v51 }
 0x3ab   : > { %v3084_v55 = vmul.f32 0.70710677, %v3079_v50 }
 0x3ac   : > { %v3087_v56 = vmul.f32 0.70710677, %v3081_v54  ;;  %v1686_v57 = vpop.f32.mrb[8].mxu1 }
 0x3ad   : > { %v1045_v58 = vand.u32 2147483647, %v3084_v55  ;;  %v3090_v59 = vadd.f32 %v1686_v57, %v1598_v48  ;;  %v1019_v61 = vpop.f32.mrb[9].mxu1  ;;  %vm1165_vm1 = vcmp.ge.f32.partialorder %v3084_v55, 0.0 }
 0x3ae   : > { %v1044_v63 = vand.u32 2147483647, %v3087_v56  ;;  %v3093_v0 = vadd.f32 %v1598_v48, %v1019_v61  ;;  %vm1164_vm2 = vcmp.ge.f32.partialorder %v3087_v56, 0.0 }
 0x3af   : > { %v1051_v1 = vmul.f32 0.3275911, %v1045_v58  ;;  %v3096_v2 = vmul.f32 0.70710677, %v3090_v59  ;;  %v1129_v15 = vsub.f32 0.0, %v1045_v58 }
 0x3b0   : > { %v1050_v3 = vmul.f32 0.3275911, %v1044_v63  ;;  %v3099_v52 = vmul.f32 0.70710677, %v3093_v0  ;;  %v1689_v7 = vpop.f32.mrb[10].mxu1  ;;  %v1128_v17 = vsub.f32 0.0, %v1044_v63 }
 0x3b1   : > { %v1057_v4 = vadd.f32 1.0, %v1051_v1  ;;  %v1047_v5 = vand.u32 2147483647, %v3096_v2  ;;  %v1029_v53 = vpop.f32.mrb[11].mxu1  ;;  %v3103_v62 = vadd.f32 %v1689_v7, %v1598_v48  ;;  %v1135_v25 = vmul.f32 %v1129_v15, %v1045_v58 }
 0x3b2   : > { %v1056_v60 = vadd.f32 1.0, %v1050_v3  ;;  %v1046_v9 = vand.u32 2147483647, %v3099_v52  ;;  %v3105_v8 = vadd.f32 %v1598_v48, %v1029_v53  ;;  %v1134_v30 = vmul.f32 %v1128_v17, %v1044_v63 }
 0x3b3   : > { %1942 = vrcp.f32 %v1057_v4  ;;  %v1053_v10 = vmul.f32 0.3275911, %v1047_v5  ;;  %v3108_v13 = vmul.f32 0.70710677, %v3103_v62  ;;  %v1131_v21 = vsub.f32 0.0, %v1047_v5 }
 0x3b4   : > { %1944 = vrcp.f32 %v1056_v60  ;;  %v1052_v11 = vmul.f32 0.3275911, %v1046_v9  ;;  %v3111_v14 = vmul.f32 0.70710677, %v3105_v8  ;;  %v1130_v26 = vsub.f32 0.0, %v1046_v9 }
 0x3b5   : > { %v1059_v12 = vadd.f32 1.0, %v1053_v10  ;;  %v1049_v16 = vand.u32 2147483647, %v3108_v13  ;;  %v1137_v34 = vmul.f32 %v1131_v21, %v1047_v5  ;;  %v1142_v37 = vmul.f32 1.442695, %v1135_v25 }
 0x3b6   : > { %v1058_v6 = vadd.f32 1.0, %v1052_v11  ;;  %v1048_v18 = vand.u32 2147483647, %v3111_v14  ;;  %v1136_v38 = vmul.f32 %v1130_v26, %v1046_v9  ;;  %v1140_v57 = vmul.f32 1.442695, %v1134_v30 }
 0x3b7   : > { %1946 = vrcp.f32 %v1059_v12  ;;  %v1055_v20 = vmul.f32 0.3275911, %v1049_v16  ;;  %v1133_v63 = vsub.f32 0.0, %v1049_v16  ;;  %v1146_v5 = vmul.f32 1.442695, %v1137_v34 }
 0x3b8   : > { %1948 = vrcp.f32 %v1058_v6  ;;  %v1054_v22 = vmul.f32 0.3275911, %v1048_v18  ;;  %v1144_v60 = vmul.f32 1.442695, %v1136_v38  ;;  %v1132_v11 = vsub.f32 0.0, %v1048_v18 }
 0x3b9   : > { %v1061_v27 = vadd.f32 1.0, %v1055_v20  ;;  %v1139_v6 = vmul.f32 %v1133_v63, %v1049_v16  ;;  %vm1167_vm3 = vcmp.ge.f32.partialorder %v3096_v2, 0.0  ;;  %vm1166_vm4 = vcmp.ge.f32.partialorder %v3099_v52, 0.0 }
 0x3ba   : > { %v1060_v31 = vadd.f32 1.0, %v1054_v22  ;;  %vm1169_vm5 = vcmp.ge.f32.partialorder %v3108_v13, 0.0  ;;  %vm1168_vm6 = vcmp.ge.f32.partialorder %v3111_v14, 0.0 }
 0x3bb   : > { %1950 = vrcp.f32 %v1061_v27 }
 0x3bc   : > { %1952 = vrcp.f32 %v1060_v31  ;;  %v1138_v31 = vmul.f32 %v1132_v11, %v1048_v18 }
 0x3bd   : > { %v1943_v23 = vpop.eup %1942  ;;  %1954 = vpow2.f32 %v1142_v37 }
 0x3be   : > { %v3115_v28 = vpop.eup %1944  ;;  %v1075_v29 = vmul.f32 1.0614054, %v1943_v23  ;;  %1956 = vpow2.f32 %v1140_v57 }
 0x3bf   : > { %v1074_v32 = vmul.f32 1.0614054, %v3115_v28  ;;  %1958 = vpow2.f32 %v1146_v5 }
 0x3c0   : > { %v1081_v33 = vadd.f32 -1.4531521, %v1075_v29  ;;  %1960 = vpow2.f32 %v1144_v60 }
 0x3c1   : > { %v3118_v35 = vpop.eup %1946  ;;  %v1080_v48 = vadd.f32 -1.4531521, %v1074_v32  ;;  %v3134_v32 = vld [vmem:[#allocation14] ss:$0 sm:$0xff] }
 0x3c2   : > { %v3120_v49 = vpop.eup %1948  ;;  %v1087_v51 = vmul.f32 %v1943_v23, %v1081_v33  ;;  %v1077_v58 = vmul.f32 1.0614054, %v3118_v35  ;;  %v1150_v33 = vmul.f32 1.442695, %v1139_v6  ;;  %v909_v5 = vadd.f32 %v3067_v40, %v3134_v32 }
 0x3c3   : > { %v1076_v61 = vmul.f32 1.0614054, %v3120_v49  ;;  %v1086_v1 = vmul.f32 %v3115_v28, %v1080_v48  ;;  %v924_v13 = vadd.f32 %v3134_v32, %v3077_v47 }
 0x3c4   : > { %v1093_v3 = vadd.f32 1.4214138, %v1087_v51  ;;  %v1083_v4 = vadd.f32 -1.4531521, %v1077_v58  ;;  %1962 = vpow2.f32 %v1150_v33 }
 0x3c5   : > { %v1082_v7 = vadd.f32 -1.4531521, %v1076_v61  ;;  %v1092_v53 = vadd.f32 1.4214138, %v1086_v1  ;;  %v3128_v21 = vpop.eup %1950 }
 0x3c6   : > { %v1099_v9 = vmul.f32 %v1943_v23, %v1093_v3  ;;  %v1089_v10 = vmul.f32 %v3118_v35, %v1083_v4  ;;  %v3130_v26 = vpop.eup %1952  ;;  %v1079_v30 = vmul.f32 1.0614054, %v3128_v21  ;;  %v1148_v3 = vmul.f32 1.442695, %v1138_v31 }
 0x3c7   : > { %v1088_v12 = vmul.f32 %v3120_v49, %v1082_v7  ;;  %v1098_v15 = vmul.f32 %v3115_v28, %v1092_v53  ;;  %v1078_v34 = vmul.f32 1.0614054, %v3130_v26  ;;  %v1955_v4 = vpop.eup %1954 }
 0x3c8   : > { %v1105_v17 = vadd.f32 -0.28449672, %v1099_v9  ;;  %v1095_v20 = vadd.f32 1.4214138, %v1089_v10  ;;  %v1085_v51 = vadd.f32 -1.4531521, %v1079_v30  ;;  %v1957_v9 = vpop.eup %1956  ;;  %v904_v10 = vadd.f32 %v3134_v32, %v3069_v41 }
 0x3c9   : > { %v1094_v22 = vadd.f32 1.4214138, %v1088_v12  ;;  %v1104_v25 = vadd.f32 -0.28449672, %v1098_v15  ;;  %v1084_v58 = vadd.f32 -1.4531521, %v1078_v34  ;;  %1964 = vpow2.f32 %v1148_v3 }
 0x3ca   : > { %v1111_v27 = vmul.f32 %v1943_v23, %v1105_v17  ;;  %v1101_v29 = vmul.f32 %v3118_v35, %v1095_v20  ;;  %v1091_v18 = vmul.f32 %v3128_v21, %v1085_v51  ;;  %v1959_v20 = vpop.eup %1958 }
 0x3cb   : > { %v1100_v16 = vmul.f32 %v3120_v49, %v1094_v22  ;;  %v1110_v37 = vmul.f32 %v3115_v28, %v1104_v25  ;;  %v1090_v60 = vmul.f32 %v3130_v26, %v1084_v58 }
 0x3cc   : > { %v1117_v38 = vadd.f32 0.2548296, %v1111_v27  ;;  %v1107_v48 = vadd.f32 -0.28449672, %v1101_v29  ;;  %v1097_v12 = vadd.f32 1.4214138, %v1091_v18  ;;  %v1961_v27 = vpop.eup %1960 }
 0x3cd   : > { %v1106_v57 = vadd.f32 -0.28449672, %v1100_v16  ;;  %v1116_v61 = vadd.f32 0.2548296, %v1110_v37  ;;  %v1096_v15 = vadd.f32 1.4214138, %v1090_v60 }
 0x3ce   : > { %v1123_v63 = vmul.f32 %v1943_v23, %v1117_v38  ;;  %v1113_v1 = vmul.f32 %v3118_v35, %v1107_v48  ;;  %v1103_v25 = vmul.f32 %v3128_v21, %v1097_v12  ;;  %v1182_v16 = vmul.f32 0.5, %v3081_v54 }
 0x3cf   : > { %v1112_v7 = vmul.f32 %v3120_v49, %v1106_v57  ;;  %v1122_v53 = vmul.f32 %v3115_v28, %v1116_v61  ;;  %v1183_v28 = vmul.f32 0.5, %v3079_v50  ;;  %v1102_v41 = vmul.f32 %v3130_v26, %v1096_v15 }
 0x3d0   : > { %v1153_v23 = vmul.f32 %v1955_v4, %v1123_v63  ;;  %v1119_v11 = vadd.f32 0.2548296, %v1113_v1  ;;  %v1109_v34 = vadd.f32 -0.28449672, %v1103_v25  ;;  %v1185_v54 = vmul.f32 0.5, %v3090_v59 }
 0x3d1   : > { %v1118_v6 = vadd.f32 0.2548296, %v1112_v7  ;;  %v1152_v17 = vmul.f32 %v1957_v9, %v1122_v53  ;;  %v1963_v53 = vpop.eup %1962 }
 0x3d2   : > { %v1159_v22 = vsub.f32 1.0, %v1153_v23  ;;  %v1125_v40 = vmul.f32 %v3118_v35, %v1119_v11  ;;  %v1108_v35 = vadd.f32 -0.28449672, %v1102_v41  ;;  %v1115_v50 = vmul.f32 %v3128_v21, %v1109_v34 }
 0x3d3   : > { %v1124_v29 = vmul.f32 %v3120_v49, %v1118_v6  ;;  %v1158_v30 = vsub.f32 1.0, %v1152_v17  ;;  %v1965_v59 = vpop.eup %1964  ;;  %v1184_v6 = vmul.f32 0.5, %v3093_v0 }
 0x3d4   : > { %v1171_v31 = vsub.f32 0.0, %v1159_v22  ;;  %v1155_v33 = vmul.f32 %v1959_v20, %v1125_v40  ;;  %v1114_v58 = vmul.f32 %v3130_v26, %v1108_v35  ;;  %v1121_v1 = vadd.f32 0.2548296, %v1115_v50 }
 0x3d5   : > { %v1154_v37 = vmul.f32 %v1961_v27, %v1124_v29  ;;  %v1170_v38 = vsub.f32 0.0, %v1158_v30  ;;  %v919_v20 = vadd.f32 %v3071_v43, %v3134_v32  ;;  %v1187_v43 = vmul.f32 0.5, %v3103_v62  ;;  %v1605_v62 = vld [vmem:[#allocation20] ss:$0 sm:$0xff] }
 0x3d6   : > { %v1177_v48 = vsel %vm1165_vm1, %v1159_v22, %v1171_v31  ;;  %v1161_v51 = vsub.f32 1.0, %v1155_v33  ;;  %v1120_v4 = vadd.f32 0.2548296, %v1114_v58  ;;  %v1127_v56 = vmul.f32 %v3128_v21, %v1121_v1 }
 0x3d7   : > { %v1189_v49 = vadd.f32 1.0, %v1177_v48  ;;  %v1160_v57 = vsub.f32 1.0, %v1154_v37  ;;  %v1176_v61 = vsel %vm1164_vm2, %v1158_v30, %v1170_v38  ;;  %v914_v21 = vadd.f32 %v3134_v32, %v3073_v44 }
 0x3d8   : > { %v1173_v63 = vsub.f32 0.0, %v1161_v51  ;;  %v1188_v18 = vadd.f32 1.0, %v1176_v61  ;;  %v1126_v11 = vmul.f32 %v3130_v26, %v1120_v4  ;;  %v1157_v17 = vmul.f32 %v1963_v53, %v1127_v56 }
 0x3d9   : > { %v1195_v55 = vmul.f32 %v1189_v49, %v1183_v28  ;;  %v1172_v3 = vsub.f32 0.0, %v1160_v57  ;;  %v1186_v44 = vmul.f32 0.5, %v3105_v8  ;;  %v929_v31 = vadd.f32 %v3075_v46, %v3134_v32 }
 0x3da   : > { %v1179_v7 = vsel %vm1167_vm3, %v1161_v51, %v1173_v63  ;;  %v1194_v60 = vmul.f32 %v1188_v18, %v1182_v16  ;;  %v1156_v52 = vmul.f32 %v1965_v59, %v1126_v11  ;;  %v1163_v25 = vsub.f32 1.0, %v1157_v17 }
 0x3db   : > { %v1191_v9 = vadd.f32 1.0, %v1179_v7  ;;  %v1178_v23 = vsel %vm1166_vm4, %v1160_v57, %v1172_v3  ;;  %v1201_v12 = vmul.f32 %v1195_v55, %v909_v5 }
 0x3dc   : > { %v1190_v15 = vadd.f32 1.0, %v1178_v23  ;;  %v1200_v2 = vmul.f32 %v1194_v60, %v904_v10  ;;  %v1162_v27 = vsub.f32 1.0, %v1156_v52  ;;  %v1175_v5 = vsub.f32 0.0, %v1163_v25 }
 0x3dd   : > { %v1197_v22 = vmul.f32 %v1191_v9, %v1185_v54 }
 0x3de   : > { %v1196_v40 = vmul.f32 %v1190_v15, %v1184_v6  ;;  %1722 = vmatprep.mubr.f32.mxu0 %v1200_v2  ;;  %v1174_v0 = vsub.f32 0.0, %v1162_v27  ;;  %v1181_v10 = vsel %vm1169_vm5, %v1163_v25, %v1175_v5 }
 0x3df   : > { %1723 = vmatmul.mubr.f32.vlgmr.msra.gmra.mrb[0].mxu0 %v1201_v12  ;;  %v1203_v26 = vmul.f32 %v1197_v22, %v919_v20  ;;  %v1193_v29 = vadd.f32 1.0, %v1181_v10 }
 0x3e0   : > { %v1202_v28 = vmul.f32 %v1196_v40, %v914_v21  ;;  %v1180_v41 = vsel %vm1168_vm6, %v1162_v27, %v1174_v0 }
 0x3e1   : > { %v1192_v30 = vadd.f32 1.0, %v1180_v41  ;;  %v1199_v16 = vmul.f32 %v1193_v29, %v1187_v43 }
 0x3e2   : > { %1725 = vmatprep.mubr.f32.mxu0 %v1202_v28 }
 0x3e3   : > { %1726 = vmatmul.mubr.f32.gmra.mrb[2].mxu0 %v1203_v26  ;;  %v1198_v33 = vmul.f32 %v1192_v30, %v1186_v44  ;;  %v1205_v34 = vmul.f32 %v1199_v16, %v929_v31 }
 0x3e5   : > { %v1204_v14 = vmul.f32 %v1198_v33, %v924_v13 }
 0x3e7   : > { %1728 = vmatprep.mubr.f32.mxu0 %v1204_v14 }
 0x3e8   : > { %1729 = vmatmul.mubr.f32.gmra.mrb[4].mxu0 %v1205_v34 }
 0x4b2   : > { %v1724_v37 = vpop.f32.mrb[0].mxu0 }
 0x4b3   : > { %v1301_v35 = vadd.f32 %v1724_v37, %v1605_v62  ;;  %v1295_v38 = vpop.f32.mrb[1].mxu0 }
 0x4b4   : > { %v1296_v8 = vadd.f32 %v1605_v62, %v1295_v38 }
 0x4b5   : > { %v1325_v48 = vadd.f32 %v1301_v35, %v2996_v36 }
 0x4b6   : > { %v1324_v46 = vadd.f32 %v1296_v8, %v2979_v19  ;;  %v1727_v51 = vpop.f32.mrb[2].mxu0 }
 0x4b7   : > { %1331 = vst.msk [vmem:[%s654_s29 + $0x8] sm:$0xff] %vm702_vm0, %v1325_v48  ;;  %v1311_v47 = vadd.f32 %v1727_v51, %v1605_v62  ;;  %v1305_v32 = vpop.f32.mrb[3].mxu0 }
 0x4b8   : > { %1330 = vst.msk [vmem:[%s654_s29] sm:$0xff] %vm702_vm0, %v1324_v46  ;;  %v1306_v50 = vadd.f32 %v1605_v62, %v1305_v32 }
 0x4b9   : > { %v1327_v49 = vadd.f32 %v1311_v47, %v2998_v39 }
 0x4ba   : > { %v1326_v57 = vadd.f32 %v1306_v50, %v2984_v24 }
 0x4bb   : > { %1333 = vst.msk [vmem:[%s654_s29 + $0x18] sm:$0xff] %vm702_vm0, %v1327_v49  ;;  %v1730_v19 = vpop.f32.mrb[4].mxu0 }
 0x4bc   : > { %1332 = vst.msk [vmem:[%s654_s29 + $0x10] sm:$0xff] %vm702_vm0, %v1326_v57  ;;  %v1321_v36 = vadd.f32 %v1730_v19, %v1605_v62  ;;  %v1315_v58 = vpop.f32.mrb[5].mxu0 }
 0x4bd   : > { %v1316_v61 = vadd.f32 %v1605_v62, %v1315_v58 }
 0x4be   : > { %v1329_v39 = vadd.f32 %v1321_v36, %v3007_v45 }
 0x4bf   : > { %v1328_v24 = vadd.f32 %v1316_v61, %v3003_v42 }
 0x4c0   : > { %1335 = vst.msk [vmem:[%s654_s29 + $0x28] sm:$0xff] %vm702_vm0, %v1329_v39 }
 0x4c1   : > { %1334 = vst.msk [vmem:[%s654_s29 + $0x20] sm:$0xff] %vm702_vm0, %v1328_v24 }
 0x4c2   : > { %2323 = shalt.err (!%p2320_p1)
}
 0x4c3   : > { %s2324_s7 = scalar_lea.hbm %s3192_s20, 768  ;;  %s2328_s21 = scalar_lea.hbm %s3331_s26, 1536 }
 0x4c4   : > { %p2325_p11 = scmp.ne.s32.totalorder %s3192_s20, %s2324_s7  ;;  %p2329_p4 = scmp.lt.u32.totalorder %s3192_s20, %s3331_s26 }
 0x4c5   : > { %p2330_p2 = scmp.lt.u32.totalorder %s2328_s21, %s2324_s7  ;;  %p2332_p5 = scmp.lt.u32.totalorder %s2324_s7, %s3192_s20 }
 0x4c6   : > { %p2326_p12 = pnand %p2325_p11, %p3332_p9 }
 0x4c7   : > { %p2331_p3 = por %p2330_p2, %p2329_p4 }
 0x4c8   : > { %p2327_p10 = pneg %p2326_p12 }
 0x4c9   : > { %p2333_p6 = por %p2332_p5, %p2331_p3 }
 0x4cb   : > { %p2334_p0 = pnand %p2333_p6, %p2327_p10 }
 0x4cd   : > { %2337 = shalt.err (!%p2334_p0)
}
 0x4ce   : > { %s2421_s19 = smov 128   ;;  %s2422_s29 = smov 8  }
 0x4cf   : > { %1824 = dma.vmem_to_hbm [thread:$0]  (%p3332_p9), %s3186_s3, 768, %s3192_s20, %s1337_s9, %s2421_s19, %s2421_s19, %s2422_s29  }
 0x4d0 PF: > { %s3333_s15 = sld [smem:[#allocation32_spill]]  ;;  %s3334_s5 = sld [smem:[#allocation39_spill]] }
 0x4d1   : > { %p3336_p8 = scmp.ge.s32.totalorder %s2404_s24, 2 }
 0x4d6   : > { %s1365_s30 = sand.u32 1, %s3333_s15   ;;  %p3335_p7 = scmp.ne.s32.totalorder %s3334_s5, 0 }
 0x4d7   : > { %s1366_s17 = scalar_lea.sflag [#allocation4], %s1365_s30 }
 0x4d8   : > { %p1865_p13 = pnand %p3336_p8, %p3335_p7 }
 0x4da   : > { %2387 = dma.done.wait (!%p1865_p13), %s1366_s17, 768  }
 0x4db   : > { %2389 = vsyncadd (!%p1865_p13), %s1366_s17, 4294966528  ;;  %s3337_s24 = sld [smem:[#allocation35_spill]]  ;;  %s3338_s12 = sld [smem:[#allocation36_spill]] }
 0x4dc   : > { %s3339_s21 = smov %s2396_s22  ;;  %s3340_s22 = smov %s2400_s23 }
 0x4e1   : > { %p35_p1 = scmp.ge.s32.totalorder %s3337_s24, 4   ;;  %s3341_s23 = smov %s3338_s12 }
 0x4e3   :  { %37 = sbr.rel (!%p35_p1) target bundleno = 21 (0x15), region = 182 }
 0x4ea   :  { %1371 = vsyncpa [#allocation3], 1 }
 0x4eb   :  { %1373 = vsyncpa [#allocation3 + $0x1], 1 }
 0x4ec   :  { %1374 = vsyncpa [#allocation6], 1 }
 0x4ed   :  { %1376 = vsyncpa [#allocation6 + $0x1], 1 }
 0x4ee   :  { %1377 = vsyncpa [#allocation9], 1 }
 0x4ef   :  { %1379 = vsyncpa [#allocation9 + $0x1], 1 }
 0x4f0   :  { %1380 = vsyncpa [#allocation12], 1 }
 0x4f1   :  { %1381 = vsyncpa [#allocation15], 1 }
 0x4f2   :  { %1382 = vsyncpa [#allocation18], 1 }
 0x4f3   :  { %1383 = vsyncpa [#allocation21], 1 }
 0x4f4   :  { %1384 = vsyncpa [#allocation4], 1 }
 0x4f5   :  { %1386 = vsyncpa [#allocation4 + $0x1], 1 }

</bundles_post_ra>
